<compile_context>
chip_gen: v6e
topology: v6e:2x2x1
jax: 0.10.0
libtpu: 0.0.40
codegen_flags: <defaults>
</compile_context>

<pallas_src>
import functools

import jax
import jax.numpy as jnp
from jax.experimental import pallas as pl
from jax.experimental.pallas import tpu as pltpu

EPS = 1e-5  # PyTorch nn.LayerNorm default


def _layernorm_f32(h, gamma, beta):
    """LayerNorm over the last axis, f32 math, biased variance (PyTorch)."""
    mean = jnp.mean(h, axis=-1, keepdims=True)
    c = h - mean
    var = jnp.mean(c * c, axis=-1, keepdims=True)
    return c * jax.lax.rsqrt(var + EPS) * gamma + beta


# ---------------------------------------------------------------------------
# Fully fused encoder-layer kernel (one batch element per grid step)
# ---------------------------------------------------------------------------
def _encoder_layer_kernel(
    x_ref,                                # (1, N, D)
    w_qkv_ref,                            # (D, 3*inner)
    w_out_ref, b_out_ref,                 # (inner, D), (1, D)
    g1_ref, be1_ref,                      # (1, D), (1, D)
    w1_ref, b1_ref,                       # (D, d_ff), (1, d_ff)
    w2_ref, b2_ref,                       # (d_ff, D), (1, D)
    g2_ref, be2_ref,                      # (1, D), (1, D)
    o_ref,                                # (1, N, D)
    *, heads, dim_head, scale,
):
    inner = heads * dim_head
    x = x_ref[0].astype(jnp.float32)                           # (N, D)

    # ---- attention: qkv projection (single wide matmul) ----
    qkv = jnp.dot(x, w_qkv_ref[...].astype(jnp.float32),
                  preferred_element_type=jnp.float32)          # (N, 3*inner)

    # residual + out-proj bias; per-head outputs accumulate into this
    w_out = w_out_ref[...].astype(jnp.float32)                 # (inner, D)
    acc = x + b_out_ref[...].astype(jnp.float32)               # (N, D)

    for h in range(heads):                                      # static, small
        q = qkv[:, h * dim_head:(h + 1) * dim_head]            # (N, dh)
        k = qkv[:, inner + h * dim_head: inner + (h + 1) * dim_head]
        v = qkv[:, 2 * inner + h * dim_head: 2 * inner + (h + 1) * dim_head]
        # scores = q @ k^T (contract last dims; no explicit transpose)
        s = jax.lax.dot_general(
            q, k, (((1,), (1,)), ((), ())), preferred_element_type=jnp.float32
        ) * scale                                               # (N, N)
        s = s - jnp.max(s, axis=-1, keepdims=True)
        p = jnp.exp(s)
        p = p / jnp.sum(p, axis=-1, keepdims=True)
        o_h = jnp.dot(p, v, preferred_element_type=jnp.float32)  # (N, dh)
        # fold this head straight into the out-projection (no concat needed)
        acc = acc + jnp.dot(o_h, w_out[h * dim_head:(h + 1) * dim_head, :],
                            preferred_element_type=jnp.float32)

    # ---- residual + LayerNorm1 ----
    x1 = _layernorm_f32(acc,
                        g1_ref[...].astype(jnp.float32),
                        be1_ref[...].astype(jnp.float32))       # (N, D)

    # ---- FFN (fc1 + relu + fc2) + residual + LayerNorm2 ----
    hf = jnp.dot(x1, w1_ref[...].astype(jnp.float32),
                 preferred_element_type=jnp.float32)
    hf = jnp.maximum(hf + b1_ref[...].astype(jnp.float32), 0.0)
    h2 = jnp.dot(hf, w2_ref[...].astype(jnp.float32),
                 preferred_element_type=jnp.float32)
    h2 = h2 + b2_ref[...].astype(jnp.float32) + x1
    x2 = _layernorm_f32(h2,
                        g2_ref[...].astype(jnp.float32),
                        be2_ref[...].astype(jnp.float32))

    o_ref[0] = x2.astype(o_ref.dtype)


# ---------------------------------------------------------------------------
# Wrapper
# ---------------------------------------------------------------------------
def encoder_layer_pallas(x, params):
    B, N, D = x.shape
    H = params["heads"]
    dh = params["dim_head"]
    scale = float(dh) ** -0.5

    consts = [
        params["w_qkv"],
        params["w_out"], params["b_out"].reshape(1, -1),
        params["g1"].reshape(1, -1), params["be1"].reshape(1, -1),
        params["w1"], params["b1"].reshape(1, -1),
        params["w2"], params["b2"].reshape(1, -1),
        params["g2"].reshape(1, -1), params["be2"].reshape(1, -1),
    ]

    kern = functools.partial(_encoder_layer_kernel, heads=H, dim_head=dh, scale=scale)

    in_specs = [pl.BlockSpec((1, N, D), lambda b: (b, 0, 0))]
    # all const arrays are 2D; constant index map keeps them VMEM-resident
    in_specs += [pl.BlockSpec(c.shape, lambda b: (0, 0)) for c in consts]

    out = pl.pallas_call(
        kern,
        out_shape=jax.ShapeDtypeStruct((B, N, D), x.dtype),
        grid_spec=pltpu.PrefetchScalarGridSpec(
            num_scalar_prefetch=0,
            grid=(B,),
            in_specs=in_specs,
            out_specs=pl.BlockSpec((1, N, D), lambda b: (b, 0, 0)),
        ),
        compiler_params=pltpu.CompilerParams(
            dimension_semantics=("parallel",),
            vmem_limit_bytes=32 * 1024 * 1024,  # safe on v5e/v6e/v7x
        ),
    )(x, *consts)
    return out


# ---------------------------------------------------------------------------
# Pure-JAX reference (mirrors the PyTorch forward in eval mode)
# ---------------------------------------------------------------------------
def _layernorm_ref(h, gamma, beta):
    mean = jnp.mean(h, axis=-1, keepdims=True)
    var = jnp.mean((h - mean) ** 2, axis=-1, keepdims=True)
    return (h - mean) * jax.lax.rsqrt(var + EPS) * gamma + beta


def encoder_layer_ref(x, params):
    B, N, D = x.shape
    H = params["heads"]
    dh = params["dim_head"]
    inner = H * dh

    qkv = x @ params["w_qkv"]                              # (B, N, 3*inner)
    q, k, v = jnp.split(qkv, 3, axis=-1)

    def to_heads(t):
        return t.reshape(B, N, H, dh).transpose(0, 2, 1, 3)

    q, k, v = map(to_heads, (q, k, v))
    scale = float(dh) ** -0.5
    dots = jnp.einsum("bhid,bhjd->bhij", q, k) * scale
    attn = jax.nn.softmax(dots, axis=-1)
    out = jnp.einsum("bhij,bhjd->bhid", attn, v)
    out = out.transpose(0, 2, 1, 3).reshape(B, N, inner)
    attn_out = out @ params["w_out"] + params["b_out"]

    x1 = _layernorm_ref(x + attn_out, params["g1"], params["be1"])
    ff = jnp.maximum(x1 @ params["w1"] + params["b1"], 0.0) @ params["w2"] + params["b2"]
    x2 = _layernorm_ref(x1 + ff, params["g2"], params["be2"])
    return x2


if __name__ == "__main__":
    # Match reference matmul precision to the kernel's f32 MXU path.
    jax.config.update("jax_default_matmul_precision", "highest")

    key = jax.random.PRNGKey(0)
    B, N = 2, 64
    d_model, num_heads, d_ff = 128, 2, 64     # EncoderLayer(d_model, num_heads, d_ff, dropout)
    dim_head = d_ff                            # Attention(dim_head=d_ff) as in the module
    inner = num_heads * dim_head

    keys = jax.random.split(key, 12)
    x = jax.random.normal(keys[0], (B, N, d_model), dtype=jnp.float32)

    params = {
        "heads": num_heads,
        "dim_head": dim_head,
        # Attention
        "w_qkv": jax.random.normal(keys[1], (d_model, 3 * inner), jnp.float32) * (d_model ** -0.5),
        "w_out": jax.random.normal(keys[2], (inner, d_model), jnp.float32) * (inner ** -0.5),
        "b_out": jax.random.normal(keys[3], (d_model,), jnp.float32) * 0.02,
        # LayerNorm1 / LayerNorm2 (gamma near 1, beta near 0, exercising the affine)
        "g1": 1.0 + 0.1 * jax.random.normal(keys[4], (d_model,), jnp.float32),
        "be1": 0.1 * jax.random.normal(keys[5], (d_model,), jnp.float32),
        "g2": 1.0 + 0.1 * jax.random.normal(keys[6], (d_model,), jnp.float32),
        "be2": 0.1 * jax.random.normal(keys[7], (d_model,), jnp.float32),
        # Feed-forward
        "w1": jax.random.normal(keys[8], (d_model, d_ff), jnp.float32) * (d_model ** -0.5),
        "b1": jax.random.normal(keys[9], (d_ff,), jnp.float32) * 0.02,
        "w2": jax.random.normal(keys[10], (d_ff, d_model), jnp.float32) * (d_ff ** -0.5),
        "b2": jax.random.normal(keys[11], (d_model,), jnp.float32) * 0.02,
    }

    out = encoder_layer_pallas(x, params)
    out = jax.block_until_ready(out)

    ref = encoder_layer_ref(x, params)
    assert out.shape == (B, N, d_model)
    max_err = float(jnp.max(jnp.abs(out - ref)))
    assert jnp.allclose(out, ref, atol=1e-3, rtol=1e-3), f"mismatch vs reference, max_err={max_err}"

    print("KERNEL_OK")
</pallas_src>

<mosaic_0001>
module attributes {stable_mosaic.version = 11 : i64} {
  func.func @_encoder_layer_kernel(%arg0: i32, %arg1: memref<1x64x128xf32, #tpu.memory_space<vmem>>, %arg2: memref<128x384xf32, #tpu.memory_space<vmem>>, %arg3: memref<128x128xf32, #tpu.memory_space<vmem>>, %arg4: memref<1x128xf32, #tpu.memory_space<vmem>>, %arg5: memref<1x128xf32, #tpu.memory_space<vmem>>, %arg6: memref<1x128xf32, #tpu.memory_space<vmem>>, %arg7: memref<128x64xf32, #tpu.memory_space<vmem>>, %arg8: memref<1x64xf32, #tpu.memory_space<vmem>>, %arg9: memref<64x128xf32, #tpu.memory_space<vmem>>, %arg10: memref<1x128xf32, #tpu.memory_space<vmem>>, %arg11: memref<1x128xf32, #tpu.memory_space<vmem>>, %arg12: memref<1x128xf32, #tpu.memory_space<vmem>>, %arg13: memref<1x64x128xf32, #tpu.memory_space<vmem>>) attributes {dimension_semantics = [#tpu.dimension_semantics<parallel>], iteration_bounds = array<i64: 2>, scalar_prefetch = 0 : i64, scratch_operands = 0 : i64, tpu.core_type = #tpu.core_type<tc>, window_params = [{transform_indices = @transform_0, window_bounds = array<i64: 1, 64, 128>}, {pipeline_mode = #tpu.pipeline_mode<synchronous>, transform_indices = @transform_1, window_bounds = array<i64: 128, 384>}, {pipeline_mode = #tpu.pipeline_mode<synchronous>, transform_indices = @transform_2, window_bounds = array<i64: 128, 128>}, {pipeline_mode = #tpu.pipeline_mode<synchronous>, transform_indices = @transform_3, window_bounds = array<i64: 1, 128>}, {pipeline_mode = #tpu.pipeline_mode<synchronous>, transform_indices = @transform_4, window_bounds = array<i64: 1, 128>}, {pipeline_mode = #tpu.pipeline_mode<synchronous>, transform_indices = @transform_5, window_bounds = array<i64: 1, 128>}, {pipeline_mode = #tpu.pipeline_mode<synchronous>, transform_indices = @transform_6, window_bounds = array<i64: 128, 64>}, {pipeline_mode = #tpu.pipeline_mode<synchronous>, transform_indices = @transform_7, window_bounds = array<i64: 1, 64>}, {pipeline_mode = #tpu.pipeline_mode<synchronous>, transform_indices = @transform_8, window_bounds = array<i64: 64, 128>}, {pipeline_mode = #tpu.pipeline_mode<synchronous>, transform_indices = @transform_9, window_bounds = array<i64: 1, 128>}, {pipeline_mode = #tpu.pipeline_mode<synchronous>, transform_indices = @transform_10, window_bounds = array<i64: 1, 128>}, {pipeline_mode = #tpu.pipeline_mode<synchronous>, transform_indices = @transform_11, window_bounds = array<i64: 1, 128>}, {transform_indices = @transform_12, window_bounds = array<i64: 1, 64, 128>}]} {
    %c0 = arith.constant 0 : index
    %c0_0 = arith.constant 0 : index
    %c0_1 = arith.constant 0 : index
    %0 = vector.load %arg1[%c0, %c0_0, %c0_1] : memref<1x64x128xf32, #tpu.memory_space<vmem>>, vector<1x64x128xf32>
    %1 = vector.shape_cast %0 : vector<1x64x128xf32> to vector<64x128xf32>
    %c0_2 = arith.constant 0 : index
    %c0_3 = arith.constant 0 : index
    %2 = vector.load %arg2[%c0_2, %c0_3] : memref<128x384xf32, #tpu.memory_space<vmem>>, vector<128x384xf32>
    %cst = arith.constant dense<0.000000e+00> : vector<64x384xf32>
    %3 = tpu.matmul %1, %2, %cst {dimension_numbers = #tpu.dot_dimension_numbers<[1], [0], [0], [1], [0, 0, 1, 1], [], []>, precision = #tpu.contract_precision<fp32>} : vector<64x128xf32>, vector<128x384xf32>, vector<64x384xf32> -> vector<64x384xf32>
    %c0_4 = arith.constant 0 : index
    %c0_5 = arith.constant 0 : index
    %4 = vector.load %arg3[%c0_4, %c0_5] : memref<128x128xf32, #tpu.memory_space<vmem>>, vector<128x128xf32>
    %c0_6 = arith.constant 0 : index
    %c0_7 = arith.constant 0 : index
    %5 = vector.load %arg4[%c0_6, %c0_7] : memref<1x128xf32, #tpu.memory_space<vmem>>, vector<1x128xf32>
    %6 = vector.broadcast %5 : vector<1x128xf32> to vector<64x128xf32>
    %7 = arith.addf %1, %6 : vector<64x128xf32>
    %8 = vector.extract_strided_slice %3 {offsets = [0, 0], sizes = [64, 64], strides = [1, 1]} : vector<64x384xf32> to vector<64x64xf32>
    %9 = vector.extract_strided_slice %3 {offsets = [0, 128], sizes = [64, 64], strides = [1, 1]} : vector<64x384xf32> to vector<64x64xf32>
    %10 = vector.extract_strided_slice %3 {offsets = [0, 256], sizes = [64, 64], strides = [1, 1]} : vector<64x384xf32> to vector<64x64xf32>
    %cst_8 = arith.constant dense<0.000000e+00> : vector<64x64xf32>
    %11 = tpu.matmul %8, %9, %cst_8 {dimension_numbers = #tpu.dot_dimension_numbers<[1], [1], [0], [0], [0, 0, 1, 0], [], []>, precision = #tpu.contract_precision<fp32>} : vector<64x64xf32>, vector<64x64xf32>, vector<64x64xf32> -> vector<64x64xf32>
    %cst_9 = arith.constant 1.250000e-01 : f32
    %12 = vector.broadcast %cst_9 : f32 to vector<64x64xf32>
    %13 = arith.mulf %11, %12 : vector<64x64xf32>
    %cst_10 = arith.constant dense<0xFF800000> : vector<64xf32>
    %14 = vector.multi_reduction <maximumf>, %13, %cst_10 [1] : vector<64x64xf32> to vector<64xf32>
    %15 = vector.shape_cast %14 : vector<64xf32> to vector<64x1xf32>
    %16 = vector.broadcast %15 : vector<64x1xf32> to vector<64x64xf32>
    %17 = arith.subf %13, %16 : vector<64x64xf32>
    %18 = math.exp %17 : vector<64x64xf32>
    %cst_11 = arith.constant dense<0.000000e+00> : vector<64xf32>
    %19 = vector.multi_reduction <add>, %18, %cst_11 [1] : vector<64x64xf32> to vector<64xf32>
    %20 = vector.shape_cast %19 : vector<64xf32> to vector<64x1xf32>
    %21 = vector.broadcast %20 : vector<64x1xf32> to vector<64x64xf32>
    %22 = arith.divf %18, %21 : vector<64x64xf32>
    %cst_12 = arith.constant dense<0.000000e+00> : vector<64x64xf32>
    %23 = tpu.matmul %22, %10, %cst_12 {dimension_numbers = #tpu.dot_dimension_numbers<[1], [0], [0], [1], [0, 0, 1, 1], [], []>, precision = #tpu.contract_precision<fp32>} : vector<64x64xf32>, vector<64x64xf32>, vector<64x64xf32> -> vector<64x64xf32>
    %24 = vector.extract_strided_slice %4 {offsets = [0, 0], sizes = [64, 128], strides = [1, 1]} : vector<128x128xf32> to vector<64x128xf32>
    %cst_13 = arith.constant dense<0.000000e+00> : vector<64x128xf32>
    %25 = tpu.matmul %23, %24, %cst_13 {dimension_numbers = #tpu.dot_dimension_numbers<[1], [0], [0], [1], [0, 0, 1, 1], [], []>, precision = #tpu.contract_precision<fp32>} : vector<64x64xf32>, vector<64x128xf32>, vector<64x128xf32> -> vector<64x128xf32>
    %26 = arith.addf %7, %25 : vector<64x128xf32>
    %27 = vector.extract_strided_slice %3 {offsets = [0, 64], sizes = [64, 64], strides = [1, 1]} : vector<64x384xf32> to vector<64x64xf32>
    %28 = vector.extract_strided_slice %3 {offsets = [0, 192], sizes = [64, 64], strides = [1, 1]} : vector<64x384xf32> to vector<64x64xf32>
    %29 = vector.extract_strided_slice %3 {offsets = [0, 320], sizes = [64, 64], strides = [1, 1]} : vector<64x384xf32> to vector<64x64xf32>
    %cst_14 = arith.constant dense<0.000000e+00> : vector<64x64xf32>
    %30 = tpu.matmul %27, %28, %cst_14 {dimension_numbers = #tpu.dot_dimension_numbers<[1], [1], [0], [0], [0, 0, 1, 0], [], []>, precision = #tpu.contract_precision<fp32>} : vector<64x64xf32>, vector<64x64xf32>, vector<64x64xf32> -> vector<64x64xf32>
    %cst_15 = arith.constant 1.250000e-01 : f32
    %31 = vector.broadcast %cst_15 : f32 to vector<64x64xf32>
    %32 = arith.mulf %30, %31 : vector<64x64xf32>
    %cst_16 = arith.constant dense<0xFF800000> : vector<64xf32>
    %33 = vector.multi_reduction <maximumf>, %32, %cst_16 [1] : vector<64x64xf32> to vector<64xf32>
    %34 = vector.shape_cast %33 : vector<64xf32> to vector<64x1xf32>
    %35 = vector.broadcast %34 : vector<64x1xf32> to vector<64x64xf32>
    %36 = arith.subf %32, %35 : vector<64x64xf32>
    %37 = math.exp %36 : vector<64x64xf32>
    %cst_17 = arith.constant dense<0.000000e+00> : vector<64xf32>
    %38 = vector.multi_reduction <add>, %37, %cst_17 [1] : vector<64x64xf32> to vector<64xf32>
    %39 = vector.shape_cast %38 : vector<64xf32> to vector<64x1xf32>
    %40 = vector.broadcast %39 : vector<64x1xf32> to vector<64x64xf32>
    %41 = arith.divf %37, %40 : vector<64x64xf32>
    %cst_18 = arith.constant dense<0.000000e+00> : vector<64x64xf32>
    %42 = tpu.matmul %41, %29, %cst_18 {dimension_numbers = #tpu.dot_dimension_numbers<[1], [0], [0], [1], [0, 0, 1, 1], [], []>, precision = #tpu.contract_precision<fp32>} : vector<64x64xf32>, vector<64x64xf32>, vector<64x64xf32> -> vector<64x64xf32>
    %43 = vector.extract_strided_slice %4 {offsets = [64, 0], sizes = [64, 128], strides = [1, 1]} : vector<128x128xf32> to vector<64x128xf32>
    %cst_19 = arith.constant dense<0.000000e+00> : vector<64x128xf32>
    %44 = tpu.matmul %42, %43, %cst_19 {dimension_numbers = #tpu.dot_dimension_numbers<[1], [0], [0], [1], [0, 0, 1, 1], [], []>, precision = #tpu.contract_precision<fp32>} : vector<64x64xf32>, vector<64x128xf32>, vector<64x128xf32> -> vector<64x128xf32>
    %45 = arith.addf %26, %44 : vector<64x128xf32>
    %c0_20 = arith.constant 0 : index
    %c0_21 = arith.constant 0 : index
    %46 = vector.load %arg5[%c0_20, %c0_21] : memref<1x128xf32, #tpu.memory_space<vmem>>, vector<1x128xf32>
    %c0_22 = arith.constant 0 : index
    %c0_23 = arith.constant 0 : index
    %47 = vector.load %arg6[%c0_22, %c0_23] : memref<1x128xf32, #tpu.memory_space<vmem>>, vector<1x128xf32>
    %cst_24 = arith.constant dense<0.000000e+00> : vector<64xf32>
    %48 = vector.multi_reduction <add>, %45, %cst_24 [1] : vector<64x128xf32> to vector<64xf32>
    %49 = vector.shape_cast %48 : vector<64xf32> to vector<64x1xf32>
    %cst_25 = arith.constant 1.280000e+02 : f32
    %50 = vector.broadcast %cst_25 : f32 to vector<64x1xf32>
    %51 = arith.divf %49, %50 : vector<64x1xf32>
    %52 = vector.broadcast %51 : vector<64x1xf32> to vector<64x128xf32>
    %53 = arith.subf %45, %52 : vector<64x128xf32>
    %54 = arith.mulf %53, %53 : vector<64x128xf32>
    %cst_26 = arith.constant dense<0.000000e+00> : vector<64xf32>
    %55 = vector.multi_reduction <add>, %54, %cst_26 [1] : vector<64x128xf32> to vector<64xf32>
    %56 = vector.shape_cast %55 : vector<64xf32> to vector<64x1xf32>
    %cst_27 = arith.constant 1.280000e+02 : f32
    %57 = vector.broadcast %cst_27 : f32 to vector<64x1xf32>
    %58 = arith.divf %56, %57 : vector<64x1xf32>
    %cst_28 = arith.constant 9.99999974E-6 : f32
    %59 = vector.broadcast %cst_28 : f32 to vector<64x1xf32>
    %60 = arith.addf %58, %59 : vector<64x1xf32>
    %61 = math.rsqrt %60 : vector<64x1xf32>
    %62 = vector.broadcast %61 : vector<64x1xf32> to vector<64x128xf32>
    %63 = arith.mulf %53, %62 : vector<64x128xf32>
    %64 = vector.broadcast %46 : vector<1x128xf32> to vector<64x128xf32>
    %65 = arith.mulf %63, %64 : vector<64x128xf32>
    %66 = vector.broadcast %47 : vector<1x128xf32> to vector<64x128xf32>
    %67 = arith.addf %65, %66 : vector<64x128xf32>
    %c0_29 = arith.constant 0 : index
    %c0_30 = arith.constant 0 : index
    %68 = vector.load %arg7[%c0_29, %c0_30] : memref<128x64xf32, #tpu.memory_space<vmem>>, vector<128x64xf32>
    %cst_31 = arith.constant dense<0.000000e+00> : vector<64x64xf32>
    %69 = tpu.matmul %67, %68, %cst_31 {dimension_numbers = #tpu.dot_dimension_numbers<[1], [0], [0], [1], [0, 0, 1, 1], [], []>, precision = #tpu.contract_precision<fp32>} : vector<64x128xf32>, vector<128x64xf32>, vector<64x64xf32> -> vector<64x64xf32>
    %c0_32 = arith.constant 0 : index
    %c0_33 = arith.constant 0 : index
    %70 = vector.load %arg8[%c0_32, %c0_33] : memref<1x64xf32, #tpu.memory_space<vmem>>, vector<1x64xf32>
    %71 = vector.broadcast %70 : vector<1x64xf32> to vector<64x64xf32>
    %72 = arith.addf %69, %71 : vector<64x64xf32>
    %cst_34 = arith.constant 0.000000e+00 : f32
    %73 = vector.broadcast %cst_34 : f32 to vector<64x64xf32>
    %74 = arith.maximumf %72, %73 : vector<64x64xf32>
    %c0_35 = arith.constant 0 : index
    %c0_36 = arith.constant 0 : index
    %75 = vector.load %arg9[%c0_35, %c0_36] : memref<64x128xf32, #tpu.memory_space<vmem>>, vector<64x128xf32>
    %cst_37 = arith.constant dense<0.000000e+00> : vector<64x128xf32>
    %76 = tpu.matmul %74, %75, %cst_37 {dimension_numbers = #tpu.dot_dimension_numbers<[1], [0], [0], [1], [0, 0, 1, 1], [], []>, precision = #tpu.contract_precision<fp32>} : vector<64x64xf32>, vector<64x128xf32>, vector<64x128xf32> -> vector<64x128xf32>
    %c0_38 = arith.constant 0 : index
    %c0_39 = arith.constant 0 : index
    %77 = vector.load %arg10[%c0_38, %c0_39] : memref<1x128xf32, #tpu.memory_space<vmem>>, vector<1x128xf32>
    %78 = vector.broadcast %77 : vector<1x128xf32> to vector<64x128xf32>
    %79 = arith.addf %76, %78 : vector<64x128xf32>
    %80 = arith.addf %79, %67 : vector<64x128xf32>
    %c0_40 = arith.constant 0 : index
    %c0_41 = arith.constant 0 : index
    %81 = vector.load %arg11[%c0_40, %c0_41] : memref<1x128xf32, #tpu.memory_space<vmem>>, vector<1x128xf32>
    %c0_42 = arith.constant 0 : index
    %c0_43 = arith.constant 0 : index
    %82 = vector.load %arg12[%c0_42, %c0_43] : memref<1x128xf32, #tpu.memory_space<vmem>>, vector<1x128xf32>
    %cst_44 = arith.constant dense<0.000000e+00> : vector<64xf32>
    %83 = vector.multi_reduction <add>, %80, %cst_44 [1] : vector<64x128xf32> to vector<64xf32>
    %84 = vector.shape_cast %83 : vector<64xf32> to vector<64x1xf32>
    %cst_45 = arith.constant 1.280000e+02 : f32
    %85 = vector.broadcast %cst_45 : f32 to vector<64x1xf32>
    %86 = arith.divf %84, %85 : vector<64x1xf32>
    %87 = vector.broadcast %86 : vector<64x1xf32> to vector<64x128xf32>
    %88 = arith.subf %80, %87 : vector<64x128xf32>
    %89 = arith.mulf %88, %88 : vector<64x128xf32>
    %cst_46 = arith.constant dense<0.000000e+00> : vector<64xf32>
    %90 = vector.multi_reduction <add>, %89, %cst_46 [1] : vector<64x128xf32> to vector<64xf32>
    %91 = vector.shape_cast %90 : vector<64xf32> to vector<64x1xf32>
    %cst_47 = arith.constant 1.280000e+02 : f32
    %92 = vector.broadcast %cst_47 : f32 to vector<64x1xf32>
    %93 = arith.divf %91, %92 : vector<64x1xf32>
    %cst_48 = arith.constant 9.99999974E-6 : f32
    %94 = vector.broadcast %cst_48 : f32 to vector<64x1xf32>
    %95 = arith.addf %93, %94 : vector<64x1xf32>
    %96 = math.rsqrt %95 : vector<64x1xf32>
    %97 = vector.broadcast %96 : vector<64x1xf32> to vector<64x128xf32>
    %98 = arith.mulf %88, %97 : vector<64x128xf32>
    %99 = vector.broadcast %81 : vector<1x128xf32> to vector<64x128xf32>
    %100 = arith.mulf %98, %99 : vector<64x128xf32>
    %101 = vector.broadcast %82 : vector<1x128xf32> to vector<64x128xf32>
    %102 = arith.addf %100, %101 : vector<64x128xf32>
    %c0_49 = arith.constant 0 : index
    %c0_50 = arith.constant 0 : index
    %c0_51 = arith.constant 0 : index
    %103 = vector.load %arg13[%c0_49, %c0_50, %c0_51] : memref<1x64x128xf32, #tpu.memory_space<vmem>>, vector<1x64x128xf32>
    %104 = vector.shape_cast %103 : vector<1x64x128xf32> to vector<64x128xf32>
    %105 = vector.shape_cast %102 : vector<64x128xf32> to vector<1x64x128xf32>
    tpu.vector_store %arg13[%c0_49, %c0_50, %c0_51], %105 {strides = array<i32>} : memref<1x64x128xf32, #tpu.memory_space<vmem>>, vector<1x64x128xf32>,
    return
  }
  func.func @transform_0(%arg0: i32) -> (i32, i32, i32) {
    %c0_i32 = arith.constant 0 : i32
    %c0_i32_0 = arith.constant 0 : i32
    %c0_i32_1 = arith.constant 0 : i32
    return %arg0, %c0_i32, %c0_i32_0 : i32, i32, i32
  }
  func.func @transform_1(%arg0: i32) -> (i32, i32) {
    %c0_i32 = arith.constant 0 : i32
    %c0_i32_0 = arith.constant 0 : i32
    %c0_i32_1 = arith.constant 0 : i32
    return %c0_i32, %c0_i32_0 : i32, i32
  }
  func.func @transform_2(%arg0: i32) -> (i32, i32) {
    %c0_i32 = arith.constant 0 : i32
    %c0_i32_0 = arith.constant 0 : i32
    %c0_i32_1 = arith.constant 0 : i32
    return %c0_i32, %c0_i32_0 : i32, i32
  }
  func.func @transform_3(%arg0: i32) -> (i32, i32) {
    %c0_i32 = arith.constant 0 : i32
    %c0_i32_0 = arith.constant 0 : i32
    %c0_i32_1 = arith.constant 0 : i32
    return %c0_i32, %c0_i32_0 : i32, i32
  }
  func.func @transform_4(%arg0: i32) -> (i32, i32) {
    %c0_i32 = arith.constant 0 : i32
    %c0_i32_0 = arith.constant 0 : i32
    %c0_i32_1 = arith.constant 0 : i32
    return %c0_i32, %c0_i32_0 : i32, i32
  }
  func.func @transform_5(%arg0: i32) -> (i32, i32) {
    %c0_i32 = arith.constant 0 : i32
    %c0_i32_0 = arith.constant 0 : i32
    %c0_i32_1 = arith.constant 0 : i32
    return %c0_i32, %c0_i32_0 : i32, i32
  }
  func.func @transform_6(%arg0: i32) -> (i32, i32) {
    %c0_i32 = arith.constant 0 : i32
    %c0_i32_0 = arith.constant 0 : i32
    %c0_i32_1 = arith.constant 0 : i32
    return %c0_i32, %c0_i32_0 : i32, i32
  }
  func.func @transform_7(%arg0: i32) -> (i32, i32) {
    %c0_i32 = arith.constant 0 : i32
    %c0_i32_0 = arith.constant 0 : i32
    %c0_i32_1 = arith.constant 0 : i32
    return %c0_i32, %c0_i32_0 : i32, i32
  }
  func.func @transform_8(%arg0: i32) -> (i32, i32) {
    %c0_i32 = arith.constant 0 : i32
    %c0_i32_0 = arith.constant 0 : i32
    %c0_i32_1 = arith.constant 0 : i32
    return %c0_i32, %c0_i32_0 : i32, i32
  }
  func.func @transform_9(%arg0: i32) -> (i32, i32) {
    %c0_i32 = arith.constant 0 : i32
    %c0_i32_0 = arith.constant 0 : i32
    %c0_i32_1 = arith.constant 0 : i32
    return %c0_i32, %c0_i32_0 : i32, i32
  }
  func.func @transform_10(%arg0: i32) -> (i32, i32) {
    %c0_i32 = arith.constant 0 : i32
    %c0_i32_0 = arith.constant 0 : i32
    %c0_i32_1 = arith.constant 0 : i32
    return %c0_i32, %c0_i32_0 : i32, i32
  }
  func.func @transform_11(%arg0: i32) -> (i32, i32) {
    %c0_i32 = arith.constant 0 : i32
    %c0_i32_0 = arith.constant 0 : i32
    %c0_i32_1 = arith.constant 0 : i32
    return %c0_i32, %c0_i32_0 : i32, i32
  }
  func.func @transform_12(%arg0: i32) -> (i32, i32, i32) {
    %c0_i32 = arith.constant 0 : i32
    %c0_i32_0 = arith.constant 0 : i32
    %c0_i32_1 = arith.constant 0 : i32
    return %arg0, %c0_i32, %c0_i32_0 : i32, i32, i32
  }
}

</mosaic_0001>

<bundles_post_ra>
// kernel: tpu_custom_call.1
= control target key start
LH: loop header
LB: loop body
LE: loop exit
PB: predicated region body
PF: predicated region fallthrough
CT: control target
= control target key end

     0   :  { %17 = vsyncpa [#allocation3], 0  ;;  %s17956_s0 = inlined_call_operand.vmem [shape: f32[2,64,128], index: 0, kind: input, shape index: {}]   ;;  %s17957_s1 = inlined_call_operand.hbm [shape: f32[128,384], index: 1, kind: input, shape index: {}]   ;;  %s17958_s2 = inlined_call_operand.hbm [shape: f32[128,128], index: 2, kind: input, shape index: {}]   ;;  %s17959_s3 = inlined_call_operand.vmem [shape: f32[1,128], index: 3, kind: input, shape index: {}]   ;;  %s17960_s4 = inlined_call_operand.vmem [shape: f32[1,128], index: 4, kind: input, shape index: {}]   ;;  %s17961_s5 = inlined_call_operand.vmem [shape: f32[1,128], index: 5, kind: input, shape index: {}]   ;;  %s17962_s6 = inlined_call_operand.vmem [shape: f32[128,64], index: 6, kind: input, shape index: {}]   ;;  %s17963_s7 = inlined_call_operand.vmem [shape: f32[1,64], index: 7, kind: input, shape index: {}]   ;;  %s17964_s8 = inlined_call_operand.vmem [shape: f32[64,128], index: 8, kind: input, shape index: {}]   ;;  %s17965_s9 = inlined_call_operand.vmem [shape: f32[1,128], index: 9, kind: input, shape index: {}]   ;;  %s17966_s10 = inlined_call_operand.vmem [shape: f32[1,128], index: 10, kind: input, shape index: {}]   ;;  %s17967_s11 = inlined_call_operand.vmem [shape: f32[1,128], index: 11, kind: input, shape index: {}]   ;;  %s17968_s12 = inlined_call_operand.hbm [shape: f32[2,64,128], index: 12, kind: output, shape index: {}]  }
   0x1   :  { %18 = vsyncpa [#allocation6], 0 }
   0x2   :  { %19 = vsyncpa [#allocation4], 0 }
   0x3   :  { %21 = vsyncpa [#allocation4 + $0x1], 0  ;;  %s13406_s21 = smov 0   ;;  %s13408_s22 = smov 0  }
   0x4   :  { %s13410_s23 = smov 0   ;;  %s13412_s24 = smov 0  }
   0x5 LB: > { %18266 = sst [smem:[#allocation11_spill]] %s13324_s23  ;;  %s13427_s25 = sadd.s32 4294967295, %s13328_s24   ;;  %s13328_s24 = sphi %s13412_s24, %s18717_s24   ;;  %s13324_s23 = sphi %s13410_s23, %s18719_s23   ;;  %s13320_s22 = sphi %s13408_s22, %s18721_s22   ;;  %s13316_s21 = sphi %s13406_s21, %s18720_s21  }
   0x6   : > { %s10347_s26 = sadd.s32 4294967294, %s13328_s24   ;;  %s13431_s27 = sadd.s32 1, %s13328_s24  }
   0x7   : > { %18267 = sst [smem:[#allocation12_spill]] %s13431_s27  ;;  %s291_s28 = sadd.s32 1, %s13324_s23 }
   0x8   : > { %s288_s29 = ssub.s32 %s13328_s24, %s13431_s27  ;;  %p301_p0 = scmp.ne.s32.totalorder %s13324_s23, %s13320_s22 }
   0x9   : > { %p289_p1 = scmp.eq.s32.totalorder %s288_s29, 0  ;;  %p302_p2 = scmp.eq.s32.totalorder %s13427_s25, 1 }
   0xa   : > { %p307_p3 = scmp.ne.s32.totalorder %s13320_s22, %s13316_s21  ;;  %p308_p4 = scmp.eq.s32.totalorder %s10347_s26, 1 }
   0xb   : > { %s13442_s30 = scalar_select %p289_p1, %s13324_s23, %s291_s28  }
   0xc   : > { %p13444_p5 = por %p302_p2, %p301_p0  ;;  %p13448_p6 = por %p308_p4, %p307_p3 }
   0xd   : > { %18268 = sst [smem:[#allocation13_spill]] %s13442_s30  ;;  %p10348_p7 = scmp.ge.s32.totalorder %s13328_s24, 1 }
   0xe   : > { %s18270_s14 = scalar_select %p13448_p6, 1, 0 }
   0xf   : > { %p315_p8 = scmp.lt.s32.totalorder %s13328_s24, 3  ;;  %p17969_p9 = scmp.eq.s32.totalorder %s13427_s25, 0 }
  0x10   : > { %18271 = sst [smem:[#allocation14_spill]] %s18270_s14  ;;  %s13330_s16 = smov [#allocation2]  }
  0x11   : > { %p13455_p10 = pnand %p10348_p7, %p315_p8  ;;  %s327_s17 = sshll.u32 %s13330_s16, 4  ;;  %s328_s17 = int_to_ptr.vmem [resolvable:$true] %s327_s17 }
  0x12   : > { %s13331_s19 = smov [#allocation5]   ;;  %s13219_s26 = scalar_lea.vmem %s328_s17, 6144 }
  0x13   : > { %p13046_p11 = pneg %p13455_p10  ;;  %s340_s20 = sshll.u32 %s13331_s19, 4  ;;  %s341_s20 = int_to_ptr.vmem [resolvable:$true] %s340_s20 }
  0x14   : > { %p13220_p0 = scmp.ne.s32.totalorder %s328_s17, %s13219_s26  ;;  %p13227_p3 = scmp.lt.s32.totalorder %s328_s17, %s328_s17 }
  0x15   : > { %p13463_p12 = pnand %p17969_p9, %p13046_p11  ;;  %p13228_p4 = scmp.lt.s32.totalorder %s13219_s26, %s13219_s26 }
  0x17   : > { %p13210_p13 = pneg %p13463_p12  ;;  %p13229_p7 = por %p13228_p4, %p13227_p3 }
  0x19   : > { %p13222_p1 = pnand %p13220_p0, %p13210_p13 }
  0x1b   : > { %p13223_p2 = pneg %p13222_p1 }
  0x1d   : > { %p13230_p8 = pnand %p13229_p7, %p13223_p2 }
  0x1f   : > { %13233 = shalt.err (!%p13230_p8)
}
  0x20   : > { %s13332_s28 = smov 384   ;;  %s13333_s29 = smov 24  }
  0x21   : > { %13049 = dma.hbm_to_vmem [thread:$0]  (!%p13463_p12), %s17957_s1, 6144, %s328_s17, [#allocation3], %s13332_s28, %s13332_s28, %s13333_s29  }
  0x22   : > { %s13245_s30 = scalar_lea.vmem %s341_s20, 2048  ;;  %p13253_p9 = scmp.lt.s32.totalorder %s341_s20, %s341_s20 }
  0x23   : > { %p13246_p11 = scmp.ne.s32.totalorder %s341_s20, %s13245_s30  ;;  %p13254_p6 = scmp.lt.s32.totalorder %s13245_s30, %s13245_s30 }
  0x25   : > { %p13248_p0 = pnand %p13246_p11, %p13210_p13  ;;  %p13255_p3 = por %p13254_p6, %p13253_p9 }
  0x27   : > { %p13249_p1 = pneg %p13248_p0 }
  0x29   : > { %p13256_p2 = pnand %p13255_p3, %p13249_p1 }
  0x2b   : > { %13259 = shalt.err (!%p13256_p2)
}
  0x2c   : > { %s13334_s26 = smov 128   ;;  %s13335_s23 = smov 8  }
  0x2d   : > { %13052 = dma.hbm_to_vmem [thread:$0]  (!%p13463_p12), %s17958_s2, 2048, %s341_s20, [#allocation6], %s13334_s26, %s13334_s26, %s13335_s23  }
  0x2e   : > { %391 = sbr.rel (%p13455_p10) target bundleno = 3685 (0xe65), region = 68 }
  0x33   : > { %p18274_p4 = scmp.eq.s32.totalorder %s13427_s25, 0 }
  0x35   : > { %13303 = dma.done.wait (%p18274_p4), [#allocation3], 6144   ;;  %p18275_p13 = pmov %p18274_p4 }
  0x36   : > { %p18276_p6 = pmov %p18274_p4 }
  0x37   : > { %13305 = vsyncadd (%p18275_p13), [#allocation3], 4294961152 }
  0x38   : > { %13307 = dma.done.wait (%p18276_p6), [#allocation6], 2048   ;;  %p18277_p9 = pmov %p18274_p4 }
  0x39   : > { %v17988_v0 = vmov 0.0   ;;  %v496_v1 = vld [vmem:[#allocation2 + $0x170] sm:$0xff]  ;;  %v495_v2 = vld [vmem:[#allocation2 + $0x168] sm:$0xff]  ;;  %v493_v3 = vld [vmem:[#allocation2 + $0x158] sm:$0xff]  ;;  %p437_p10 = scmp.lt.s32.totalorder %s13427_s25, 1  ;;  %vm2669_vm0 = vcmask 523264  }
  0x3a   : > { %13309 = vsyncadd (%p18277_p9), [#allocation6], 4294965248  ;;  %594 = vmatprep.mubr.f32.mxu0 %v17988_v0  ;;  %907 = vmatprep.mubr.f32.mxu1 %v17988_v0  ;;  %v13497_v4 = vand.u32 4294901760, %v496_v1  ;;  %v13499_v5 = vand.u32 4294901760, %v495_v2  ;;  %v13501_v6 = vand.u32 4294901760, %v493_v3  ;;  %v492_v7 = vld [vmem:[#allocation2 + $0x150] sm:$0xff] }
  0x3b   : > { %v490_v8 = vld [vmem:[#allocation2 + $0x140] sm:$0xff]  ;;  %v489_v9 = vld [vmem:[#allocation2 + $0x138] sm:$0xff]  ;;  %v13503_v10 = vand.u32 4294901760, %v492_v7  ;;  %v487_v13 = vld [vmem:[#allocation2 + $0x128] sm:$0xff]  ;;  %s13702_s23 = scalar_select %p437_p10, %s13427_s25, 1 }
  0x3c   : > { %v13505_v11 = vand.u32 4294901760, %v490_v8  ;;  %v13507_v12 = vand.u32 4294901760, %v489_v9  ;;  %v486_v14 = vld [vmem:[#allocation2 + $0x120] sm:$0xff]  ;;  %v484_v15 = vld [vmem:[#allocation2 + $0x110] sm:$0xff]  ;;  %499 = vmatprep.subr.mxu0 %v13497_v4  ;;  %v13510_v16 = vand.u32 4294901760, %v487_v13  ;;  %v13517_v19 = vsub.f32 %v496_v1, %v13497_v4  ;;  %v13519_v20 = vld [vmem:[#allocation2 + $0x108] sm:$0xff] }
  0x3d   : > { %v13512_v17 = vand.u32 4294901760, %v486_v14  ;;  %v13514_v18 = vand.u32 4294901760, %v484_v15  ;;  %v13521_v21 = vld [vmem:[#allocation2 + $0xf8] sm:$0xff]  ;;  %v13523_v22 = vld [vmem:[#allocation2 + $0xf0] sm:$0xff]  ;;  %501 = vmatpush1.msra.mxu0 %v13499_v5  ;;  %v13527_v23 = vand.u32 4294901760, %v13519_v20  ;;  %v13530_v24 = vsub.f32 %v495_v2, %v13499_v5  ;;  %v13538_v27 = vld [vmem:[#allocation2 + $0xe0] sm:$0xff] }
  0x3e   : > { %18278 = vst [vmem:[#allocation15_spill] sm:$0xff] %v13517_v19  ;;  %v13533_v25 = vand.u32 4294901760, %v13521_v21  ;;  %v13536_v26 = vsub.f32 %v493_v3, %v13501_v6  ;;  %v13540_v28 = vld [vmem:[#allocation2 + $0xd8] sm:$0xff]  ;;  %v13542_v29 = vld [vmem:[#allocation2 + $0xc8] sm:$0xff]  ;;  %503 = vmatprep.subr.mxu0 %v13501_v6  ;;  %v17986_v30 = vand.u32 4294901760, %v13517_v19  ;;  %v13547_v31 = vand.u32 4294901760, %v13523_v22 }
  0x3f   : > { %v13550_v32 = vsub.f32 %v492_v7, %v13503_v10  ;;  %v13553_v33 = vand.u32 4294901760, %v13538_v27  ;;  %505 = vmatpush1.msra.mxu0 %v13503_v10  ;;  %v17985_v34 = vand.u32 4294901760, %v13530_v24  ;;  %v13559_v36 = vsub.f32 %v490_v8, %v13505_v11  ;;  %v13564_v38 = vld [vmem:[#allocation2 + $0xc0] sm:$0xff]  ;;  %v13588_v47 = vld [vmem:[#allocation2 + $0xb0] sm:$0xff]  ;;  %v13598_v52 = vld [vmem:[#allocation2 + $0xa8] sm:$0xff]  ;;  %s10370_s27 = sshll.u32 %s13702_s23, 6 }
  0x40   : > { %18279 = vst [vmem:[#allocation16_spill] sm:$0xff] %v13547_v31  ;;  %v17984_v35 = vand.u32 4294901760, %v13536_v26  ;;  %v13562_v37 = vand.u32 4294901760, %v13540_v28  ;;  %507 = vmatprep.subr.mxu0 %v13505_v11  ;;  %v686_v39 = vsub.f32 %v13517_v19, %v17986_v30  ;;  %v13572_v41 = vsub.f32 %v489_v9, %v13507_v12  ;;  %v13605_v57 = vld [vmem:[#allocation2 + $0x98] sm:$0xff]  ;;  %v13617_v62 = vld [vmem:[#allocation2 + $0x90] sm:$0xff]  ;;  %v13629_v7 = vld [vmem:[#allocation2 + $0x80] sm:$0xff]  ;;  %s13789_s15 = scalar_lea.vmem %s17956_s0, %s10370_s27 }
  0x41   : > { %18280 = vst [vmem:[#allocation17_spill] sm:$0xff] %v13553_v33  ;;  %v17981_v40 = vand.u32 4294901760, %v13550_v32  ;;  %v13575_v42 = vand.u32 4294901760, %v13542_v29  ;;  %509 = vmatpush1.msra.mxu0 %v13507_v12  ;;  %v692_v43 = vsub.f32 %v13530_v24, %v17985_v34  ;;  %v17980_v45 = vand.u32 4294901760, %v13559_v36  ;;  %v13736_v34 = vld [vmem:[#allocation2 + $0x30] sm:$0xff]  ;;  %s13337_s17 = smov 64  }
  0x42   : > { %18281 = vst [vmem:[#allocation18_spill] sm:$0xff] %v13562_v37  ;;  %v698_v44 = vsub.f32 %v13536_v26, %v17984_v35  ;;  %v13586_v46 = vsub.f32 %v487_v13, %v13510_v16  ;;  %511 = vmatprep.subr.mxu0 %v13510_v16  ;;  %v687_v48 = vand.u32 4294901760, %v686_v39  ;;  %v17979_v50 = vand.u32 4294901760, %v13572_v41  ;;  %s434_s26 = sand.u32 1, %s13320_s22   ;;  %s10371_s18 = sshll.u32 %s13427_s25, 10 }
  0x43   : > { %18282 = vst [vmem:[#allocation19_spill] sm:$0xff] %v13575_v42  ;;  %v704_v49 = vsub.f32 %v13550_v32, %v17981_v40  ;;  %v13596_v51 = vand.u32 4294901760, %v13564_v38  ;;  %513 = vmatpush1.msra.mxu0 %v13512_v17  ;;  %v693_v53 = vand.u32 4294901760, %v692_v43  ;;  %v710_v55 = vsub.f32 %v13559_v36, %v17980_v45  ;;  %v13713_v45 = vld [vmem:[#allocation2 + $0x48] sm:$0xff]  ;;  %s10355_s30 = sshll.u32 %s434_s26, 6  ;;  %s17908_s16 = scalar_lea.hbm %s17968_s12, %s10371_s18 }
  0x44   : > { %v699_v54 = vand.u32 4294901760, %v698_v44  ;;  %v17976_v56 = vand.u32 4294901760, %v13586_v46  ;;  %515 = vmatprep.subr.mxu0 %v13514_v18  ;;  %688 = vmatprep.subr.mxu1 %v687_v48  ;;  %v716_v59 = vsub.f32 %v13572_v41, %v17979_v50  ;;  %v13612_v60 = vsub.f32 %v486_v14, %v13512_v17  ;;  %s17916_s19 = scalar_lea.sflag [#allocation4], %s434_s26  ;;  %s13338_s23 = smov [#allocation7]  }
  0x45   : > { %18283 = vst [vmem:[#allocation20_spill] sm:$0xff] %v13596_v51  ;;  %v705_v58 = vand.u32 4294901760, %v704_v49  ;;  %v13615_v61 = vand.u32 4294901760, %v13588_v47  ;;  %517 = vmatpush1.msra.mxu0 %v13527_v23  ;;  %694 = vmatpush1.msra.mxu1 %v693_v53  ;;  %v711_v63 = vand.u32 4294901760, %v710_v55  ;;  %v13624_v2 = vsub.f32 %v484_v15, %v13514_v18  ;;  %v13640_v15 = vld [vmem:[#allocation2 + $0x78] sm:$0xff]  ;;  %s13264_s27 = sshll.u32 %s13338_s23, 4  ;;  %s13265_s27 = int_to_ptr.vmem [resolvable:$false] %s13264_s27 }
  0x46   : > { %v722_v1 = vsub.f32 %v13586_v46, %v17976_v56  ;;  %v13627_v3 = vand.u32 4294901760, %v13598_v52  ;;  %519 = vmatprep.subr.mxu0 %v13533_v25  ;;  %700 = vmatprep.subr.mxu1 %v699_v54  ;;  %v717_v8 = vand.u32 4294901760, %v716_v59  ;;  %v17975_v9 = vand.u32 4294901760, %v13612_v60  ;;  %v13664_v54 = vld [vmem:[#allocation2 + $0x68] sm:$0xff] }
  0x47   : > { %18284 = vst [vmem:[#allocation21_spill] sm:$0xff] %v13615_v61  ;;  %v13635_v13 = vsub.f32 %v13519_v20, %v13527_v23  ;;  %v13638_v14 = vand.u32 4294901760, %v13605_v57  ;;  %521 = vmatpush1.msra.mxu0 %v13547_v31  ;;  %706 = vmatpush1.msra.mxu1 %v705_v58  ;;  %v17974_v43 = vand.u32 4294901760, %v13624_v2  ;;  %v13646_v44 = vsub.f32 %v13521_v21, %v13533_v25 }
  0x48   : > { %18285 = vst [vmem:[#allocation22_spill] sm:$0xff] %v13627_v3  ;;  %v723_v39 = vand.u32 4294901760, %v722_v1  ;;  %v13649_v48 = vand.u32 4294901760, %v13617_v62  ;;  %523 = vmatprep.subr.mxu0 %v13553_v33  ;;  %712 = vmatprep.subr.mxu1 %v711_v63  ;;  %v728_v20 = vsub.f32 %v13612_v60, %v17975_v9  ;;  %v13659_v53 = vsub.f32 %v13523_v22, %v13547_v31  ;;  %v13687_v9 = vld [vmem:[#allocation2 + $0x60] sm:$0xff] }
  0x49   : > { %18286 = vst [vmem:[#allocation23_spill] sm:$0xff] %v13638_v14  ;;  %v17977_v49 = vand.u32 4294901760, %v13635_v13  ;;  %v13662_v21 = vand.u32 4294901760, %v13629_v7  ;;  %525 = vmatpush1.msra.mxu0 %v13562_v37  ;;  %718 = vmatpush1.msra.mxu1 %v717_v8  ;;  %v734_v55 = vsub.f32 %v13624_v2, %v17974_v43  ;;  %v17978_v58 = vand.u32 4294901760, %v13646_v44 }
  0x4a   : > { %18287 = vst [vmem:[#allocation24_spill] sm:$0xff] %v13649_v48  ;;  %v13673_v22 = vsub.f32 %v13538_v27, %v13553_v33  ;;  %v13676_v59 = vand.u32 4294901760, %v13640_v15  ;;  %527 = vmatprep.subr.mxu0 %v13575_v42  ;;  %724 = vmatprep.subr.mxu1 %v723_v39  ;;  %v729_v63 = vand.u32 4294901760, %v728_v20  ;;  %v17982_v8 = vand.u32 4294901760, %v13659_v53 }
  0x4b   : > { %18288 = vst [vmem:[#allocation25_spill] sm:$0xff] %v13662_v21  ;;  %v740_v1 = vsub.f32 %v13635_v13, %v17977_v49  ;;  %v13685_v43 = vsub.f32 %v13540_v28, %v13562_v37  ;;  %529 = vmatpush1.msra.mxu0 %v13596_v51  ;;  %v735_v27 = vand.u32 4294901760, %v734_v55  ;;  %v746_v39 = vsub.f32 %v13646_v44, %v17978_v58  ;;  %v13697_v49 = vld [vmem:[#allocation2 + $0x50] sm:$0xff]  ;;  %v442_v37 = vld [vmem:[%s13789_s15] sm:$0xff] }
  0x4c   : > { %18289 = vst [vmem:[#allocation26_spill] sm:$0xff] %v13676_v59  ;;  %v17983_v20 = vand.u32 4294901760, %v13673_v22  ;;  %v13695_v56 = vand.u32 4294901760, %v13664_v54  ;;  %730 = vmatpush1.msra.mxu1 %v729_v63  ;;  %531 = vmatprep.subr.mxu0 %v13615_v61  ;;  %v752_v55 = vsub.f32 %v13659_v53, %v17982_v8  ;;  %v13711_v50 = vsub.f32 %v13542_v29, %v13575_v42  ;;  %v13726_v29 = vld [vmem:[#allocation2 + $0x38] sm:$0xff] }
  0x4d   : > { %v741_v28 = vand.u32 4294901760, %v740_v1  ;;  %v17987_v58 = vand.u32 4294901760, %v13685_v43  ;;  %736 = vmatprep.subr.mxu1 %v735_v27  ;;  %533 = vmatpush1.msra.mxu0 %v13627_v3  ;;  %v747_v40 = vand.u32 4294901760, %v746_v39  ;;  %v13720_v1 = vand.u32 4294901760, %v13687_v9 }
  0x4e   : > { %18290 = vst [vmem:[#allocation27_spill] sm:$0xff] %v13695_v56  ;;  %v758_v63 = vsub.f32 %v13673_v22, %v17983_v20  ;;  %v13724_v8 = vsub.f32 %v13564_v38, %v13596_v51  ;;  %535 = vmatprep.subr.mxu0 %v13638_v14  ;;  %v753_v27 = vand.u32 4294901760, %v752_v55  ;;  %v17992_v20 = vand.u32 4294901760, %v13711_v50 }
  0x4f   : > { %18291 = vst [vmem:[#allocation28_spill] sm:$0xff] %v13720_v1  ;;  %742 = vmatpush1.msra.mxu1 %v741_v28  ;;  %v764_v39 = vsub.f32 %v13685_v43, %v17987_v58  ;;  %v13734_v35 = vand.u32 4294901760, %v13697_v49  ;;  %537 = vmatpush1.msra.mxu0 %v13649_v48  ;;  %v13742_v55 = vsub.f32 %v13588_v47, %v13615_v61  ;;  %v13745_v30 = vand.u32 4294901760, %v13713_v45  ;;  %v13747_v58 = vld [vmem:[#allocation2 + $0x20] sm:$0xff] }
  0x50   : > { %748 = vmatprep.subr.mxu1 %v747_v40  ;;  %v759_v38 = vand.u32 4294901760, %v758_v63  ;;  %v17995_v28 = vand.u32 4294901760, %v13724_v8  ;;  %539 = vmatprep.subr.mxu0 %v13662_v21  ;;  %v770_v40 = vsub.f32 %v13711_v50, %v17992_v20  ;;  %v13756_v63 = vsub.f32 %v13598_v52, %v13627_v3  ;;  %v13773_v52 = vld [vmem:[#allocation2 + $0x18] sm:$0xff] }
  0x51   : > { %18292 = vst [vmem:[#allocation29_spill] sm:$0xff] %v13734_v35  ;;  %18293 = vst [vmem:[#allocation30_spill] sm:$0xff] %v13745_v30  ;;  %754 = vmatpush1.msra.mxu1 %v753_v27  ;;  %v765_v0 = vand.u32 4294901760, %v764_v39  ;;  %v13759_v47 = vand.u32 4294901760, %v13726_v29  ;;  %541 = vmatpush1.msra.mxu0 %v13676_v59  ;;  %v13768_v61 = vsub.f32 %v13605_v57, %v13638_v14  ;;  %v13771_v20 = vand.u32 4294901760, %v13736_v34  ;;  %v13784_v57 = vld [vmem:[#allocation2 + $0x8] sm:$0xff] }
  0x52   : > { %760 = vmatprep.subr.mxu1 %v759_v38  ;;  %v776_v27 = vsub.f32 %v13724_v8, %v17995_v28  ;;  %543 = vmatprep.subr.mxu0 %v13695_v56  ;;  %v771_v38 = vand.u32 4294901760, %v770_v40  ;;  %v13779_v28 = vsub.f32 %v13617_v62, %v13649_v48  ;;  %v13782_v39 = vand.u32 4294901760, %v13747_v58  ;;  %v13812_v62 = vld [vmem:[#allocation2] sm:$0xff] }
  0x53   : > { %18294 = vst [vmem:[#allocation31_spill] sm:$0xff] %v13759_v47  ;;  %18295 = vst [vmem:[#allocation32_spill] sm:$0xff] %v13771_v20  ;;  %766 = vmatpush1.msra.mxu1 %v765_v0  ;;  %545 = vmatpush1.msra.mxu0 %v13720_v1  ;;  %v18296_v40 = vand.u32 4294901760, %v13742_v55  ;;  %v13798_v48 = vsub.f32 %v13629_v7, %v13662_v21  ;;  %v18298_v14 = vand.u32 4294901760, %v13756_v63  ;;  %v13806_v42 = vand.u32 4294901760, %v13773_v52 }
  0x54   : > { %v777_v0 = vand.u32 4294901760, %v776_v27  ;;  %772 = vmatprep.subr.mxu1 %v771_v38  ;;  %547 = vmatprep.subr.mxu0 %v13734_v35  ;;  %v18300_v38 = vand.u32 4294901760, %v13768_v61  ;;  %v13820_v27 = vand.u32 4294901760, %v13784_v57  ;;  %v13837_v31 = vand.u32 4294901760, %v13812_v62 }
  0x55   : > { %v782_v3 = vsub.f32 %v13742_v55, %v18296_v40  ;;  %18297 = vst [vmem:[#allocation33_spill] sm:$0xff] %v13798_v48  ;;  %v788_v51 = vsub.f32 %v13756_v63, %v18298_v14  ;;  %18299 = vst [vmem:[#allocation34_spill] sm:$0xff] %v13806_v42  ;;  %v13810_v40 = vsub.f32 %v13640_v15, %v13676_v59  ;;  %549 = vmatpush1.msra.mxu0 %v13745_v30 }
  0x56   : > { %778 = vmatpush1.msra.mxu1 %v777_v0  ;;  %v794_v21 = vsub.f32 %v13768_v61, %v18300_v38  ;;  %v18016_v14 = vand.u32 4294901760, %v13798_v48  ;;  %18301 = vst [vmem:[#allocation35_spill] sm:$0xff] %v13820_v27  ;;  %551 = vmatprep.subr.mxu0 %v13759_v47  ;;  %v18302_v15 = vand.u32 4294901760, %v13779_v28  ;;  %v13830_v59 = vsub.f32 %v13664_v54, %v13695_v56 }
  0x57   : > { %v783_v7 = vand.u32 4294901760, %v782_v3  ;;  %v789_v33 = vand.u32 4294901760, %v788_v51  ;;  %553 = vmatpush1.msra.mxu0 %v13771_v20  ;;  %18304 = vst [vmem:[#allocation37_spill] sm:$0xff] %v13837_v31  ;;  %v13848_v56 = vand.u32 4294901760, %v442_v37 }
  0x58   : > { %v800_v0 = vsub.f32 %v13779_v28, %v18302_v15  ;;  %18303 = vst [vmem:[#allocation36_spill] sm:$0xff] %v13830_v59  ;;  %v795_v38 = vand.u32 4294901760, %v794_v21  ;;  %v806_v51 = vsub.f32 %v13798_v48, %v18016_v14  ;;  %v13841_v15 = vsub.f32 %v13687_v9, %v13720_v1  ;;  %555 = vmatprep.subr.mxu0 %v13782_v39 }
  0x59   : > { %784 = vmatprep.subr.mxu1 %v783_v7  ;;  %v18305_v21 = vand.u32 4294901760, %v13810_v40  ;;  %v18019_v7 = vand.u32 4294901760, %v13830_v59  ;;  %18306 = vst [vmem:[#allocation38_spill] sm:$0xff] %v13848_v56  ;;  %557 = vmatpush1.msra.mxu0 %v13806_v42  ;;  %v13858_v9 = vsub.f32 %v13713_v45, %v13745_v30 }
  0x5a   : > { %790 = vmatpush1.msra.mxu1 %v789_v33  ;;  %v801_v3 = vand.u32 4294901760, %v800_v0  ;;  %v807_v14 = vand.u32 4294901760, %v806_v51  ;;  %v18022_v48 = vand.u32 4294901760, %v13841_v15  ;;  %v13854_v33 = vsub.f32 %v13697_v49, %v13734_v35  ;;  %v443_v0 = vld [vmem:[%s13789_s15 + $0x8] sm:$0xff]  ;;  %559 = vmatprep.subr.mxu0 %v13820_v27  ;;  %v444_v35 = vld [vmem:[%s13789_s15 + $0x10] sm:$0xff] }
  0x5b   : > { %v812_v54 = vsub.f32 %v13810_v40, %v18305_v21  ;;  %796 = vmatprep.subr.mxu1 %v795_v38  ;;  %v818_v38 = vsub.f32 %v13830_v59, %v18019_v7  ;;  %v13866_v51 = vsub.f32 %v442_v37, %v13848_v56  ;;  %v13870_v49 = vsub.f32 %v13726_v29, %v13759_v47 }
  0x5c   : > { %802 = vmatpush1.msra.mxu1 %v801_v3  ;;  %561 = vmatpush1.msra.mxu0 %v13837_v31  ;;  %v824_v45 = vsub.f32 %v13841_v15, %v18022_v48  ;;  %v18027_v3 = vand.u32 4294901760, %v13854_v33  ;;  %v13880_v7 = vsub.f32 %v13736_v34, %v13771_v20  ;;  %v13887_v47 = vand.u32 4294901760, %v443_v0 }
  0x5d   : > { %v813_v21 = vand.u32 4294901760, %v812_v54  ;;  %18307 = vst [vmem:[#allocation39_spill] sm:$0xff] %v13866_v51  ;;  %808 = vmatprep.subr.mxu1 %v807_v14  ;;  %v819_v37 = vand.u32 4294901760, %v818_v38  ;;  %v13883_v29 = vand.u32 4294901760, %v13866_v51  ;;  %966 = vmatprep.subr.mxu0 %v13517_v19  ;;  %v18310_v34 = vand.u32 4294901760, %v13858_v9 }
  0x5e   : > { %18309 = vst [vmem:[#allocation41_spill] sm:$0xff] %v13887_v47  ;;  %v825_v48 = vand.u32 4294901760, %v824_v45  ;;  %v830_v54 = vsub.f32 %v13854_v33, %v18027_v3  ;;  %v18037_v38 = vand.u32 4294901760, %v13880_v7  ;;  %v18311_v20 = vand.u32 4294901760, %v13870_v49 }
  0x5f   : > { %814 = vmatpush1.msra.mxu1 %v813_v21  ;;  %18308 = vst [vmem:[#allocation40_spill] sm:$0xff] %v13883_v29  ;;  %v836_v21 = vsub.f32 %v13858_v9, %v18310_v34  ;;  %v598_v14 = vsub.f32 %v13866_v51, %v13883_v29  ;;  %v13902_v45 = vsub.f32 %v443_v0, %v13887_v47 }
  0x60   : > { %820 = vmatprep.subr.mxu1 %v819_v37  ;;  %v842_v30 = vsub.f32 %v13870_v49, %v18311_v20  ;;  %v13906_v3 = vsub.f32 %v13747_v58, %v13782_v39  ;;  %v831_v34 = vand.u32 4294901760, %v830_v54  ;;  %v848_v37 = vsub.f32 %v13880_v7, %v18037_v38  ;;  %v445_v20 = vld [vmem:[%s13789_s15 + $0x18] sm:$0xff]  ;;  %v446_v58 = vld [vmem:[%s13789_s15 + $0x20] sm:$0xff] }
  0x61   : > { %826 = vmatpush1.msra.mxu1 %v825_v48  ;;  %v837_v19 = vand.u32 4294901760, %v836_v21  ;;  %v13913_v29 = vsub.f32 %v13773_v52, %v13806_v42  ;;  %v13917_v51 = vand.u32 4294901760, %v598_v14  ;;  %v13920_v1 = vand.u32 4294901760, %v13902_v45 }
  0x62   : > { %18312 = vst [vmem:[#allocation42_spill] sm:$0xff] %v13906_v3  ;;  %v843_v0 = vand.u32 4294901760, %v842_v30  ;;  %v18039_v48 = vand.u32 4294901760, %v13906_v3  ;;  %832 = vmatprep.subr.mxu1 %v831_v34  ;;  %v849_v54 = vand.u32 4294901760, %v848_v37  ;;  %v13927_v38 = vsub.f32 %v13784_v57, %v13820_v27 }
  0x63   : > { %18313 = vst [vmem:[#allocation43_spill] sm:$0xff] %v13913_v29  ;;  %18314 = vst [vmem:[#allocation44_spill] sm:$0xff] %v13917_v51  ;;  %v18046_v21 = vand.u32 4294901760, %v13913_v29  ;;  %v13931_v52 = vsub.f32 %v13812_v62, %v13837_v31  ;;  %600 = vmatmul.mubr.f32.vlgmr.msra.gmra.mxu0 %v13917_v51  ;;  %838 = vmatpush1.msra.mxu1 %v837_v19  ;;  %v609_v30 = vsub.f32 %v13902_v45, %v13920_v1 }
  0x64   : > { %18315 = vst [vmem:[#allocation45_spill] sm:$0xff] %v13920_v1  ;;  %18316 = vst [vmem:[#allocation46_spill] sm:$0xff] %v13927_v38  ;;  %v854_v14 = vsub.f32 %v13906_v3, %v18039_v48  ;;  %v13939_v34 = vand.u32 4294901760, %v444_v35  ;;  %v13941_v37 = vand.u32 4294901760, %v445_v20  ;;  %969 = vmatpush1.msra.mxu0 %v13530_v24  ;;  %844 = vmatprep.subr.mxu1 %v843_v0  ;;  %v18049_v19 = vand.u32 4294901760, %v13927_v38 }
  0x65   : > { %18317 = vst [vmem:[#allocation47_spill] sm:$0xff] %v13931_v52  ;;  %v860_v57 = vsub.f32 %v13913_v29, %v18046_v21  ;;  %v13949_v51 = vand.u32 4294901760, %v446_v58  ;;  %972 = vmatprep.subr.mxu0 %v13536_v26  ;;  %v18321_v48 = vmov 0.0   ;;  %v13953_v1 = vand.u32 4294901760, %v609_v30  ;;  %850 = vmatpush1.msra.mxu1 %v849_v54  ;;  %v447_v54 = vld [vmem:[%s13789_s15 + $0x28] sm:$0xff] }
  0x66   : > { %18318 = vst [vmem:[#allocation48_spill] sm:$0xff] %v13939_v34  ;;  %18319 = vst [vmem:[#allocation49_spill] sm:$0xff] %v13941_v37  ;;  %605 = vmatprep.mubr.f32.mxu0 %v18321_v48  ;;  %v855_v31 = vand.u32 4294901760, %v854_v14  ;;  %v13956_v0 = vsub.f32 %v444_v35, %v13939_v34  ;;  %v13959_v27 = vsub.f32 %v445_v20, %v13941_v37  ;;  %975 = vmatpush1.msra.mxu0 %v13550_v32 }
  0x67   : > { %18320 = vst [vmem:[#allocation50_spill] sm:$0xff] %v13949_v51  ;;  %18322 = vst [vmem:[#allocation51_spill] sm:$0xff] %v13953_v1  ;;  %v861_v21 = vand.u32 4294901760, %v860_v57  ;;  %v866_v62 = vsub.f32 %v13927_v38, %v18049_v19  ;;  %v18325_v42 = vand.u32 4294901760, %v13931_v52  ;;  %611 = vmatmul.mubr.f32.gmra.mxu0 %v13953_v1  ;;  %978 = vmatprep.subr.mxu0 %v13559_v36 }
  0x68   : > { %18323 = vst [vmem:[#allocation52_spill] sm:$0xff] %v13956_v0  ;;  %18324 = vst [vmem:[#allocation53_spill] sm:$0xff] %v13959_v27  ;;  %856 = vmatprep.subr.mxu1 %v855_v31  ;;  %v13970_v35 = vand.u32 4294901760, %v13956_v0  ;;  %v13973_v20 = vand.u32 4294901760, %v13959_v27  ;;  %v13978_v19 = vsub.f32 %v446_v58, %v13949_v51  ;;  %981 = vmatpush1.msra.mxu0 %v13572_v41 }
  0x69   : > { %v872_v30 = vsub.f32 %v13931_v52, %v18325_v42  ;;  %862 = vmatpush1.msra.mxu1 %v861_v21  ;;  %v867_v14 = vand.u32 4294901760, %v866_v62  ;;  %616 = vmatprep.mubr.f32.mxu0 %v18321_v48  ;;  %v13987_v21 = vand.u32 4294901760, %v447_v54 }
  0x6a   : > { %18326 = vst [vmem:[#allocation54_spill] sm:$0xff] %v13970_v35  ;;  %18327 = vst [vmem:[#allocation55_spill] sm:$0xff] %v13973_v20  ;;  %v620_v31 = vsub.f32 %v13956_v0, %v13970_v35  ;;  %984 = vmatprep.subr.mxu0 %v13586_v46  ;;  %v631_v42 = vsub.f32 %v13959_v27, %v13973_v20  ;;  %v13995_v62 = vand.u32 4294901760, %v13978_v19  ;;  %v18345_v20 = vld [vmem:[#allocation18_spill] sm:$0xff] }
  0x6b   : > { %v873_v57 = vand.u32 4294901760, %v872_v30  ;;  %18328 = vst [vmem:[#allocation56_spill] sm:$0xff] %v13978_v19  ;;  %868 = vmatprep.subr.mxu1 %v867_v14  ;;  %18329 = vst [vmem:[#allocation57_spill] sm:$0xff] %v13987_v21  ;;  %987 = vmatpush1.msra.mxu0 %v13612_v60  ;;  %v448_v30 = vld [vmem:[%s13789_s15 + $0x30] sm:$0xff] }
  0x6c   : > { %v13990_v58 = vand.u32 4294901760, %v620_v31  ;;  %990 = vmatprep.subr.mxu0 %v13624_v2  ;;  %18331 = vst [vmem:[#allocation59_spill] sm:$0xff] %v13995_v62  ;;  %v14002_v14 = vand.u32 4294901760, %v631_v42  ;;  %v642_v31 = vsub.f32 %v13978_v19, %v13995_v62  ;;  %v449_v42 = vld [vmem:[%s13789_s15 + $0x38] sm:$0xff]  ;;  %v18344_v62 = vld [vmem:[#allocation17_spill] sm:$0xff] }
  0x6d   : > { %874 = vmatpush1.msra.mxu1 %v873_v57  ;;  %993 = vmatpush1.msra.mxu0 %v13635_v13  ;;  %v14005_v57 = vsub.f32 %v447_v54, %v13987_v21 }
  0x6e   : > { %18330 = vst [vmem:[#allocation58_spill] sm:$0xff] %v13990_v58  ;;  %909 = vmatmul.mubr.f32.vlgmr.msra.gmra.mxu1 %v13848_v56  ;;  %622 = vmatmul.mubr.f32.gmra.mxu0 %v13990_v58  ;;  %18332 = vst [vmem:[#allocation60_spill] sm:$0xff] %v14002_v14  ;;  %v14013_v58 = vand.u32 4294901760, %v448_v30  ;;  %v14027_v1 = vand.u32 4294901760, %v642_v31 }
  0x6f   : > { %1158 = vmatprep.subr.mxu1 %v13497_v4  ;;  %18333 = vst [vmem:[#allocation61_spill] sm:$0xff] %v14005_v57  ;;  %996 = vmatprep.subr.mxu0 %v13646_v44  ;;  %v14020_v54 = vand.u32 4294901760, %v14005_v57 }
  0x70   : > { %1160 = vmatpush1.msra.mxu1 %v13499_v5  ;;  %627 = vmatprep.mubr.f32.mxu0 %v18321_v48  ;;  %18334 = vst [vmem:[#allocation62_spill] sm:$0xff] %v14013_v58  ;;  %18336 = vst [vmem:[#allocation64_spill] sm:$0xff] %v14027_v1  ;;  %v14030_v56 = vsub.f32 %v448_v30, %v14013_v58 }
  0x71   : > { %1162 = vmatprep.subr.mxu1 %v13501_v6  ;;  %914 = vmatprep.mubr.f32.mxu1 %v18321_v48  ;;  %18335 = vst [vmem:[#allocation63_spill] sm:$0xff] %v14020_v54 }
  0x72   : > { %999 = vmatpush1.msra.mxu0 %v13659_v53  ;;  %1164 = vmatpush1.msra.mxu1 %v13503_v10  ;;  %18337 = vst [vmem:[#allocation65_spill] sm:$0xff] %v14030_v56  ;;  %v14045_v30 = vand.u32 4294901760, %v14030_v56 }
  0x73   : > { %633 = vmatmul.mubr.f32.gmra.mxu0 %v14002_v14  ;;  %916 = vmatmul.mubr.f32.gmra.mxu1 %v13887_v47  ;;  %v653_v14 = vsub.f32 %v14005_v57, %v14020_v54  ;;  %v14038_v47 = vand.u32 4294901760, %v449_v42 }
  0x74   : > { %1002 = vmatprep.subr.mxu0 %v13673_v22  ;;  %1166 = vmatprep.subr.mxu1 %v13505_v11  ;;  %18338 = vst [vmem:[#allocation66_spill] sm:$0xff] %v14045_v30 }
  0x75   : > { %1005 = vmatpush1.msra.mxu0 %v13685_v43  ;;  %1168 = vmatpush1.msra.mxu1 %v13507_v12  ;;  %v14051_v31 = vand.u32 4294901760, %v653_v14  ;;  %v14054_v54 = vsub.f32 %v449_v42, %v14038_v47  ;;  %v18343_v42 = vld [vmem:[#allocation33_spill] sm:$0xff] }
  0x76   : > { %1008 = vmatprep.subr.mxu0 %v13711_v50  ;;  %1170 = vmatprep.subr.mxu1 %v13510_v16 }
  0x77   : > { %638 = vmatprep.mubr.f32.mxu0 %v18321_v48  ;;  %921 = vmatprep.mubr.f32.mxu1 %v18321_v48  ;;  %18339 = vst [vmem:[#allocation67_spill] sm:$0xff] %v14051_v31  ;;  %18340 = vst [vmem:[#allocation68_spill] sm:$0xff] %v14054_v54  ;;  %v14067_v14 = vand.u32 4294901760, %v14054_v54 }
  0x78   : > { %1011 = vmatpush1.msra.mxu0 %v13724_v8  ;;  %1172 = vmatpush1.msra.mxu1 %v13512_v17 }
  0x79   : > { %644 = vmatmul.mubr.f32.gmra.mxu0 %v14027_v1  ;;  %923 = vmatmul.mubr.f32.gmra.mxu1 %v13939_v34  ;;  %v664_v1 = vsub.f32 %v14030_v56, %v14045_v30  ;;  %v18341_v34 = vld [vmem:[#allocation16_spill] sm:$0xff]  ;;  %v18347_v56 = vld [vmem:[#allocation19_spill] sm:$0xff] }
  0x7a   : > { %1014 = vmatprep.subr.mxu0 %v13742_v55  ;;  %1174 = vmatprep.subr.mxu1 %v13514_v18  ;;  %18342 = vst [vmem:[#allocation16_spill] sm:$0xff] %v14067_v14 }
  0x7b   : > { %1017 = vmatpush1.msra.mxu0 %v13756_v63  ;;  %1176 = vmatpush1.msra.mxu1 %v13527_v23  ;;  %v14073_v30 = vand.u32 4294901760, %v664_v1  ;;  %v18349_v1 = vld [vmem:[#allocation21_spill] sm:$0xff] }
  0x7c   : > { %1020 = vmatprep.subr.mxu0 %v13768_v61  ;;  %1178 = vmatprep.subr.mxu1 %v13533_v25 }
  0x7d   : > { %649 = vmatprep.mubr.f32.mxu0 %v18321_v48  ;;  %928 = vmatprep.mubr.f32.mxu1 %v18321_v48  ;;  %18346 = vst [vmem:[#allocation33_spill] sm:$0xff] %v14073_v30 }
  0x7e   : > { %1023 = vmatpush1.msra.mxu0 %v13779_v28  ;;  %1180 = vmatpush1.msra.mxu1 %v18341_v34 }
  0x7f   : > { %655 = vmatmul.mubr.f32.gmra.mxu0 %v14051_v31  ;;  %930 = vmatmul.mubr.f32.gmra.mxu1 %v13941_v37  ;;  %v675_v31 = vsub.f32 %v14054_v54, %v14067_v14  ;;  %v18348_v37 = vld [vmem:[#allocation20_spill] sm:$0xff]  ;;  %v18352_v14 = vld [vmem:[#allocation23_spill] sm:$0xff] }
  0x80   : > { %1026 = vmatprep.subr.mxu0 %v18343_v42  ;;  %1182 = vmatprep.subr.mxu1 %v18344_v62  ;;  %v18356_v54 = vld [vmem:[#allocation27_spill] sm:$0xff] }
  0x81   : > { %1029 = vmatpush1.msra.mxu0 %v13810_v40  ;;  %1184 = vmatpush1.msra.mxu1 %v18345_v20 }
  0x82   : > { %1032 = vmatprep.subr.mxu0 %v13830_v59  ;;  %1186 = vmatprep.subr.mxu1 %v18347_v56  ;;  %v18350_v56 = vld [vmem:[#allocation22_spill] sm:$0xff]  ;;  %v14089_v59 = vand.u32 4294901760, %v675_v31  ;;  %v18354_v31 = vld [vmem:[#allocation25_spill] sm:$0xff] }
  0x83   : > { %660 = vmatprep.mubr.f32.mxu0 %v18321_v48  ;;  %935 = vmatprep.mubr.f32.mxu1 %v18321_v48 }
  0x84   : > { %1035 = vmatpush1.msra.mxu0 %v13841_v15  ;;  %1188 = vmatpush1.msra.mxu1 %v18348_v37  ;;  %18351 = vst [vmem:[#allocation17_spill] sm:$0xff] %v14089_v59 }
  0x85   : > { %666 = vmatmul.mubr.f32.gmra.mxu0 %v14073_v30  ;;  %937 = vmatmul.mubr.f32.gmra.mxu1 %v13949_v51  ;;  %v18353_v30 = vld [vmem:[#allocation24_spill] sm:$0xff]  ;;  %v18355_v51 = vld [vmem:[#allocation26_spill] sm:$0xff] }
  0x86   : > { %1038 = vmatprep.subr.mxu0 %v13854_v33  ;;  %1190 = vmatprep.subr.mxu1 %v18349_v1 }
  0x87   : > { %1041 = vmatpush1.msra.mxu0 %v13858_v9  ;;  %1192 = vmatpush1.msra.mxu1 %v18350_v56 }
  0x88   : > { %1044 = vmatprep.subr.mxu0 %v13870_v49  ;;  %1194 = vmatprep.subr.mxu1 %v18352_v14 }
  0x89   : > { %671 = vmatprep.mubr.f32.mxu0 %v18321_v48  ;;  %942 = vmatprep.mubr.f32.mxu1 %v18321_v48 }
  0x8a   : > { %1047 = vmatpush1.msra.mxu0 %v13880_v7  ;;  %1196 = vmatpush1.msra.mxu1 %v18353_v30 }
  0x8b   : > { %677 = vmatmul.mubr.f32.gmra.mxu0 %v14089_v59  ;;  %944 = vmatmul.mubr.f32.gmra.mxu1 %v13987_v21  ;;  %v18357_v59 = vld [vmem:[#allocation28_spill] sm:$0xff]  ;;  %v18358_v21 = vld [vmem:[#allocation39_spill] sm:$0xff] }
  0x8c   : > { %1050 = vmatprep.subr.mxu0 %v13906_v3  ;;  %1198 = vmatprep.subr.mxu1 %v18354_v31  ;;  %v18359_v31 = vld [vmem:[#allocation29_spill] sm:$0xff]  ;;  %v18364_v3 = vld [vmem:[#allocation31_spill] sm:$0xff] }
  0x8d   : > { %1053 = vmatpush1.msra.mxu0 %v13913_v29  ;;  %1200 = vmatpush1.msra.mxu1 %v18355_v51  ;;  %v18360_v29 = vld [vmem:[#allocation15_spill] sm:$0xff] }
  0x8e   : > { %1056 = vmatprep.subr.mxu0 %v13927_v38  ;;  %1202 = vmatprep.subr.mxu1 %v18356_v54  ;;  %v18361_v51 = vand.u32 4294901760, %v18360_v29  ;;  %v18362_v38 = vld [vmem:[#allocation30_spill] sm:$0xff]  ;;  %v18363_v54 = vand.u32 4294901760, %v13530_v24  ;;  %v18368_v24 = vand.u32 4294901760, %v13559_v36  ;;  %v18371_v29 = vld [vmem:[#allocation35_spill] sm:$0xff]  ;;  %v18375_v36 = vld [vmem:[#allocation40_spill] sm:$0xff] }
  0x8f   : > { %949 = vmatprep.mubr.f32.mxu1 %v18321_v48  ;;  %1059 = vmatpush1.msra.mxu0 %v13931_v52  ;;  %v18365_v52 = vand.u32 4294901760, %v13536_v26  ;;  %v18369_v26 = vld [vmem:[#allocation34_spill] sm:$0xff] }
  0x90   : > { %1092 = vmatprep.mubr.f32.mxu0 %v18321_v48  ;;  %1204 = vmatpush1.msra.mxu1 %v18357_v59 }
  0x91   : > { %951 = vmatmul.mubr.f32.gmra.mxu1 %v14013_v58  ;;  %1095 = vmatmul.mubr.f32.vlgmr.msra.gmra.mxu0 %v18358_v21  ;;  %v18366_v21 = vld [vmem:[#allocation32_spill] sm:$0xff]  ;;  %v18367_v58 = vand.u32 4294901760, %v13550_v32  ;;  %v18373_v32 = vld [vmem:[#allocation37_spill] sm:$0xff] }
  0x92   : > { %1206 = vmatprep.subr.mxu1 %v18359_v31  ;;  %1329 = vmatprep.subr.mxu0 %v18361_v51  ;;  %v18370_v51 = vand.u32 4294901760, %v13572_v41  ;;  %v18376_v41 = vand.u32 4294901760, %v13624_v2  ;;  %v18383_v2 = vand.u32 4294901760, %v13711_v50  ;;  %v18392_v50 = vld [vmem:[#allocation36_spill] sm:$0xff] }
  0x93   : > { %1208 = vmatpush1.msra.mxu1 %v18362_v38  ;;  %1333 = vmatpush1.msra.mxu0 %v18363_v54  ;;  %v18378_v54 = vand.u32 4294901760, %v13646_v44  ;;  %v18396_v44 = vld [vmem:[#allocation65_spill] sm:$0xff] }
  0x94   : > { %1210 = vmatprep.subr.mxu1 %v18364_v3  ;;  %1337 = vmatprep.subr.mxu0 %v18365_v52  ;;  %v18372_v52 = vand.u32 4294901760, %v13586_v46  ;;  %v18377_v46 = vand.u32 4294901760, %v13635_v13  ;;  %v18394_v13 = vld [vmem:[#allocation19_spill] sm:$0xff] }
  0x95   : > { %956 = vmatprep.mubr.f32.mxu1 %v18321_v48  ;;  %1100 = vmatprep.mubr.f32.mxu0 %v18321_v48 }
  0x96   : > { %1212 = vmatpush1.msra.mxu1 %v18366_v21  ;;  %1341 = vmatpush1.msra.mxu0 %v18367_v58  ;;  %v18374_v58 = vand.u32 4294901760, %v13612_v60  ;;  %v18379_v60 = vand.u32 4294901760, %v13659_v53  ;;  %v18397_v53 = vld [vmem:[#allocation59_spill] sm:$0xff] }
  0x97   : > { %958 = vmatmul.mubr.f32.gmra.mxu1 %v14038_v47  ;;  %1103 = vmatmul.mubr.f32.gmra.mxu0 %v13902_v45 }
  0x98   : > { %1214 = vmatprep.subr.mxu1 %v13782_v39  ;;  %1345 = vmatprep.subr.mxu0 %v18368_v24  ;;  %v18412_v24 = vld [vmem:[#allocation27_spill] sm:$0xff] }
  0x99   : > { %1216 = vmatpush1.msra.mxu1 %v18369_v26  ;;  %1349 = vmatpush1.msra.mxu0 %v18370_v51  ;;  %v18413_v51 = vld [vmem:[#allocation47_spill] sm:$0xff] }
  0x9a   : > { %1218 = vmatprep.subr.mxu1 %v18371_v29  ;;  %1353 = vmatprep.subr.mxu0 %v18372_v52  ;;  %v18414_v52 = vand.u32 4294901760, %v18413_v51  ;;  %v467_v51 = vld [vmem:[#allocation2 + $0x88] sm:$0xff] }
  0x9b   : > { %1108 = vmatprep.mubr.f32.mxu0 %v18321_v48  ;;  %1220 = vmatpush1.msra.mxu1 %v18373_v32 }
  0x9c   : > { %1253 = vmatprep.mubr.f32.mxu1 %v18321_v48  ;;  %1357 = vmatpush1.msra.mxu0 %v18374_v58 }
  0x9d   : > { %1111 = vmatmul.mubr.f32.gmra.mxu0 %v13956_v0  ;;  %1257 = vmatmul.mubr.f32.vlgmr.msra.gmra.mxu1 %v18375_v36 }
  0x9e   : > { %1361 = vmatprep.subr.mxu0 %v18376_v41  ;;  %1544 = vmatprep.subr.mxu1 %v13497_v4  ;;  %v18380_v4 = vld [vmem:[#allocation45_spill] sm:$0xff] }
  0x9f   : > { %1365 = vmatpush1.msra.mxu0 %v18377_v46  ;;  %1546 = vmatpush1.msra.mxu1 %v13499_v5  ;;  %v18381_v5 = vand.u32 4294901760, %v13673_v22  ;;  %v497_v22 = vld [vmem:[#allocation2 + $0x178] sm:$0xff] }
  0xa0   : > { %1369 = vmatprep.subr.mxu0 %v18378_v54  ;;  %1548 = vmatprep.subr.mxu1 %v13501_v6  ;;  %v18382_v6 = vand.u32 4294901760, %v13685_v43  ;;  %v18395_v43 = vand.u32 4294901760, %v13841_v15  ;;  %v18401_v15 = vand.u32 4294901760, %v13880_v7  ;;  %v18409_v7 = vld [vmem:[#allocation26_spill] sm:$0xff] }
  0xa1   : > { %1116 = vmatprep.mubr.f32.mxu0 %v18321_v48  ;;  %1262 = vmatprep.mubr.f32.mxu1 %v18321_v48  ;;  %v18415_v54 = vld [vmem:[#allocation66_spill] sm:$0xff] }
  0xa2   : > { %1373 = vmatpush1.msra.mxu0 %v18379_v60  ;;  %1550 = vmatpush1.msra.mxu1 %v13503_v10  ;;  %v18384_v10 = vand.u32 4294901760, %v13724_v8  ;;  %v18398_v8 = vand.u32 4294901760, %v13854_v33  ;;  %v18402_v33 = vld [vmem:[#allocation68_spill] sm:$0xff]  ;;  %v18416_v60 = vld [vmem:[#allocation38_spill] sm:$0xff] }
  0xa3   : > { %1119 = vmatmul.mubr.f32.gmra.mxu0 %v13959_v27  ;;  %1266 = vmatmul.mubr.f32.gmra.mxu1 %v18380_v4 }
  0xa4   : > { %1377 = vmatprep.subr.mxu0 %v18381_v5  ;;  %1552 = vmatprep.subr.mxu1 %v13505_v11  ;;  %v18385_v11 = vand.u32 4294901760, %v13742_v55  ;;  %v18400_v55 = vand.u32 4294901760, %v13870_v49  ;;  %v488_v5 = vld [vmem:[#allocation2 + $0x130] sm:$0xff] }
  0xa5   : > { %1381 = vmatpush1.msra.mxu0 %v18382_v6  ;;  %1554 = vmatpush1.msra.mxu1 %v13507_v12  ;;  %v18386_v12 = vand.u32 4294901760, %v13756_v63  ;;  %v14216_v63 = vand.u32 4294901760, %v497_v22 }
  0xa6   : > { %1385 = vmatprep.subr.mxu0 %v18383_v2  ;;  %1556 = vmatprep.subr.mxu1 %v13510_v16  ;;  %v18387_v16 = vand.u32 4294901760, %v13768_v61  ;;  %v18393_v61 = vand.u32 4294901760, %v18392_v50  ;;  %v14265_v2 = vand.u32 4294901760, %v488_v5 }
  0xa7   : > { %1124 = vmatprep.mubr.f32.mxu0 %v18321_v48  ;;  %1271 = vmatprep.mubr.f32.mxu1 %v18321_v48 }
  0xa8   : > { %1389 = vmatpush1.msra.mxu0 %v18384_v10  ;;  %1558 = vmatpush1.msra.mxu1 %v13512_v17  ;;  %v18388_v17 = vand.u32 4294901760, %v13779_v28  ;;  %v18399_v28 = vand.u32 4294901760, %v13858_v9  ;;  %v18404_v9 = vld [vmem:[#allocation42_spill] sm:$0xff] }
  0xa9   : > { %1127 = vmatmul.mubr.f32.gmra.mxu0 %v13978_v19  ;;  %1275 = vmatmul.mubr.f32.gmra.mxu1 %v13970_v35  ;;  %v18405_v49 = vand.u32 4294901760, %v18404_v9  ;;  %v485_v10 = vld [vmem:[#allocation2 + $0x118] sm:$0xff] }
  0xaa   : > { %1393 = vmatprep.subr.mxu0 %v18385_v11  ;;  %1560 = vmatprep.subr.mxu1 %v13514_v18  ;;  %v18389_v18 = vld [vmem:[#allocation55_spill] sm:$0xff]  ;;  %v18418_v11 = vld [vmem:[#allocation16_spill] sm:$0xff] }
  0xab   : > { %1397 = vmatpush1.msra.mxu0 %v18386_v12  ;;  %1562 = vmatpush1.msra.mxu1 %v13527_v23  ;;  %v18390_v23 = vand.u32 4294901760, %v18343_v42  ;;  %v18410_v42 = vld [vmem:[#allocation46_spill] sm:$0xff] }
  0xac   : > { %1401 = vmatprep.subr.mxu0 %v18387_v16  ;;  %1564 = vmatprep.subr.mxu1 %v13533_v25  ;;  %v18391_v25 = vand.u32 4294901760, %v13810_v40  ;;  %v494_v40 = vld [vmem:[#allocation2 + $0x160] sm:$0xff] }
  0xad   : > { %1132 = vmatprep.mubr.f32.mxu0 %v18321_v48  ;;  %1280 = vmatprep.mubr.f32.mxu1 %v18321_v48 }
  0xae   : > { %1405 = vmatpush1.msra.mxu0 %v18388_v17  ;;  %1566 = vmatpush1.msra.mxu1 %v18341_v34  ;;  %v18406_v34 = vld [vmem:[#allocation25_spill] sm:$0xff]  ;;  %v14286_v17 = vsub.f32 %v488_v5, %v14265_v2 }
  0xaf   : > { %1135 = vmatmul.mubr.f32.gmra.mxu0 %v14005_v57  ;;  %1284 = vmatmul.mubr.f32.gmra.mxu1 %v18389_v18 }
  0xb0   : > { %1409 = vmatprep.subr.mxu0 %v18390_v23  ;;  %1568 = vmatprep.subr.mxu1 %v18344_v62  ;;  %v18407_v62 = vld [vmem:[#allocation43_spill] sm:$0xff]  ;;  %v479_v23 = vld [vmem:[#allocation2 + $0xe8] sm:$0xff]  ;;  %v14300_v50 = vand.u32 4294901760, %v14286_v17 }
  0xb1   : > { %1413 = vmatpush1.msra.mxu0 %v18391_v25  ;;  %1570 = vmatpush1.msra.mxu1 %v18345_v20  ;;  %v14231_v20 = vsub.f32 %v497_v22, %v14216_v63  ;;  %v476_v22 = vld [vmem:[#allocation2 + $0xd0] sm:$0xff] }
  0xb2   : > { %1417 = vmatprep.subr.mxu0 %v18393_v61  ;;  %1572 = vmatprep.subr.mxu1 %v18394_v13  ;;  %v18420_v13 = vld [vmem:[#allocation49_spill] sm:$0xff]  ;;  %v14322_v9 = vand.u32 4294901760, %v476_v22 }
  0xb3   : > { %1140 = vmatprep.mubr.f32.mxu0 %v18321_v48  ;;  %1289 = vmatprep.mubr.f32.mxu1 %v18321_v48  ;;  %v14245_v58 = vand.u32 4294901760, %v14231_v20 }
  0xb4   : > { %1421 = vmatpush1.msra.mxu0 %v18395_v43  ;;  %1574 = vmatpush1.msra.mxu1 %v18348_v37  ;;  %v14228_v37 = vand.u32 4294901760, %v494_v40  ;;  %v14308_v43 = vand.u32 4294901760, %v479_v23 }
  0xb5   : > { %1143 = vmatmul.mubr.f32.gmra.mxu0 %v18396_v44  ;;  %1293 = vmatmul.mubr.f32.gmra.mxu1 %v18397_v53 }
  0xb6   : > { %1425 = vmatprep.subr.mxu0 %v18398_v8  ;;  %1576 = vmatprep.subr.mxu1 %v18349_v1  ;;  %v18411_v1 = vand.u32 4294901760, %v18410_v42  ;;  %v14250_v46 = vsub.f32 %v494_v40, %v14228_v37 }
  0xb7   : > { %1429 = vmatpush1.msra.mxu0 %v18399_v28  ;;  %1578 = vmatpush1.msra.mxu1 %v18350_v56  ;;  %v18403_v56 = vld [vmem:[#allocation63_spill] sm:$0xff]  ;;  %v1882_v28 = vsub.f32 %v14286_v17, %v14300_v50 }
  0xb8   : > { %1433 = vmatprep.subr.mxu0 %v18400_v55  ;;  %1580 = vmatprep.subr.mxu1 %v18352_v14  ;;  %v18408_v14 = vand.u32 4294901760, %v18407_v62  ;;  %v14263_v6 = vand.u32 4294901760, %v14250_v46  ;;  %v470_v62 = vld [vmem:[#allocation2 + $0xa0] sm:$0xff] }
  0xb9   : > { %1148 = vmatprep.mubr.f32.mxu0 %v18321_v48  ;;  %1298 = vmatprep.mubr.f32.mxu1 %v18321_v48  ;;  %v14348_v5 = vand.u32 4294901760, %v470_v62 }
  0xba   : > { %1437 = vmatpush1.msra.mxu0 %v18401_v15  ;;  %1582 = vmatpush1.msra.mxu1 %v18353_v30  ;;  %v491_v30 = vld [vmem:[#allocation2 + $0x148] sm:$0xff]  ;;  %v18421_v15 = vld [vmem:[#allocation50_spill] sm:$0xff] }
  0xbb   : > { %1151 = vmatmul.mubr.f32.gmra.mxu0 %v18402_v33  ;;  %1302 = vmatmul.mubr.f32.gmra.mxu1 %v18403_v56  ;;  %v14247_v41 = vand.u32 4294901760, %v491_v30  ;;  %v455_v33 = vld [vmem:[#allocation2 + $0x28] sm:$0xff] }
  0xbc   : > { %1441 = vmatprep.subr.mxu0 %v18405_v49  ;;  %1584 = vmatprep.subr.mxu1 %v18406_v34  ;;  %v473_v49 = vld [vmem:[#allocation2 + $0xb8] sm:$0xff]  ;;  %v14327_v34 = vsub.f32 %v479_v23, %v14308_v43 }
  0xbd   : > { %1445 = vmatpush1.msra.mxu0 %v18408_v14  ;;  %1586 = vmatpush1.msra.mxu1 %v18409_v7  ;;  %v1883_v14 = vand.u32 4294901760, %v1882_v28  ;;  %v14337_v42 = vand.u32 4294901760, %v473_v49  ;;  %v18423_v23 = vld [vmem:[#allocation62_spill] sm:$0xff] }
  0xbe   : > { %1449 = vmatprep.subr.mxu0 %v18411_v1  ;;  %1588 = vmatprep.subr.mxu1 %v18412_v24  ;;  %v18422_v1 = vld [vmem:[#allocation57_spill] sm:$0xff]  ;;  %v14341_v24 = vsub.f32 %v476_v22, %v14322_v9 }
  0xbf   : > { %1307 = vmatprep.mubr.f32.mxu1 %v18321_v48  ;;  %1453 = vmatpush1.msra.mxu0 %v18414_v52  ;;  %v14346_v52 = vand.u32 4294901760, %v14327_v34 }
  0xc0   : > { %1486 = vmatprep.mubr.f32.mxu0 %v18321_v48  ;;  %1590 = vmatpush1.msra.mxu1 %v18357_v59  ;;  %v1861_v59 = vsub.f32 %v14231_v20, %v14245_v58 }
  0xc1   : > { %1311 = vmatmul.mubr.f32.gmra.mxu1 %v18415_v54  ;;  %1488 = vmatmul.mubr.f32.vlgmr.msra.gmra.mxu0 %v18416_v60  ;;  %v1903_v22 = vsub.f32 %v14327_v34, %v14346_v52 }
  0xc2   : > { %1592 = vmatprep.subr.mxu1 %v18359_v31  ;;  %1316 = vmatprep.mubr.f32.mxu1 %v18321_v48  ;;  %v14268_v31 = vsub.f32 %v491_v30, %v14247_v41  ;;  %v1862_v12 = vand.u32 4294901760, %v1861_v59  ;;  %v464_v59 = vld [vmem:[#allocation2 + $0x70] sm:$0xff] }
  0xc3   : > { %1594 = vmatpush1.msra.mxu1 %v18362_v38  ;;  %1493 = vmatprep.mubr.f32.mxu0 %v18321_v48  ;;  %v18417_v38 = vld [vmem:[#allocation41_spill] sm:$0xff]  ;;  %v14371_v28 = vand.u32 4294901760, %v464_v59 }
  0xc4   : > { %1596 = vmatprep.subr.mxu1 %v18364_v3  ;;  %11332 = vmatprep.subr.mxu0 %v14216_v63  ;;  %v14276_v3 = vand.u32 4294901760, %v485_v10  ;;  %v14283_v16 = vand.u32 4294901760, %v14268_v31 }
  0xc5   : > { %1598 = vmatpush1.msra.mxu1 %v18366_v21  ;;  %1495 = vmatmul.mubr.f32.gmra.mxu0 %v18417_v38  ;;  %v1868_v21 = vsub.f32 %v14250_v46, %v14263_v6 }
  0xc6   : > { %1320 = vmatmul.mubr.f32.gmra.mxu1 %v18418_v11  ;;  %1600 = vmatprep.subr.mxu1 %v13782_v39  ;;  %v482_v39 = vld [vmem:[#allocation2 + $0x100] sm:$0xff]  ;;  %v14303_v61 = vsub.f32 %v485_v10, %v14276_v3 }
  0xc7   : > { %1602 = vmatpush1.msra.mxu1 %v18369_v26  ;;  %1500 = vmatprep.mubr.f32.mxu0 %v18321_v48  ;;  %v18419_v26 = vld [vmem:[#allocation48_spill] sm:$0xff]  ;;  %v1869_v25 = vand.u32 4294901760, %v1868_v21  ;;  %v14356_v21 = vsub.f32 %v473_v49, %v14337_v42  ;;  %v458_v49 = vld [vmem:[#allocation2 + $0x40] sm:$0xff] }
  0xc8   : > { %1604 = vmatprep.subr.mxu1 %v18371_v29  ;;  %1639 = vmatprep.mubr.f32.mxu1 %v18321_v48  ;;  %v14294_v29 = vand.u32 4294901760, %v482_v39  ;;  %v14316_v55 = vand.u32 4294901760, %v14303_v61  ;;  %v14395_v56 = vand.u32 4294901760, %v458_v49 }
  0xc9   : > { %1606 = vmatpush1.msra.mxu1 %v18373_v32  ;;  %1502 = vmatmul.mubr.f32.gmra.mxu0 %v18419_v26  ;;  %v1875_v32 = vsub.f32 %v14268_v31, %v14283_v16 }
  0xca   : > { %1641 = vmatmul.mubr.f32.vlgmr.msra.gmra.mxu1 %v18416_v60  ;;  %1507 = vmatprep.mubr.f32.mxu0 %v18321_v48  ;;  %v14319_v40 = vsub.f32 %v482_v39, %v14294_v29  ;;  %v1889_v7 = vsub.f32 %v14303_v61, %v14316_v55  ;;  %v14358_v39 = vand.u32 4294901760, %v467_v51  ;;  %v14418_v27 = vsub.f32 %v458_v49, %v14395_v56 }
  0xcb   : > { %1646 = vmatprep.mubr.f32.mxu1 %v18321_v48  ;;  %11333 = vmatpush3.msra.mxu0 %v14216_v63  ;;  %v1876_v8 = vand.u32 4294901760, %v1875_v32  ;;  %v461_v32 = vld [vmem:[#allocation2 + $0x58] sm:$0xff] }
  0xcc   : > { %11334 = vmatprep.subr.mxu0 %v14228_v37  ;;  %11376 = vmatprep.subr.mxu1 %v1862_v12  ;;  %v14335_v30 = vand.u32 4294901760, %v14319_v40  ;;  %v1890_v10 = vand.u32 4294901760, %v1889_v7  ;;  %v14377_v7 = vand.u32 4294901760, %v14356_v21  ;;  %v14380_v11 = vsub.f32 %v467_v51, %v14358_v39 }
  0xcd   : > { %1509 = vmatmul.mubr.f32.gmra.mxu0 %v18420_v13  ;;  %11377 = vmatpush3.msra.mxu1 %v1862_v12  ;;  %v14382_v54 = vand.u32 4294901760, %v461_v32  ;;  %v14393_v51 = vsub.f32 %v464_v59, %v14371_v28  ;;  %v14408_v59 = vand.u32 4294901760, %v455_v33  ;;  %v14439_v49 = vand.u32 4294901760, %v14418_v27 }
  0xce   : > { %1648 = vmatmul.mubr.f32.gmra.mxu1 %v18417_v38  ;;  %1514 = vmatprep.mubr.f32.mxu0 %v18321_v48  ;;  %v1896_v12 = vsub.f32 %v14319_v40, %v14335_v30  ;;  %v1917_v53 = vsub.f32 %v14356_v21, %v14377_v7 }
  0xcf   : > { %1653 = vmatprep.mubr.f32.mxu1 %v18321_v48  ;;  %11335 = vmatpush3.msra.mxu0 %v14228_v37  ;;  %v14406_v57 = vsub.f32 %v461_v32, %v14382_v54  ;;  %v14415_v35 = vand.u32 4294901760, %v14393_v51  ;;  %18427 = vst [vmem:[#allocation22_spill] sm:$0xff] %v14439_v49 }
  0xd0   : > { %11336 = vmatprep.subr.mxu0 %v14247_v41  ;;  %11378 = vmatprep.subr.mxu1 %v1869_v25 }
  0xd1   : > { %1516 = vmatmul.mubr.f32.gmra.mxu0 %v18421_v15  ;;  %11379 = vmatpush3.msra.mxu1 %v1869_v25  ;;  %v14362_v25 = vand.u32 4294901760, %v14341_v24  ;;  %18426 = vst [vmem:[#allocation21_spill] sm:$0xff] %v14415_v35  ;;  %v14428_v0 = vand.u32 4294901760, %v14406_v57 }
  0xd2   : > { %1655 = vmatmul.mubr.f32.gmra.mxu1 %v18419_v26  ;;  %1521 = vmatprep.mubr.f32.mxu0 %v18321_v48 }
  0xd3   : > { %1660 = vmatprep.mubr.f32.mxu1 %v18321_v48  ;;  %11337 = vmatpush3.msra.mxu0 %v14247_v41 }
  0xd4   : > { %11338 = vmatprep.subr.mxu0 %v14265_v2  ;;  %11380 = vmatprep.subr.mxu1 %v1876_v8 }
  0xd5   : > { %1523 = vmatmul.mubr.f32.gmra.mxu0 %v18422_v1  ;;  %11381 = vmatpush3.msra.mxu1 %v1876_v8  ;;  %v14369_v8 = vsub.f32 %v470_v62, %v14348_v5  ;;  %v1910_v62 = vsub.f32 %v14341_v24, %v14362_v25 }
  0xd6   : > { %1662 = vmatmul.mubr.f32.gmra.mxu1 %v18420_v13  ;;  %1528 = vmatprep.mubr.f32.mxu0 %v18321_v48 }
  0xd7   : > { %1667 = vmatprep.mubr.f32.mxu1 %v18321_v48  ;;  %11339 = vmatpush3.msra.mxu0 %v14265_v2  ;;  %v14390_v44 = vand.u32 4294901760, %v14369_v8  ;;  %v1911_v19 = vand.u32 4294901760, %v1910_v62 }
  0xd8   : > { %11340 = vmatprep.subr.mxu0 %v14276_v3  ;;  %11382 = vmatprep.subr.mxu1 %v1883_v14 }
  0xd9   : > { %1530 = vmatmul.mubr.f32.gmra.mxu0 %v18423_v23  ;;  %11383 = vmatpush3.msra.mxu1 %v1883_v14  ;;  %v1897_v14 = vand.u32 4294901760, %v1896_v12  ;;  %v1904_v12 = vand.u32 4294901760, %v1903_v22  ;;  %18424 = vst [vmem:[#allocation18_spill] sm:$0xff] %v14390_v44  ;;  %v14403_v22 = vand.u32 4294901760, %v14380_v11  ;;  %v1924_v18 = vsub.f32 %v14369_v8, %v14390_v44 }
  0xda   : > { %1669 = vmatmul.mubr.f32.gmra.mxu1 %v18421_v15  ;;  %1535 = vmatprep.mubr.f32.mxu0 %v18321_v48  ;;  %v14431_v44 = vsub.f32 %v455_v33, %v14408_v59 }
  0xdb   : > { %1674 = vmatprep.mubr.f32.mxu1 %v18321_v48  ;;  %11341 = vmatpush3.msra.mxu0 %v14276_v3  ;;  %18425 = vst [vmem:[#allocation20_spill] sm:$0xff] %v14403_v22  ;;  %v1931_v62 = vsub.f32 %v14380_v11, %v14403_v22  ;;  %v1945_v22 = vsub.f32 %v14406_v57, %v14428_v0 }
  0xdc   : > { %11342 = vmatprep.subr.mxu0 %v14294_v29  ;;  %11384 = vmatprep.subr.mxu1 %v1890_v10 }
  0xdd   : > { %1537 = vmatmul.mubr.f32.gmra.mxu0 %v14038_v47  ;;  %11385 = vmatpush3.msra.mxu1 %v1890_v10  ;;  %v452_v10 = vld [vmem:[#allocation2 + $0x10] sm:$0xff]  ;;  %v1932_v33 = vand.u32 4294901760, %v1931_v62  ;;  %v1946_v62 = vand.u32 4294901760, %v1945_v22 }
  0xde   : > { %1676 = vmatmul.mubr.f32.gmra.mxu1 %v18422_v1  ;;  %11343 = vmatpush3.msra.mxu0 %v14294_v29  ;;  %v14420_v32 = vand.u32 4294901760, %v452_v10 }
  0xdf   : > { %1681 = vmatprep.mubr.f32.mxu1 %v18321_v48  ;;  %11344 = vmatprep.subr.mxu0 %v14308_v43 }
  0xe0   : > { %11386 = vmatprep.subr.mxu1 %v1897_v14  ;;  %11345 = vmatpush3.msra.mxu0 %v14308_v43 }
  0xe1   : > { %11387 = vmatpush3.msra.mxu1 %v1897_v14  ;;  %11346 = vmatprep.subr.mxu0 %v14322_v9  ;;  %v1918_v14 = vand.u32 4294901760, %v1917_v53  ;;  %v1938_v53 = vsub.f32 %v14393_v51, %v14415_v35 }
  0xe2   : > { %1683 = vmatmul.mubr.f32.gmra.mxu1 %v18423_v23  ;;  %11388 = vmatprep.subr.mxu1 %v1904_v12 }
  0xe3   : > { %1688 = vmatprep.mubr.f32.mxu1 %v18321_v48  ;;  %11347 = vmatpush3.msra.mxu0 %v14322_v9  ;;  %v1925_v48 = vand.u32 4294901760, %v1924_v18  ;;  %v14449_v18 = vand.u32 4294901760, %v14431_v44 }
  0xe4   : > { %11389 = vmatpush3.msra.mxu1 %v1904_v12  ;;  %11348 = vmatprep.subr.mxu0 %v14337_v42  ;;  %v14442_v12 = vsub.f32 %v452_v10, %v14420_v32  ;;  %v1939_v10 = vand.u32 4294901760, %v1938_v53 }
  0xe5   : > { %11390 = vmatprep.subr.mxu1 %v1911_v19  ;;  %11349 = vmatpush3.msra.mxu0 %v14337_v42 }
  0xe6   : > { %1690 = vmatmul.mubr.f32.gmra.mxu1 %v14038_v47  ;;  %11350 = vmatprep.subr.mxu0 %v14348_v5  ;;  %v14456_v35 = vand.u32 4294901760, %v14442_v12 }
  0xe7   : > { %11391 = vmatpush3.msra.mxu1 %v1911_v19  ;;  %11351 = vmatpush3.msra.mxu0 %v14348_v5  ;;  %v1952_v19 = vsub.f32 %v14418_v27, %v14439_v49 }
  0xe8   : > { %11392 = vmatprep.subr.mxu1 %v1918_v14  ;;  %11352 = vmatprep.subr.mxu0 %v14358_v39  ;;  %v1966_v49 = vsub.f32 %v14442_v12, %v14456_v35 }
  0xe9   : > { %11393 = vmatpush3.msra.mxu1 %v1918_v14  ;;  %11353 = vmatpush3.msra.mxu0 %v14358_v39  ;;  %v1959_v14 = vsub.f32 %v14431_v44, %v14449_v18  ;;  %v1953_v53 = vand.u32 4294901760, %v1952_v19  ;;  %v18450_v19 = vld [vmem:[#allocation68_spill] sm:$0xff] }
  0xea   : > { %11394 = vmatprep.subr.mxu1 %v1925_v48  ;;  %11354 = vmatprep.subr.mxu0 %v14371_v28 }
  0xeb   : > { %11395 = vmatpush3.msra.mxu1 %v1925_v48  ;;  %11355 = vmatpush3.msra.mxu0 %v14371_v28  ;;  %v1960_v22 = vand.u32 4294901760, %v1959_v14  ;;  %v1967_v48 = vand.u32 4294901760, %v1966_v49  ;;  %v18451_v14 = vld [vmem:[#allocation66_spill] sm:$0xff] }
  0xec   : > { %11396 = vmatprep.subr.mxu1 %v1932_v33  ;;  %11356 = vmatprep.subr.mxu0 %v14382_v54 }
  0xed   : > { %11397 = vmatpush3.msra.mxu1 %v1932_v33  ;;  %11357 = vmatpush3.msra.mxu0 %v14382_v54  ;;  %v18428_v33 = vld [vmem:[#allocation44_spill] sm:$0xff] }
  0xee   : > { %11398 = vmatprep.subr.mxu1 %v1939_v10  ;;  %11358 = vmatprep.subr.mxu0 %v14395_v56 }
  0xef   : > { %11399 = vmatpush3.msra.mxu1 %v1939_v10  ;;  %11359 = vmatpush3.msra.mxu0 %v14395_v56  ;;  %v18429_v10 = vld [vmem:[#allocation51_spill] sm:$0xff] }
  0xf0   : > { %11400 = vmatprep.subr.mxu1 %v1946_v62  ;;  %11360 = vmatprep.subr.mxu0 %v14408_v59 }
  0xf1   : > { %11401 = vmatpush3.msra.mxu1 %v1946_v62  ;;  %11361 = vmatpush3.msra.mxu0 %v14408_v59 }
  0xf2   : > { %11402 = vmatprep.subr.mxu1 %v1953_v53  ;;  %11362 = vmatprep.subr.mxu0 %v14420_v32 }
  0xf3   : > { %11403 = vmatpush3.msra.mxu1 %v1953_v53  ;;  %11363 = vmatpush3.msra.mxu0 %v14420_v32 }
  0xf4   : > { %11404 = vmatprep.subr.mxu1 %v1960_v22  ;;  %11364 = vmatprep.mubr.f32.mxu0 %v18428_v33 }
  0xf5   : > { %11405 = vmatpush3.msra.mxu1 %v1960_v22  ;;  %11420 = vmatprep.subr.mxu0 %v14231_v20 }
  0xf6   : > { %11406 = vmatprep.subr.mxu1 %v1967_v48  ;;  %11365 = vmatmul.mubr.f32.vlgmr.msra.gmra.mxu0 %v18429_v10 }
  0xf7   : > { %11407 = vmatpush3.msra.mxu1 %v1967_v48  ;;  %11421 = vmatpush3.msra.mxu0 %v14231_v20  ;;  %v18430_v20 = vld [vmem:[#allocation58_spill] sm:$0xff] }
  0xf8   : > { %11408 = vmatprep.mubr.f32.mxu1 %v18416_v60  ;;  %11422 = vmatprep.subr.mxu0 %v14250_v46 }
  0xf9   : > { %11464 = vmatprep.subr.mxu1 %v14216_v63  ;;  %11409 = vmatmul.mubr.f32.vlgmr.msra.gmra.mxu1 %v18417_v38 }
  0xfa   : > { %11423 = vmatpush3.msra.mxu0 %v14250_v46  ;;  %11465 = vmatpush3.msra.mxu1 %v14216_v63  ;;  %v18431_v46 = vld [vmem:[#allocation60_spill] sm:$0xff] }
  0xfb   : > { %11424 = vmatprep.subr.mxu0 %v14268_v31  ;;  %11466 = vmatprep.subr.mxu1 %v14228_v37 }
  0xfc   : > { %11425 = vmatpush3.msra.mxu0 %v14268_v31  ;;  %11467 = vmatpush3.msra.mxu1 %v14228_v37  ;;  %v18432_v31 = vld [vmem:[#allocation64_spill] sm:$0xff] }
  0xfd   : > { %11426 = vmatprep.subr.mxu0 %v14286_v17  ;;  %11468 = vmatprep.subr.mxu1 %v14247_v41 }
  0xfe   : > { %11427 = vmatpush3.msra.mxu0 %v14286_v17  ;;  %11469 = vmatpush3.msra.mxu1 %v14247_v41  ;;  %v18434_v17 = vld [vmem:[#allocation33_spill] sm:$0xff] }
  0xff   : > { %11428 = vmatprep.subr.mxu0 %v14303_v61  ;;  %11470 = vmatprep.subr.mxu1 %v14265_v2 }
 0x100   : > { %11429 = vmatpush3.msra.mxu0 %v14303_v61  ;;  %11471 = vmatpush3.msra.mxu1 %v14265_v2  ;;  %v18440_v61 = vld [vmem:[#allocation20_spill] sm:$0xff] }
 0x101   : > { %11430 = vmatprep.subr.mxu0 %v14319_v40  ;;  %11472 = vmatprep.subr.mxu1 %v14276_v3 }
 0x102   : > { %11431 = vmatpush3.msra.mxu0 %v14319_v40  ;;  %11473 = vmatpush3.msra.mxu1 %v14276_v3  ;;  %v18441_v40 = vld [vmem:[#allocation54_spill] sm:$0xff] }
 0x103   : > { %11432 = vmatprep.subr.mxu0 %v14327_v34  ;;  %11474 = vmatprep.subr.mxu1 %v14294_v29 }
 0x104   : > { %11433 = vmatpush3.msra.mxu0 %v14327_v34  ;;  %11475 = vmatpush3.msra.mxu1 %v14294_v29  ;;  %v18443_v34 = vld [vmem:[#allocation55_spill] sm:$0xff] }
 0x105   : > { %11434 = vmatprep.subr.mxu0 %v14341_v24  ;;  %11476 = vmatprep.subr.mxu1 %v14308_v43 }
 0x106   : > { %11435 = vmatpush3.msra.mxu0 %v14341_v24  ;;  %11477 = vmatpush3.msra.mxu1 %v14308_v43 }
 0x107   : > { %11436 = vmatprep.subr.mxu0 %v14356_v21  ;;  %11478 = vmatprep.subr.mxu1 %v14322_v9 }
 0x108   : > { %11437 = vmatpush3.msra.mxu0 %v14356_v21  ;;  %11479 = vmatpush3.msra.mxu1 %v14322_v9 }
 0x109   : > { %11438 = vmatprep.subr.mxu0 %v14369_v8  ;;  %11480 = vmatprep.subr.mxu1 %v14337_v42 }
 0x10a   : > { %11439 = vmatpush3.msra.mxu0 %v14369_v8  ;;  %11481 = vmatpush3.msra.mxu1 %v14337_v42  ;;  %v18446_v8 = vld [vmem:[#allocation59_spill] sm:$0xff] }
 0x10b   : > { %11367 = vmatprep.mubr.f32.mxu0 %v18430_v20  ;;  %11440 = vmatprep.subr.mxu0 %v14380_v11 }
 0x10c   : > { %11482 = vmatprep.subr.mxu1 %v14348_v5  ;;  %11368 = vmatmul.mubr.f32.gmra.mxu0 %v18431_v46 }
 0x10d   : > { %11441 = vmatpush3.msra.mxu0 %v14380_v11  ;;  %11483 = vmatpush3.msra.mxu1 %v14348_v5  ;;  %v18433_v11 = vld [vmem:[#allocation67_spill] sm:$0xff] }
 0x10e   : > { %11411 = vmatprep.mubr.f32.mxu1 %v18419_v26  ;;  %11442 = vmatprep.subr.mxu0 %v14393_v51 }
 0x10f   : > { %11484 = vmatprep.subr.mxu1 %v14358_v39  ;;  %11412 = vmatmul.mubr.f32.gmra.mxu1 %v18420_v13 }
 0x110   : > { %11443 = vmatpush3.msra.mxu0 %v14393_v51  ;;  %11485 = vmatpush3.msra.mxu1 %v14358_v39  ;;  %v18449_v51 = vld [vmem:[#allocation65_spill] sm:$0xff] }
 0x111   : > { %11370 = vmatprep.mubr.f32.mxu0 %v18432_v31  ;;  %11444 = vmatprep.subr.mxu0 %v14406_v57 }
 0x112   : > { %11486 = vmatprep.subr.mxu1 %v14371_v28  ;;  %11371 = vmatmul.mubr.f32.gmra.mxu0 %v18433_v11 }
 0x113   : > { %11445 = vmatpush3.msra.mxu0 %v14406_v57  ;;  %11487 = vmatpush3.msra.mxu1 %v14371_v28  ;;  %v18435_v57 = vld [vmem:[#allocation17_spill] sm:$0xff] }
 0x114   : > { %11414 = vmatprep.mubr.f32.mxu1 %v18421_v15  ;;  %11446 = vmatprep.subr.mxu0 %v14418_v27 }
 0x115   : > { %11488 = vmatprep.subr.mxu1 %v14382_v54  ;;  %11415 = vmatmul.mubr.f32.gmra.mxu1 %v18422_v1 }
 0x116   : > { %11447 = vmatpush3.msra.mxu0 %v14418_v27  ;;  %11489 = vmatpush3.msra.mxu1 %v14382_v54  ;;  %v18436_v27 = vld [vmem:[#allocation39_spill] sm:$0xff] }
 0x117   : > { %11373 = vmatprep.mubr.f32.mxu0 %v18434_v17  ;;  %11448 = vmatprep.subr.mxu0 %v14431_v44 }
 0x118   : > { %11490 = vmatprep.subr.mxu1 %v14395_v56  ;;  %11374 = vmatmul.mubr.f32.gmra.mxu0 %v18435_v57 }
 0x119   : > { %11449 = vmatpush3.msra.mxu0 %v14431_v44  ;;  %11491 = vmatpush3.msra.mxu1 %v14395_v56 }
 0x11a   : > { %11417 = vmatprep.mubr.f32.mxu1 %v18423_v23  ;;  %11450 = vmatprep.subr.mxu0 %v14442_v12 }
 0x11b   : > { %11492 = vmatprep.subr.mxu1 %v14408_v59  ;;  %11418 = vmatmul.mubr.f32.gmra.mxu1 %v14038_v47 }
 0x11c   : > { %11451 = vmatpush3.msra.mxu0 %v14442_v12  ;;  %11493 = vmatpush3.msra.mxu1 %v14408_v59 }
 0x11d   : > { %11452 = vmatprep.mubr.f32.mxu0 %v18436_v27  ;;  %11494 = vmatprep.subr.mxu1 %v14420_v32 }
 0x11e   : > { %11508 = vmatprep.subr.mxu0 %v14245_v58  ;;  %11453 = vmatmul.mubr.f32.vlgmr.msra.gmra.mxu0 %v13902_v45 }
 0x11f   : > { %11495 = vmatpush3.msra.mxu1 %v14420_v32  ;;  %11509 = vmatpush3.msra.mxu0 %v14245_v58 }
 0x120   : > { %11496 = vmatprep.mubr.f32.mxu1 %v18375_v36  ;;  %11510 = vmatprep.subr.mxu0 %v14263_v6 }
 0x121   : > { %11552 = vmatprep.subr.mxu1 %v14216_v63  ;;  %11497 = vmatmul.mubr.f32.vlgmr.msra.gmra.mxu1 %v18380_v4 }
 0x122   : > { %11511 = vmatpush3.msra.mxu0 %v14263_v6  ;;  %11553 = vmatpush3.msra.mxu1 %v14216_v63  ;;  %v18437_v6 = vld [vmem:[#allocation18_spill] sm:$0xff] }
 0x123   : > { %11512 = vmatprep.subr.mxu0 %v14283_v16  ;;  %11554 = vmatprep.subr.mxu1 %v14228_v37  ;;  %v14565_v45 = vpop.f32.mrf.mxu0 }
 0x124   : > { %11513 = vmatpush3.msra.mxu0 %v14283_v16  ;;  %11555 = vmatpush3.msra.mxu1 %v14228_v37 }
 0x125   : > { %11514 = vmatprep.subr.mxu0 %v14300_v50  ;;  %11556 = vmatprep.subr.mxu1 %v14247_v41  ;;  %v14571_v36 = vpop.f32.mrf.mxu0 }
 0x126   : > { %11515 = vmatpush3.msra.mxu0 %v14300_v50  ;;  %11557 = vmatpush3.msra.mxu1 %v14247_v41 }
 0x127   : > { %11516 = vmatprep.subr.mxu0 %v14316_v55  ;;  %11558 = vmatprep.subr.mxu1 %v14265_v2  ;;  %v612_v4 = vpop.f32.mrf.mxu0 }
 0x128   : > { %11517 = vmatpush3.msra.mxu0 %v14316_v55  ;;  %11559 = vmatpush3.msra.mxu1 %v14265_v2  ;;  %v18438_v2 = vld [vmem:[#allocation52_spill] sm:$0xff] }
 0x129   : > { %11518 = vmatprep.subr.mxu0 %v14335_v30  ;;  %11560 = vmatprep.subr.mxu1 %v14276_v3  ;;  %v14581_v44 = vpop.f32.mrf.mxu0 }
 0x12a   : > { %11519 = vmatpush3.msra.mxu0 %v14335_v30  ;;  %11561 = vmatpush3.msra.mxu1 %v14276_v3  ;;  %v18444_v30 = vld [vmem:[#allocation56_spill] sm:$0xff] }
 0x12b   : > { %11520 = vmatprep.subr.mxu0 %v14346_v52  ;;  %11562 = vmatprep.subr.mxu1 %v14294_v29 }
 0x12c   : > { %11521 = vmatpush3.msra.mxu0 %v14346_v52  ;;  %11563 = vmatpush3.msra.mxu1 %v14294_v29  ;;  %v18439_v29 = vld [vmem:[#allocation53_spill] sm:$0xff] }
 0x12d   : > { %11522 = vmatprep.subr.mxu0 %v14362_v25  ;;  %11564 = vmatprep.subr.mxu1 %v14308_v43  ;;  %v18445_v52 = vld [vmem:[#allocation61_spill] sm:$0xff] }
 0x12e   : > { %v14587_v63 = vpop.f32.mrf.mxu1  ;;  %v623_v37 = vpop.f32.mrf.mxu0  ;;  %11523 = vmatpush3.msra.mxu0 %v14362_v25  ;;  %11565 = vmatpush3.msra.mxu1 %v14308_v43 }
 0x12f   : > { %11524 = vmatprep.subr.mxu0 %v14377_v7  ;;  %11566 = vmatprep.subr.mxu1 %v14322_v9 }
 0x130   : > { %v14593_v58 = vpop.f32.mrf.mxu1  ;;  %v14597_v41 = vpop.f32.mrf.mxu0  ;;  %11525 = vmatpush3.msra.mxu0 %v14377_v7  ;;  %11567 = vmatpush3.msra.mxu1 %v14322_v9  ;;  %v18442_v9 = vld [vmem:[#allocation21_spill] sm:$0xff]  ;;  %v18447_v7 = vld [vmem:[#allocation22_spill] sm:$0xff] }
 0x131   : > { %11526 = vmatprep.subr.mxu0 %v18437_v6  ;;  %11568 = vmatprep.subr.mxu1 %v14337_v42 }
 0x132   : > { %11455 = vmatprep.mubr.f32.mxu0 %v18438_v2  ;;  %11527 = vmatpush3.msra.mxu0 %v18437_v6 }
 0x133   : > { %v634_v3 = vpop.f32.mrf.mxu0  ;;  %v917_v16 = vpop.f32.mrf.mxu1  ;;  %11569 = vmatpush3.msra.mxu1 %v14337_v42  ;;  %11456 = vmatmul.mubr.f32.gmra.mxu0 %v18439_v29 }
 0x134   : > { %v14607_v50 = vadd.f32 %v917_v16, %v612_v4  ;;  %11528 = vmatprep.subr.mxu0 %v18440_v61  ;;  %11570 = vmatprep.subr.mxu1 %v14348_v5 }
 0x135   : > { %v14611_v43 = vpop.f32.mrf.mxu0  ;;  %v14613_v55 = vpop.f32.mrf.mxu1  ;;  %11499 = vmatprep.mubr.f32.mxu1 %v18441_v40  ;;  %11529 = vmatpush3.msra.mxu0 %v18440_v61 }
 0x136   : > { %11571 = vmatpush3.msra.mxu1 %v14348_v5  ;;  %11530 = vmatprep.subr.mxu0 %v18442_v9 }
 0x137   : > { %11500 = vmatmul.mubr.f32.gmra.mxu1 %v18443_v34  ;;  %11572 = vmatprep.subr.mxu1 %v14358_v39 }
 0x138   : > { %11458 = vmatprep.mubr.f32.mxu0 %v18444_v30  ;;  %11531 = vmatpush3.msra.mxu0 %v18442_v9 }
 0x139   : > { %v645_v42 = vpop.f32.mrf.mxu0  ;;  %v924_v24 = vpop.f32.mrf.mxu1  ;;  %11573 = vmatpush3.msra.mxu1 %v14358_v39  ;;  %11459 = vmatmul.mubr.f32.gmra.mxu0 %v18445_v52  ;;  %v18448_v39 = vld [vmem:[#allocation63_spill] sm:$0xff] }
 0x13a   : > { %v14625_v21 = vadd.f32 %v924_v24, %v623_v37  ;;  %11532 = vmatprep.subr.mxu0 %v14428_v0  ;;  %11574 = vmatprep.subr.mxu1 %v14371_v28 }
 0x13b   : > { %v14629_v5 = vpop.f32.mrf.mxu0  ;;  %v14631_v25 = vpop.f32.mrf.mxu1  ;;  %11502 = vmatprep.mubr.f32.mxu1 %v18446_v8  ;;  %11533 = vmatpush3.msra.mxu0 %v14428_v0 }
 0x13c   : > { %11575 = vmatpush3.msra.mxu1 %v14371_v28  ;;  %11534 = vmatprep.subr.mxu0 %v18447_v7 }
 0x13d   : > { %11503 = vmatmul.mubr.f32.gmra.mxu1 %v18448_v39  ;;  %11576 = vmatprep.subr.mxu1 %v14382_v54 }
 0x13e   : > { %11461 = vmatprep.mubr.f32.mxu0 %v18449_v51  ;;  %11535 = vmatpush3.msra.mxu0 %v18447_v7 }
 0x13f   : > { %v656_v49 = vpop.f32.mrf.mxu0  ;;  %v931_v12 = vpop.f32.mrf.mxu1  ;;  %11577 = vmatpush3.msra.mxu1 %v14382_v54  ;;  %11462 = vmatmul.mubr.f32.gmra.mxu0 %v18450_v19  ;;  %v18452_v54 = vld [vmem:[#allocation16_spill] sm:$0xff] }
 0x140   : > { %v932_v62 = vadd.f32 %v931_v12, %v634_v3  ;;  %11536 = vmatprep.subr.mxu0 %v14449_v18  ;;  %11578 = vmatprep.subr.mxu1 %v14395_v56 }
 0x141   : > { %v14645_v0 = vpop.f32.mrf.mxu0  ;;  %v14647_v28 = vpop.f32.mrf.mxu1  ;;  %11505 = vmatprep.mubr.f32.mxu1 %v18451_v14  ;;  %11537 = vmatpush3.msra.mxu0 %v14449_v18 }
 0x142   : > { %11579 = vmatpush3.msra.mxu1 %v14395_v56  ;;  %11538 = vmatprep.subr.mxu0 %v14456_v35 }
 0x143   : > { %11506 = vmatmul.mubr.f32.gmra.mxu1 %v18452_v54  ;;  %11580 = vmatprep.subr.mxu1 %v14408_v59 }
 0x144   : > { %11539 = vmatpush3.msra.mxu0 %v14456_v35  ;;  %11540 = vmatprep.mubr.f32.mxu0 %v18416_v60 }
 0x145   : > { %v667_v53 = vpop.f32.mrf.mxu0  ;;  %v938_v22 = vpop.f32.mrf.mxu1  ;;  %11581 = vmatpush3.msra.mxu1 %v14408_v59  ;;  %11541 = vmatmul.mubr.f32.vlgmr.msra.gmra.mxu0 %v18417_v38 }
 0x146   : > { %v939_v48 = vadd.f32 %v938_v22, %v645_v42  ;;  %11582 = vmatprep.subr.mxu1 %v14420_v32  ;;  %11584 = vmatprep.mubr.f32.mxu1 %v18416_v60 }
 0x147   : > { %v14661_v56 = vpop.f32.mrf.mxu0  ;;  %v14663_v18 = vpop.f32.mrf.mxu1  ;;  %11583 = vmatpush3.msra.mxu1 %v14420_v32  ;;  %11543 = vmatprep.mubr.f32.mxu0 %v18419_v26 }
 0x148   : > { %11585 = vmatmul.mubr.f32.vlgmr.msra.gmra.mxu1 %v18417_v38 }
 0x149   : > { %11544 = vmatmul.mubr.f32.gmra.mxu0 %v18420_v13  ;;  %11587 = vmatprep.mubr.f32.mxu1 %v18419_v26 }
 0x14a   : > { %11546 = vmatprep.mubr.f32.mxu0 %v18421_v15 }
 0x14b   : > { %v678_v35 = vpop.f32.mrf.mxu0  ;;  %v945_v59 = vpop.f32.mrf.mxu1 }
 0x14c   : > { %v946_v33 = vadd.f32 %v945_v59, %v656_v49  ;;  %11588 = vmatmul.mubr.f32.gmra.mxu1 %v18420_v13 }
 0x14d   : > { %v14672_v60 = vpop.f32.mrf.mxu0  ;;  %v14674_v10 = vpop.f32.mrf.mxu1  ;;  %11547 = vmatmul.mubr.f32.gmra.mxu0 %v18422_v1  ;;  %11590 = vmatprep.mubr.f32.mxu1 %v18421_v15 }
 0x14e   : > { %11549 = vmatprep.mubr.f32.mxu0 %v18423_v23 }
 0x150   : > { %11591 = vmatmul.mubr.f32.gmra.mxu1 %v18422_v1 }
 0x151   : > { %v952_v38 = vpop.f32.mrf.mxu1  ;;  %v1096_v26 = vpop.f32.mrf.mxu0  ;;  %11550 = vmatmul.mubr.f32.gmra.mxu0 %v14038_v47  ;;  %11593 = vmatprep.mubr.f32.mxu1 %v18423_v23 }
 0x152   : > { %v953_v32 = vadd.f32 %v952_v38, %v667_v53 }
 0x153   : > { %v14682_v13 = vpop.f32.mrf.mxu1  ;;  %v14684_v20 = vpop.f32.mrf.mxu0 }
 0x154   : > { %11594 = vmatmul.mubr.f32.gmra.mxu1 %v14038_v47 }
 0x157   : > { %v959_v46 = vpop.f32.mrf.mxu1  ;;  %v1104_v31 = vpop.f32.mrf.mxu0 }
 0x158   : > { %v960_v15 = vadd.f32 %v959_v46, %v678_v35  ;;  %v1105_v11 = vadd.f32 %v1104_v31, %v14607_v50 }
 0x159   : > { %v14688_v17 = vpop.f32.mrf.mxu1  ;;  %v14690_v1 = vpop.f32.mrf.mxu0 }
 0x15d   : > { %v1112_v57 = vpop.f32.mrf.mxu0  ;;  %v1258_v27 = vpop.f32.mrf.mxu1 }
 0x15e   : > { %v1113_v23 = vadd.f32 %v1112_v57, %v14625_v21 }
 0x15f   : > { %v14693_v4 = vpop.f32.mrf.mxu0  ;;  %v14695_v37 = vpop.f32.mrf.mxu1 }
 0x163   : > { %v1120_v6 = vpop.f32.mrf.mxu0  ;;  %v1267_v2 = vpop.f32.mrf.mxu1 }
 0x164   : > { %v1121_v47 = vadd.f32 %v1120_v6, %v932_v62  ;;  %v14697_v3 = vadd.f32 %v1267_v2, %v1105_v11 }
 0x165   : > { %v14699_v16 = vpop.f32.mrf.mxu0  ;;  %v14701_v29 = vpop.f32.mrf.mxu1 }
 0x169   : > { %v1128_v50 = vpop.f32.mrf.mxu0  ;;  %v1276_v61 = vpop.f32.mrf.mxu1 }
 0x16a   : > { %v1129_v40 = vadd.f32 %v1128_v50, %v939_v48  ;;  %v14703_v9 = vadd.f32 %v1276_v61, %v1113_v23 }
 0x16b   : > { %v14705_v34 = vpop.f32.mrf.mxu0  ;;  %v14707_v30 = vpop.f32.mrf.mxu1 }
 0x16f   : > { %v1136_v42 = vpop.f32.mrf.mxu0  ;;  %v1285_v24 = vpop.f32.mrf.mxu1 }
 0x170   : > { %v1137_v52 = vadd.f32 %v1136_v42, %v946_v33  ;;  %v14709_v21 = vadd.f32 %v1285_v24, %v1121_v47 }
 0x171   : > { %v1138_v8 = vpop.f32.mrf.mxu0  ;;  %v14711_v7 = vpop.f32.mrf.mxu1 }
 0x175   : > { %v1144_v39 = vpop.f32.mrf.mxu0  ;;  %v1294_v51 = vpop.f32.mrf.mxu1 }
 0x176   : > { %v1145_v49 = vadd.f32 %v1144_v39, %v953_v32  ;;  %v14713_v12 = vadd.f32 %v1294_v51, %v1129_v40  ;;  %v911_v32 = vadd.f32 %v14587_v63, %v14565_v45 }
 0x177   : > { %v1146_v19 = vpop.f32.mrf.mxu0  ;;  %v14715_v62 = vpop.f32.mrf.mxu1 }
 0x178   : > { %v1097_v11 = vadd.f32 %v1096_v26, %v911_v32 }
 0x17b   : > { %v1152_v14 = vpop.f32.mrf.mxu0  ;;  %v1303_v54 = vpop.f32.mrf.mxu1 }
 0x17c   : > { %v1153_v53 = vadd.f32 %v1152_v14, %v960_v15  ;;  %v14717_v22 = vadd.f32 %v1303_v54, %v1137_v52  ;;  %v1259_v15 = vadd.f32 %v1258_v27, %v1097_v11 }
 0x17d   : > { %v14719_v48 = vpop.f32.mrf.mxu0  ;;  %v1305_v35 = vpop.f32.mrf.mxu1 }
 0x17e   : > { %18453 = vst [vmem:[#allocation23_spill] sm:$0xff] %v14717_v22 }
 0x181   : > { %v1312_v59 = vpop.f32.mrf.mxu1  ;;  %v1489_v33 = vpop.f32.mrf.mxu0 }
 0x182   : > { %v14721_v38 = vadd.f32 %v1312_v59, %v1145_v49  ;;  %v1490_v50 = vadd.f32 %v1489_v33, %v1259_v15 }
 0x183   : > { %v1314_v46 = vpop.f32.mrf.mxu1  ;;  %v14725_v31 = vpop.f32.mrf.mxu0 }
 0x184   : > { %18454 = vst [vmem:[#allocation24_spill] sm:$0xff] %v14721_v38 }
 0x185   : > { %v14727_v57 = vpop.f32.mrf.mxu0 }
 0x186   : > { %v1321_v23 = vpop.f32.mrf.mxu1 }
 0x187   : > { %v14729_v6 = vadd.f32 %v1321_v23, %v1153_v53  ;;  %v14731_v2 = vpop.f32.mrf.mxu0 }
 0x188   : > { %v1323_v47 = vpop.f32.mrf.mxu1 }
 0x189   : > { %18455 = vst [vmem:[#allocation28_spill] sm:$0xff] %v14729_v6  ;;  %v14733_v61 = vpop.f32.mrf.mxu0 }
 0x18a   : > { %v1642_v40 = vpop.f32.mrf.mxu1 }
 0x18b   : > { %v14735_v42 = vadd.f32 %v1642_v40, %v1490_v50  ;;  %v14737_v45 = vpop.f32.mrf.mxu0 }
 0x18c   : > { %v14739_v63 = vpop.f32.mrf.mxu1 }
 0x18d   : > { %18456 = vst [vmem:[#allocation29_spill] sm:$0xff] %v14735_v42  ;;  %v2671_v26 = vsel %vm2669_vm0, %v14735_v42, 0  ;;  %v14743_v27 = vpop.f32.mrf.mxu0 }
 0x18e   : > { %v14745_v24 = vand.u32 4294901760, %v2671_v26  ;;  %v14747_v52 = vpop.f32.mrf.mxu1 }
 0x18f   : > { %v1512_v39 = vpop.f32.mrf.mxu0 }
 0x190   : > { %18457 = vst [vmem:[#allocation15_spill] sm:$0xff] %v14745_v24  ;;  %v14750_v51 = vsub.f32 %v2671_v26, %v14745_v24  ;;  %v14752_v49 = vpop.f32.mrf.mxu1  ;;  %11640 = vmatprep.mubr.f32.mxu1 %v14745_v24  ;;  %v948_v24 = vadd.f32 %v14674_v10, %v14645_v0  ;;  %v962_v0 = vadd.f32 %v14688_v17, %v14672_v60 }
 0x191   : > { %v14755_v14 = vpop.f32.mrf.mxu0 }
 0x192   : > { %18458 = vst [vmem:[#allocation30_spill] sm:$0xff] %v14750_v51  ;;  %v14757_v54 = vpop.f32.mrf.mxu1  ;;  %v18106_v53 = vand.u32 4294901760, %v14750_v51 }
 0x193   : > { %v1519_v59 = vpop.f32.mrf.mxu0 }
 0x194   : > { %v1658_v33 = vpop.f32.mrf.mxu1  ;;  %v2794_v32 = vsub.f32 %v14750_v51, %v18106_v53  ;;  %v955_v53 = vadd.f32 %v14682_v13, %v14661_v56  ;;  %v1139_v51 = vadd.f32 %v1138_v8, %v948_v24 }
 0x195   : > { %v14763_v11 = vpop.f32.mrf.mxu0 }
 0x196   : > { %18459 = vst [vmem:[#allocation31_spill] sm:$0xff] %v14763_v11  ;;  %v14765_v23 = vpop.f32.mrf.mxu1  ;;  %v2795_v50 = vand.u32 4294901760, %v2794_v32  ;;  %v941_v32 = vadd.f32 %v14663_v18, %v14629_v5  ;;  %v1147_v22 = vadd.f32 %v1146_v19, %v955_v53  ;;  %v1155_v18 = vadd.f32 %v14719_v48, %v962_v0 }
 0x197   : > { %18460 = vst [vmem:[#allocation32_spill] sm:$0xff] %v14765_v23  ;;  %v1526_v15 = vpop.f32.mrf.mxu0 }
 0x198   : > { %v1665_v40 = vpop.f32.mrf.mxu1  ;;  %11612 = vmatprep.mubr.f32.mxu0 %v2795_v50  ;;  %v1306_v50 = vadd.f32 %v1305_v35, %v1139_v51  ;;  %v1131_v10 = vadd.f32 %v14705_v34, %v941_v32  ;;  %v1315_v56 = vadd.f32 %v1314_v46, %v1147_v22  ;;  %v1324_v22 = vadd.f32 %v1323_v47, %v1155_v18 }
 0x199   : > { %v14767_v26 = vpop.f32.mrf.mxu0  ;;  %v920_v47 = vadd.f32 %v14613_v55, %v14581_v44 }
 0x19a   : > { %18461 = vst [vmem:[#allocation34_spill] sm:$0xff] %v14767_v26  ;;  %v14769_v42 = vpop.f32.mrf.mxu1  ;;  %v934_v26 = vadd.f32 %v14647_v28, %v14611_v43  ;;  %v1527_v13 = vadd.f32 %v1526_v15, %v1306_v50  ;;  %v1297_v5 = vadd.f32 %v14715_v62, %v1131_v10  ;;  %v927_v28 = vadd.f32 %v14631_v25, %v14597_v41 }
 0x19b   : > { %18462 = vst [vmem:[#allocation35_spill] sm:$0xff] %v14769_v42  ;;  %v1533_v6 = vpop.f32.mrf.mxu0 }
 0x19c   : > { %v1672_v38 = vpop.f32.mrf.mxu1  ;;  %v1123_v8 = vadd.f32 %v14699_v16, %v934_v26  ;;  %v1534_v19 = vadd.f32 %v1533_v6, %v1315_v56  ;;  %v1520_v35 = vadd.f32 %v1519_v59, %v1297_v5  ;;  %v1115_v16 = vadd.f32 %v14693_v4, %v927_v28 }
 0x19d   : > { %v14781_v42 = vpop.f32.mrf.mxu0  ;;  %v1107_v26 = vadd.f32 %v14690_v1, %v920_v47 }
 0x19e   : > { %v14775_v11 = vpop.f32.mrf.mxu1  ;;  %v1288_v60 = vadd.f32 %v14711_v7, %v1123_v8  ;;  %v14801_v48 = vadd.f32 %v1672_v38, %v1520_v35  ;;  %v1279_v4 = vadd.f32 %v14707_v30, %v1115_v16  ;;  %v913_v38 = vadd.f32 %v14593_v58, %v14571_v36 }
 0x19f   : > { %v1540_v17 = vpop.f32.mrf.mxu0  ;;  %v1270_v36 = vadd.f32 %v14701_v29, %v1107_v26  ;;  %v1518_v16 = vadd.f32 %v14755_v14, %v14713_v12 }
 0x1a0   : > { %v1679_v23 = vpop.f32.mrf.mxu1  ;;  %v1513_v51 = vadd.f32 %v1512_v39, %v1288_v60  ;;  %v1541_v6 = vadd.f32 %v1540_v17, %v1324_v22  ;;  %v1506_v32 = vadd.f32 %v14737_v45, %v1279_v4  ;;  %v2707_v44 = vsel %vm2669_vm0, %v14801_v48, 0  ;;  %v18469_v4 = vld [vmem:[#allocation23_spill] sm:$0xff] }
 0x1a1   : > { %v14791_v43 = vadd.f32 %v1679_v23, %v1527_v13  ;;  %v14837_v1 = vand.u32 4294901760, %v2707_v44  ;;  %v1499_v29 = vadd.f32 %v14731_v2, %v1270_v36  ;;  %v18472_v36 = vld [vmem:[#allocation34_spill] sm:$0xff] }
 0x1a2   : > { %v14787_v24 = vpop.f32.mrf.mxu1  ;;  %v14812_v39 = vadd.f32 %v1665_v40, %v1513_v51  ;;  %v1099_v40 = vadd.f32 %v14684_v20, %v913_v38  ;;  %v14833_v58 = vadd.f32 %v1658_v33, %v1506_v32  ;;  %v18470_v38 = vld [vmem:[#allocation31_spill] sm:$0xff] }
 0x1a3   : > { %v2710_v53 = vsel %vm2669_vm0, %v14791_v43, 0  ;;  %v14858_v13 = vadd.f32 %v14752_v49, %v1499_v29  ;;  %v1504_v49 = vadd.f32 %v14733_v61, %v14703_v9  ;;  %v1525_v26 = vadd.f32 %v18470_v38, %v18469_v4 }
 0x1a4   : > { %v1686_v34 = vpop.f32.mrf.mxu1  ;;  %v14818_v23 = vand.u32 4294901760, %v2710_v53  ;;  %v2704_v50 = vsel %vm2669_vm0, %v14812_v39, 0  ;;  %v1261_v20 = vadd.f32 %v14695_v37, %v1099_v40  ;;  %v2701_v8 = vsel %vm2669_vm0, %v14833_v58, 0  ;;  %v18471_v40 = vld [vmem:[#allocation24_spill] sm:$0xff] }
 0x1a5   : > { %v14796_v46 = vadd.f32 %v1686_v34, %v1534_v19  ;;  %v14862_v5 = vand.u32 4294901760, %v2704_v50  ;;  %v14865_v37 = vsub.f32 %v2707_v44, %v14837_v1  ;;  %v2698_v34 = vsel %vm2669_vm0, %v14858_v13, 0 }
 0x1a6   : > { %v14799_v62 = vpop.f32.mrf.mxu1  ;;  %v14840_v45 = vsub.f32 %v2710_v53, %v14818_v23  ;;  %v1492_v56 = vadd.f32 %v14725_v31, %v1261_v20  ;;  %v1497_v31 = vadd.f32 %v14727_v57, %v14697_v3  ;;  %v14889_v22 = vadd.f32 %v14757_v54, %v1504_v49 }
 0x1a7   : > { %v2713_v41 = vsel %vm2669_vm0, %v14796_v46, 0  ;;  %v14891_v3 = vand.u32 4294901760, %v2701_v8  ;;  %v14894_v9 = vsub.f32 %v2704_v50, %v14862_v5  ;;  %v14906_v35 = vand.u32 4294901760, %v2698_v34 }
 0x1a8   : > { %v14807_v25 = vand.u32 4294901760, %v2713_v41  ;;  %v1693_v7 = vpop.f32.mrf.mxu1  ;;  %v14872_v19 = vand.u32 4294901760, %v14840_v45  ;;  %v14880_v28 = vadd.f32 %v14739_v63, %v1492_v56  ;;  %v14884_v17 = vadd.f32 %v14747_v52, %v1497_v31  ;;  %18464 = vst [vmem:[#allocation40_spill] sm:$0xff] %v14889_v22 }
 0x1a9   : > { %v14814_v59 = vadd.f32 %v1693_v7, %v1541_v6  ;;  %v14899_v63 = vand.u32 4294901760, %v14865_v37  ;;  %v1511_v52 = vadd.f32 %v14743_v27, %v14709_v21  ;;  %v2677_v21 = vsel %vm2669_vm0, %v14889_v22, 0  ;;  %v18465_v6 = vld [vmem:[#allocation32_spill] sm:$0xff] }
 0x1aa   : > { %v14821_v15 = vsub.f32 %v2713_v41, %v14807_v25  ;;  %18463 = vst [vmem:[#allocation37_spill] sm:$0xff] %v14884_v17  ;;  %v2905_v61 = vsub.f32 %v14840_v45, %v14872_v19  ;;  %v2695_v54 = vsel %vm2669_vm0, %v14880_v28, 0  ;;  %v2674_v51 = vsel %vm2669_vm0, %v14884_v17, 0  ;;  %v18467_v41 = vld [vmem:[#allocation35_spill] sm:$0xff] }
 0x1ab   : > { %v2716_v55 = vsel %vm2669_vm0, %v14814_v59, 0  ;;  %v14916_v27 = vsub.f32 %v2701_v8, %v14891_v3  ;;  %v14919_v53 = vadd.f32 %v18465_v6, %v1511_v52  ;;  %v14922_v7 = vadd.f32 %v18467_v41, %v1518_v16 }
 0x1ac   : > { %v14829_v30 = vand.u32 4294901760, %v2716_v55  ;;  %v14847_v10 = vand.u32 4294901760, %v14821_v15  ;;  %v2906_v47 = vand.u32 4294901760, %v2905_v61  ;;  %v2912_v12 = vsub.f32 %v14865_v37, %v14899_v63 }
 0x1ad   : > { %18466 = vst [vmem:[#allocation45_spill] sm:$0xff] %v14919_v53  ;;  %18468 = vst [vmem:[#allocation36_spill] sm:$0xff] %v14922_v7  ;;  %v14927_v14 = vand.u32 4294901760, %v14894_v9  ;;  %v14932_v32 = vand.u32 4294901760, %v2695_v54  ;;  %v14934_v44 = vand.u32 4294901760, %v2674_v51  ;;  %v1532_v50 = vadd.f32 %v18472_v36, %v18471_v40 }
 0x1ae   : > { %v14843_v0 = vsub.f32 %v2716_v55, %v14829_v30  ;;  %11596 = vmatprep.subr.mxu0 %v14829_v30  ;;  %v2898_v18 = vsub.f32 %v14821_v15, %v14847_v10  ;;  %v14937_v55 = vsub.f32 %v2698_v34, %v14906_v35  ;;  %v14942_v20 = vand.u32 4294901760, %v2677_v21 }
 0x1af   : > { %11597 = vmatpush3.xpose.msra.mxu0 %v14829_v30  ;;  %v2680_v29 = vsel %vm2669_vm0, %v14919_v53, 0  ;;  %v14947_v56 = vadd.f32 %v14775_v11, %v1525_v26  ;;  %v14950_v8 = vand.u32 4294901760, %v14916_v27  ;;  %v2913_v31 = vand.u32 4294901760, %v2912_v12 }
 0x1b0   : > { %11598 = vmatprep.subr.mxu0 %v14807_v25  ;;  %v14854_v33 = vand.u32 4294901760, %v14843_v0  ;;  %v2899_v57 = vand.u32 4294901760, %v2898_v18  ;;  %v14955_v18 = vadd.f32 %v14787_v24, %v1532_v50  ;;  %v2919_v49 = vsub.f32 %v14894_v9, %v14927_v14 }
 0x1b1   : > { %18473 = vst [vmem:[#allocation19_spill] sm:$0xff] %v14947_v56  ;;  %v14963_v11 = vsub.f32 %v2695_v54, %v14932_v32  ;;  %v14968_v61 = vand.u32 4294901760, %v2680_v29  ;;  %v14972_v24 = vsub.f32 %v2677_v21, %v14942_v20  ;;  %v2926_v6 = vsub.f32 %v14916_v27, %v14950_v8 }
 0x1b2   : > { %v2891_v2 = vsub.f32 %v14843_v0, %v14854_v33  ;;  %18474 = vst [vmem:[#allocation42_spill] sm:$0xff] %v14955_v18  ;;  %v2689_v54 = vsel %vm2669_vm0, %v14955_v18, 0  ;;  %v14986_v41 = vand.u32 4294901760, %v14937_v55 }
 0x1b3   : > { %11599 = vmatpush3.xpose.msra.mxu0 %v14807_v25  ;;  %v14999_v4 = vand.u32 4294901760, %v2689_v54  ;;  %v18111_v26 = vand.u32 4294901760, %v14972_v24  ;;  %v2927_v40 = vand.u32 4294901760, %v2926_v6  ;;  %v15007_v50 = vand.u32 4294901760, %v14963_v11 }
 0x1b4   : > { %11600 = vmatprep.subr.mxu0 %v14818_v23  ;;  %v2892_v60 = vand.u32 4294901760, %v2891_v2  ;;  %v2683_v2 = vsel %vm2669_vm0, %v14922_v7, 0  ;;  %v2933_v36 = vsub.f32 %v14937_v55, %v14986_v41  ;;  %v18482_v7 = vand.u32 4294901760, %v14972_v24 }
 0x1b5   : > { %v14974_v52 = vand.u32 4294901760, %v2683_v2 }
 0x1b6   : > { %11624 = vmatprep.subr.mxu1 %v2892_v60  ;;  %v2934_v6 = vand.u32 4294901760, %v2933_v36 }
 0x1b7   : > { %11601 = vmatpush3.xpose.msra.mxu0 %v14818_v23  ;;  %11625 = vmatpush3.xpose.msra.mxu1 %v2892_v60  ;;  %v18475_v60 = vld [vmem:[#allocation28_spill] sm:$0xff]  ;;  %v14997_v12 = vsub.f32 %v2683_v2, %v14974_v52 }
 0x1b8   : > { %11602 = vmatprep.subr.mxu0 %v14837_v1  ;;  %11626 = vmatprep.subr.mxu1 %v2899_v57  ;;  %v1539_v34 = vadd.f32 %v14781_v42, %v18475_v60  ;;  %v2686_v42 = vsel %vm2669_vm0, %v14947_v56, 0  ;;  %v15021_v60 = vsub.f32 %v2689_v54, %v14999_v4 }
 0x1b9   : > { %v18478_v56 = vand.u32 4294901760, %v14997_v12  ;;  %v15046_v53 = vpop.f32.mrf.mxu1  ;;  %v18484_v22 = vand.u32 4294901760, %v14997_v12 }
 0x1ba   : > { %v14979_v16 = vadd.f32 %v14799_v62, %v1539_v34  ;;  %v14993_v62 = vand.u32 4294901760, %v2686_v42  ;;  %v2814_v34 = vsub.f32 %v14972_v24, %v18111_v26  ;;  %v18116_v18 = vand.u32 4294901760, %v15021_v60 }
 0x1bb   : > { %11603 = vmatpush3.xpose.msra.mxu0 %v14837_v1  ;;  %11627 = vmatpush3.xpose.msra.mxu1 %v2899_v57  ;;  %v14966_v57 = vsub.f32 %v2674_v51, %v14934_v44  ;;  %v2920_v51 = vand.u32 4294901760, %v2919_v49 }
 0x1bc   : > { %11604 = vmatprep.subr.mxu0 %v14862_v5  ;;  %11628 = vmatprep.subr.mxu1 %v2906_v47  ;;  %18476 = vst [vmem:[#allocation25_spill] sm:$0xff] %v14979_v16  ;;  %v2692_v38 = vsel %vm2669_vm0, %v14979_v16, 0  ;;  %v15014_v2 = vsub.f32 %v2686_v42, %v14993_v62  ;;  %v2940_v42 = vsub.f32 %v14963_v11, %v15007_v50 }
 0x1bd   : > { %v18109_v21 = vand.u32 4294901760, %v14966_v57 }
 0x1be   : > { %v18117_v36 = vand.u32 4294901760, %v15014_v2 }
 0x1bf   : > { %11605 = vmatpush3.xpose.msra.mxu0 %v14862_v5  ;;  %11629 = vmatpush3.xpose.msra.mxu1 %v2906_v47  ;;  %v14991_v47 = vsub.f32 %v2680_v29, %v14968_v61  ;;  %v2804_v29 = vsub.f32 %v14966_v57, %v18109_v21  ;;  %v15030_v21 = vpop.f32.mrf.mxu0 }
 0x1c0   : > { %11606 = vmatprep.subr.mxu0 %v14891_v3  ;;  %11630 = vmatprep.subr.mxu1 %v2913_v31 }
 0x1c1   : > { %v2805_v16 = vand.u32 4294901760, %v2804_v29  ;;  %v18477_v54 = vand.u32 4294901760, %v14991_v47  ;;  %v2941_v29 = vand.u32 4294901760, %v2940_v42 }
 0x1c3   : > { %11607 = vmatpush3.xpose.msra.mxu0 %v14891_v3  ;;  %11631 = vmatpush3.xpose.msra.mxu1 %v2913_v31  ;;  %v15016_v31 = vand.u32 4294901760, %v2692_v38  ;;  %v2824_v26 = vsub.f32 %v14991_v47, %v18477_v54 }
 0x1c4   : > { %11608 = vmatprep.subr.mxu0 %v14906_v35  ;;  %11632 = vmatprep.subr.mxu1 %v2920_v51 }
 0x1c5   : > { %v15033_v49 = vsub.f32 %v2692_v38, %v15016_v31  ;;  %v15044_v38 = vpop.f32.mrf.mxu0  ;;  %v2825_v54 = vand.u32 4294901760, %v2824_v26 }
 0x1c7   : > { %11609 = vmatpush3.xpose.msra.mxu0 %v14906_v35  ;;  %11633 = vmatpush3.xpose.msra.mxu1 %v2920_v51  ;;  %v2815_v51 = vand.u32 4294901760, %v2814_v34  ;;  %v2844_v34 = vsub.f32 %v15014_v2, %v18117_v36 }
 0x1c8   : > { %11610 = vmatprep.subr.mxu0 %v14932_v32  ;;  %11634 = vmatprep.subr.mxu1 %v2927_v40 }
 0x1c9   : > { %v2845_v26 = vand.u32 4294901760, %v2844_v34  ;;  %v18479_v34 = vld [vmem:[#allocation30_spill] sm:$0xff] }
 0x1cb   : > { %11611 = vmatpush3.xpose.msra.mxu0 %v14932_v32  ;;  %11635 = vmatpush3.xpose.msra.mxu1 %v2927_v40  ;;  %v2834_v40 = vsub.f32 %v14997_v12, %v18478_v56  ;;  %v18115_v56 = vand.u32 4294901760, %v15033_v49 }
 0x1cc   : > { %11636 = vmatprep.subr.mxu1 %v2934_v6  ;;  %11652 = vmatprep.subr.mxu0 %v14843_v0 }
 0x1cd   : > { %v2864_v42 = vsub.f32 %v15033_v49, %v18115_v56 }
 0x1ce   : > { %11613 = vmatmul.mubr.f32.vlgmr.msra.gmra.mxu0 %v2805_v16  ;;  %v2835_v16 = vand.u32 4294901760, %v2834_v40 }
 0x1cf   : > { %11615 = vmatprep.mubr.f32.mxu0 %v2815_v51  ;;  %11637 = vmatpush3.xpose.msra.mxu1 %v2934_v6  ;;  %v2854_v51 = vsub.f32 %v15021_v60, %v18116_v18  ;;  %v15057_v6 = vpop.f32.mrf.mxu0 }
 0x1d0   : > { %11653 = vmatpush3.xpose.msra.mxu0 %v14843_v0  ;;  %11638 = vmatprep.subr.mxu1 %v2941_v29  ;;  %v15059_v0 = vpop.f32.mrf.mxu1 }
 0x1d1   : > { %11654 = vmatprep.subr.mxu0 %v14821_v15  ;;  %v2855_v40 = vand.u32 4294901760, %v2854_v51 }
 0x1d2   : > { %11616 = vmatmul.mubr.f32.gmra.mxu0 %v2825_v54  ;;  %v15071_v54 = vpop.f32.mrf.mxu1 }
 0x1d3   : > { %11618 = vmatprep.mubr.f32.mxu0 %v2835_v16  ;;  %11639 = vmatpush3.xpose.msra.mxu1 %v2941_v29  ;;  %v15069_v29 = vpop.f32.mrf.mxu0 }
 0x1d4   : > { %11655 = vmatpush3.xpose.msra.mxu0 %v14821_v15  ;;  %11680 = vmatprep.subr.mxu1 %v14829_v30  ;;  %v2865_v15 = vand.u32 4294901760, %v2864_v42  ;;  %v15082_v51 = vpop.f32.mrf.mxu1 }
 0x1d5   : > { %11656 = vmatprep.subr.mxu0 %v14840_v45  ;;  %v15080_v16 = vpop.f32.mrf.mxu0 }
 0x1d6   : > { %11619 = vmatmul.mubr.f32.gmra.mxu0 %v2845_v26  ;;  %11641 = vmatmul.mubr.f32.vlgmr.msra.gmra.mxu1 %v14934_v44  ;;  %v15092_v26 = vpop.f32.mrf.mxu1 }
 0x1d7   : > { %11621 = vmatprep.mubr.f32.mxu0 %v2855_v40  ;;  %11643 = vmatprep.mubr.f32.mxu1 %v14942_v20 }
 0x1d8   : > { %11657 = vmatpush3.xpose.msra.mxu0 %v14840_v45  ;;  %11681 = vmatpush3.xpose.msra.mxu1 %v14829_v30  ;;  %v15090_v45 = vpop.f32.mrf.mxu0  ;;  %v15103_v40 = vpop.f32.mrf.mxu1 }
 0x1d9   : > { %11658 = vmatprep.subr.mxu0 %v14865_v37  ;;  %11682 = vmatprep.subr.mxu1 %v14807_v25 }
 0x1da   : > { %11622 = vmatmul.mubr.f32.gmra.mxu0 %v2865_v15  ;;  %11644 = vmatmul.mubr.f32.gmra.mxu1 %v14968_v61  ;;  %v15101_v42 = vpop.f32.mrf.mxu0 }
 0x1db   : > { %11646 = vmatprep.mubr.f32.mxu1 %v14974_v52  ;;  %11668 = vmatprep.mubr.f32.mxu0 %v18479_v34  ;;  %v15111_v15 = vpop.f32.mrf.mxu1 }
 0x1dc   : > { %11659 = vmatpush3.xpose.msra.mxu0 %v14865_v37  ;;  %11683 = vmatpush3.xpose.msra.mxu1 %v14807_v25  ;;  %v18480_v37 = vand.u32 4294901760, %v18479_v34 }
 0x1dd   : > { %11660 = vmatprep.subr.mxu0 %v14894_v9  ;;  %11684 = vmatprep.subr.mxu1 %v14818_v23  ;;  %v15117_v34 = vpop.f32.mrf.mxu1 }
 0x1de   : > { %11647 = vmatmul.mubr.f32.gmra.mxu1 %v14993_v62 }
 0x1df   : > { %11649 = vmatprep.mubr.f32.mxu1 %v14999_v4 }
 0x1e0   : > { %11661 = vmatpush3.xpose.msra.mxu0 %v14894_v9  ;;  %11685 = vmatpush3.xpose.msra.mxu1 %v14818_v23  ;;  %v15109_v9 = vpop.f32.mrf.mxu0 }
 0x1e1   : > { %11662 = vmatprep.subr.mxu0 %v14916_v27  ;;  %11686 = vmatprep.subr.mxu1 %v14837_v1 }
 0x1e2   : > { %11650 = vmatmul.mubr.f32.gmra.mxu1 %v15016_v31 }
 0x1e3   : > { %11696 = vmatprep.mubr.f32.mxu1 %v18480_v37  ;;  %v15128_v37 = vpop.f32.mrf.mxu1 }
 0x1e4   : > { %11663 = vmatpush3.xpose.msra.mxu0 %v14916_v27  ;;  %11687 = vmatpush3.xpose.msra.mxu1 %v14837_v1  ;;  %v15119_v27 = vpop.f32.mrf.mxu0 }
 0x1e5   : > { %11664 = vmatprep.subr.mxu0 %v14937_v55  ;;  %11688 = vmatprep.subr.mxu1 %v14862_v5  ;;  %v15136_v56 = vpop.f32.mrf.mxu1 }
 0x1e8   : > { %11665 = vmatpush3.xpose.msra.mxu0 %v14937_v55  ;;  %11689 = vmatpush3.xpose.msra.mxu1 %v14862_v5  ;;  %v15126_v55 = vpop.f32.mrf.mxu0 }
 0x1e9   : > { %11666 = vmatprep.subr.mxu0 %v14963_v11  ;;  %11690 = vmatprep.subr.mxu1 %v14891_v3 }
 0x1ec   : > { %11667 = vmatpush3.xpose.msra.mxu0 %v14963_v11  ;;  %11691 = vmatpush3.xpose.msra.mxu1 %v14891_v3 }
 0x1ed   : > { %11692 = vmatprep.subr.mxu1 %v14906_v35  ;;  %11708 = vmatprep.subr.mxu0 %v14854_v33 }
 0x1ef   : > { %11669 = vmatmul.mubr.f32.vlgmr.msra.gmra.mxu0 %v14966_v57 }
 0x1f0   : > { %11671 = vmatprep.mubr.f32.mxu0 %v14972_v24  ;;  %11693 = vmatpush3.xpose.msra.mxu1 %v14906_v35 }
 0x1f1   : > { %11709 = vmatpush3.xpose.msra.mxu0 %v14854_v33  ;;  %11694 = vmatprep.subr.mxu1 %v14932_v32  ;;  %v18481_v33 = vand.u32 4294901760, %v14966_v57  ;;  %v18483_v57 = vand.u32 4294901760, %v14991_v47 }
 0x1f2   : > { %11710 = vmatprep.subr.mxu0 %v14847_v10 }
 0x1f3   : > { %11672 = vmatmul.mubr.f32.gmra.mxu0 %v14991_v47  ;;  %v11457_v11 = vpop.f32.mrf.mxu0 }
 0x1f4   : > { %11674 = vmatprep.mubr.f32.mxu0 %v14997_v12  ;;  %11695 = vmatpush3.xpose.msra.mxu1 %v14932_v32  ;;  %v18488_v12 = vand.u32 4294901760, %v15033_v49 }
 0x1f5   : > { %11711 = vmatpush3.xpose.msra.mxu0 %v14847_v10  ;;  %11736 = vmatprep.subr.mxu1 %v14829_v30  ;;  %v2164_v18 = vpop.f32.mrf.mxu0 }
 0x1f6   : > { %11712 = vmatprep.subr.mxu0 %v14872_v19 }
 0x1f7   : > { %11675 = vmatmul.mubr.f32.gmra.mxu0 %v15014_v2  ;;  %11697 = vmatmul.mubr.f32.vlgmr.msra.gmra.mxu1 %v18481_v33  ;;  %v11501_v36 = vpop.f32.mrf.mxu1 }
 0x1f8   : > { %11677 = vmatprep.mubr.f32.mxu0 %v15021_v60  ;;  %11699 = vmatprep.mubr.f32.mxu1 %v18482_v7  ;;  %v18485_v7 = vld [vmem:[#allocation15_spill] sm:$0xff] }
 0x1f9   : > { %11713 = vmatpush3.xpose.msra.mxu0 %v14872_v19  ;;  %11737 = vmatpush3.xpose.msra.mxu1 %v14829_v30  ;;  %v11460_v10 = vpop.f32.mrf.mxu0  ;;  %v2304_v17 = vpop.f32.mrf.mxu1  ;;  %v18486_v19 = vand.u32 4294901760, %v15014_v2 }
 0x1fa   : > { %11714 = vmatprep.subr.mxu0 %v14899_v63  ;;  %11738 = vmatprep.subr.mxu1 %v14807_v25 }
 0x1fb   : > { %11678 = vmatmul.mubr.f32.gmra.mxu0 %v15033_v49  ;;  %11700 = vmatmul.mubr.f32.gmra.mxu1 %v18483_v57  ;;  %v2178_v33 = vpop.f32.mrf.mxu0  ;;  %v18487_v57 = vand.u32 4294901760, %v15021_v60  ;;  %v2011_v60 = vadd.f32 %v15046_v53, %v15030_v21  ;;  %v2047_v49 = vadd.f32 %v15111_v15, %v15101_v42  ;;  %v2041_v53 = vadd.f32 %v15117_v34, %v15109_v9 }
 0x1fc   : > { %11702 = vmatprep.mubr.f32.mxu1 %v18484_v22  ;;  %11724 = vmatprep.mubr.f32.mxu0 %v18485_v7 }
 0x1fd   : > { %11715 = vmatpush3.xpose.msra.mxu0 %v14899_v63  ;;  %11739 = vmatpush3.xpose.msra.mxu1 %v14807_v25  ;;  %v11504_v30 = vpop.f32.mrf.mxu1  ;;  %v2023_v25 = vadd.f32 %v15071_v54, %v15057_v6  ;;  %v2035_v63 = vadd.f32 %v15092_v26, %v15080_v16  ;;  %v2158_v26 = vadd.f32 %v15119_v27, %v2011_v60 }
 0x1fe   : > { %11716 = vmatprep.subr.mxu0 %v14927_v14  ;;  %11740 = vmatprep.subr.mxu1 %v14818_v23 }
 0x1ff   : > { %11703 = vmatmul.mubr.f32.gmra.mxu1 %v18486_v19  ;;  %v11463_v24 = vpop.f32.mrf.mxu0  ;;  %v2320_v47 = vpop.f32.mrf.mxu1  ;;  %v2186_v16 = vadd.f32 %v11460_v10, %v2035_v63  ;;  %v2297_v27 = vadd.f32 %v15128_v37, %v2158_v26 }
 0x200   : > { %11705 = vmatprep.mubr.f32.mxu1 %v18487_v57 }
 0x201   : > { %11717 = vmatpush3.xpose.msra.mxu0 %v14927_v14  ;;  %11741 = vmatpush3.xpose.msra.mxu1 %v14818_v23  ;;  %v2192_v22 = vpop.f32.mrf.mxu0  ;;  %v2017_v23 = vadd.f32 %v15082_v51, %v15069_v29  ;;  %v2029_v14 = vadd.f32 %v15103_v40, %v15090_v45  ;;  %v2172_v29 = vadd.f32 %v11457_v11, %v2023_v25 }
 0x202   : > { %11718 = vmatprep.subr.mxu0 %v14950_v8  ;;  %11742 = vmatprep.subr.mxu1 %v14837_v1  ;;  %v2005_v45 = vadd.f32 %v15059_v0, %v15044_v38  ;;  %v2329_v15 = vadd.f32 %v11504_v30, %v2186_v16  ;;  %v2200_v38 = vadd.f32 %v11463_v24, %v2047_v49 }
 0x203   : > { %11706 = vmatmul.mubr.f32.gmra.mxu1 %v18488_v12  ;;  %v11507_v2 = vpop.f32.mrf.mxu1  ;;  %v2313_v42 = vadd.f32 %v11501_v36, %v2172_v29  ;;  %v2193_v10 = vadd.f32 %v2192_v22, %v2041_v53 }
 0x204   : > { %11752 = vmatprep.mubr.f32.mxu1 %v18485_v7  ;;  %v2345_v36 = vadd.f32 %v11507_v2, %v2200_v38 }
 0x205   : > { %11719 = vmatpush3.xpose.msra.mxu0 %v14950_v8  ;;  %11743 = vmatpush3.xpose.msra.mxu1 %v14837_v1  ;;  %v2336_v6 = vpop.f32.mrf.mxu1  ;;  %v11542_v54 = vpop.f32.mrf.mxu0  ;;  %v2165_v8 = vadd.f32 %v2164_v18, %v2017_v23  ;;  %v2179_v1 = vadd.f32 %v2178_v33, %v2029_v14  ;;  %v2151_v18 = vadd.f32 %v15126_v55, %v2005_v45 }
 0x206   : > { %11720 = vmatprep.subr.mxu0 %v14986_v41  ;;  %11744 = vmatprep.subr.mxu1 %v14862_v5  ;;  %v2337_v55 = vadd.f32 %v2336_v6, %v2193_v10  ;;  %v2470_v57 = vadd.f32 %v11542_v54, %v2297_v27 }
 0x207   : > { %v2463_v51 = vpop.f32.mrf.mxu0  ;;  %v2305_v9 = vadd.f32 %v2304_v17, %v2165_v8  ;;  %v2321_v34 = vadd.f32 %v2320_v47, %v2179_v1  ;;  %v2289_v17 = vadd.f32 %v15136_v56, %v2151_v18 }
 0x208   : > { %v11586_v21 = vpop.f32.mrf.mxu1 }
 0x209   : > { %11721 = vmatpush3.xpose.msra.mxu0 %v14986_v41  ;;  %11745 = vmatpush3.xpose.msra.mxu1 %v14862_v5  ;;  %v11545_v40 = vpop.f32.mrf.mxu0  ;;  %v2464_v23 = vadd.f32 %v2463_v51, %v2289_v17  ;;  %v15228_v49 = vadd.f32 %v11586_v21, %v2470_v57 }
 0x20a   : > { %11722 = vmatprep.subr.mxu0 %v15007_v50  ;;  %11746 = vmatprep.subr.mxu1 %v14891_v3  ;;  %v2592_v0 = vpop.f32.mrf.mxu1  ;;  %v2482_v33 = vadd.f32 %v11545_v40, %v2313_v42 }
 0x20b   : > { %v2475_v11 = vpop.f32.mrf.mxu0  ;;  %18495 = vst [vmem:[#allocation41_spill] sm:$0xff] %v15228_v49 }
 0x20c   : > { %v11589_v41 = vpop.f32.mrf.mxu1  ;;  %v2476_v24 = vadd.f32 %v2475_v11, %v2305_v9 }
 0x20d   : > { %11723 = vmatpush3.xpose.msra.mxu0 %v15007_v50  ;;  %11747 = vmatpush3.xpose.msra.mxu1 %v14891_v3  ;;  %v11548_v5 = vpop.f32.mrf.mxu0  ;;  %v15211_v22 = vadd.f32 %v11589_v41, %v2482_v33 }
 0x20e   : > { %11748 = vmatprep.subr.mxu1 %v14906_v35  ;;  %v2494_v7 = vadd.f32 %v11548_v5, %v2329_v15  ;;  %v2604_v30 = vpop.f32.mrf.mxu1 }
 0x20f   : > { %v2487_v19 = vpop.f32.mrf.mxu0  ;;  %18490 = vst [vmem:[#allocation26_spill] sm:$0xff] %v15211_v22  ;;  %v15231_v29 = vand.u32 4294901760, %v15211_v22 }
 0x210   : > { %11725 = vmatmul.mubr.f32.vlgmr.msra.gmra.mxu0 %v14934_v44  ;;  %v2488_v47 = vadd.f32 %v2487_v19, %v2321_v34  ;;  %v11592_v50 = vpop.f32.mrf.mxu1 }
 0x211   : > { %11727 = vmatprep.mubr.f32.mxu0 %v14942_v20  ;;  %11749 = vmatpush3.xpose.msra.mxu1 %v14906_v35  ;;  %v15208_v3 = vadd.f32 %v11592_v50, %v2494_v7  ;;  %v11551_v37 = vpop.f32.mrf.mxu0  ;;  %v15219_v35 = vadd.f32 %v2604_v30, %v2476_v24  ;;  %18496 = vst [vmem:[#allocation48_spill] sm:$0xff] %v15231_v29 }
 0x212   : > { %11750 = vmatprep.subr.mxu1 %v14932_v32  ;;  %v2506_v25 = vadd.f32 %v11551_v37, %v2345_v36  ;;  %v2616_v63 = vpop.f32.mrf.mxu1  ;;  %v15267_v40 = vsub.f32 %v15211_v22, %v15231_v29 }
 0x213   : > { %18489 = vst [vmem:[#allocation43_spill] sm:$0xff] %v15208_v3  ;;  %v15214_v56 = vand.u32 4294901760, %v15208_v3  ;;  %v15216_v12 = vadd.f32 %v2616_v63, %v2488_v47  ;;  %v2499_v2 = vpop.f32.mrf.mxu0  ;;  %18492 = vst [vmem:[#allocation27_spill] sm:$0xff] %v15219_v35  ;;  %v15247_v8 = vand.u32 4294901760, %v15219_v35 }
 0x214   : > { %11728 = vmatmul.mubr.f32.gmra.mxu0 %v14968_v61  ;;  %v2500_v14 = vadd.f32 %v2499_v2, %v2337_v55  ;;  %v11595_v60 = vpop.f32.mrf.mxu1  ;;  %18504 = vst [vmem:[#allocation60_spill] sm:$0xff] %v15267_v40  ;;  %v15308_v10 = vand.u32 4294901760, %v15267_v40 }
 0x215   : > { %18491 = vst [vmem:[#allocation46_spill] sm:$0xff] %v15216_v12  ;;  %11730 = vmatprep.mubr.f32.mxu0 %v14974_v52  ;;  %11751 = vmatpush3.xpose.msra.mxu1 %v14932_v32  ;;  %v15224_v6 = vand.u32 4294901760, %v15216_v12  ;;  %v15226_v54 = vadd.f32 %v11595_v60, %v2506_v25  ;;  %v15235_v16 = vsub.f32 %v15208_v3, %v15214_v56  ;;  %18500 = vst [vmem:[#allocation62_spill] sm:$0xff] %v15247_v8 }
 0x216   : > { %v2628_v51 = vpop.f32.mrf.mxu1  ;;  %v15244_v32 = vadd.f32 %v2592_v0, %v2464_v23  ;;  %v15288_v0 = vsub.f32 %v15219_v35, %v15247_v8  ;;  %18513 = vst [vmem:[#allocation20_spill] sm:$0xff] %v15308_v10  ;;  %v3877_v7 = vsub.f32 %v15267_v40, %v15308_v10 }
 0x217   : > { %18493 = vst [vmem:[#allocation47_spill] sm:$0xff] %v15224_v6  ;;  %18494 = vst [vmem:[#allocation38_spill] sm:$0xff] %v15226_v54  ;;  %v15238_v45 = vand.u32 4294901760, %v15226_v54  ;;  %v15240_v53 = vadd.f32 %v2628_v51, %v2500_v14  ;;  %v15251_v1 = vsub.f32 %v15216_v12, %v15224_v6  ;;  %v15271_v42 = vand.u32 4294901760, %v15235_v16 }
 0x218   : > { %18497 = vst [vmem:[#allocation49_spill] sm:$0xff] %v15235_v16  ;;  %11731 = vmatmul.mubr.f32.gmra.mxu0 %v14993_v62  ;;  %11753 = vmatmul.mubr.f32.vlgmr.msra.gmra.mxu1 %v14934_v44  ;;  %18499 = vst [vmem:[#allocation57_spill] sm:$0xff] %v15244_v32  ;;  %v15263_v44 = vand.u32 4294901760, %v15228_v49  ;;  %v15284_v38 = vand.u32 4294901760, %v15244_v32  ;;  %v15322_v36 = vand.u32 4294901760, %v15288_v0  ;;  %v3878_v55 = vand.u32 4294901760, %v3877_v7 }
 0x219   : > { %18498 = vst [vmem:[#allocation50_spill] sm:$0xff] %v15240_v53  ;;  %18501 = vst [vmem:[#allocation44_spill] sm:$0xff] %v15251_v1  ;;  %11733 = vmatprep.mubr.f32.mxu0 %v14999_v4  ;;  %11755 = vmatprep.mubr.f32.mxu1 %v14942_v20  ;;  %v15257_v21 = vsub.f32 %v15226_v54, %v15238_v45  ;;  %v15260_v26 = vand.u32 4294901760, %v15240_v53  ;;  %v15291_v11 = vand.u32 4294901760, %v15251_v1 }
 0x21a   : > { %18503 = vst [vmem:[#allocation58_spill] sm:$0xff] %v15263_v44  ;;  %11764 = vmatprep.subr.mxu0 %v15238_v45  ;;  %18505 = vst [vmem:[#allocation64_spill] sm:$0xff] %v15271_v42  ;;  %v3863_v34 = vsub.f32 %v15235_v16, %v15271_v42  ;;  %v15316_v5 = vsub.f32 %v15244_v32, %v15284_v38  ;;  %v3884_v19 = vsub.f32 %v15288_v0, %v15322_v36 }
 0x21b   : > { %18502 = vst [vmem:[#allocation51_spill] sm:$0xff] %v15257_v21  ;;  %v15275_v20 = vsub.f32 %v15240_v53, %v15260_v26  ;;  %11765 = vmatpush3.msra.mxu0 %v15238_v45  ;;  %v15279_v15 = vand.u32 4294901760, %v15257_v21  ;;  %18508 = vst [vmem:[#allocation17_spill] sm:$0xff] %v15284_v38  ;;  %v3870_v27 = vsub.f32 %v15251_v1, %v15291_v11 }
 0x21c   : > { %11734 = vmatmul.mubr.f32.gmra.mxu0 %v15016_v31  ;;  %11756 = vmatmul.mubr.f32.gmra.mxu1 %v14968_v61  ;;  %18509 = vst [vmem:[#allocation39_spill] sm:$0xff] %v15288_v0  ;;  %18510 = vst [vmem:[#allocation18_spill] sm:$0xff] %v15291_v11  ;;  %v15302_v61 = vsub.f32 %v15228_v49, %v15263_v44  ;;  %v15337_v17 = vand.u32 4294901760, %v15316_v5 }
 0x21d   : > { %18506 = vst [vmem:[#allocation67_spill] sm:$0xff] %v15275_v20  ;;  %18507 = vst [vmem:[#allocation33_spill] sm:$0xff] %v15279_v15  ;;  %11758 = vmatprep.mubr.f32.mxu1 %v14974_v52  ;;  %11766 = vmatprep.subr.mxu0 %v15260_v26  ;;  %v3849_v18 = vsub.f32 %v15257_v21, %v15279_v15  ;;  %v15298_v9 = vand.u32 4294901760, %v15275_v20 }
 0x21e   : > { %18512 = vst [vmem:[#allocation53_spill] sm:$0xff] %v15302_v61  ;;  %11767 = vmatpush3.msra.mxu0 %v15260_v26  ;;  %18514 = vst [vmem:[#allocation54_spill] sm:$0xff] %v15316_v5  ;;  %v15329_v30 = vand.u32 4294901760, %v15302_v61  ;;  %v3898_v47 = vsub.f32 %v15316_v5, %v15337_v17 }
 0x21f   : > { %18511 = vst [vmem:[#allocation52_spill] sm:$0xff] %v15298_v9  ;;  %11768 = vmatprep.subr.mxu0 %v15214_v56  ;;  %v3850_v52 = vand.u32 4294901760, %v3849_v18  ;;  %v3856_v41 = vsub.f32 %v15275_v20, %v15298_v9  ;;  %18515 = vst [vmem:[#allocation21_spill] sm:$0xff] %v15322_v36 }
 0x220   : > { %11759 = vmatmul.mubr.f32.gmra.mxu1 %v14993_v62  ;;  %11769 = vmatpush3.msra.mxu0 %v15214_v56  ;;  %v3864_v62 = vand.u32 4294901760, %v3863_v34  ;;  %18516 = vst [vmem:[#allocation55_spill] sm:$0xff] %v15329_v30  ;;  %18517 = vst [vmem:[#allocation56_spill] sm:$0xff] %v15337_v17  ;;  %v3891_v24 = vsub.f32 %v15302_v61, %v15329_v30  ;;  %v3899_v37 = vand.u32 4294901760, %v3898_v47 }
 0x221   : > { %11761 = vmatprep.mubr.f32.mxu1 %v14999_v4  ;;  %11792 = vmatprep.subr.mxu1 %v3850_v52  ;;  %v3857_v33 = vand.u32 4294901760, %v3856_v41  ;;  %v3871_v4 = vand.u32 4294901760, %v3870_v27 }
 0x222   : > { %11793 = vmatpush3.msra.mxu1 %v3850_v52  ;;  %11770 = vmatprep.subr.mxu0 %v15224_v6  ;;  %v3892_v50 = vand.u32 4294901760, %v3891_v24 }
 0x223   : > { %11794 = vmatprep.subr.mxu1 %v3857_v33  ;;  %11771 = vmatpush3.msra.mxu0 %v15224_v6 }
 0x224   : > { %11762 = vmatmul.mubr.f32.gmra.mxu1 %v15016_v31  ;;  %11772 = vmatprep.subr.mxu0 %v15231_v29  ;;  %v3885_v31 = vand.u32 4294901760, %v3884_v19 }
 0x225   : > { %11795 = vmatpush3.msra.mxu1 %v3857_v33  ;;  %11773 = vmatpush3.msra.mxu0 %v15231_v29 }
 0x226   : > { %11796 = vmatprep.subr.mxu1 %v3864_v62  ;;  %11774 = vmatprep.subr.mxu0 %v15247_v8 }
 0x227   : > { %11797 = vmatpush3.msra.mxu1 %v3864_v62  ;;  %11775 = vmatpush3.msra.mxu0 %v15247_v8 }
 0x228   : > { %11798 = vmatprep.subr.mxu1 %v3871_v4  ;;  %11776 = vmatprep.subr.mxu0 %v15263_v44 }
 0x229   : > { %11799 = vmatpush3.msra.mxu1 %v3871_v4  ;;  %11777 = vmatpush3.msra.mxu0 %v15263_v44 }
 0x22a   : > { %11800 = vmatprep.subr.mxu1 %v3878_v55  ;;  %11778 = vmatprep.subr.mxu0 %v15284_v38 }
 0x22b   : > { %11801 = vmatpush3.msra.mxu1 %v3878_v55  ;;  %11779 = vmatpush3.msra.mxu0 %v15284_v38 }
 0x22c   : > { %11802 = vmatprep.subr.mxu1 %v3885_v31  ;;  %11820 = vmatprep.subr.mxu0 %v15257_v21 }
 0x22d   : > { %11803 = vmatpush3.msra.mxu1 %v3885_v31 }
 0x22e   : > { %11804 = vmatprep.subr.mxu1 %v3892_v50 }
 0x22f   : > { %11805 = vmatpush3.msra.mxu1 %v3892_v50 }
 0x230   : > { %11806 = vmatprep.subr.mxu1 %v3899_v37 }
 0x231   : > { %11807 = vmatpush3.msra.mxu1 %v3899_v37 }
 0x232   : > { %11848 = vmatprep.subr.mxu1 %v15238_v45 }
 0x28e   : > { %v11614_v57 = vpop.f32.mrf.mxu0 }
 0x290   : > { %v2797_v25 = vpop.f32.mrf.mxu0 }
 0x292   : > { %v11617_v63 = vpop.f32.mrf.mxu0 }
 0x294   : > { %v2817_v23 = vpop.f32.mrf.mxu0 }
 0x296   : > { %v11642_v2 = vpop.f32.mrf.mxu1  ;;  %v11620_v60 = vpop.f32.mrf.mxu0 }
 0x297   : > { %v2985_v30 = vadd.f32 %v11642_v2, %v11614_v57 }
 0x298   : > { %v2978_v14 = vpop.f32.mrf.mxu1  ;;  %v2837_v18 = vpop.f32.mrf.mxu0 }
 0x299   : > { %v2979_v36 = vadd.f32 %v2978_v14, %v2797_v25 }
 0x29a   : > { %v11645_v51 = vpop.f32.mrf.mxu1  ;;  %v11623_v52 = vpop.f32.mrf.mxu0 }
 0x29b   : > { %v2997_v9 = vadd.f32 %v11645_v51, %v11617_v63 }
 0x29c   : > { %v2990_v34 = vpop.f32.mrf.mxu1  ;;  %v2857_v27 = vpop.f32.mrf.mxu0 }
 0x29d   : > { %v2991_v61 = vadd.f32 %v2990_v34, %v2817_v23 }
 0x29e   : > { %v11648_v41 = vpop.f32.mrf.mxu1 }
 0x29f   : > { %v3009_v21 = vadd.f32 %v11648_v41, %v11620_v60 }
 0x2a0   : > { %v3002_v33 = vpop.f32.mrf.mxu1 }
 0x2a1   : > { %v3003_v25 = vadd.f32 %v3002_v33, %v2837_v18 }
 0x2a2   : > { %v11651_v7 = vpop.f32.mrf.mxu1 }
 0x2a4   : > { %v3014_v19 = vpop.f32.mrf.mxu1 }
 0x2a5   : > { %v3015_v34 = vadd.f32 %v3014_v19, %v2857_v27 }
 0x2af   : > { %v11670_v62 = vpop.f32.mrf.mxu0 }
 0x2b0   : > { %v3116_v11 = vadd.f32 %v11670_v62, %v2985_v30 }
 0x2b1   : > { %v3108_v4 = vpop.f32.mrf.mxu0 }
 0x2b2   : > { %v3109_v42 = vadd.f32 %v3108_v4, %v2979_v36 }
 0x2b3   : > { %v11673_v55 = vpop.f32.mrf.mxu0 }
 0x2b4   : > { %v3130_v38 = vadd.f32 %v11673_v55, %v2997_v9  ;;  %v3021_v9 = vadd.f32 %v11651_v7, %v11623_v52 }
 0x2b5   : > { %v3122_v31 = vpop.f32.mrf.mxu0 }
 0x2b6   : > { %v3123_v16 = vadd.f32 %v3122_v31, %v2991_v61 }
 0x2b7   : > { %v11698_v24 = vpop.f32.mrf.mxu1  ;;  %v11676_v50 = vpop.f32.mrf.mxu0 }
 0x2b8   : > { %v3247_v0 = vadd.f32 %v11698_v24, %v3116_v11  ;;  %v3144_v63 = vadd.f32 %v11676_v50, %v3009_v21 }
 0x2b9   : > { %v3238_v47 = vpop.f32.mrf.mxu1  ;;  %v3136_v49 = vpop.f32.mrf.mxu0 }
 0x2ba   : > { %v3239_v40 = vadd.f32 %v3238_v47, %v3109_v42  ;;  %v3137_v23 = vadd.f32 %v3136_v49, %v3003_v25 }
 0x2bb   : > { %v11701_v37 = vpop.f32.mrf.mxu1  ;;  %v11679_v22 = vpop.f32.mrf.mxu0 }
 0x2bc   : > { %v3263_v29 = vadd.f32 %v11701_v37, %v3130_v38 }
 0x2bd   : > { %v3254_v32 = vpop.f32.mrf.mxu1  ;;  %v3150_v54 = vpop.f32.mrf.mxu0 }
 0x2be   : > { %v3255_v2 = vadd.f32 %v3254_v32, %v3123_v16  ;;  %v3158_v16 = vadd.f32 %v11679_v22, %v3021_v9  ;;  %v3151_v32 = vadd.f32 %v3150_v54, %v3015_v34 }
 0x2bf   : > { %v11704_v35 = vpop.f32.mrf.mxu1 }
 0x2c0   : > { %v3279_v62 = vadd.f32 %v11704_v35, %v3144_v63 }
 0x2c1   : > { %v3270_v12 = vpop.f32.mrf.mxu1 }
 0x2c3   : > { %v11707_v53 = vpop.f32.mrf.mxu1 }
 0x2c5   : > { %v3286_v15 = vpop.f32.mrf.mxu1 }
 0x2d0   : > { %v11726_v3 = vpop.f32.mrf.mxu0 }
 0x2d1   : > { %v3396_v8 = vadd.f32 %v11726_v3, %v3247_v0  ;;  %v3271_v0 = vadd.f32 %v3270_v12, %v3137_v23 }
 0x2d2   : > { %v3389_v17 = vpop.f32.mrf.mxu0 }
 0x2d3   : > { %v3390_v20 = vadd.f32 %v3389_v17, %v3239_v40 }
 0x2d4   : > { %v11729_v10 = vpop.f32.mrf.mxu0 }
 0x2d5   : > { %v3408_v14 = vadd.f32 %v11729_v10, %v3263_v29 }
 0x2d6   : > { %v3401_v5 = vpop.f32.mrf.mxu0 }
 0x2d7   : > { %v3402_v11 = vadd.f32 %v3401_v5, %v3255_v2 }
 0x2d8   : > { %v11732_v1 = vpop.f32.mrf.mxu0  ;;  %v11754_v44 = vpop.f32.mrf.mxu1 }
 0x2d9   : > { %v3517_v30 = vadd.f32 %v11754_v44, %v3396_v8  ;;  %v3420_v29 = vadd.f32 %v11732_v1, %v3279_v62  ;;  %v3295_v44 = vadd.f32 %v11707_v53, %v3158_v16 }
 0x2da   : > { %v3413_v6 = vpop.f32.mrf.mxu0  ;;  %v3510_v57 = vpop.f32.mrf.mxu1 }
 0x2db   : > { %v3511_v36 = vadd.f32 %v3510_v57, %v3390_v20  ;;  %v3557_v38 = vmul.f32 0.125, %v3517_v30  ;;  %v3414_v21 = vadd.f32 %v3413_v6, %v3271_v0  ;;  %v3287_v20 = vadd.f32 %v3286_v15, %v3151_v32 }
 0x2dc   : > { %v11757_v51 = vpop.f32.mrf.mxu1  ;;  %v11735_v61 = vpop.f32.mrf.mxu0 }
 0x2dd   : > { %v3556_v42 = vmul.f32 0.125, %v3511_v36  ;;  %v3529_v3 = vadd.f32 %v11757_v51, %v3408_v14  ;;  %v3567_v41 = vsel %vm2669_vm0, %v3557_v38, -inf  ;;  %v3432_v22 = vadd.f32 %v11735_v61, %v3295_v44 }
 0x2de   : > { %v3522_v40 = vpop.f32.mrf.mxu1  ;;  %v3425_v5 = vpop.f32.mrf.mxu0 }
 0x2df   : > { %v3523_v17 = vadd.f32 %v3522_v40, %v3402_v11  ;;  %v3564_v60 = vsel %vm2669_vm0, %v3556_v42, -inf  ;;  %v3559_v10 = vmul.f32 0.125, %v3529_v3  ;;  %v3426_v54 = vadd.f32 %v3425_v5, %v3287_v20 }
 0x2e0   : > { %v11760_v8 = vpop.f32.mrf.mxu1  ;;  %3565 = vmax.xlane.f32.xlu0 %v3564_v60 }
 0x2e1   : > { %v3558_v49 = vmul.f32 0.125, %v3523_v17  ;;  %v3541_v18 = vadd.f32 %v11760_v8, %v3420_v29  ;;  %v3573_v6 = vsel %vm2669_vm0, %v3559_v10, -inf }
 0x2e2   : > { %v3534_v35 = vpop.f32.mrf.mxu1 }
 0x2e3   : > { %v3535_v52 = vadd.f32 %v3534_v35, %v3414_v21  ;;  %v3570_v12 = vsel %vm2669_vm0, %v3558_v49, -inf  ;;  %v3561_v53 = vmul.f32 0.125, %v3541_v18 }
 0x2e4   : > { %v11763_v27 = vpop.f32.mrf.mxu1  ;;  %3571 = vmax.xlane.f32.xlu1 %v3570_v12  ;;  %3568 = vmax.xlane.f32.xlu0 %v3567_v41 }
 0x2e5   : > { %v3560_v33 = vmul.f32 0.125, %v3535_v52  ;;  %v3553_v15 = vadd.f32 %v11763_v27, %v3432_v22  ;;  %v3579_v24 = vsel %vm2669_vm0, %v3561_v53, -inf }
 0x2e6   : > { %v3546_v1 = vpop.f32.mrf.mxu1 }
 0x2e7   : > { %v3547_v7 = vadd.f32 %v3546_v1, %v3426_v54  ;;  %v3576_v4 = vsel %vm2669_vm0, %v3560_v33, -inf  ;;  %v3563_v55 = vmul.f32 0.125, %v3553_v15 }
 0x2e8   : > { %3574 = vmax.xlane.f32.xlu1 %v3573_v6  ;;  %3577 = vmax.xlane.f32.xlu0 %v3576_v4 }
 0x2e9   : > { %v3562_v19 = vmul.f32 0.125, %v3547_v7  ;;  %v3585_v47 = vsel %vm2669_vm0, %v3563_v55, -inf }
 0x2eb   : > { %v3582_v31 = vsel %vm2669_vm0, %v3562_v19, -inf }
 0x2ec   : > { %3580 = vmax.xlane.f32.xlu1 %v3579_v24  ;;  %3583 = vmax.xlane.f32.xlu0 %v3582_v31 }
 0x2f0   : > { %3586 = vmax.xlane.f32.xlu1 %v3585_v47 }
 0x369   : > { %v3566_v50 = vpop.xlane.xlu0 %3565 }
 0x36a   : > { %v3588_v37 = vsub.f32 %v3556_v42, %v3566_v50 }
 0x36c   : > { %v3596_v57 = vmul.f32 1.442695, %v3588_v37 }
 0x36d   : > { %v3572_v25 = vpop.xlane.xlu1 %3571  ;;  %v3569_v2 = vpop.xlane.xlu0 %3568 }
 0x36e   : > { %13104 = vpow2.f32 %v3596_v57  ;;  %v3590_v30 = vsub.f32 %v3558_v49, %v3572_v25  ;;  %v3589_v36 = vsub.f32 %v3557_v38, %v3569_v2 }
 0x370   : > { %v3600_v63 = vmul.f32 1.442695, %v3590_v30  ;;  %v3598_v14 = vmul.f32 1.442695, %v3589_v36 }
 0x371   : > { %v3575_v51 = vpop.xlane.xlu1 %3574  ;;  %v3578_v23 = vpop.xlane.xlu0 %3577 }
 0x372   : > { %13106 = vpow2.f32 %v3600_v63  ;;  %v3591_v11 = vsub.f32 %v3559_v10, %v3575_v51  ;;  %v3592_v9 = vsub.f32 %v3560_v33, %v3578_v23 }
 0x373   : > { %13108 = vpow2.f32 %v3598_v14 }
 0x374   : > { %v3602_v34 = vmul.f32 1.442695, %v3591_v11  ;;  %v3604_v62 = vmul.f32 1.442695, %v3592_v9 }
 0x375   : > { %v3581_v61 = vpop.xlane.xlu1 %3580  ;;  %v3584_v3 = vpop.xlane.xlu0 %3583 }
 0x376   : > { %13110 = vpow2.f32 %v3602_v34  ;;  %v3593_v42 = vsub.f32 %v3561_v53, %v3581_v61  ;;  %v3594_v40 = vsub.f32 %v3562_v19, %v3584_v3 }
 0x377   : > { %13112 = vpow2.f32 %v3604_v62 }
 0x378   : > { %v3606_v0 = vmul.f32 1.442695, %v3593_v42  ;;  %v3608_v17 = vmul.f32 1.442695, %v3594_v40 }
 0x379   : > { %v3587_v60 = vpop.xlane.xlu1 %3586 }
 0x37a   : > { %13114 = vpow2.f32 %v3606_v0  ;;  %v3595_v38 = vsub.f32 %v3563_v55, %v3587_v60 }
 0x37b   : > { %v13105_v16 = vpop.eup %13104  ;;  %13116 = vpow2.f32 %v3608_v17 }
 0x37c   : > { %v3610_v32 = vmul.f32 1.442695, %v3595_v38  ;;  %v3612_v8 = vsel %vm2669_vm0, %v13105_v16, 0.0 }
 0x37d   : > { %3613 = vadd.xlane.f32.xlu0 %v3612_v8 }
 0x37e   : > { %13118 = vpow2.f32 %v3610_v32 }
 0x37f   : > { %v13107_v29 = vpop.eup %13106 }
 0x380   : > { %v13109_v21 = vpop.eup %13108  ;;  %v3618_v49 = vsel %vm2669_vm0, %v13107_v29, 0.0 }
 0x381   : > { %v3615_v44 = vsel %vm2669_vm0, %v13109_v21, 0.0  ;;  %3619 = vadd.xlane.f32.xlu0 %v3618_v49 }
 0x382   : > { %3616 = vadd.xlane.f32.xlu1 %v3615_v44 }
 0x383   : > { %v15363_v20 = vpop.eup %13110 }
 0x384   : > { %v15365_v10 = vpop.eup %13112  ;;  %v3621_v5 = vsel %vm2669_vm0, %v15363_v20, 0.0 }
 0x385   : > { %v3624_v35 = vsel %vm2669_vm0, %v15365_v10, 0.0 }
 0x386   : > { %3622 = vadd.xlane.f32.xlu1 %v3621_v5  ;;  %3625 = vadd.xlane.f32.xlu0 %v3624_v35  ;;  %v18526_v5 = vld [vmem:[#allocation47_spill] sm:$0xff] }
 0x387   : > { %v15371_v18 = vpop.eup %13114 }
 0x388   : > { %v15373_v52 = vpop.eup %13116  ;;  %v3627_v12 = vsel %vm2669_vm0, %v15371_v18, 0.0 }
 0x389   : > { %v3630_v41 = vsel %vm2669_vm0, %v15373_v52, 0.0 }
 0x38a   : > { %3628 = vadd.xlane.f32.xlu1 %v3627_v12  ;;  %3631 = vadd.xlane.f32.xlu0 %v3630_v41 }
 0x38b   : > { %v15379_v27 = vpop.eup %13118 }
 0x38c   : > { %v3633_v22 = vsel %vm2669_vm0, %v15379_v27, 0.0 }
 0x38e   : > { %3634 = vadd.xlane.f32.xlu1 %v3633_v22 }
 0x39f   : > { %5412 = vrot.lane.b32.xlu1 %v14796_v46, %s13337_s17  ;;  %v18518_v46 = vld [vmem:[#allocation29_spill] sm:$0xff] }
 0x3a0   : > { %5414 = vrot.lane.b32.xlu0 %v14814_v59, %s13337_s17  ;;  %v18522_v59 = vld [vmem:[#allocation45_spill] sm:$0xff] }
 0x3a3   : > { %5410 = vrot.lane.b32.xlu1 %v14791_v43, %s13337_s17  ;;  %v18519_v43 = vld [vmem:[#allocation40_spill] sm:$0xff] }
 0x3a4   : > { %5406 = vrot.lane.b32.xlu0 %v14812_v39, %s13337_s17  ;;  %v18520_v39 = vld [vmem:[#allocation37_spill] sm:$0xff] }
 0x3a7   : > { %5408 = vrot.lane.b32.xlu1 %v14801_v48, %s13337_s17  ;;  %v18521_v48 = vld [vmem:[#allocation36_spill] sm:$0xff] }
 0x3a8   : > { %5402 = vrot.lane.b32.xlu0 %v14858_v13, %s13337_s17  ;;  %v18524_v13 = vld [vmem:[#allocation19_spill] sm:$0xff] }
 0x3ab   : > { %5404 = vrot.lane.b32.xlu1 %v14833_v58, %s13337_s17  ;;  %v18523_v58 = vld [vmem:[#allocation42_spill] sm:$0xff] }
 0x3ac   : > { %5384 = vrot.lane.b32.xlu0 %v18518_v46, %s13337_s17  ;;  %v18527_v46 = vld [vmem:[#allocation48_spill] sm:$0xff] }
 0x3af   : > { %5400 = vrot.lane.b32.xlu1 %v14880_v28, %s13337_s17  ;;  %v18525_v28 = vld [vmem:[#allocation25_spill] sm:$0xff] }
 0x3b0   : > { %5388 = vrot.lane.b32.xlu0 %v18519_v43, %s13337_s17 }
 0x3b3   : > { %5386 = vrot.lane.b32.xlu1 %v18520_v39, %s13337_s17 }
 0x3b4   : > { %5392 = vrot.lane.b32.xlu0 %v18521_v48, %s13337_s17  ;;  %v18528_v48 = vld [vmem:[#allocation51_spill] sm:$0xff] }
 0x3b7   : > { %5390 = vrot.lane.b32.xlu1 %v18522_v59, %s13337_s17 }
 0x3b8   : > { %5396 = vrot.lane.b32.xlu0 %v18523_v58, %s13337_s17 }
 0x3bb   : > { %5394 = vrot.lane.b32.xlu1 %v18524_v13, %s13337_s17 }
 0x3bf   : > { %5398 = vrot.lane.b32.xlu1 %v18525_v28, %s13337_s17  ;;  %v18529_v28 = vld [vmem:[#allocation67_spill] sm:$0xff] }
 0x406   : > { %v3614_v54 = vpop.xlane.xlu0 %3613 }
 0x407   : > { %13120 = vrcp.f32 %v3614_v54 }
 0x40a   : > { %v3620_v33 = vpop.xlane.xlu0 %3619 }
 0x40b   : > { %v3617_v1 = vpop.xlane.xlu1 %3616  ;;  %13122 = vrcp.f32 %v3620_v33  ;;  %v18530_v33 = vld [vmem:[#allocation62_spill] sm:$0xff] }
 0x40c   : > { %13124 = vrcp.f32 %v3617_v1 }
 0x40f   : > { %v3623_v6 = vpop.xlane.xlu1 %3622  ;;  %v3626_v53 = vpop.xlane.xlu0 %3625 }
 0x410   : > { %13126 = vrcp.f32 %v3623_v6 }
 0x411   : > { %13128 = vrcp.f32 %v3626_v53  ;;  %v18531_v53 = vld [vmem:[#allocation49_spill] sm:$0xff] }
 0x413   : > { %v3629_v15 = vpop.xlane.xlu1 %3628  ;;  %v3632_v7 = vpop.xlane.xlu0 %3631 }
 0x414   : > { %v13121_v4 = vpop.eup %13120  ;;  %13130 = vrcp.f32 %v3629_v15 }
 0x415   : > { %13132 = vrcp.f32 %v3632_v7  ;;  %v3637_v19 = vmul.f32 %v13121_v4, %v13105_v16  ;;  %v18532_v7 = vld [vmem:[#allocation58_spill] sm:$0xff] }
 0x417   : > { %v3635_v55 = vpop.xlane.xlu1 %3634  ;;  %v3653_v24 = vsel %vm2669_vm0, %v3637_v19, 0 }
 0x418   : > { %v13123_v31 = vpop.eup %13122  ;;  %13134 = vrcp.f32 %v3635_v55  ;;  %v15416_v47 = vand.u32 4294901760, %v3653_v24 }
 0x419   : > { %v13125_v50 = vpop.eup %13124  ;;  %v3641_v37 = vmul.f32 %v13123_v31, %v13107_v29 }
 0x41a   : > { %v3639_v57 = vmul.f32 %v13125_v50, %v13109_v21  ;;  %11808 = vmatprep.mubr.f32.mxu1 %v15416_v47  ;;  %v15420_v25 = vsub.f32 %v3653_v24, %v15416_v47  ;;  %v18533_v50 = vld [vmem:[#allocation44_spill] sm:$0xff] }
 0x41b   : > { %v3659_v2 = vsel %vm2669_vm0, %v3641_v37, 0 }
 0x41c   : > { %v3656_v30 = vsel %vm2669_vm0, %v3639_v57, 0  ;;  %v15424_v36 = vand.u32 4294901760, %v3659_v2  ;;  %v3751_v51 = vand.u32 4294901760, %v15420_v25  ;;  %v18534_v57 = vld [vmem:[#allocation17_spill] sm:$0xff] }
 0x41d   : > { %v13127_v63 = vpop.eup %13126  ;;  %v15426_v14 = vand.u32 4294901760, %v3656_v30 }
 0x41e   : > { %v13129_v23 = vpop.eup %13128  ;;  %v3643_v11 = vmul.f32 %v13127_v63, %v15363_v20  ;;  %v15431_v9 = vsub.f32 %v3659_v2, %v15424_v36  ;;  %v3752_v62 = vsub.f32 %v15420_v25, %v3751_v51 }
 0x41f   : > { %v15434_v34 = vsub.f32 %v3656_v30, %v15426_v14  ;;  %11809 = vmatmul.mubr.f32.vlgmr.msra.gmra.mxu1 %v15426_v14  ;;  %v3645_v3 = vmul.f32 %v13129_v23, %v15365_v10  ;;  %v18535_v23 = vld [vmem:[#allocation60_spill] sm:$0xff] }
 0x420   : > { %11849 = vmatpush3.msra.mxu1 %v15238_v45  ;;  %11811 = vmatprep.mubr.f32.mxu1 %v15424_v36  ;;  %v3662_v61 = vsel %vm2669_vm0, %v3643_v11, 0  ;;  %v3753_v40 = vand.u32 4294901760, %v3752_v62  ;;  %v3771_v32 = vand.u32 4294901760, %v15431_v9  ;;  %v18536_v62 = vld [vmem:[#allocation39_spill] sm:$0xff] }
 0x421   : > { %v13131_v42 = vpop.eup %13130  ;;  %11850 = vmatprep.subr.mxu1 %v15260_v26  ;;  %v15445_v0 = vand.u32 4294901760, %v3662_v61  ;;  %v3665_v60 = vsel %vm2669_vm0, %v3645_v3, 0  ;;  %v3761_v38 = vand.u32 4294901760, %v15434_v34  ;;  %v18544_v3 = vld [vmem:[#allocation21_spill] sm:$0xff] }
 0x422   : > { %v13133_v17 = vpop.eup %13132  ;;  %11851 = vmatpush3.msra.mxu1 %v15260_v26  ;;  %v3647_v16 = vmul.f32 %v13131_v42, %v15371_v18  ;;  %11780 = vmatprep.mubr.f32.mxu0 %v3753_v40  ;;  %v15453_v8 = vand.u32 4294901760, %v3665_v60  ;;  %v3772_v10 = vsub.f32 %v15431_v9, %v3771_v32  ;;  %v18545_v42 = vld [vmem:[#allocation55_spill] sm:$0xff]  ;;  %v18546_v40 = vld [vmem:[#allocation56_spill] sm:$0xff] }
 0x423   : > { %11852 = vmatprep.subr.mxu1 %v15214_v56  ;;  %v3649_v29 = vmul.f32 %v13133_v17, %v15373_v52  ;;  %11812 = vmatmul.mubr.f32.gmra.mxu1 %v15445_v0  ;;  %v3762_v21 = vsub.f32 %v15434_v34, %v3761_v38  ;;  %v15471_v52 = vsub.f32 %v3662_v61, %v15445_v0  ;;  %v18537_v61 = vld [vmem:[#allocation53_spill] sm:$0xff] }
 0x424   : > { %v3668_v49 = vsel %vm2669_vm0, %v3647_v16, 0  ;;  %11853 = vmatpush3.msra.mxu1 %v15214_v56  ;;  %11814 = vmatprep.mubr.f32.mxu1 %v15453_v8  ;;  %v3773_v41 = vand.u32 4294901760, %v3772_v10  ;;  %v15487_v58 = vsub.f32 %v3665_v60, %v15453_v8  ;;  %v2644_v17 = vld [vmem:[#allocation5 + $0x30] sm:$0xff] }
 0x425   : > { %v13135_v44 = vpop.eup %13134  ;;  %v15463_v20 = vand.u32 4294901760, %v3668_v49  ;;  %11854 = vmatprep.subr.mxu1 %v18526_v5  ;;  %v3763_v35 = vand.u32 4294901760, %v3762_v21  ;;  %v3671_v18 = vsel %vm2669_vm0, %v3649_v29, 0  ;;  %v3781_v43 = vand.u32 4294901760, %v15471_v52 }
 0x426   : > { %v3651_v12 = vmul.f32 %v13135_v44, %v15379_v27  ;;  %11855 = vmatpush3.msra.mxu1 %v18526_v5  ;;  %v15475_v22 = vand.u32 4294901760, %v3671_v18  ;;  %v3791_v6 = vand.u32 4294901760, %v15487_v58  ;;  %v15595_v60 = vand.u32 4294901760, %v2644_v17 }
 0x427   : > { %11856 = vmatprep.subr.mxu1 %v18527_v46  ;;  %11781 = vmatmul.mubr.f32.vlgmr.msra.gmra.mxu0 %v3763_v35  ;;  %v3782_v27 = vsub.f32 %v15471_v52, %v3781_v43  ;;  %v15490_v13 = vsub.f32 %v3668_v49, %v15463_v20 }
 0x428   : > { %v3674_v39 = vsel %vm2669_vm0, %v3651_v12, 0  ;;  %11815 = vmatmul.mubr.f32.gmra.mxu1 %v15463_v20  ;;  %11821 = vmatpush3.msra.mxu0 %v18528_v48  ;;  %v15495_v54 = vsub.f32 %v3671_v18, %v15475_v22  ;;  %v3792_v4 = vsub.f32 %v15487_v58, %v3791_v6  ;;  %v15603_v16 = vsub.f32 %v2644_v17, %v15595_v60  ;;  %v2640_v12 = vld [vmem:[#allocation5 + $0x10] sm:$0xff]  ;;  %v2639_v48 = vld [vmem:[#allocation5 + $0x8] sm:$0xff] }
 0x429   : > { %11857 = vmatpush3.msra.mxu1 %v18527_v46  ;;  %11783 = vmatprep.mubr.f32.mxu0 %v3773_v41  ;;  %v15484_v59 = vand.u32 4294901760, %v3674_v39  ;;  %v3783_v1 = vand.u32 4294901760, %v3782_v27  ;;  %v3801_v15 = vand.u32 4294901760, %v15490_v13 }
 0x42a   : > { %11817 = vmatprep.mubr.f32.mxu1 %v15475_v22  ;;  %11822 = vmatprep.subr.mxu0 %v18529_v28  ;;  %v3811_v19 = vand.u32 4294901760, %v15495_v54  ;;  %v3793_v31 = vand.u32 4294901760, %v3792_v4  ;;  %v15612_v21 = vand.u32 4294901760, %v15603_v16 }
 0x42b   : > { %11858 = vmatprep.subr.mxu1 %v18530_v33  ;;  %11823 = vmatpush3.msra.mxu0 %v18529_v28  ;;  %v15507_v55 = vsub.f32 %v3674_v39, %v15484_v59  ;;  %v3802_v24 = vsub.f32 %v15490_v13, %v3801_v15 }
 0x42c   : > { %11859 = vmatpush3.msra.mxu1 %v18530_v33  ;;  %11824 = vmatprep.subr.mxu0 %v18531_v53  ;;  %v3812_v37 = vsub.f32 %v15495_v54, %v3811_v19  ;;  %18548 = vst [vmem:[#allocation59_spill] sm:$0xff] %v15612_v21 }
 0x42d   : > { %11860 = vmatprep.subr.mxu1 %v18532_v7  ;;  %11784 = vmatmul.mubr.f32.gmra.mxu0 %v3783_v1  ;;  %v3803_v2 = vand.u32 4294901760, %v3802_v24  ;;  %v3821_v63 = vand.u32 4294901760, %v15507_v55 }
 0x42e   : > { %11818 = vmatmul.mubr.f32.gmra.mxu1 %v15484_v59  ;;  %11825 = vmatpush3.msra.mxu0 %v18531_v53  ;;  %v3813_v30 = vand.u32 4294901760, %v3812_v37 }
 0x42f   : > { %11861 = vmatpush3.msra.mxu1 %v18532_v7  ;;  %11826 = vmatprep.subr.mxu0 %v18533_v50  ;;  %v3822_v11 = vsub.f32 %v15507_v55, %v3821_v63 }
 0x430   : > { %11862 = vmatprep.subr.mxu1 %v18534_v57  ;;  %11864 = vmatprep.mubr.f32.mxu1 %v3751_v51 }
 0x431   : > { %11786 = vmatprep.mubr.f32.mxu0 %v3793_v31  ;;  %11827 = vmatpush3.msra.mxu0 %v18533_v50  ;;  %v3823_v51 = vand.u32 4294901760, %v3822_v11 }
 0x432   : > { %11863 = vmatpush3.msra.mxu1 %v18534_v57  ;;  %11828 = vmatprep.subr.mxu0 %v18535_v23 }
 0x433   : > { %11904 = vmatprep.subr.mxu1 %v15238_v45  ;;  %11787 = vmatmul.mubr.f32.gmra.mxu0 %v3803_v2 }
 0x434   : > { %11829 = vmatpush3.msra.mxu0 %v18535_v23  ;;  %11865 = vmatmul.mubr.f32.vlgmr.msra.gmra.mxu1 %v3761_v38 }
 0x435   : > { %11905 = vmatpush3.msra.mxu1 %v15238_v45  ;;  %11789 = vmatprep.mubr.f32.mxu0 %v3813_v30  ;;  %v18538_v45 = vld [vmem:[#allocation54_spill] sm:$0xff] }
 0x436   : > { %11830 = vmatprep.subr.mxu0 %v18536_v62  ;;  %11867 = vmatprep.mubr.f32.mxu1 %v3771_v32 }
 0x437   : > { %11906 = vmatprep.subr.mxu1 %v15260_v26  ;;  %11831 = vmatpush3.msra.mxu0 %v18536_v62 }
 0x438   : > { %11907 = vmatpush3.msra.mxu1 %v15260_v26  ;;  %11832 = vmatprep.subr.mxu0 %v18537_v61  ;;  %v18539_v26 = vld [vmem:[#allocation33_spill] sm:$0xff] }
 0x439   : > { %11908 = vmatprep.subr.mxu1 %v15214_v56  ;;  %11790 = vmatmul.mubr.f32.gmra.mxu0 %v3823_v51 }
 0x43a   : > { %11833 = vmatpush3.msra.mxu0 %v18537_v61  ;;  %11868 = vmatmul.mubr.f32.gmra.mxu1 %v3781_v43  ;;  %v15638_v43 = vand.u32 4294901760, %v2640_v12 }
 0x43b   : > { %11909 = vmatpush3.msra.mxu1 %v15214_v56  ;;  %11834 = vmatprep.subr.mxu0 %v18538_v45  ;;  %v18540_v56 = vld [vmem:[#allocation52_spill] sm:$0xff] }
 0x43c   : > { %11836 = vmatprep.mubr.f32.mxu0 %v15420_v25  ;;  %11870 = vmatprep.mubr.f32.mxu1 %v3791_v6  ;;  %v18541_v25 = vld [vmem:[#allocation64_spill] sm:$0xff] }
 0x43d   : > { %11910 = vmatprep.subr.mxu1 %v18526_v5  ;;  %11835 = vmatpush3.msra.mxu0 %v18538_v45 }
 0x43e   : > { %11911 = vmatpush3.msra.mxu1 %v18526_v5  ;;  %11876 = vmatprep.subr.mxu0 %v18539_v26  ;;  %v4718_v5 = vsub.f32 %v15603_v16, %v15612_v21 }
 0x43f   : > { %11912 = vmatprep.subr.mxu1 %v18527_v46  ;;  %11837 = vmatmul.mubr.f32.vlgmr.msra.gmra.mxu0 %v15434_v34  ;;  %v18543_v34 = vld [vmem:[#allocation20_spill] sm:$0xff] }
 0x440   : > { %11871 = vmatmul.mubr.f32.gmra.mxu1 %v3801_v15  ;;  %11877 = vmatpush3.msra.mxu0 %v18539_v26  ;;  %v4719_v41 = vand.u32 4294901760, %v4718_v5 }
 0x441   : > { %11913 = vmatpush3.msra.mxu1 %v18527_v46  ;;  %11839 = vmatprep.mubr.f32.mxu0 %v15431_v9  ;;  %v18542_v9 = vld [vmem:[#allocation18_spill] sm:$0xff] }
 0x442   : > { %11873 = vmatprep.mubr.f32.mxu1 %v3811_v19  ;;  %11878 = vmatprep.subr.mxu0 %v18540_v56 }
 0x443   : > { %11914 = vmatprep.subr.mxu1 %v18530_v33  ;;  %11879 = vmatpush3.msra.mxu0 %v18540_v56 }
 0x444   : > { %11915 = vmatpush3.msra.mxu1 %v18530_v33  ;;  %11880 = vmatprep.subr.mxu0 %v18541_v25 }
 0x445   : > { %11916 = vmatprep.subr.mxu1 %v18532_v7  ;;  %11840 = vmatmul.mubr.f32.gmra.mxu0 %v15471_v52 }
 0x446   : > { %11874 = vmatmul.mubr.f32.gmra.mxu1 %v3821_v63  ;;  %11881 = vmatpush3.msra.mxu0 %v18541_v25 }
 0x447   : > { %11917 = vmatpush3.msra.mxu1 %v18532_v7  ;;  %11842 = vmatprep.mubr.f32.mxu0 %v15487_v58  ;;  %v15647_v58 = vsub.f32 %v2640_v12, %v15638_v43 }
 0x448   : > { %11882 = vmatprep.subr.mxu0 %v18542_v9  ;;  %11918 = vmatprep.subr.mxu1 %v18534_v57 }
 0x449   : > { %11920 = vmatprep.mubr.f32.mxu1 %v15416_v47  ;;  %11883 = vmatpush3.msra.mxu0 %v18542_v9  ;;  %18551 = vst [vmem:[#allocation65_spill] sm:$0xff] %v15647_v58  ;;  %v15657_v1 = vand.u32 4294901760, %v15647_v58 }
 0x44a   : > { %11919 = vmatpush3.msra.mxu1 %v18534_v57  ;;  %11884 = vmatprep.subr.mxu0 %v18543_v34 }
 0x44b   : > { %11843 = vmatmul.mubr.f32.gmra.mxu0 %v15490_v13  ;;  %11921 = vmatmul.mubr.f32.vlgmr.msra.gmra.mxu1 %v15426_v14  ;;  %v15649_v13 = vand.u32 4294901760, %v2639_v48  ;;  %18553 = vst [vmem:[#allocation66_spill] sm:$0xff] %v15657_v1  ;;  %v4746_v7 = vsub.f32 %v15647_v58, %v15657_v1 }
 0x44c   : > { %11885 = vmatpush3.msra.mxu0 %v18543_v34  ;;  %11845 = vmatprep.mubr.f32.mxu0 %v15495_v54  ;;  %v2638_v54 = vld [vmem:[#allocation5] sm:$0xff] }
 0x44d   : > { %11886 = vmatprep.subr.mxu0 %v18544_v3  ;;  %11923 = vmatprep.mubr.f32.mxu1 %v15424_v36  ;;  %v15660_v6 = vsub.f32 %v2639_v48, %v15649_v13  ;;  %v15662_v53 = vand.u32 4294901760, %v2638_v54  ;;  %v4747_v24 = vand.u32 4294901760, %v4746_v7 }
 0x44e   : > { %11887 = vmatpush3.msra.mxu0 %v18544_v3 }
 0x44f   : > { %11888 = vmatprep.subr.mxu0 %v18545_v42  ;;  %11846 = vmatmul.mubr.f32.gmra.mxu0 %v15507_v55  ;;  %18554 = vst [vmem:[#allocation16_spill] sm:$0xff] %v15660_v6  ;;  %v15671_v4 = vand.u32 4294901760, %v15660_v6  ;;  %v15674_v19 = vsub.f32 %v2638_v54, %v15662_v53 }
 0x450   : > { %11889 = vmatpush3.msra.mxu0 %v18545_v42  ;;  %11924 = vmatmul.mubr.f32.gmra.mxu1 %v15445_v0 }
 0x451   : > { %11890 = vmatprep.subr.mxu0 %v18546_v40  ;;  %11892 = vmatprep.mubr.f32.mxu0 %v15416_v47  ;;  %v2645_v47 = vld [vmem:[#allocation5 + $0x38] sm:$0xff]  ;;  %18555 = vst [vmem:[#allocation32_spill] sm:$0xff] %v15671_v4  ;;  %18556 = vst [vmem:[#allocation35_spill] sm:$0xff] %v15674_v19  ;;  %v4753_v31 = vsub.f32 %v15660_v6, %v15671_v4  ;;  %v15681_v50 = vand.u32 4294901760, %v15674_v19 }
 0x452   : > { %11926 = vmatprep.mubr.f32.mxu1 %v15453_v8  ;;  %11891 = vmatpush3.msra.mxu0 %v18546_v40 }
 0x453   : > { %11893 = vmatmul.mubr.f32.vlgmr.msra.gmra.mxu0 %v15426_v14  ;;  %v15590_v14 = vand.u32 4294901760, %v2645_v47  ;;  %18557 = vst [vmem:[#allocation23_spill] sm:$0xff] %v15681_v50  ;;  %v4754_v37 = vand.u32 4294901760, %v4753_v31  ;;  %v4760_v57 = vsub.f32 %v15674_v19, %v15681_v50 }
 0x454   : > { %11927 = vmatmul.mubr.f32.gmra.mxu1 %v15463_v20  ;;  %11895 = vmatprep.mubr.f32.mxu0 %v15424_v36 }
 0x455   : > { %11929 = vmatprep.mubr.f32.mxu1 %v15475_v22  ;;  %v15593_v36 = vsub.f32 %v2645_v47, %v15590_v14  ;;  %11932 = vmatprep.subr.mxu0 %v15590_v14  ;;  %v4761_v2 = vand.u32 4294901760, %v4760_v57 }
 0x456   : > { %11933 = vmatpush3.msra.mxu0 %v15590_v14 }
 0x457   : > { %11896 = vmatmul.mubr.f32.gmra.mxu0 %v15445_v0  ;;  %v2643_v0 = vld [vmem:[#allocation5 + $0x28] sm:$0xff]  ;;  %v15600_v38 = vand.u32 4294901760, %v15593_v36  ;;  %11934 = vmatprep.subr.mxu0 %v15595_v60 }
 0x458   : > { %11930 = vmatmul.mubr.f32.gmra.mxu1 %v15484_v59  ;;  %11898 = vmatprep.mubr.f32.mxu0 %v15453_v8  ;;  %v15605_v32 = vand.u32 4294901760, %v2643_v0  ;;  %v2642_v8 = vld [vmem:[#allocation5 + $0x20] sm:$0xff] }
 0x459   : > { %18547 = vst [vmem:[#allocation61_spill] sm:$0xff] %v15600_v38  ;;  %11935 = vmatpush3.msra.mxu0 %v15595_v60  ;;  %v4711_v29 = vsub.f32 %v15593_v36, %v15600_v38  ;;  %v15617_v44 = vand.u32 4294901760, %v2642_v8 }
 0x45a   : > { %v15615_v49 = vsub.f32 %v2643_v0, %v15605_v32  ;;  %11936 = vmatprep.subr.mxu0 %v15605_v32 }
 0x45b   : > { %11899 = vmatmul.mubr.f32.gmra.mxu0 %v15463_v20  ;;  %v2641_v20 = vld [vmem:[#allocation5 + $0x18] sm:$0xff]  ;;  %v4712_v10 = vand.u32 4294901760, %v4711_v29  ;;  %v15627_v18 = vsub.f32 %v2642_v8, %v15617_v44 }
 0x45c   : > { %11901 = vmatprep.mubr.f32.mxu0 %v15475_v22  ;;  %11937 = vmatpush3.msra.mxu0 %v15605_v32  ;;  %v15624_v35 = vand.u32 4294901760, %v15615_v49  ;;  %v15630_v52 = vand.u32 4294901760, %v2641_v20 }
 0x45d   : > { %11938 = vmatprep.subr.mxu0 %v15617_v44  ;;  %11960 = vmatprep.subr.mxu1 %v4712_v10  ;;  %v15636_v46 = vand.u32 4294901760, %v15627_v18 }
 0x45e   : > { %18549 = vst [vmem:[#allocation22_spill] sm:$0xff] %v15624_v35  ;;  %11939 = vmatpush3.msra.mxu0 %v15617_v44  ;;  %v4725_v22 = vsub.f32 %v15615_v49, %v15624_v35  ;;  %11961 = vmatpush3.msra.mxu1 %v4712_v10  ;;  %v15641_v39 = vsub.f32 %v2641_v20, %v15630_v52 }
 0x45f   : > { %11902 = vmatmul.mubr.f32.gmra.mxu0 %v15484_v59  ;;  %18550 = vst [vmem:[#allocation63_spill] sm:$0xff] %v15636_v46  ;;  %11940 = vmatprep.subr.mxu0 %v15630_v52  ;;  %v4732_v59 = vsub.f32 %v15627_v18, %v15636_v46 }
 0x460   : > { %11962 = vmatprep.subr.mxu1 %v4719_v41  ;;  %v4726_v27 = vand.u32 4294901760, %v4725_v22  ;;  %11941 = vmatpush3.msra.mxu0 %v15630_v52  ;;  %v15653_v28 = vand.u32 4294901760, %v15641_v39 }
 0x461   : > { %11963 = vmatpush3.msra.mxu1 %v4719_v41  ;;  %11942 = vmatprep.subr.mxu0 %v15638_v43  ;;  %v4733_v33 = vand.u32 4294901760, %v4732_v59 }
 0x462   : > { %18552 = vst [vmem:[#allocation68_spill] sm:$0xff] %v15653_v28  ;;  %11964 = vmatprep.subr.mxu1 %v4726_v27  ;;  %11943 = vmatpush3.msra.mxu0 %v15638_v43  ;;  %v4739_v15 = vsub.f32 %v15641_v39, %v15653_v28 }
 0x463   : > { %11965 = vmatpush3.msra.mxu1 %v4726_v27  ;;  %11944 = vmatprep.subr.mxu0 %v15649_v13 }
 0x464   : > { %11966 = vmatprep.subr.mxu1 %v4733_v33  ;;  %11945 = vmatpush3.msra.mxu0 %v15649_v13  ;;  %v4740_v55 = vand.u32 4294901760, %v4739_v15 }
 0x465   : > { %11967 = vmatpush3.msra.mxu1 %v4733_v33  ;;  %11946 = vmatprep.subr.mxu0 %v15662_v53 }
 0x466   : > { %11947 = vmatpush3.msra.mxu0 %v15662_v53  ;;  %11968 = vmatprep.subr.mxu1 %v4740_v55 }
 0x467   : > { %11988 = vmatprep.subr.mxu0 %v15593_v36  ;;  %11969 = vmatpush3.msra.mxu1 %v4740_v55 }
 0x468   : > { %11970 = vmatprep.subr.mxu1 %v4747_v24 }
 0x469   : > { %11971 = vmatpush3.msra.mxu1 %v4747_v24 }
 0x46a   : > { %11972 = vmatprep.subr.mxu1 %v4754_v37 }
 0x46b   : > { %11973 = vmatpush3.msra.mxu1 %v4754_v37 }
 0x46c   : > { %11974 = vmatprep.subr.mxu1 %v4761_v2 }
 0x46d   : > { %11975 = vmatpush3.msra.mxu1 %v4761_v2 }
 0x46e   : > { %12016 = vmatprep.subr.mxu1 %v15590_v14 }
 0x4df   : > { %v11810_v30 = vpop.f32.mrf.mxu1 }
 0x4e1   : > { %v3936_v63 = vpop.f32.mrf.mxu1 }
 0x4e3   : > { %v11813_v23 = vpop.f32.mrf.mxu1 }
 0x4e5   : > { %v3948_v11 = vpop.f32.mrf.mxu1 }
 0x4e7   : > { %v11782_v51 = vpop.f32.mrf.mxu0 }
 0x4e8   : > { %v11816_v62 = vpop.f32.mrf.mxu1  ;;  %v3943_v54 = vadd.f32 %v11810_v30, %v11782_v51 }
 0x4e9   : > { %v3755_v61 = vpop.f32.mrf.mxu0 }
 0x4ea   : > { %v3960_v45 = vpop.f32.mrf.mxu1  ;;  %v3937_v7 = vadd.f32 %v3936_v63, %v3755_v61 }
 0x4ed   : > { %v11785_v26 = vpop.f32.mrf.mxu0 }
 0x4ee   : > { %v11819_v56 = vpop.f32.mrf.mxu1  ;;  %v3955_v31 = vadd.f32 %v11813_v23, %v11785_v26 }
 0x4ef   : > { %v3775_v25 = vpop.f32.mrf.mxu0 }
 0x4f0   : > { %v3972_v9 = vpop.f32.mrf.mxu1  ;;  %v3949_v50 = vadd.f32 %v3948_v11, %v3775_v25 }
 0x4f3   : > { %v11788_v34 = vpop.f32.mrf.mxu0 }
 0x4f4   : > { %v11866_v3 = vpop.f32.mrf.mxu1  ;;  %v3967_v28 = vadd.f32 %v11816_v62, %v11788_v34 }
 0x4f5   : > { %v3795_v42 = vpop.f32.mrf.mxu0 }
 0x4f6   : > { %v4196_v40 = vpop.f32.mrf.mxu1  ;;  %v3961_v6 = vadd.f32 %v3960_v45, %v3795_v42 }
 0x4f9   : > { %v11791_v47 = vpop.f32.mrf.mxu0 }
 0x4fa   : > { %v11869_v17 = vpop.f32.mrf.mxu1 }
 0x4fb   : > { %v3815_v0 = vpop.f32.mrf.mxu0 }
 0x4fc   : > { %v4212_v8 = vpop.f32.mrf.mxu1  ;;  %v3973_v34 = vadd.f32 %v3972_v9, %v3815_v0 }
 0x4ff   : > { %v11838_v29 = vpop.f32.mrf.mxu0 }
 0x500   : > { %v11872_v20 = vpop.f32.mrf.mxu1  ;;  %v4074_v55 = vadd.f32 %v11838_v29, %v3943_v54  ;;  %v3979_v29 = vadd.f32 %v11819_v56, %v11791_v47 }
 0x501   : > { %v4066_v10 = vpop.f32.mrf.mxu0 }
 0x502   : > { %v4228_v5 = vpop.f32.mrf.mxu1  ;;  %v4067_v37 = vadd.f32 %v4066_v10, %v3937_v7  ;;  %v4205_v1 = vadd.f32 %v11866_v3, %v4074_v55 }
 0x504   : > { %v4197_v19 = vadd.f32 %v4196_v40, %v4067_v37 }
 0x505   : > { %v11841_v12 = vpop.f32.mrf.mxu0 }
 0x506   : > { %v15688_v41 = vpop.f32.mrf.mxu1  ;;  %v4088_v4 = vadd.f32 %v11841_v12, %v3955_v31 }
 0x507   : > { %v4080_v22 = vpop.f32.mrf.mxu0 }
 0x508   : > { %v15690_v48 = vpop.f32.mrf.mxu1  ;;  %v4081_v21 = vadd.f32 %v4080_v22, %v3949_v50  ;;  %v4221_v61 = vadd.f32 %v11869_v17, %v4088_v4 }
 0x50a   : > { %v4213_v62 = vadd.f32 %v4212_v8, %v4081_v21 }
 0x50b   : > { %v11844_v27 = vpop.f32.mrf.mxu0  ;;  %v11922_v59 = vpop.f32.mrf.mxu1 }
 0x50c   : > { %v4102_v30 = vadd.f32 %v11844_v27, %v3967_v28 }
 0x50d   : > { %v4094_v33 = vpop.f32.mrf.mxu0  ;;  %v4468_v15 = vpop.f32.mrf.mxu1 }
 0x50e   : > { %v4095_v23 = vadd.f32 %v4094_v33, %v3961_v6 }
 0x50f   : > { %v11847_v24 = vpop.f32.mrf.mxu0 }
 0x510   : > { %v11925_v57 = vpop.f32.mrf.mxu1  ;;  %v4116_v50 = vadd.f32 %v11847_v24, %v3979_v29  ;;  %v4229_v56 = vadd.f32 %v4228_v5, %v4095_v23 }
 0x511   : > { %v4108_v2 = vpop.f32.mrf.mxu0 }
 0x512   : > { %v4480_v46 = vpop.f32.mrf.mxu1  ;;  %v4109_v42 = vadd.f32 %v4108_v2, %v3973_v34  ;;  %v4253_v5 = vadd.f32 %v15688_v41, %v4116_v50 }
 0x513   : > { %v11894_v35 = vpop.f32.mrf.mxu0 }
 0x514   : > { %v4354_v38 = vadd.f32 %v11894_v35, %v4205_v1  ;;  %v11928_v26 = vpop.f32.mrf.mxu1  ;;  %v4237_v1 = vadd.f32 %v11872_v20, %v4102_v30  ;;  %v4245_v31 = vadd.f32 %v15690_v48, %v4109_v42 }
 0x515   : > { %v4347_v51 = vpop.f32.mrf.mxu0 }
 0x516   : > { %v4475_v58 = vadd.f32 %v11922_v59, %v4354_v38  ;;  %v4348_v63 = vadd.f32 %v4347_v51, %v4197_v19  ;;  %v4492_v45 = vpop.f32.mrf.mxu1 }
 0x517   : > { %v11897_v10 = vpop.f32.mrf.mxu0 }
 0x518   : > { %v4518_v11 = vsel %vm2669_vm0, %v4475_v58, 0  ;;  %v4469_v25 = vadd.f32 %v4468_v15, %v4348_v63  ;;  %v4366_v3 = vadd.f32 %v11897_v10, %v4221_v61  ;;  %v11931_v59 = vpop.f32.mrf.mxu1 }
 0x519   : > { %v15693_v12 = vand.u32 4294901760, %v4518_v11  ;;  %v4359_v35 = vpop.f32.mrf.mxu0 }
 0x51a   : > { %v4515_v28 = vsel %vm2669_vm0, %v4469_v25, 0  ;;  %v4487_v38 = vadd.f32 %v11925_v57, %v4366_v3  ;;  %v4360_v19 = vadd.f32 %v4359_v35, %v4213_v62  ;;  %v4504_v29 = vpop.f32.mrf.mxu1 }
 0x51b   : > { %v15697_v4 = vsub.f32 %v4518_v11, %v15693_v12  ;;  %v15699_v6 = vand.u32 4294901760, %v4515_v28  ;;  %v11900_v58 = vpop.f32.mrf.mxu0 }
 0x51c   : > { %v4524_v21 = vsel %vm2669_vm0, %v4487_v38, 0  ;;  %v4481_v9 = vadd.f32 %v4480_v46, %v4360_v19  ;;  %v4378_v40 = vadd.f32 %v11900_v58, %v4237_v1 }
 0x51d   : > { %v4623_v47 = vand.u32 4294901760, %v15697_v4  ;;  %v15704_v17 = vsub.f32 %v4515_v28, %v15699_v6  ;;  %v15706_v0 = vand.u32 4294901760, %v4524_v21  ;;  %v4371_v8 = vpop.f32.mrf.mxu0  ;;  %11976 = vmatprep.mubr.f32.mxu1 %v15699_v6 }
 0x51e   : > { %v4521_v20 = vsel %vm2669_vm0, %v4481_v9, 0  ;;  %v4499_v22 = vadd.f32 %v11928_v26, %v4378_v40  ;;  %v4372_v27 = vadd.f32 %v4371_v8, %v4229_v56  ;;  %11977 = vmatmul.mubr.f32.vlgmr.msra.gmra.mxu1 %v15693_v12 }
 0x51f   : > { %v15713_v46 = vsub.f32 %v4524_v21, %v15706_v0  ;;  %v15715_v54 = vand.u32 4294901760, %v4521_v20  ;;  %12017 = vmatpush3.msra.mxu1 %v15590_v14  ;;  %v11903_v33 = vpop.f32.mrf.mxu0  ;;  %v4613_v15 = vand.u32 4294901760, %v15704_v17  ;;  %v4624_v41 = vsub.f32 %v15697_v4, %v4623_v47 }
 0x520   : > { %v4530_v7 = vsel %vm2669_vm0, %v4499_v22, 0  ;;  %v4493_v55 = vadd.f32 %v4492_v45, %v4372_v27  ;;  %v4390_v24 = vadd.f32 %v11903_v33, %v4253_v5  ;;  %12018 = vmatprep.subr.mxu1 %v15595_v60  ;;  %v5415_v22 = vpop.permute.xlu0 %5414  ;;  %v18558_v33 = vld [vmem:[#allocation65_spill] sm:$0xff] }
 0x521   : > { %v15726_v37 = vsub.f32 %v4521_v20, %v15715_v54  ;;  %v15728_v57 = vand.u32 4294901760, %v4530_v7  ;;  %12019 = vmatpush3.msra.mxu1 %v15595_v60  ;;  %v4383_v2 = vpop.f32.mrf.mxu0  ;;  %11979 = vmatprep.mubr.f32.mxu1 %v15715_v54  ;;  %v4614_v30 = vsub.f32 %v15704_v17, %v4613_v15  ;;  %v4643_v61 = vand.u32 4294901760, %v15713_v46 }
 0x522   : > { %v4527_v48 = vsel %vm2669_vm0, %v4493_v55, 0  ;;  %v4511_v51 = vadd.f32 %v11931_v59, %v4390_v24  ;;  %v4384_v63 = vadd.f32 %v4383_v2, %v4245_v31  ;;  %12020 = vmatprep.subr.mxu1 %v15605_v32  ;;  %11980 = vmatmul.mubr.f32.gmra.mxu1 %v15706_v0  ;;  %v4625_v3 = vand.u32 4294901760, %v4624_v41  ;;  %v5413_v59 = vpop.permute.xlu1 %5412  ;;  %v18561_v41 = vld [vmem:[#allocation61_spill] sm:$0xff] }
 0x523   : > { %v15739_v23 = vand.u32 4294901760, %v4527_v48  ;;  %12021 = vmatpush3.msra.mxu1 %v15605_v32  ;;  %v4615_v26 = vand.u32 4294901760, %v4614_v30  ;;  %v4633_v10 = vand.u32 4294901760, %v15726_v37  ;;  %v15746_v62 = vsub.f32 %v4530_v7, %v15728_v57  ;;  %v18559_v7 = vld [vmem:[#allocation16_spill] sm:$0xff] }
 0x524   : > { %v4536_v11 = vsel %vm2669_vm0, %v4511_v51, 0  ;;  %v4505_v25 = vadd.f32 %v4504_v29, %v4384_v63  ;;  %12022 = vmatprep.subr.mxu1 %v15617_v44  ;;  %v4644_v50 = vsub.f32 %v15713_v46, %v4643_v61 }
 0x525   : > { %v15749_v34 = vsub.f32 %v4527_v48, %v15739_v23  ;;  %12023 = vmatpush3.msra.mxu1 %v15617_v44  ;;  %11948 = vmatprep.mubr.f32.mxu0 %v4615_v26  ;;  %v4634_v35 = vsub.f32 %v15726_v37, %v4633_v10  ;;  %v15759_v28 = vand.u32 4294901760, %v4536_v11  ;;  %v4663_v42 = vand.u32 4294901760, %v15746_v62  ;;  %v18564_v26 = vld [vmem:[#allocation63_spill] sm:$0xff] }
 0x526   : > { %v4533_v1 = vsel %vm2669_vm0, %v4505_v25, 0  ;;  %11982 = vmatprep.mubr.f32.mxu1 %v15739_v23  ;;  %12024 = vmatprep.subr.mxu1 %v15630_v52 }
 0x527   : > { %v15761_v38 = vand.u32 4294901760, %v4533_v1  ;;  %11949 = vmatmul.mubr.f32.vlgmr.msra.gmra.mxu0 %v4625_v3  ;;  %11983 = vmatmul.mubr.f32.gmra.mxu1 %v15728_v57  ;;  %v4635_v19 = vand.u32 4294901760, %v4634_v35  ;;  %v4653_v45 = vand.u32 4294901760, %v15749_v34  ;;  %v15777_v21 = vsub.f32 %v4536_v11, %v15759_v28 }
 0x528   : > { %11989 = vmatpush3.msra.mxu0 %v15593_v36  ;;  %12025 = vmatpush3.msra.mxu1 %v15630_v52  ;;  %v4645_v36 = vand.u32 4294901760, %v4644_v50 }
 0x529   : > { %v15768_v58 = vsub.f32 %v4533_v1, %v15761_v38  ;;  %11990 = vmatprep.subr.mxu0 %v15603_v16  ;;  %12026 = vmatprep.subr.mxu1 %v15638_v43  ;;  %v4654_v56 = vsub.f32 %v15749_v34, %v4653_v45  ;;  %v4683_v20 = vand.u32 4294901760, %v15777_v21 }
 0x52a   : > { %11991 = vmatpush3.msra.mxu0 %v15603_v16  ;;  %12027 = vmatpush3.msra.mxu1 %v15638_v43  ;;  %v4664_v16 = vsub.f32 %v15746_v62, %v4663_v42 }
 0x52b   : > { %11951 = vmatprep.mubr.f32.mxu0 %v4635_v19  ;;  %11985 = vmatprep.mubr.f32.mxu1 %v15761_v38  ;;  %v4673_v9 = vand.u32 4294901760, %v15768_v58  ;;  %v4655_v40 = vand.u32 4294901760, %v4654_v56  ;;  %v4684_v5 = vsub.f32 %v15777_v21, %v4683_v20  ;;  %v18566_v19 = vld [vmem:[#allocation66_spill] sm:$0xff] }
 0x52c   : > { %11992 = vmatprep.subr.mxu0 %v15615_v49  ;;  %12028 = vmatprep.subr.mxu1 %v15649_v13 }
 0x52d   : > { %11952 = vmatmul.mubr.f32.gmra.mxu0 %v4645_v36  ;;  %11986 = vmatmul.mubr.f32.gmra.mxu1 %v15759_v28  ;;  %v4674_v8 = vsub.f32 %v15768_v58, %v4673_v9 }
 0x52e   : > { %11993 = vmatpush3.msra.mxu0 %v15615_v49  ;;  %12029 = vmatpush3.msra.mxu1 %v15649_v13  ;;  %v4665_v49 = vand.u32 4294901760, %v4664_v16 }
 0x52f   : > { %11994 = vmatprep.subr.mxu0 %v15627_v18  ;;  %12030 = vmatprep.subr.mxu1 %v15662_v53  ;;  %v4675_v27 = vand.u32 4294901760, %v4674_v8 }
 0x530   : > { %12032 = vmatprep.mubr.f32.mxu1 %v4613_v15  ;;  %11995 = vmatpush3.msra.mxu0 %v15627_v18  ;;  %v5446_v18 = vsel %vm2669_vm0, %v5415_v22, 0  ;;  %v18568_v22 = vld [vmem:[#allocation23_spill] sm:$0xff] }
 0x531   : > { %12031 = vmatpush3.msra.mxu1 %v15662_v53  ;;  %11954 = vmatprep.mubr.f32.mxu0 %v4655_v40  ;;  %v15813_v15 = vand.u32 4294901760, %v5446_v18 }
 0x532   : > { %11996 = vmatprep.subr.mxu0 %v15641_v39  ;;  %12072 = vmatprep.subr.mxu1 %v15590_v14 }
 0x533   : > { %11955 = vmatmul.mubr.f32.gmra.mxu0 %v4665_v49  ;;  %12033 = vmatmul.mubr.f32.vlgmr.msra.gmra.mxu1 %v4623_v47  ;;  %v4685_v47 = vand.u32 4294901760, %v4684_v5  ;;  %v15825_v55 = vsub.f32 %v5446_v18, %v15813_v15 }
 0x534   : > { %11997 = vmatpush3.msra.mxu0 %v15641_v39  ;;  %12073 = vmatpush3.msra.mxu1 %v15590_v14  ;;  %v5444_v14 = vsel %vm2669_vm0, %v5413_v59, 0  ;;  %v5411_v39 = vpop.permute.xlu1 %5410 }
 0x535   : > { %11998 = vmatprep.subr.mxu0 %v18558_v33  ;;  %12035 = vmatprep.mubr.f32.mxu1 %v4633_v10  ;;  %v15827_v24 = vand.u32 4294901760, %v5444_v14  ;;  %v5442_v31 = vsel %vm2669_vm0, %v5411_v39, 0 }
 0x536   : > { %12074 = vmatprep.subr.mxu1 %v15595_v60  ;;  %11999 = vmatpush3.msra.mxu0 %v18558_v33  ;;  %v15846_v30 = vand.u32 4294901760, %v5442_v31 }
 0x537   : > { %12075 = vmatpush3.msra.mxu1 %v15595_v60  ;;  %11957 = vmatprep.mubr.f32.mxu0 %v4675_v27  ;;  %v18560_v60 = vld [vmem:[#allocation35_spill] sm:$0xff] }
 0x538   : > { %12000 = vmatprep.subr.mxu0 %v18559_v7  ;;  %12076 = vmatprep.subr.mxu1 %v15605_v32  ;;  %v5409_v2 = vpop.permute.xlu1 %5408  ;;  %v15864_v63 = vsub.f32 %v5442_v31, %v15846_v30 }
 0x539   : > { %11958 = vmatmul.mubr.f32.gmra.mxu0 %v4685_v47  ;;  %12036 = vmatmul.mubr.f32.gmra.mxu1 %v4643_v61  ;;  %v5440_v48 = vsel %vm2669_vm0, %v5409_v2, 0 }
 0x53a   : > { %12001 = vmatpush3.msra.mxu0 %v18559_v7  ;;  %12077 = vmatpush3.msra.mxu1 %v15605_v32  ;;  %v5407_v32 = vpop.permute.xlu0 %5406  ;;  %v15870_v29 = vand.u32 4294901760, %v5440_v48 }
 0x53b   : > { %12002 = vmatprep.subr.mxu0 %v18560_v60  ;;  %12004 = vmatprep.mubr.f32.mxu0 %v15704_v17  ;;  %v15839_v17 = vsub.f32 %v5444_v14, %v15827_v24 }
 0x53c   : > { %12038 = vmatprep.mubr.f32.mxu1 %v4653_v45  ;;  %12078 = vmatprep.subr.mxu1 %v15617_v44  ;;  %v5405_v10 = vpop.permute.xlu1 %5404  ;;  %v15888_v3 = vsub.f32 %v5440_v48, %v15870_v29 }
 0x53d   : > { %12003 = vmatpush3.msra.mxu0 %v18560_v60  ;;  %12079 = vmatpush3.msra.mxu1 %v15617_v44  ;;  %v15844_v44 = vand.u32 4294901760, %v15825_v55  ;;  %v15861_v51 = vand.u32 4294901760, %v15839_v17  ;;  %v5436_v1 = vsel %vm2669_vm0, %v5405_v10, 0 }
 0x53e   : > { %12044 = vmatprep.subr.mxu0 %v18561_v41  ;;  %12080 = vmatprep.subr.mxu1 %v15630_v52  ;;  %v5403_v61 = vpop.permute.xlu0 %5402  ;;  %v15908_v36 = vand.u32 4294901760, %v15888_v3 }
 0x53f   : > { %12005 = vmatmul.mubr.f32.vlgmr.msra.gmra.mxu0 %v15697_v4  ;;  %12039 = vmatmul.mubr.f32.gmra.mxu1 %v4663_v42  ;;  %v18562_v4 = vld [vmem:[#allocation59_spill] sm:$0xff]  ;;  %v5628_v11 = vsub.f32 %v15839_v17, %v15861_v51  ;;  %v5434_v56 = vsel %vm2669_vm0, %v5403_v61, 0  ;;  %v15904_v42 = vand.u32 4294901760, %v5436_v1 }
 0x540   : > { %12045 = vmatpush3.msra.mxu0 %v18561_v41  ;;  %12081 = vmatpush3.msra.mxu1 %v15630_v52  ;;  %v18563_v52 = vld [vmem:[#allocation22_spill] sm:$0xff]  ;;  %v15914_v40 = vand.u32 4294901760, %v5434_v56 }
 0x541   : > { %12007 = vmatprep.mubr.f32.mxu0 %v15726_v37  ;;  %12041 = vmatprep.mubr.f32.mxu1 %v4673_v9  ;;  %v5621_v37 = vsub.f32 %v15825_v55, %v15844_v44  ;;  %v5401_v9 = vpop.permute.xlu1 %5400 }
 0x542   : > { %12046 = vmatprep.subr.mxu0 %v18562_v4  ;;  %12082 = vmatprep.subr.mxu1 %v15638_v43  ;;  %v5385_v35 = vpop.permute.xlu0 %5384  ;;  %v5432_v49 = vsel %vm2669_vm0, %v5401_v9, 0 }
 0x543   : > { %12047 = vmatpush3.msra.mxu0 %v18562_v4  ;;  %12083 = vmatpush3.msra.mxu1 %v15638_v43  ;;  %v5438_v43 = vsel %vm2669_vm0, %v5407_v32, 0  ;;  %v15936_v59 = vand.u32 4294901760, %v5432_v49 }
 0x544   : > { %12048 = vmatprep.subr.mxu0 %v18563_v52  ;;  %12084 = vmatprep.subr.mxu1 %v15649_v13  ;;  %v15880_v25 = vand.u32 4294901760, %v5438_v43 }
 0x545   : > { %12008 = vmatmul.mubr.f32.gmra.mxu0 %v15713_v46  ;;  %12042 = vmatmul.mubr.f32.gmra.mxu1 %v4683_v20  ;;  %v5622_v46 = vand.u32 4294901760, %v5621_v37  ;;  %v15920_v20 = vsub.f32 %v5436_v1, %v15904_v42  ;;  %v5387_v7 = vpop.permute.xlu1 %5386  ;;  %v15954_v14 = vsub.f32 %v5432_v49, %v15936_v59 }
 0x546   : > { %12049 = vmatpush3.msra.mxu0 %v18563_v52  ;;  %12085 = vmatpush3.msra.mxu1 %v15649_v13  ;;  %v15885_v13 = vand.u32 4294901760, %v15864_v63  ;;  %v15896_v50 = vsub.f32 %v5438_v43, %v15880_v25  ;;  %v5389_v39 = vpop.permute.xlu0 %5388 }
 0x547   : > { %12010 = vmatprep.mubr.f32.mxu0 %v15749_v34  ;;  %12050 = vmatprep.subr.mxu0 %v18564_v26  ;;  %v18565_v34 = vld [vmem:[#allocation68_spill] sm:$0xff]  ;;  %v15947_v47 = vand.u32 4294901760, %v15920_v20  ;;  %v15972_v32 = vand.u32 4294901760, %v15954_v14  ;;  %v5420_v48 = vsel %vm2669_vm0, %v5389_v39, 0 }
 0x548   : > { %12086 = vmatprep.subr.mxu1 %v15662_v53  ;;  %12088 = vmatprep.mubr.f32.mxu1 %v15699_v6  ;;  %v5635_v45 = vsub.f32 %v15864_v63, %v15885_v13  ;;  %v15928_v27 = vand.u32 4294901760, %v15896_v50 }
 0x549   : > { %12051 = vmatpush3.msra.mxu0 %v18564_v26  ;;  %12087 = vmatpush3.msra.mxu1 %v15662_v53  ;;  %v5629_v53 = vand.u32 4294901760, %v5628_v11  ;;  %v5670_v37 = vsub.f32 %v15954_v14, %v15972_v32  ;;  %v15988_v26 = vand.u32 4294901760, %v5420_v48 }
 0x54a   : > { %12052 = vmatprep.subr.mxu0 %v18565_v34  ;;  %12128 = vmatprep.subr.mxu1 %v5622_v46  ;;  %v5636_v8 = vand.u32 4294901760, %v5635_v45  ;;  %v5649_v33 = vsub.f32 %v15896_v50, %v15928_v27  ;;  %v5393_v4 = vpop.permute.xlu0 %5392 }
 0x54b   : > { %12011 = vmatmul.mubr.f32.gmra.mxu0 %v15746_v62  ;;  %12089 = vmatmul.mubr.f32.vlgmr.msra.gmra.mxu1 %v15693_v12  ;;  %v5416_v62 = vsel %vm2669_vm0, %v5385_v35, 0  ;;  %v16000_v1 = vsub.f32 %v5420_v48, %v15988_v26 }
 0x54c   : > { %12053 = vmatpush3.msra.mxu0 %v18565_v34  ;;  %12129 = vmatpush3.xpose.msra.mxu1 %v5622_v46  ;;  %v15916_v16 = vand.u32 4294901760, %v5416_v62  ;;  %v5650_v60 = vand.u32 4294901760, %v5649_v33  ;;  %v5671_v46 = vand.u32 4294901760, %v5670_v37 }
 0x54d   : > { %12013 = vmatprep.mubr.f32.mxu0 %v15768_v58  ;;  %12054 = vmatprep.subr.mxu0 %v18566_v19  ;;  %v18567_v58 = vld [vmem:[#allocation32_spill] sm:$0xff] }
 0x54e   : > { %12091 = vmatprep.mubr.f32.mxu1 %v15715_v54  ;;  %12130 = vmatprep.subr.mxu1 %v5629_v53  ;;  %v15934_v5 = vsub.f32 %v5416_v62, %v15916_v16  ;;  %v5397_v11 = vpop.permute.xlu0 %5396 }
 0x54f   : > { %12055 = vmatpush3.msra.mxu0 %v18566_v19  ;;  %12092 = vmatmul.mubr.f32.gmra.mxu1 %v15706_v0  ;;  %v5428_v45 = vsel %vm2669_vm0, %v5397_v11, 0 }
 0x550   : > { %12056 = vmatprep.subr.mxu0 %v18567_v58  ;;  %12014 = vmatmul.mubr.f32.gmra.mxu0 %v15777_v21  ;;  %v5642_v21 = vsub.f32 %v15888_v3, %v15908_v36 }
 0x551   : > { %12057 = vmatpush3.msra.mxu0 %v18567_v58  ;;  %12131 = vmatpush3.xpose.msra.mxu1 %v5629_v53 }
 0x552   : > { %12058 = vmatprep.subr.mxu0 %v18568_v22  ;;  %12060 = vmatprep.mubr.f32.mxu0 %v15699_v6  ;;  %v15941_v6 = vsub.f32 %v5434_v56, %v15914_v40  ;;  %v5643_v18 = vand.u32 4294901760, %v5642_v21 }
 0x553   : > { %12094 = vmatprep.mubr.f32.mxu1 %v15739_v23  ;;  %12132 = vmatprep.subr.mxu1 %v5636_v8 }
 0x554   : > { %12059 = vmatpush3.msra.mxu0 %v18568_v22  ;;  %12095 = vmatmul.mubr.f32.gmra.mxu1 %v15728_v57  ;;  %v15962_v31 = vand.u32 4294901760, %v15941_v6  ;;  %v16019_v22 = vand.u32 4294901760, %v5428_v45 }
 0x555   : > { %12100 = vmatprep.subr.mxu0 %v15813_v15  ;;  %12061 = vmatmul.mubr.f32.vlgmr.msra.gmra.mxu0 %v15693_v12  ;;  %v5523_v12 = vand.u32 4294901760, %v15934_v5 }
 0x556   : > { %12101 = vmatpush3.xpose.msra.mxu0 %v15813_v15  ;;  %12133 = vmatpush3.xpose.msra.mxu1 %v5636_v8  ;;  %v5543_v8 = vand.u32 4294901760, %v16000_v1 }
 0x557   : > { %12063 = vmatprep.mubr.f32.mxu0 %v15715_v54  ;;  %12097 = vmatprep.mubr.f32.mxu1 %v15761_v38  ;;  %v5656_v54 = vsub.f32 %v15920_v20, %v15947_v47  ;;  %v5524_v41 = vsub.f32 %v15934_v5, %v5523_v12 }
 0x558   : > { %12102 = vmatprep.subr.mxu0 %v15827_v24  ;;  %12134 = vmatprep.subr.mxu1 %v5643_v18 }
 0x559   : > { %12064 = vmatmul.mubr.f32.gmra.mxu0 %v15706_v0  ;;  %12098 = vmatmul.mubr.f32.gmra.mxu1 %v15759_v28  ;;  %v5391_v0 = vpop.permute.xlu1 %5390  ;;  %v5657_v2 = vand.u32 4294901760, %v5656_v54  ;;  %v5525_v52 = vand.u32 4294901760, %v5524_v41  ;;  %v16038_v54 = vsub.f32 %v5428_v45, %v16019_v22 }
 0x55a   : > { %12103 = vmatpush3.xpose.msra.mxu0 %v15827_v24  ;;  %12135 = vmatpush3.xpose.msra.mxu1 %v5643_v18  ;;  %v5422_v10 = vsel %vm2669_vm0, %v5391_v0, 0  ;;  %v5544_v0 = vsub.f32 %v16000_v1, %v5543_v8 }
 0x55b   : > { %12066 = vmatprep.mubr.f32.mxu0 %v15739_v23  ;;  %12104 = vmatprep.subr.mxu0 %v15846_v30  ;;  %v5663_v23 = vsub.f32 %v15941_v6, %v15962_v31  ;;  %v15996_v35 = vand.u32 4294901760, %v5422_v10 }
 0x55c   : > { %12136 = vmatprep.subr.mxu1 %v5650_v60  ;;  %12144 = vmatprep.mubr.f32.mxu1 %v15916_v16  ;;  %v5545_v48 = vand.u32 4294901760, %v5544_v0 }
 0x55d   : > { %12067 = vmatmul.mubr.f32.gmra.mxu0 %v15728_v57  ;;  %v5418_v57 = vsel %vm2669_vm0, %v5387_v7, 0  ;;  %v5664_v61 = vand.u32 4294901760, %v5663_v23  ;;  %v16009_v9 = vsub.f32 %v5422_v10, %v15996_v35 }
 0x55e   : > { %12105 = vmatpush3.xpose.msra.mxu0 %v15846_v30  ;;  %12137 = vmatpush3.xpose.msra.mxu1 %v5650_v60  ;;  %v15985_v43 = vand.u32 4294901760, %v5418_v57 }
 0x55f   : > { %12069 = vmatprep.mubr.f32.mxu0 %v15761_v38  ;;  %12106 = vmatprep.subr.mxu0 %v15870_v29  ;;  %v5395_v38 = vpop.permute.xlu1 %5394  ;;  %v5553_v33 = vand.u32 4294901760, %v16009_v9 }
 0x560   : > { %12138 = vmatprep.subr.mxu1 %v5657_v2  ;;  %v15994_v34 = vsub.f32 %v5418_v57, %v15985_v43  ;;  %v5426_v19 = vsel %vm2669_vm0, %v5395_v38, 0  ;;  %v5583_v57 = vand.u32 4294901760, %v16038_v54 }
 0x561   : > { %12070 = vmatmul.mubr.f32.gmra.mxu0 %v15759_v28  ;;  %v5424_v28 = vsel %vm2669_vm0, %v5393_v4, 0  ;;  %v16011_v58 = vand.u32 4294901760, %v5426_v19 }
 0x562   : > { %12107 = vmatpush3.xpose.msra.mxu0 %v15870_v29  ;;  %12139 = vmatpush3.xpose.msra.mxu1 %v5657_v2  ;;  %v16002_v53 = vand.u32 4294901760, %v5424_v28  ;;  %v5533_v62 = vand.u32 4294901760, %v15994_v34  ;;  %v5554_v2 = vsub.f32 %v16009_v9, %v5553_v33 }
 0x563   : > { %12108 = vmatprep.subr.mxu0 %v15880_v25  ;;  %12116 = vmatprep.mubr.f32.mxu0 %v5525_v52  ;;  %v5399_v56 = vpop.permute.xlu1 %5398  ;;  %v16030_v7 = vsub.f32 %v5426_v19, %v16011_v58 }
 0x564   : > { %12140 = vmatprep.subr.mxu1 %v5664_v61  ;;  %v16017_v49 = vsub.f32 %v5424_v28, %v16002_v53  ;;  %v5430_v21 = vsel %vm2669_vm0, %v5399_v56, 0  ;;  %v5534_v18 = vsub.f32 %v15994_v34, %v5533_v62  ;;  %v5555_v37 = vand.u32 4294901760, %v5554_v2 }
 0x565   : > { %v16032_v39 = vand.u32 4294901760, %v5430_v21  ;;  %v5573_v23 = vand.u32 4294901760, %v16030_v7  ;;  %v5584_v28 = vsub.f32 %v16038_v54, %v5583_v57 }
 0x566   : > { %12109 = vmatpush3.xpose.msra.mxu0 %v15880_v25  ;;  %12141 = vmatpush3.xpose.msra.mxu1 %v5664_v61  ;;  %v5563_v60 = vand.u32 4294901760, %v16017_v49  ;;  %v5535_v41 = vand.u32 4294901760, %v5534_v18 }
 0x567   : > { %12110 = vmatprep.subr.mxu0 %v15904_v42  ;;  %12142 = vmatprep.subr.mxu1 %v5671_v46  ;;  %v16052_v4 = vsub.f32 %v5430_v21, %v16032_v39  ;;  %v5574_v61 = vsub.f32 %v16030_v7, %v5573_v23  ;;  %v5585_v11 = vand.u32 4294901760, %v5584_v28 }
 0x568   : > { %v5564_v52 = vsub.f32 %v16017_v49, %v5563_v60 }
 0x569   : > { %v5593_v38 = vand.u32 4294901760, %v16052_v4 }
 0x56a   : > { %12111 = vmatpush3.xpose.msra.mxu0 %v15904_v42  ;;  %12143 = vmatpush3.xpose.msra.mxu1 %v5671_v46  ;;  %v5565_v10 = vand.u32 4294901760, %v5564_v52  ;;  %v5575_v46 = vand.u32 4294901760, %v5574_v61 }
 0x56b   : > { %12112 = vmatprep.subr.mxu0 %v15914_v40  ;;  %12184 = vmatprep.subr.mxu1 %v15813_v15 }
 0x56d   : > { %12145 = vmatmul.mubr.f32.vlgmr.msra.gmra.mxu1 %v15985_v43 }
 0x56e   : > { %12113 = vmatpush3.xpose.msra.mxu0 %v15914_v40  ;;  %12147 = vmatprep.mubr.f32.mxu1 %v15988_v26 }
 0x56f   : > { %12185 = vmatpush3.xpose.msra.mxu1 %v15813_v15  ;;  %12114 = vmatprep.subr.mxu0 %v15936_v59 }
 0x570   : > { %12186 = vmatprep.subr.mxu1 %v15827_v24 }
 0x571   : > { %12148 = vmatmul.mubr.f32.gmra.mxu1 %v15996_v35 }
 0x572   : > { %12115 = vmatpush3.xpose.msra.mxu0 %v15936_v59  ;;  %12150 = vmatprep.mubr.f32.mxu1 %v16002_v53 }
 0x573   : > { %12187 = vmatpush3.xpose.msra.mxu1 %v15827_v24  ;;  %12156 = vmatprep.subr.mxu0 %v15825_v55 }
 0x574   : > { %12188 = vmatprep.subr.mxu1 %v15846_v30 }
 0x575   : > { %12117 = vmatmul.mubr.f32.vlgmr.msra.gmra.mxu0 %v5535_v41  ;;  %12151 = vmatmul.mubr.f32.gmra.mxu1 %v16011_v58 }
 0x576   : > { %12119 = vmatprep.mubr.f32.mxu0 %v5545_v48  ;;  %12153 = vmatprep.mubr.f32.mxu1 %v16019_v22 }
 0x577   : > { %12157 = vmatpush3.xpose.msra.mxu0 %v15825_v55  ;;  %12189 = vmatpush3.xpose.msra.mxu1 %v15846_v30  ;;  %v5594_v55 = vsub.f32 %v16052_v4, %v5593_v38 }
 0x578   : > { %12158 = vmatprep.subr.mxu0 %v15839_v17  ;;  %12190 = vmatprep.subr.mxu1 %v15870_v29 }
 0x579   : > { %12120 = vmatmul.mubr.f32.gmra.mxu0 %v5555_v37  ;;  %12154 = vmatmul.mubr.f32.gmra.mxu1 %v16032_v39  ;;  %v5595_v19 = vand.u32 4294901760, %v5594_v55 }
 0x57a   : > { %12122 = vmatprep.mubr.f32.mxu0 %v5565_v10  ;;  %12200 = vmatprep.mubr.f32.mxu1 %v5523_v12 }
 0x57b   : > { %12159 = vmatpush3.xpose.msra.mxu0 %v15839_v17  ;;  %12191 = vmatpush3.xpose.msra.mxu1 %v15870_v29 }
 0x57c   : > { %12160 = vmatprep.subr.mxu0 %v15864_v63  ;;  %12192 = vmatprep.subr.mxu1 %v15880_v25 }
 0x57d   : > { %12123 = vmatmul.mubr.f32.gmra.mxu0 %v5575_v46 }
 0x57e   : > { %12125 = vmatprep.mubr.f32.mxu0 %v5585_v11 }
 0x57f   : > { %12161 = vmatpush3.xpose.msra.mxu0 %v15864_v63  ;;  %12193 = vmatpush3.xpose.msra.mxu1 %v15880_v25 }
 0x580   : > { %12162 = vmatprep.subr.mxu0 %v15888_v3  ;;  %12194 = vmatprep.subr.mxu1 %v15904_v42 }
 0x581   : > { %12126 = vmatmul.mubr.f32.gmra.mxu0 %v5595_v19 }
 0x582   : > { %12172 = vmatprep.mubr.f32.mxu0 %v15934_v5 }
 0x583   : > { %12163 = vmatpush3.xpose.msra.mxu0 %v15888_v3  ;;  %12195 = vmatpush3.xpose.msra.mxu1 %v15904_v42 }
 0x584   : > { %12164 = vmatprep.subr.mxu0 %v15896_v50  ;;  %12196 = vmatprep.subr.mxu1 %v15914_v40 }
 0x587   : > { %12165 = vmatpush3.xpose.msra.mxu0 %v15896_v50  ;;  %12197 = vmatpush3.xpose.msra.mxu1 %v15914_v40 }
 0x588   : > { %12166 = vmatprep.subr.mxu0 %v15920_v20  ;;  %12198 = vmatprep.subr.mxu1 %v15936_v59 }
 0x58b   : > { %12167 = vmatpush3.xpose.msra.mxu0 %v15920_v20  ;;  %12199 = vmatpush3.xpose.msra.mxu1 %v15936_v59 }
 0x58c   : > { %12168 = vmatprep.subr.mxu0 %v15941_v6  ;;  %12240 = vmatprep.subr.mxu1 %v15813_v15 }
 0x58e   : > { %12201 = vmatmul.mubr.f32.vlgmr.msra.gmra.mxu1 %v5533_v62 }
 0x58f   : > { %12169 = vmatpush3.xpose.msra.mxu0 %v15941_v6  ;;  %12203 = vmatprep.mubr.f32.mxu1 %v5543_v8 }
 0x590   : > { %12241 = vmatpush3.xpose.msra.mxu1 %v15813_v15  ;;  %12170 = vmatprep.subr.mxu0 %v15954_v14 }
 0x591   : > { %12242 = vmatprep.subr.mxu1 %v15827_v24 }
 0x592   : > { %12204 = vmatmul.mubr.f32.gmra.mxu1 %v5553_v33 }
 0x593   : > { %12171 = vmatpush3.xpose.msra.mxu0 %v15954_v14  ;;  %12206 = vmatprep.mubr.f32.mxu1 %v5563_v60 }
 0x594   : > { %12243 = vmatpush3.xpose.msra.mxu1 %v15827_v24  ;;  %12212 = vmatprep.subr.mxu0 %v15844_v44 }
 0x595   : > { %12244 = vmatprep.subr.mxu1 %v15846_v30 }
 0x596   : > { %12173 = vmatmul.mubr.f32.vlgmr.msra.gmra.mxu0 %v15994_v34  ;;  %12207 = vmatmul.mubr.f32.gmra.mxu1 %v5573_v23 }
 0x597   : > { %12175 = vmatprep.mubr.f32.mxu0 %v16000_v1  ;;  %12209 = vmatprep.mubr.f32.mxu1 %v5583_v57 }
 0x598   : > { %12213 = vmatpush3.xpose.msra.mxu0 %v15844_v44  ;;  %12245 = vmatpush3.xpose.msra.mxu1 %v15846_v30 }
 0x599   : > { %12214 = vmatprep.subr.mxu0 %v15861_v51  ;;  %12246 = vmatprep.subr.mxu1 %v15870_v29 }
 0x59a   : > { %12176 = vmatmul.mubr.f32.gmra.mxu0 %v16009_v9  ;;  %12210 = vmatmul.mubr.f32.gmra.mxu1 %v5593_v38 }
 0x59b   : > { %12178 = vmatprep.mubr.f32.mxu0 %v16017_v49  ;;  %12256 = vmatprep.mubr.f32.mxu1 %v15916_v16 }
 0x59c   : > { %12215 = vmatpush3.xpose.msra.mxu0 %v15861_v51  ;;  %12247 = vmatpush3.xpose.msra.mxu1 %v15870_v29 }
 0x59d   : > { %12216 = vmatprep.subr.mxu0 %v15885_v13  ;;  %12248 = vmatprep.subr.mxu1 %v15880_v25 }
 0x59e   : > { %12179 = vmatmul.mubr.f32.gmra.mxu0 %v16030_v7 }
 0x59f   : > { %12181 = vmatprep.mubr.f32.mxu0 %v16038_v54 }
 0x5a0   : > { %12217 = vmatpush3.xpose.msra.mxu0 %v15885_v13  ;;  %12249 = vmatpush3.xpose.msra.mxu1 %v15880_v25 }
 0x5a1   : > { %12218 = vmatprep.subr.mxu0 %v15908_v36  ;;  %12250 = vmatprep.subr.mxu1 %v15904_v42 }
 0x5a2   : > { %12182 = vmatmul.mubr.f32.gmra.mxu0 %v16052_v4 }
 0x5a3   : > { %12228 = vmatprep.mubr.f32.mxu0 %v15916_v16 }
 0x5a4   : > { %12219 = vmatpush3.xpose.msra.mxu0 %v15908_v36  ;;  %12251 = vmatpush3.xpose.msra.mxu1 %v15904_v42 }
 0x5a5   : > { %12220 = vmatprep.subr.mxu0 %v15928_v27  ;;  %12252 = vmatprep.subr.mxu1 %v15914_v40 }
 0x5a8   : > { %12221 = vmatpush3.xpose.msra.mxu0 %v15928_v27  ;;  %12253 = vmatpush3.xpose.msra.mxu1 %v15914_v40 }
 0x5a9   : > { %12222 = vmatprep.subr.mxu0 %v15947_v47  ;;  %12254 = vmatprep.subr.mxu1 %v15936_v59 }
 0x5ac   : > { %12223 = vmatpush3.xpose.msra.mxu0 %v15947_v47  ;;  %12255 = vmatpush3.xpose.msra.mxu1 %v15936_v59 }
 0x5ad   : > { %12224 = vmatprep.subr.mxu0 %v15962_v31 }
 0x5af   : > { %12257 = vmatmul.mubr.f32.vlgmr.msra.gmra.mxu1 %v15985_v43 }
 0x5b0   : > { %12225 = vmatpush3.xpose.msra.mxu0 %v15962_v31  ;;  %12259 = vmatprep.mubr.f32.mxu1 %v15988_v26 }
 0x5b1   : > { %12226 = vmatprep.subr.mxu0 %v15972_v32 }
 0x5b3   : > { %12260 = vmatmul.mubr.f32.gmra.mxu1 %v15996_v35 }
 0x5b4   : > { %12227 = vmatpush3.xpose.msra.mxu0 %v15972_v32  ;;  %12262 = vmatprep.mubr.f32.mxu1 %v16002_v53 }
 0x5b7   : > { %12229 = vmatmul.mubr.f32.vlgmr.msra.gmra.mxu0 %v15985_v43  ;;  %12263 = vmatmul.mubr.f32.gmra.mxu1 %v16011_v58 }
 0x5b8   : > { %12231 = vmatprep.mubr.f32.mxu0 %v15988_v26  ;;  %12265 = vmatprep.mubr.f32.mxu1 %v16019_v22 }
 0x5bb   : > { %12232 = vmatmul.mubr.f32.gmra.mxu0 %v15996_v35  ;;  %12266 = vmatmul.mubr.f32.gmra.mxu1 %v16032_v39 }
 0x5bc   : > { %12234 = vmatprep.mubr.f32.mxu0 %v16002_v53 }
 0x5bf   : > { %12235 = vmatmul.mubr.f32.gmra.mxu0 %v16011_v58 }
 0x5c0   : > { %12237 = vmatprep.mubr.f32.mxu0 %v16019_v22 }
 0x5c3   : > { %12238 = vmatmul.mubr.f32.gmra.mxu0 %v16032_v39 }
 0x5de   : > { %v11978_v15 = vpop.f32.mrf.mxu1 }
 0x5e0   : > { %v16168_v24 = vpop.f32.mrf.mxu1 }
 0x5e1   : > { %18569 = vst [vmem:[#allocation31_spill] sm:$0xff] %v16168_v24 }
 0x5e2   : > { %v11981_v17 = vpop.f32.mrf.mxu1 }
 0x5e4   : > { %v16170_v44 = vpop.f32.mrf.mxu1 }
 0x5e5   : > { %18570 = vst [vmem:[#allocation24_spill] sm:$0xff] %v16170_v44 }
 0x5e7   : > { %v11950_v30 = vpop.f32.mrf.mxu0  ;;  %v11984_v51 = vpop.f32.mrf.mxu1 }
 0x5e8   : > { %v4805_v63 = vadd.f32 %v11978_v15, %v11950_v30 }
 0x5e9   : > { %v16172_v29 = vpop.f32.mrf.mxu0  ;;  %v16174_v25 = vpop.f32.mrf.mxu1 }
 0x5ea   : > { %18571 = vst [vmem:[#allocation34_spill] sm:$0xff] %v16172_v29  ;;  %18572 = vst [vmem:[#allocation28_spill] sm:$0xff] %v16174_v25 }
 0x5ed   : > { %v11953_v13 = vpop.f32.mrf.mxu0  ;;  %v11987_v3 = vpop.f32.mrf.mxu1 }
 0x5ee   : > { %v4817_v50 = vadd.f32 %v11981_v17, %v11953_v13 }
 0x5ef   : > { %v16176_v42 = vpop.f32.mrf.mxu0  ;;  %v16178_v36 = vpop.f32.mrf.mxu1 }
 0x5f0   : > { %18573 = vst [vmem:[#allocation30_spill] sm:$0xff] %v16176_v42  ;;  %18574 = vst [vmem:[#allocation15_spill] sm:$0xff] %v16178_v36 }
 0x5f3   : > { %v11956_v40 = vpop.f32.mrf.mxu0  ;;  %v12034_v16 = vpop.f32.mrf.mxu1 }
 0x5f4   : > { %v4829_v20 = vadd.f32 %v11984_v51, %v11956_v40 }
 0x5f5   : > { %v16180_v27 = vpop.f32.mrf.mxu0  ;;  %v16182_v5 = vpop.f32.mrf.mxu1 }
 0x5f6   : > { %18575 = vst [vmem:[#allocation29_spill] sm:$0xff] %v16180_v27  ;;  %18576 = vst [vmem:[#allocation40_spill] sm:$0xff] %v16182_v5 }
 0x5f9   : > { %v11959_v59 = vpop.f32.mrf.mxu0  ;;  %v12037_v6 = vpop.f32.mrf.mxu1 }
 0x5fa   : > { %v4841_v47 = vadd.f32 %v11987_v3, %v11959_v59 }
 0x5fb   : > { %v16184_v12 = vpop.f32.mrf.mxu0  ;;  %v16186_v14 = vpop.f32.mrf.mxu1 }
 0x5fc   : > { %18577 = vst [vmem:[#allocation37_spill] sm:$0xff] %v16184_v12  ;;  %18578 = vst [vmem:[#allocation36_spill] sm:$0xff] %v16186_v14 }
 0x5ff   : > { %v12006_v31 = vpop.f32.mrf.mxu0  ;;  %v12040_v32 = vpop.f32.mrf.mxu1 }
 0x600   : > { %v4936_v43 = vadd.f32 %v12006_v31, %v4805_v63 }
 0x601   : > { %v16188_v26 = vpop.f32.mrf.mxu0  ;;  %v16190_v34 = vpop.f32.mrf.mxu1 }
 0x602   : > { %18579 = vst [vmem:[#allocation45_spill] sm:$0xff] %v16188_v26  ;;  %18580 = vst [vmem:[#allocation42_spill] sm:$0xff] %v16190_v34  ;;  %v5067_v35 = vadd.f32 %v12034_v16, %v4936_v43 }
 0x605   : > { %v12009_v1 = vpop.f32.mrf.mxu0  ;;  %v12043_v53 = vpop.f32.mrf.mxu1 }
 0x606   : > { %v4950_v45 = vadd.f32 %v12009_v1, %v4817_v50 }
 0x607   : > { %v16192_v56 = vpop.f32.mrf.mxu0  ;;  %v16194_v62 = vpop.f32.mrf.mxu1 }
 0x608   : > { %18581 = vst [vmem:[#allocation19_spill] sm:$0xff] %v16192_v56  ;;  %18582 = vst [vmem:[#allocation25_spill] sm:$0xff] %v16194_v62  ;;  %v5083_v9 = vadd.f32 %v12037_v6, %v4950_v45 }
 0x60b   : > { %v12012_v58 = vpop.f32.mrf.mxu0  ;;  %v12090_v8 = vpop.f32.mrf.mxu1 }
 0x60c   : > { %v4964_v49 = vadd.f32 %v12012_v58, %v4829_v20 }
 0x60d   : > { %v16196_v22 = vpop.f32.mrf.mxu0  ;;  %v16198_v18 = vpop.f32.mrf.mxu1 }
 0x60e   : > { %18583 = vst [vmem:[#allocation47_spill] sm:$0xff] %v16196_v22  ;;  %v5099_v21 = vadd.f32 %v12040_v32, %v4964_v49  ;;  %18584 = vst [vmem:[#allocation48_spill] sm:$0xff] %v16198_v18 }
 0x60f   : > { %v12093_v60 = vpop.f32.mrf.mxu1 }
 0x610   : > { %v12015_v33 = vpop.f32.mrf.mxu0 }
 0x611   : > { %v4978_v7 = vadd.f32 %v12015_v33, %v4841_v47  ;;  %v16202_v2 = vpop.f32.mrf.mxu1 }
 0x612   : > { %v16200_v39 = vpop.f32.mrf.mxu0  ;;  %18586 = vst [vmem:[#allocation67_spill] sm:$0xff] %v16202_v2 }
 0x613   : > { %18585 = vst [vmem:[#allocation51_spill] sm:$0xff] %v16200_v39  ;;  %v5115_v54 = vadd.f32 %v12043_v53, %v4978_v7 }
 0x614   : > { %v12096_v52 = vpop.f32.mrf.mxu1 }
 0x615   : > { %v12062_v0 = vpop.f32.mrf.mxu0 }
 0x616   : > { %v5216_v41 = vadd.f32 %v12062_v0, %v5067_v35  ;;  %v16212_v28 = vpop.f32.mrf.mxu1 }
 0x617   : > { %v16204_v23 = vpop.f32.mrf.mxu0  ;;  %18591 = vst [vmem:[#allocation17_spill] sm:$0xff] %v16212_v28 }
 0x618   : > { %18587 = vst [vmem:[#allocation62_spill] sm:$0xff] %v16204_v23  ;;  %v16206_v4 = vadd.f32 %v12090_v8, %v5216_v41 }
 0x619   : > { %v12065_v57 = vpop.f32.mrf.mxu0  ;;  %v12099_v15 = vpop.f32.mrf.mxu1 }
 0x61a   : > { %18588 = vst [vmem:[#allocation49_spill] sm:$0xff] %v16206_v4  ;;  %v5228_v48 = vadd.f32 %v12065_v57, %v5083_v9 }
 0x61b   : > { %v16208_v37 = vpop.f32.mrf.mxu0  ;;  %v16220_v30 = vpop.f32.mrf.mxu1 }
 0x61c   : > { %18589 = vst [vmem:[#allocation58_spill] sm:$0xff] %v16208_v37  ;;  %v16210_v61 = vadd.f32 %v12093_v60, %v5228_v48  ;;  %18595 = vst [vmem:[#allocation54_spill] sm:$0xff] %v16220_v30 }
 0x61d   : > { %v12068_v38 = vpop.f32.mrf.mxu0 }
 0x61e   : > { %18590 = vst [vmem:[#allocation44_spill] sm:$0xff] %v16210_v61  ;;  %v5240_v10 = vadd.f32 %v12068_v38, %v5099_v21 }
 0x61f   : > { %v16214_v46 = vpop.f32.mrf.mxu0 }
 0x620   : > { %18592 = vst [vmem:[#allocation60_spill] sm:$0xff] %v16214_v46  ;;  %v16216_v55 = vadd.f32 %v12096_v52, %v5240_v10 }
 0x621   : > { %v12071_v11 = vpop.f32.mrf.mxu0 }
 0x622   : > { %18593 = vst [vmem:[#allocation39_spill] sm:$0xff] %v16216_v55  ;;  %v5252_v19 = vadd.f32 %v12071_v11, %v5115_v54 }
 0x623   : > { %v16222_v13 = vpop.f32.mrf.mxu0 }
 0x624   : > { %v16218_v17 = vadd.f32 %v12099_v15, %v5252_v19  ;;  %18596 = vst [vmem:[#allocation33_spill] sm:$0xff] %v16222_v13 }
 0x626   : > { %18594 = vst [vmem:[#allocation53_spill] sm:$0xff] %v16218_v17 }
 0x62d   : > { %v12146_v51 = vpop.f32.mrf.mxu1 }
 0x62f   : > { %v5708_v63 = vpop.f32.mrf.mxu1 }
 0x631   : > { %v12149_v3 = vpop.f32.mrf.mxu1 }
 0x633   : > { %v5720_v40 = vpop.f32.mrf.mxu1 }
 0x635   : > { %v12118_v50 = vpop.f32.mrf.mxu0  ;;  %v12152_v20 = vpop.f32.mrf.mxu1 }
 0x636   : > { %v5715_v38 = vadd.f32 %v12146_v51, %v12118_v50 }
 0x637   : > { %v5527_v16 = vpop.f32.mrf.mxu0  ;;  %v5732_v6 = vpop.f32.mrf.mxu1 }
 0x638   : > { %v5709_v19 = vadd.f32 %v5708_v63, %v5527_v16 }
 0x639   : > { %v12121_v59 = vpop.f32.mrf.mxu0  ;;  %v12155_v31 = vpop.f32.mrf.mxu1 }
 0x63a   : > { %v5727_v17 = vadd.f32 %v12149_v3, %v12121_v59 }
 0x63b   : > { %v5547_v47 = vpop.f32.mrf.mxu0  ;;  %v5744_v43 = vpop.f32.mrf.mxu1 }
 0x63c   : > { %v5721_v55 = vadd.f32 %v5720_v40, %v5547_v47 }
 0x63d   : > { %v12124_v32 = vpop.f32.mrf.mxu0 }
 0x63e   : > { %v5739_v46 = vadd.f32 %v12152_v20, %v12124_v32 }
 0x63f   : > { %v5567_v35 = vpop.f32.mrf.mxu0 }
 0x640   : > { %v5733_v14 = vadd.f32 %v5732_v6, %v5567_v35 }
 0x641   : > { %v12127_v53 = vpop.f32.mrf.mxu0 }
 0x642   : > { %v5751_v16 = vadd.f32 %v12155_v31, %v12127_v53 }
 0x643   : > { %v5587_v9 = vpop.f32.mrf.mxu0 }
 0x644   : > { %v5745_v20 = vadd.f32 %v5744_v43, %v5587_v9 }
 0x64e   : > { %v12202_v1 = vpop.f32.mrf.mxu1 }
 0x650   : > { %v5968_v45 = vpop.f32.mrf.mxu1 }
 0x652   : > { %v12205_v58 = vpop.f32.mrf.mxu1 }
 0x654   : > { %v5984_v49 = vpop.f32.mrf.mxu1 }
 0x656   : > { %v12174_v8 = vpop.f32.mrf.mxu0  ;;  %v12208_v33 = vpop.f32.mrf.mxu1 }
 0x657   : > { %v5846_v15 = vadd.f32 %v12174_v8, %v5715_v38 }
 0x658   : > { %v5838_v21 = vpop.f32.mrf.mxu0  ;;  %v6000_v60 = vpop.f32.mrf.mxu1 }
 0x659   : > { %v5839_v13 = vadd.f32 %v5838_v21, %v5709_v19  ;;  %v5977_v61 = vadd.f32 %v12202_v1, %v5846_v15 }
 0x65a   : > { %v12177_v7 = vpop.f32.mrf.mxu0  ;;  %v12211_v0 = vpop.f32.mrf.mxu1 }
 0x65b   : > { %v5860_v62 = vadd.f32 %v12177_v7, %v5727_v17  ;;  %v5969_v4 = vadd.f32 %v5968_v45, %v5839_v13 }
 0x65c   : > { %v5852_v54 = vpop.f32.mrf.mxu0  ;;  %v6016_v57 = vpop.f32.mrf.mxu1 }
 0x65d   : > { %v5853_v39 = vadd.f32 %v5852_v54, %v5721_v55  ;;  %v5993_v63 = vadd.f32 %v12205_v58, %v5860_v62 }
 0x65e   : > { %v12180_v41 = vpop.f32.mrf.mxu0 }
 0x65f   : > { %v5874_v22 = vadd.f32 %v12180_v41, %v5739_v46  ;;  %v5985_v17 = vadd.f32 %v5984_v49, %v5853_v39 }
 0x660   : > { %v5866_v48 = vpop.f32.mrf.mxu0 }
 0x661   : > { %v5867_v8 = vadd.f32 %v5866_v48, %v5733_v14  ;;  %v6009_v55 = vadd.f32 %v12208_v33, %v5874_v22 }
 0x662   : > { %v12183_v10 = vpop.f32.mrf.mxu0 }
 0x663   : > { %v5888_v32 = vadd.f32 %v12183_v10, %v5751_v16  ;;  %v6001_v14 = vadd.f32 %v6000_v60, %v5867_v8  ;;  %v18600_v16 = vld [vmem:[#allocation38_spill] sm:$0xff]  ;;  %v18601_v8 = vld [vmem:[#allocation27_spill] sm:$0xff] }
 0x664   : > { %v5880_v28 = vpop.f32.mrf.mxu0 }
 0x665   : > { %v6025_v22 = vadd.f32 %v12211_v0, %v5888_v32 }
 0x66f   : > { %v12258_v52 = vpop.f32.mrf.mxu1 }
 0x671   : > { %v6240_v11 = vpop.f32.mrf.mxu1 }
 0x673   : > { %v12261_v30 = vpop.f32.mrf.mxu1 }
 0x675   : > { %v6252_v2 = vpop.f32.mrf.mxu1 }
 0x677   : > { %v12230_v34 = vpop.f32.mrf.mxu0  ;;  %v12264_v3 = vpop.f32.mrf.mxu1 }
 0x678   : > { %v6126_v37 = vadd.f32 %v12230_v34, %v5977_v61 }
 0x679   : > { %v6119_v51 = vpop.f32.mrf.mxu0 }
 0x67a   : > { %v6247_v50 = vadd.f32 %v12258_v52, %v6126_v37  ;;  %v6120_v36 = vadd.f32 %v6119_v51, %v5969_v4  ;;  %v5881_v37 = vadd.f32 %v5880_v28, %v5745_v20  ;;  %v6264_v4 = vpop.f32.mrf.mxu1  ;;  %v18597_v51 = vld [vmem:[#allocation50_spill] sm:$0xff] }
 0x67b   : > { %v12233_v59 = vpop.f32.mrf.mxu0 }
 0x67c   : > { %v6241_v21 = vadd.f32 %v6240_v11, %v6120_v36  ;;  %v6138_v40 = vadd.f32 %v12233_v59, %v5993_v63  ;;  %v6287_v47 = vmul.f32 0.125, %v6247_v50  ;;  %v6017_v9 = vadd.f32 %v6016_v57, %v5881_v37  ;;  %v18598_v50 = vld [vmem:[#allocation43_spill] sm:$0xff]  ;;  %v18599_v63 = vld [vmem:[#allocation46_spill] sm:$0xff] }
 0x67d   : > { %v6131_v1 = vpop.f32.mrf.mxu0 }
 0x67e   : > { %v6259_v34 = vadd.f32 %v12261_v30, %v6138_v40  ;;  %v6132_v61 = vadd.f32 %v6131_v1, %v5985_v17  ;;  %v6297_v46 = vsel %vm2669_vm0, %v6287_v47, -inf  ;;  %v6286_v13 = vmul.f32 0.125, %v6241_v21  ;;  %v12267_v30 = vpop.f32.mrf.mxu1 }
 0x67f   : > { %6298 = vmax.xlane.f32.xlu1 %v6297_v46  ;;  %v12236_v62 = vpop.f32.mrf.mxu0 }
 0x680   : > { %v6253_v6 = vadd.f32 %v6252_v2, %v6132_v61  ;;  %v6150_v31 = vadd.f32 %v12236_v62, %v6009_v55  ;;  %v6294_v36 = vsel %vm2669_vm0, %v6286_v13, -inf  ;;  %v6289_v39 = vmul.f32 0.125, %v6259_v34  ;;  %v6276_v48 = vpop.f32.mrf.mxu1 }
 0x681   : > { %v6143_v35 = vpop.f32.mrf.mxu0  ;;  %6295 = vmax.xlane.f32.xlu0 %v6294_v36 }
 0x682   : > { %v6271_v43 = vadd.f32 %v12264_v3, %v6150_v31  ;;  %v6144_v53 = vadd.f32 %v6143_v35, %v6001_v14  ;;  %v6303_v58 = vsel %vm2669_vm0, %v6289_v39, -inf  ;;  %v6288_v7 = vmul.f32 0.125, %v6253_v6  ;;  %v18602_v3 = vld [vmem:[#allocation26_spill] sm:$0xff] }
 0x683   : > { %v12239_v45 = vpop.f32.mrf.mxu0 }
 0x684   : > { %v6265_v28 = vadd.f32 %v6264_v4, %v6144_v53  ;;  %v6162_v49 = vadd.f32 %v12239_v45, %v6025_v22  ;;  %v6291_v33 = vmul.f32 0.125, %v6271_v43  ;;  %v6300_v0 = vsel %vm2669_vm0, %v6288_v7, -inf }
 0x685   : > { %v6155_v60 = vpop.f32.mrf.mxu0  ;;  %6304 = vmax.xlane.f32.xlu0 %v6303_v58 }
 0x686   : > { %v6283_v2 = vadd.f32 %v12267_v30, %v6162_v49  ;;  %v6156_v54 = vadd.f32 %v6155_v60, %v6017_v9  ;;  %v6309_v41 = vsel %vm2669_vm0, %v6291_v33, -inf  ;;  %v6290_v10 = vmul.f32 0.125, %v6265_v28 }
 0x687   : > { %6310 = vmax.xlane.f32.xlu1 %v6309_v41 }
 0x688   : > { %v6277_v52 = vadd.f32 %v6276_v48, %v6156_v54  ;;  %v6293_v38 = vmul.f32 0.125, %v6283_v2  ;;  %v6306_v11 = vsel %vm2669_vm0, %v6290_v10, -inf }
 0x689   : > { %6301 = vmax.xlane.f32.xlu0 %v6300_v0 }
 0x68a   : > { %v6315_v57 = vsel %vm2669_vm0, %v6293_v38, -inf  ;;  %v6292_v19 = vmul.f32 0.125, %v6277_v52 }
 0x68b   : > { %6316 = vmax.xlane.f32.xlu1 %v6315_v57 }
 0x68c   : > { %v6312_v15 = vsel %vm2669_vm0, %v6292_v19, -inf }
 0x68d   : > { %6307 = vmax.xlane.f32.xlu0 %v6306_v11 }
 0x691   : > { %6313 = vmax.xlane.f32.xlu0 %v6312_v15 }
 0x69c   : > { %6402 = vrot.lane.b32.xlu1 %v18597_v51, %s13337_s17 }
 0x6a0   : > { %6400 = vrot.lane.b32.xlu1 %v18598_v50, %s13337_s17 }
 0x6a4   : > { %6398 = vrot.lane.b32.xlu1 %v18599_v63, %s13337_s17 }
 0x6a7   : > { %6404 = vrot.lane.b32.xlu0 %v18600_v16, %s13337_s17 }
 0x6a8   : > { %6394 = vrot.lane.b32.xlu1 %v18601_v8, %s13337_s17 }
 0x6ab   : > { %6396 = vrot.lane.b32.xlu0 %v18602_v3, %s13337_s17 }
 0x708   : > { %v6299_v59 = vpop.xlane.xlu1 %6298 }
 0x709   : > { %v6319_v21 = vsub.f32 %v6287_v47, %v6299_v59 }
 0x70a   : > { %v6296_v40 = vpop.xlane.xlu0 %6295 }
 0x70b   : > { %v6328_v17 = vmul.f32 1.442695, %v6319_v21  ;;  %v6318_v20 = vsub.f32 %v6286_v13, %v6296_v40 }
 0x70d   : > { %13136 = vpow2.f32 %v6328_v17  ;;  %v6326_v32 = vmul.f32 1.442695, %v6318_v20 }
 0x70e   : > { %v6305_v1 = vpop.xlane.xlu0 %6304 }
 0x70f   : > { %13138 = vpow2.f32 %v6326_v32  ;;  %v6321_v55 = vsub.f32 %v6289_v39, %v6305_v1 }
 0x710   : > { %v6311_v34 = vpop.xlane.xlu1 %6310 }
 0x711   : > { %v6332_v61 = vmul.f32 1.442695, %v6321_v55  ;;  %v6323_v46 = vsub.f32 %v6291_v33, %v6311_v34 }
 0x712   : > { %v6302_v37 = vpop.xlane.xlu0 %6301 }
 0x713   : > { %13140 = vpow2.f32 %v6332_v61  ;;  %v6336_v4 = vmul.f32 1.442695, %v6323_v46  ;;  %v6320_v62 = vsub.f32 %v6288_v7, %v6302_v37 }
 0x714   : > { %v6317_v14 = vpop.xlane.xlu1 %6316 }
 0x715   : > { %13142 = vpow2.f32 %v6336_v4  ;;  %v6330_v6 = vmul.f32 1.442695, %v6320_v62  ;;  %v6325_v31 = vsub.f32 %v6293_v38, %v6317_v14 }
 0x716   : > { %v6308_v47 = vpop.xlane.xlu0 %6307 }
 0x717   : > { %13144 = vpow2.f32 %v6330_v6  ;;  %v6340_v36 = vmul.f32 1.442695, %v6325_v31  ;;  %v6322_v13 = vsub.f32 %v6290_v10, %v6308_v47 }
 0x718   : > { %v6403_v35 = vpop.permute.xlu1 %6402 }
 0x719   : > { %13146 = vpow2.f32 %v6340_v36  ;;  %v6334_v43 = vmul.f32 1.442695, %v6322_v13  ;;  %v16246_v22 = vand.u32 4294901760, %v6403_v35 }
 0x71a   : > { %v16244_v53 = vpop.eup %13136  ;;  %v6314_v39 = vpop.xlane.xlu0 %6313 }
 0x71b   : > { %13148 = vpow2.f32 %v6334_v43  ;;  %v6324_v30 = vsub.f32 %v6292_v19, %v6314_v39  ;;  %v6345_v45 = vsel %vm2669_vm0, %v16244_v53, 0.0  ;;  %v16257_v60 = vsub.f32 %v6403_v35, %v16246_v22 }
 0x71c   : > { %v16250_v9 = vpop.eup %13138  ;;  %6346 = vadd.xlane.f32.xlu1 %v6345_v45  ;;  %v6401_v58 = vpop.permute.xlu1 %6400  ;;  %v18603_v45 = vld [vmem:[#allocation57_spill] sm:$0xff] }
 0x71d   : > { %v6338_v28 = vmul.f32 1.442695, %v6324_v30  ;;  %v16252_v49 = vand.u32 4294901760, %v6401_v58  ;;  %v6342_v33 = vsel %vm2669_vm0, %v16250_v9, 0.0  ;;  %v16287_v51 = vand.u32 4294901760, %v16257_v60 }
 0x71e   : > { %6343 = vadd.xlane.f32.xlu0 %v6342_v33  ;;  %v6405_v7 = vpop.permute.xlu0 %6404 }
 0x71f   : > { %13150 = vpow2.f32 %v6338_v28  ;;  %v16259_v2 = vand.u32 4294901760, %v6405_v7  ;;  %v16264_v41 = vsub.f32 %v6401_v58, %v16252_v49  ;;  %v6618_v1 = vsub.f32 %v16257_v60, %v16287_v51  ;;  %v18604_v58 = vld [vmem:[#allocation41_spill] sm:$0xff] }
 0x720   : > { %v16261_v54 = vpop.eup %13140  ;;  %v6399_v48 = vpop.permute.xlu1 %6398 }
 0x721   : > { %v16267_v52 = vsub.f32 %v6405_v7, %v16259_v2  ;;  %v16269_v0 = vand.u32 4294901760, %v6399_v48  ;;  %12268 = vmatprep.subr.mxu0 %v16259_v2  ;;  %v6351_v38 = vsel %vm2669_vm0, %v16261_v54, 0.0  ;;  %v16295_v8 = vand.u32 4294901760, %v16264_v41 }
 0x722   : > { %v16274_v10 = vpop.eup %13142  ;;  %6352 = vadd.xlane.f32.xlu1 %v6351_v38  ;;  %12269 = vmatpush3.msra.mxu0 %v16259_v2  ;;  %v6397_v57 = vpop.permute.xlu0 %6396  ;;  %v6619_v62 = vand.u32 4294901760, %v6618_v1 }
 0x723   : > { %v16278_v11 = vsub.f32 %v6399_v48, %v16269_v0  ;;  %v16280_v19 = vand.u32 4294901760, %v6397_v57  ;;  %12270 = vmatprep.subr.mxu0 %v16246_v22  ;;  %v16284_v15 = vand.u32 4294901760, %v16267_v52  ;;  %v6357_v16 = vsel %vm2669_vm0, %v16274_v10, 0.0 }
 0x724   : > { %v16289_v50 = vpop.eup %13144  ;;  %v6395_v63 = vpop.permute.xlu1 %6394  ;;  %12271 = vmatpush3.msra.mxu0 %v16246_v22  ;;  %v6625_v37 = vsub.f32 %v16264_v41, %v16295_v8 }
 0x725   : > { %v16298_v3 = vsub.f32 %v6397_v57, %v16280_v19  ;;  %v16300_v59 = vand.u32 4294901760, %v6395_v63  ;;  %12272 = vmatprep.subr.mxu0 %v16252_v49  ;;  %v6348_v21 = vsel %vm2669_vm0, %v16289_v50, 0.0  ;;  %v6611_v40 = vsub.f32 %v16267_v52, %v16284_v15 }
 0x726   : > { %v16307_v17 = vpop.eup %13146  ;;  %6358 = vadd.xlane.f32.xlu1 %v6357_v16  ;;  %6349 = vadd.xlane.f32.xlu0 %v6348_v21  ;;  %v16316_v55 = vand.u32 4294901760, %v16278_v11  ;;  %v6626_v47 = vand.u32 4294901760, %v6625_v37 }
 0x727   : > { %v16310_v20 = vsub.f32 %v6395_v63, %v16300_v59  ;;  %12273 = vmatpush3.msra.mxu0 %v16252_v49  ;;  %v6612_v32 = vand.u32 4294901760, %v6611_v40  ;;  %v6363_v61 = vsel %vm2669_vm0, %v16307_v17, 0.0  ;;  %v16329_v4 = vand.u32 4294901760, %v16298_v3 }
 0x728   : > { %v16318_v34 = vpop.eup %13148  ;;  %12274 = vmatprep.subr.mxu0 %v16269_v0  ;;  %v6632_v14 = vsub.f32 %v16278_v11, %v16316_v55 }
 0x729   : > { %12275 = vmatpush3.msra.mxu0 %v16269_v0  ;;  %12296 = vmatprep.subr.mxu1 %v6612_v32  ;;  %v6354_v46 = vsel %vm2669_vm0, %v16318_v34, 0.0  ;;  %v16336_v6 = vand.u32 4294901760, %v16310_v20  ;;  %v6639_v13 = vsub.f32 %v16298_v3, %v16329_v4 }
 0x72a   : > { %12276 = vmatprep.subr.mxu0 %v16280_v19  ;;  %6364 = vadd.xlane.f32.xlu1 %v6363_v61  ;;  %v6633_v35 = vand.u32 4294901760, %v6632_v14 }
 0x72b   : > { %6355 = vadd.xlane.f32.xlu0 %v6354_v46  ;;  %12277 = vmatpush3.msra.mxu0 %v16280_v19  ;;  %v6646_v43 = vsub.f32 %v16310_v20, %v16336_v6  ;;  %v6640_v39 = vand.u32 4294901760, %v6639_v13 }
 0x72c   : > { %v16338_v31 = vpop.eup %13150  ;;  %12297 = vmatpush3.msra.mxu1 %v6612_v32  ;;  %12278 = vmatprep.subr.mxu0 %v16300_v59 }
 0x72d   : > { %12298 = vmatprep.subr.mxu1 %v6619_v62  ;;  %12279 = vmatpush3.msra.mxu0 %v16300_v59  ;;  %v6360_v36 = vsel %vm2669_vm0, %v16338_v31, 0.0  ;;  %v6647_v30 = vand.u32 4294901760, %v6646_v43 }
 0x72e   : > { %12299 = vmatpush3.msra.mxu1 %v6619_v62 }
 0x72f   : > { %12300 = vmatprep.subr.mxu1 %v6626_v47  ;;  %6361 = vadd.xlane.f32.xlu0 %v6360_v36 }
 0x730   : > { %12301 = vmatpush3.msra.mxu1 %v6626_v47 }
 0x731   : > { %12302 = vmatprep.subr.mxu1 %v6633_v35 }
 0x732   : > { %12303 = vmatpush3.msra.mxu1 %v6633_v35 }
 0x733   : > { %12304 = vmatprep.subr.mxu1 %v6640_v39 }
 0x734   : > { %12305 = vmatpush3.msra.mxu1 %v6640_v39 }
 0x735   : > { %12306 = vmatprep.subr.mxu1 %v6647_v30 }
 0x736   : > { %12307 = vmatpush3.msra.mxu1 %v6647_v30 }
 0x73b   : > { %6390 = vrot.lane.b32.xlu1 %v18603_v45, %s13337_s17 }
 0x745   : > { %6392 = vrot.lane.b32.xlu0 %v18604_v58, %s13337_s17  ;;  %s17890_s17 = scalar_lea.vmem [#allocation7], %s10355_s30  ;;  %s13266_s30 = scalar_lea.vmem %s13265_s27, 2048 }
 0x746   : > { %s10263_s20 = sshll.u32 %s17890_s17, 4  ;;  %s17910_s20 = int_to_ptr.vmem [resolvable:$true] %s10263_s20 }
 0x747   : > { %s13260_s25 = scalar_lea.vmem %s17910_s20, 1024  ;;  %p13267_p11 = scmp.lt.s32.totalorder %s17910_s20, %s13265_s27 }
 0x748   : > { %p13261_p12 = scmp.ne.s32.totalorder %s17910_s20, %s13260_s25  ;;  %p13268_p0 = scmp.lt.s32.totalorder %s13266_s30, %s13260_s25 }
 0x74a   : > { %p13262_p7 = pnand %p13261_p12, %p13444_p5  ;;  %p13269_p1 = por %p13268_p0, %p13267_p11 }
 0x74c   : > { %p13263_p8 = pneg %p13262_p7 }
 0x74e   : > { %p13270_p3 = pnand %p13269_p1, %p13263_p8 }
 0x7a5   : > { %v6347_v28 = vpop.xlane.xlu1 %6346 }
 0x7a6   : > { %13152 = vrcp.f32 %v6347_v28 }
 0x7a7   : > { %v6344_v33 = vpop.xlane.xlu0 %6343 }
 0x7a8   : > { %13154 = vrcp.f32 %v6344_v33 }
 0x7ab   : > { %v6353_v7 = vpop.xlane.xlu1 %6352 }
 0x7ac   : > { %13156 = vrcp.f32 %v6353_v7 }
 0x7af   : > { %v6359_v48 = vpop.xlane.xlu1 %6358  ;;  %v6350_v38 = vpop.xlane.xlu0 %6349 }
 0x7b0   : > { %13158 = vrcp.f32 %v6359_v48 }
 0x7b1   : > { %13160 = vrcp.f32 %v6350_v38 }
 0x7b3   : > { %v13153_v57 = vpop.eup %13152  ;;  %v6365_v63 = vpop.xlane.xlu1 %6364 }
 0x7b4   : > { %v6369_v16 = vmul.f32 %v13153_v57, %v16244_v53  ;;  %13162 = vrcp.f32 %v6365_v63  ;;  %v6356_v21 = vpop.xlane.xlu0 %6355 }
 0x7b5   : > { %v13155_v40 = vpop.eup %13154  ;;  %13164 = vrcp.f32 %v6356_v21 }
 0x7b6   : > { %v6418_v32 = vsel %vm2669_vm0, %v6369_v16, 0  ;;  %v6367_v1 = vmul.f32 %v13155_v40, %v16250_v9 }
 0x7b7   : > { %v16355_v61 = vand.u32 4294901760, %v6418_v32  ;;  %v6391_v46 = vpop.permute.xlu1 %6390 }
 0x7b8   : > { %v16357_v37 = vand.u32 4294901760, %v6391_v46  ;;  %v6362_v62 = vpop.xlane.xlu0 %6361  ;;  %v6415_v14 = vsel %vm2669_vm0, %v6367_v1, 0 }
 0x7b9   : > { %v13157_v47 = vpop.eup %13156  ;;  %v16361_v36 = vsub.f32 %v6418_v32, %v16355_v61  ;;  %13166 = vrcp.f32 %v6362_v62  ;;  %v16363_v53 = vand.u32 4294901760, %v6415_v14 }
 0x7ba   : > { %v6373_v13 = vmul.f32 %v13157_v47, %v16261_v54  ;;  %v16367_v35 = vsub.f32 %v6391_v46, %v16357_v37 }
 0x7bb   : > { %12312 = vmatprep.mubr.f32.mxu1 %v16363_v53  ;;  %v16371_v9 = vsub.f32 %v6415_v14, %v16363_v53  ;;  %v6523_v43 = vand.u32 4294901760, %v16361_v36 }
 0x7bc   : > { %v6393_v39 = vpop.permute.xlu0 %6392  ;;  %v6424_v30 = vsel %vm2669_vm0, %v6373_v13, 0  ;;  %v16392_v63 = vand.u32 4294901760, %v16367_v35 }
 0x7bd   : > { %v13159_v45 = vpop.eup %13158  ;;  %v16375_v58 = vand.u32 4294901760, %v6393_v39  ;;  %v6513_v28 = vand.u32 4294901760, %v16371_v9  ;;  %v16378_v33 = vand.u32 4294901760, %v6424_v30  ;;  %v6524_v48 = vsub.f32 %v16361_v36, %v6523_v43 }
 0x7be   : > { %v13161_v54 = vpop.eup %13160  ;;  %v6377_v7 = vmul.f32 %v13159_v45, %v16274_v10 }
 0x7bf   : > { %v16385_v38 = vsub.f32 %v6393_v39, %v16375_v58  ;;  %12280 = vmatprep.subr.mxu0 %v16375_v58  ;;  %v6514_v57 = vsub.f32 %v16371_v9, %v6513_v28  ;;  %v6371_v16 = vmul.f32 %v13161_v54, %v16289_v50  ;;  %v16397_v10 = vsub.f32 %v6424_v30, %v16378_v33 }
 0x7c0   : > { %12281 = vmatpush3.msra.mxu0 %v16375_v58  ;;  %v6430_v21 = vsel %vm2669_vm0, %v6377_v7, 0  ;;  %v6525_v50 = vand.u32 4294901760, %v6524_v48  ;;  %v6660_v30 = vsub.f32 %v16367_v35, %v16392_v63 }
 0x7c1   : > { %v13163_v40 = vpop.eup %13162  ;;  %12282 = vmatprep.subr.mxu0 %v16357_v37  ;;  %v6515_v32 = vand.u32 4294901760, %v6514_v57  ;;  %v16402_v1 = vand.u32 4294901760, %v16385_v38  ;;  %v6421_v46 = vsel %vm2669_vm0, %v6371_v16, 0  ;;  %v16409_v13 = vand.u32 4294901760, %v6430_v21 }
 0x7c2   : > { %v13165_v62 = vpop.eup %13164  ;;  %v6381_v14 = vmul.f32 %v13163_v40, %v16307_v17  ;;  %12283 = vmatpush3.msra.mxu0 %v16357_v37  ;;  %v16407_v47 = vand.u32 4294901760, %v6421_v46  ;;  %v6543_v54 = vand.u32 4294901760, %v16397_v10 }
 0x7c3   : > { %12324 = vmatprep.subr.mxu0 %v16267_v52  ;;  %12284 = vmatprep.mubr.f32.mxu0 %v6515_v32  ;;  %v6653_v39 = vsub.f32 %v16385_v38, %v16402_v1  ;;  %v6375_v45 = vmul.f32 %v13165_v62, %v16318_v34  ;;  %v16429_v34 = vsub.f32 %v6430_v21, %v16409_v13 }
 0x7c4   : > { %12285 = vmatmul.mubr.f32.vlgmr.msra.gmra.mxu0 %v6525_v50  ;;  %v16418_v17 = vsub.f32 %v6421_v46, %v16407_v47  ;;  %v6436_v57 = vsel %vm2669_vm0, %v6381_v14, 0  ;;  %v6661_v46 = vand.u32 4294901760, %v6660_v30  ;;  %v6544_v14 = vsub.f32 %v16397_v10, %v6543_v54 }
 0x7c5   : > { %12325 = vmatpush3.msra.mxu0 %v16267_v52  ;;  %v6654_v7 = vand.u32 4294901760, %v6653_v39  ;;  %v6427_v48 = vsel %vm2669_vm0, %v6375_v45, 0  ;;  %v16443_v50 = vand.u32 4294901760, %v6436_v57  ;;  %v6563_v30 = vand.u32 4294901760, %v16429_v34 }
 0x7c6   : > { %v13167_v16 = vpop.eup %13166  ;;  %12326 = vmatprep.subr.mxu0 %v16257_v60  ;;  %v6533_v40 = vand.u32 4294901760, %v16418_v17  ;;  %v16426_v32 = vand.u32 4294901760, %v6427_v48 }
 0x7c7   : > { %12308 = vmatprep.subr.mxu1 %v6654_v7  ;;  %12327 = vmatpush3.msra.mxu0 %v16257_v60  ;;  %v6379_v52 = vmul.f32 %v13167_v16, %v16338_v31  ;;  %v16462_v16 = vsub.f32 %v6436_v57, %v16443_v50 }
 0x7c8   : > { %12309 = vmatpush3.msra.mxu1 %v6654_v7  ;;  %12328 = vmatprep.subr.mxu0 %v16264_v41  ;;  %v6534_v62 = vsub.f32 %v16418_v17, %v6533_v40  ;;  %v16441_v21 = vsub.f32 %v6427_v48, %v16426_v32 }
 0x7c9   : > { %12310 = vmatprep.subr.mxu1 %v6661_v46  ;;  %12329 = vmatpush3.msra.mxu0 %v16264_v41  ;;  %v6433_v60 = vsel %vm2669_vm0, %v6379_v52, 0  ;;  %v6545_v41 = vand.u32 4294901760, %v6544_v14 }
 0x7ca   : > { %12311 = vmatpush3.msra.mxu1 %v6661_v46  ;;  %12330 = vmatprep.subr.mxu0 %v16278_v11  ;;  %v6535_v31 = vand.u32 4294901760, %v6534_v62  ;;  %v6553_v39 = vand.u32 4294901760, %v16441_v21  ;;  %v16450_v45 = vand.u32 4294901760, %v6433_v60  ;;  %v6564_v46 = vsub.f32 %v16429_v34, %v6563_v30 }
 0x7cb   : > { %12313 = vmatmul.mubr.f32.vlgmr.msra.gmra.mxu1 %v16355_v61  ;;  %12331 = vmatpush3.msra.mxu0 %v16278_v11  ;;  %v6583_v62 = vand.u32 4294901760, %v16462_v16 }
 0x7cc   : > { %12352 = vmatprep.subr.mxu1 %v16259_v2  ;;  %12287 = vmatprep.mubr.f32.mxu0 %v6535_v31  ;;  %v6554_v7 = vsub.f32 %v16441_v21, %v6553_v39  ;;  %v16459_v48 = vsub.f32 %v6433_v60, %v16450_v45 }
 0x7cd   : > { %12315 = vmatprep.mubr.f32.mxu1 %v16407_v47  ;;  %12332 = vmatprep.subr.mxu0 %v16298_v3  ;;  %v6584_v60 = vsub.f32 %v16462_v16, %v6583_v62 }
 0x7ce   : > { %12353 = vmatpush3.msra.mxu1 %v16259_v2  ;;  %12288 = vmatmul.mubr.f32.gmra.mxu0 %v6545_v41  ;;  %v6555_v11 = vand.u32 4294901760, %v6554_v7  ;;  %v6573_v52 = vand.u32 4294901760, %v16459_v48 }
 0x7cf   : > { %12333 = vmatpush3.msra.mxu0 %v16298_v3  ;;  %12354 = vmatprep.subr.mxu1 %v16246_v22  ;;  %v6565_v3 = vand.u32 4294901760, %v6564_v46 }
 0x7d0   : > { %12334 = vmatprep.subr.mxu0 %v16310_v20  ;;  %12355 = vmatpush3.msra.mxu1 %v16246_v22  ;;  %v6574_v57 = vsub.f32 %v16459_v48, %v6573_v52 }
 0x7d1   : > { %12316 = vmatmul.mubr.f32.gmra.mxu1 %v16378_v33  ;;  %12335 = vmatpush3.msra.mxu0 %v16310_v20  ;;  %v6585_v20 = vand.u32 4294901760, %v6584_v60 }
 0x7d2   : > { %12356 = vmatprep.subr.mxu1 %v16252_v49  ;;  %12290 = vmatprep.mubr.f32.mxu0 %v6555_v11  ;;  %v6575_v14 = vand.u32 4294901760, %v6574_v57 }
 0x7d3   : > { %12318 = vmatprep.mubr.f32.mxu1 %v16426_v32  ;;  %12336 = vmatprep.subr.mxu0 %v16385_v38 }
 0x7d4   : > { %12357 = vmatpush3.msra.mxu1 %v16252_v49  ;;  %12291 = vmatmul.mubr.f32.gmra.mxu0 %v6565_v3 }
 0x7d5   : > { %12337 = vmatpush3.msra.mxu0 %v16385_v38  ;;  %12358 = vmatprep.subr.mxu1 %v16269_v0 }
 0x7d6   : > { %12338 = vmatprep.subr.mxu0 %v16367_v35  ;;  %12359 = vmatpush3.msra.mxu1 %v16269_v0 }
 0x7d7   : > { %12319 = vmatmul.mubr.f32.gmra.mxu1 %v16409_v13  ;;  %12339 = vmatpush3.msra.mxu0 %v16367_v35 }
 0x7d8   : > { %12360 = vmatprep.subr.mxu1 %v16280_v19  ;;  %12293 = vmatprep.mubr.f32.mxu0 %v6575_v14 }
 0x7d9   : > { %12321 = vmatprep.mubr.f32.mxu1 %v16450_v45  ;;  %12361 = vmatpush3.msra.mxu1 %v16280_v19 }
 0x7da   : > { %12380 = vmatprep.subr.mxu0 %v16284_v15  ;;  %12294 = vmatmul.mubr.f32.gmra.mxu0 %v6585_v20 }
 0x7db   : > { %12362 = vmatprep.subr.mxu1 %v16300_v59  ;;  %12340 = vmatprep.mubr.f32.mxu0 %v16371_v9 }
 0x7dc   : > { %12363 = vmatpush3.msra.mxu1 %v16300_v59 }
 0x7dd   : > { %12322 = vmatmul.mubr.f32.gmra.mxu1 %v16443_v50  ;;  %12364 = vmatprep.subr.mxu1 %v16375_v58 }
 0x7de   : > { %12365 = vmatpush3.msra.mxu1 %v16375_v58  ;;  %12368 = vmatprep.mubr.f32.mxu1 %v6513_v28  ;;  %v2648_v28 = vld [vmem:[#allocation5 + $0x50] sm:$0xff] }
 0x7df   : > { %12341 = vmatmul.mubr.f32.vlgmr.msra.gmra.mxu0 %v16361_v36  ;;  %12366 = vmatprep.subr.mxu1 %v16357_v37  ;;  %v2649_v36 = vld [vmem:[#allocation5 + $0x58] sm:$0xff] }
 0x7e0   : > { %12381 = vmatpush3.msra.mxu0 %v16284_v15  ;;  %12343 = vmatprep.mubr.f32.mxu0 %v16418_v17  ;;  %v2651_v15 = vld [vmem:[#allocation5 + $0x68] sm:$0xff] }
 0x7e1   : > { %12367 = vmatpush3.msra.mxu1 %v16357_v37  ;;  %12382 = vmatprep.subr.mxu0 %v16287_v51 }
 0x7e2   : > { %12369 = vmatmul.mubr.f32.vlgmr.msra.gmra.mxu1 %v6523_v43  ;;  %12383 = vmatpush3.msra.mxu0 %v16287_v51 }
 0x7e3   : > { %12408 = vmatprep.subr.mxu1 %v16259_v2  ;;  %12371 = vmatprep.mubr.f32.mxu1 %v6533_v40 }
 0x7e4   : > { %12384 = vmatprep.subr.mxu0 %v16295_v8  ;;  %12409 = vmatpush3.msra.mxu1 %v16259_v2  ;;  %v2652_v2 = vld [vmem:[#allocation5 + $0x70] sm:$0xff] }
 0x7e5   : > { %12344 = vmatmul.mubr.f32.gmra.mxu0 %v16397_v10  ;;  %12410 = vmatprep.subr.mxu1 %v16246_v22  ;;  %v16624_v10 = vand.u32 4294901760, %v2648_v28 }
 0x7e6   : > { %12385 = vmatpush3.msra.mxu0 %v16295_v8  ;;  %12346 = vmatprep.mubr.f32.mxu0 %v16441_v21 }
 0x7e7   : > { %12386 = vmatprep.subr.mxu0 %v16316_v55  ;;  %12411 = vmatpush3.msra.mxu1 %v16246_v22  ;;  %v2653_v22 = vld [vmem:[#allocation5 + $0x78] sm:$0xff] }
 0x7e8   : > { %12372 = vmatmul.mubr.f32.gmra.mxu1 %v6543_v54  ;;  %12387 = vmatpush3.msra.mxu0 %v16316_v55  ;;  %v2650_v55 = vld [vmem:[#allocation5 + $0x60] sm:$0xff]  ;;  %v16633_v54 = vsub.f32 %v2648_v28, %v16624_v10 }
 0x7e9   : > { %12412 = vmatprep.subr.mxu1 %v16252_v49  ;;  %12374 = vmatprep.mubr.f32.mxu1 %v6553_v39 }
 0x7ea   : > { %12388 = vmatprep.subr.mxu0 %v16329_v4  ;;  %12413 = vmatpush3.msra.mxu1 %v16252_v49  ;;  %v16576_v49 = vand.u32 4294901760, %v2653_v22 }
 0x7eb   : > { %12347 = vmatmul.mubr.f32.gmra.mxu0 %v16429_v34  ;;  %12414 = vmatprep.subr.mxu1 %v16269_v0  ;;  %v2646_v34 = vld [vmem:[#allocation5 + $0x40] sm:$0xff] }
 0x7ec   : > { %12389 = vmatpush3.msra.mxu0 %v16329_v4  ;;  %12349 = vmatprep.mubr.f32.mxu0 %v16459_v48  ;;  %v16648_v39 = vand.u32 4294901760, %v2646_v34 }
 0x7ed   : > { %12390 = vmatprep.subr.mxu0 %v16336_v6  ;;  %12415 = vmatpush3.msra.mxu1 %v16269_v0  ;;  %v16579_v0 = vsub.f32 %v2653_v22, %v16576_v49 }
 0x7ee   : > { %12375 = vmatmul.mubr.f32.gmra.mxu1 %v6563_v30  ;;  %12391 = vmatpush3.msra.mxu0 %v16336_v6  ;;  %v16660_v7 = vsub.f32 %v2646_v34, %v16648_v39 }
 0x7ef   : > { %12416 = vmatprep.subr.mxu1 %v16280_v19  ;;  %12377 = vmatprep.mubr.f32.mxu1 %v6573_v52  ;;  %v16586_v51 = vand.u32 4294901760, %v16579_v0 }
 0x7f0   : > { %12392 = vmatprep.subr.mxu0 %v16402_v1  ;;  %12417 = vmatpush3.msra.mxu1 %v16280_v19  ;;  %v16581_v19 = vand.u32 4294901760, %v2652_v2  ;;  %v16667_v46 = vand.u32 4294901760, %v16660_v7 }
 0x7f1   : > { %12350 = vmatmul.mubr.f32.gmra.mxu0 %v16462_v16  ;;  %12418 = vmatprep.subr.mxu1 %v16300_v59  ;;  %v7473_v4 = vsub.f32 %v16579_v0, %v16586_v51 }
 0x7f2   : > { %12393 = vmatpush3.msra.mxu0 %v16402_v1  ;;  %12396 = vmatprep.mubr.f32.mxu0 %v16363_v53  ;;  %v16589_v8 = vsub.f32 %v2652_v2, %v16581_v19  ;;  %18611 = vst [vmem:[#allocation56_spill] sm:$0xff] %v16667_v46  ;;  %v7522_v57 = vsub.f32 %v16660_v7, %v16667_v46 }
 0x7f3   : > { %12394 = vmatprep.subr.mxu0 %v16392_v63  ;;  %12419 = vmatpush3.msra.mxu1 %v16300_v59  ;;  %v16591_v59 = vand.u32 4294901760, %v2651_v15 }
 0x7f4   : > { %12378 = vmatmul.mubr.f32.gmra.mxu1 %v6583_v62  ;;  %12395 = vmatpush3.msra.mxu0 %v16392_v63  ;;  %v16598_v6 = vand.u32 4294901760, %v16589_v8  ;;  %v7523_v62 = vand.u32 4294901760, %v7522_v57 }
 0x7f5   : > { %12420 = vmatprep.subr.mxu1 %v16375_v58  ;;  %12424 = vmatprep.mubr.f32.mxu1 %v16363_v53  ;;  %v7474_v53 = vand.u32 4294901760, %v7473_v4 }
 0x7f6   : > { %12421 = vmatpush3.msra.mxu1 %v16375_v58  ;;  %12397 = vmatmul.mubr.f32.vlgmr.msra.gmra.mxu0 %v16355_v61  ;;  %18605 = vst [vmem:[#allocation52_spill] sm:$0xff] %v16598_v6  ;;  %v7480_v35 = vsub.f32 %v16589_v8, %v16598_v6  ;;  %v16616_v58 = vand.u32 4294901760, %v2649_v36 }
 0x7f7   : > { %12422 = vmatprep.subr.mxu1 %v16357_v37  ;;  %12399 = vmatprep.mubr.f32.mxu0 %v16407_v47 }
 0x7f8   : > { %12423 = vmatpush3.msra.mxu1 %v16357_v37  ;;  %12436 = vmatprep.subr.mxu0 %v16576_v49  ;;  %v16603_v37 = vand.u32 4294901760, %v2650_v55  ;;  %v16627_v1 = vsub.f32 %v2649_v36, %v16616_v58 }
 0x7f9   : > { %12425 = vmatmul.mubr.f32.vlgmr.msra.gmra.mxu1 %v16355_v61  ;;  %12437 = vmatpush3.msra.mxu0 %v16576_v49  ;;  %v16601_v61 = vsub.f32 %v2651_v15, %v16591_v59 }
 0x7fa   : > { %12427 = vmatprep.mubr.f32.mxu1 %v16407_v47  ;;  %12400 = vmatmul.mubr.f32.gmra.mxu0 %v16378_v33  ;;  %v16613_v43 = vsub.f32 %v2650_v55, %v16603_v37  ;;  %v2647_v47 = vld [vmem:[#allocation5 + $0x48] sm:$0xff] }
 0x7fb   : > { %12402 = vmatprep.mubr.f32.mxu0 %v16426_v32  ;;  %12438 = vmatprep.subr.mxu0 %v16581_v19  ;;  %v16610_v9 = vand.u32 4294901760, %v16601_v61  ;;  %v16635_v40 = vand.u32 4294901760, %v2647_v47 }
 0x7fc   : > { %12439 = vmatpush3.msra.mxu0 %v16581_v19  ;;  %12464 = vmatprep.subr.mxu1 %v7474_v53  ;;  %v16622_v63 = vand.u32 4294901760, %v16613_v43 }
 0x7fd   : > { %12428 = vmatmul.mubr.f32.gmra.mxu1 %v16378_v33  ;;  %12440 = vmatprep.subr.mxu0 %v16591_v59  ;;  %18606 = vst [vmem:[#allocation64_spill] sm:$0xff] %v16610_v9  ;;  %v7481_v33 = vand.u32 4294901760, %v7480_v35  ;;  %v7487_v38 = vsub.f32 %v16601_v61, %v16610_v9  ;;  %v16646_v31 = vsub.f32 %v2647_v47, %v16635_v40 }
 0x7fe   : > { %12430 = vmatprep.mubr.f32.mxu1 %v16426_v32  ;;  %12403 = vmatmul.mubr.f32.gmra.mxu0 %v16409_v13  ;;  %18607 = vst [vmem:[#allocation18_spill] sm:$0xff] %v16622_v63  ;;  %v7494_v17 = vsub.f32 %v16613_v43, %v16622_v63  ;;  %v16639_v32 = vand.u32 4294901760, %v16627_v1 }
 0x7ff   : > { %12405 = vmatprep.mubr.f32.mxu0 %v16450_v45  ;;  %12441 = vmatpush3.msra.mxu0 %v16591_v59  ;;  %v16657_v41 = vand.u32 4294901760, %v16646_v31 }
 0x800   : > { %12442 = vmatprep.subr.mxu0 %v16603_v37  ;;  %12465 = vmatpush3.msra.mxu1 %v7474_v53  ;;  %18608 = vst [vmem:[#allocation20_spill] sm:$0xff] %v16639_v32  ;;  %v7495_v21 = vand.u32 4294901760, %v7494_v17  ;;  %v7501_v30 = vsub.f32 %v16627_v1, %v16639_v32 }
 0x801   : > { %12431 = vmatmul.mubr.f32.gmra.mxu1 %v16409_v13  ;;  %12443 = vmatpush3.msra.mxu0 %v16603_v37  ;;  %v7488_v13 = vand.u32 4294901760, %v7487_v38  ;;  %18610 = vst [vmem:[#allocation55_spill] sm:$0xff] %v16657_v41  ;;  %v7515_v11 = vsub.f32 %v16646_v31, %v16657_v41 }
 0x802   : > { %12433 = vmatprep.mubr.f32.mxu1 %v16450_v45  ;;  %12406 = vmatmul.mubr.f32.gmra.mxu0 %v16443_v50  ;;  %v7502_v48 = vand.u32 4294901760, %v7501_v30 }
 0x803   : > { %12444 = vmatprep.subr.mxu0 %v16616_v58  ;;  %12466 = vmatprep.subr.mxu1 %v7481_v33  ;;  %v7516_v52 = vand.u32 4294901760, %v7515_v11 }
 0x804   : > { %12445 = vmatpush3.msra.mxu0 %v16616_v58  ;;  %12467 = vmatpush3.msra.mxu1 %v7481_v33 }
 0x805   : > { %12434 = vmatmul.mubr.f32.gmra.mxu1 %v16443_v50  ;;  %12446 = vmatprep.subr.mxu0 %v16624_v10  ;;  %v16643_v50 = vand.u32 4294901760, %v16633_v54 }
 0x806   : > { %12468 = vmatprep.subr.mxu1 %v7488_v13  ;;  %12447 = vmatpush3.msra.mxu0 %v16624_v10 }
 0x807   : > { %18609 = vst [vmem:[#allocation21_spill] sm:$0xff] %v16643_v50  ;;  %12469 = vmatpush3.msra.mxu1 %v7488_v13  ;;  %12448 = vmatprep.subr.mxu0 %v16635_v40  ;;  %v7508_v45 = vsub.f32 %v16633_v54, %v16643_v50 }
 0x808   : > { %12470 = vmatprep.subr.mxu1 %v7495_v21  ;;  %12449 = vmatpush3.msra.mxu0 %v16635_v40 }
 0x809   : > { %12471 = vmatpush3.msra.mxu1 %v7495_v21  ;;  %12450 = vmatprep.subr.mxu0 %v16648_v39  ;;  %v7509_v16 = vand.u32 4294901760, %v7508_v45 }
 0x80a   : > { %12451 = vmatpush3.msra.mxu0 %v16648_v39  ;;  %12472 = vmatprep.subr.mxu1 %v7502_v48 }
 0x80b   : > { %12492 = vmatprep.subr.mxu0 %v16579_v0  ;;  %12473 = vmatpush3.msra.mxu1 %v7502_v48 }
 0x80c   : > { %12474 = vmatprep.subr.mxu1 %v7509_v16 }
 0x80d   : > { %12475 = vmatpush3.msra.mxu1 %v7509_v16 }
 0x80e   : > { %12476 = vmatprep.subr.mxu1 %v7516_v52 }
 0x80f   : > { %12477 = vmatpush3.msra.mxu1 %v7516_v52 }
 0x810   : > { %12478 = vmatprep.subr.mxu1 %v7523_v62 }
 0x811   : > { %12479 = vmatpush3.msra.mxu1 %v7523_v62 }
 0x812   : > { %12520 = vmatprep.subr.mxu1 %v16576_v49 }
 0x884   : > { %v12286_v3 = vpop.f32.mrf.mxu0 }
 0x886   : > { %v6517_v60 = vpop.f32.mrf.mxu0 }
 0x88b   : > { %v12314_v14 = vpop.f32.mrf.mxu1 }
 0x88c   : > { %v6705_v62 = vadd.f32 %v12314_v14, %v12286_v3 }
 0x88d   : > { %v6698_v20 = vpop.f32.mrf.mxu1 }
 0x88e   : > { %v12289_v22 = vpop.f32.mrf.mxu0  ;;  %v6699_v18 = vadd.f32 %v6698_v20, %v6517_v60 }
 0x890   : > { %v6537_v2 = vpop.f32.mrf.mxu0 }
 0x891   : > { %v12317_v15 = vpop.f32.mrf.mxu1 }
 0x892   : > { %v6717_v56 = vadd.f32 %v12317_v15, %v12289_v22 }
 0x893   : > { %v6710_v55 = vpop.f32.mrf.mxu1 }
 0x894   : > { %v12292_v4 = vpop.f32.mrf.mxu0  ;;  %v6711_v5 = vadd.f32 %v6710_v55, %v6537_v2 }
 0x896   : > { %v6557_v36 = vpop.f32.mrf.mxu0 }
 0x897   : > { %v12320_v53 = vpop.f32.mrf.mxu1 }
 0x898   : > { %v6729_v41 = vadd.f32 %v12320_v53, %v12292_v4 }
 0x899   : > { %v6722_v35 = vpop.f32.mrf.mxu1 }
 0x89a   : > { %v12295_v28 = vpop.f32.mrf.mxu0  ;;  %v6723_v6 = vadd.f32 %v6722_v35, %v6557_v36 }
 0x89c   : > { %v6577_v33 = vpop.f32.mrf.mxu0 }
 0x89d   : > { %v12323_v38 = vpop.f32.mrf.mxu1 }
 0x89f   : > { %v6734_v47 = vpop.f32.mrf.mxu1  ;;  %v12342_v13 = vpop.f32.mrf.mxu0 }
 0x8a0   : > { %v6836_v25 = vadd.f32 %v12342_v13, %v6705_v62  ;;  %v6741_v13 = vadd.f32 %v12323_v38, %v12295_v28 }
 0x8a1   : > { %v6828_v17 = vpop.f32.mrf.mxu0 }
 0x8a2   : > { %v12370_v34 = vpop.f32.mrf.mxu1  ;;  %v6829_v23 = vadd.f32 %v6828_v17, %v6699_v18 }
 0x8a3   : > { %v6967_v26 = vadd.f32 %v12370_v34, %v6836_v25 }
 0x8a4   : > { %v6958_v21 = vpop.f32.mrf.mxu1 }
 0x8a5   : > { %v12345_v30 = vpop.f32.mrf.mxu0  ;;  %v6959_v50 = vadd.f32 %v6958_v21, %v6829_v23 }
 0x8a6   : > { %v6850_v24 = vadd.f32 %v12345_v30, %v6717_v56 }
 0x8a7   : > { %v6842_v45 = vpop.f32.mrf.mxu0 }
 0x8a8   : > { %v12373_v48 = vpop.f32.mrf.mxu1  ;;  %v6843_v32 = vadd.f32 %v6842_v45, %v6711_v5 }
 0x8a9   : > { %v6983_v3 = vadd.f32 %v12373_v48, %v6850_v24 }
 0x8aa   : > { %v6974_v16 = vpop.f32.mrf.mxu1 }
 0x8ab   : > { %v12348_v11 = vpop.f32.mrf.mxu0  ;;  %v6975_v15 = vadd.f32 %v6974_v16, %v6843_v32 }
 0x8ac   : > { %v6864_v14 = vadd.f32 %v12348_v11, %v6729_v41  ;;  %v6735_v41 = vadd.f32 %v6734_v47, %v6577_v33 }
 0x8ad   : > { %v6856_v52 = vpop.f32.mrf.mxu0 }
 0x8ae   : > { %v12376_v57 = vpop.f32.mrf.mxu1  ;;  %v6857_v17 = vadd.f32 %v6856_v52, %v6723_v6 }
 0x8af   : > { %v6999_v5 = vadd.f32 %v12376_v57, %v6864_v14 }
 0x8b0   : > { %v6990_v12 = vpop.f32.mrf.mxu1 }
 0x8b1   : > { %v12351_v27 = vpop.f32.mrf.mxu0  ;;  %v6991_v36 = vadd.f32 %v6990_v12, %v6857_v17 }
 0x8b2   : > { %v6878_v56 = vadd.f32 %v12351_v27, %v6741_v13 }
 0x8b3   : > { %v6870_v44 = vpop.f32.mrf.mxu0 }
 0x8b4   : > { %v12379_v42 = vpop.f32.mrf.mxu1  ;;  %v6871_v35 = vadd.f32 %v6870_v44, %v6735_v41 }
 0x8b5   : > { %v7015_v28 = vadd.f32 %v12379_v42, %v6878_v56 }
 0x8b6   : > { %v7006_v29 = vpop.f32.mrf.mxu1  ;;  %v12398_v46 = vpop.f32.mrf.mxu0 }
 0x8b7   : > { %v7116_v63 = vadd.f32 %v12398_v46, %v6967_v26  ;;  %v7007_v62 = vadd.f32 %v7006_v29, %v6871_v35 }
 0x8b8   : > { %v7109_v9 = vpop.f32.mrf.mxu0 }
 0x8b9   : > { %v7110_v60 = vadd.f32 %v7109_v9, %v6959_v50  ;;  %v12426_v20 = vpop.f32.mrf.mxu1 }
 0x8ba   : > { %v7237_v22 = vadd.f32 %v12426_v20, %v7116_v63  ;;  %v12401_v18 = vpop.f32.mrf.mxu0 }
 0x8bb   : > { %v7128_v2 = vadd.f32 %v12401_v18, %v6983_v3  ;;  %v7230_v25 = vpop.f32.mrf.mxu1 }
 0x8bc   : > { %v7280_v55 = vsel %vm2669_vm0, %v7237_v22, 0  ;;  %v7231_v4 = vadd.f32 %v7230_v25, %v7110_v60  ;;  %v7121_v23 = vpop.f32.mrf.mxu0 }
 0x8bd   : > { %v16675_v26 = vand.u32 4294901760, %v7280_v55  ;;  %v7122_v46 = vadd.f32 %v7121_v23, %v6975_v15  ;;  %v12429_v24 = vpop.f32.mrf.mxu1 }
 0x8be   : > { %v7277_v9 = vsel %vm2669_vm0, %v7231_v4, 0  ;;  %v7249_v50 = vadd.f32 %v12429_v24, %v7128_v2  ;;  %v12404_v63 = vpop.f32.mrf.mxu0 }
 0x8bf   : > { %v16679_v6 = vsub.f32 %v7280_v55, %v16675_v26  ;;  %v16681_v32 = vand.u32 4294901760, %v7277_v9  ;;  %v7140_v27 = vadd.f32 %v12404_v63, %v6999_v5  ;;  %v7242_v53 = vpop.f32.mrf.mxu1 }
 0x8c0   : > { %v7286_v38 = vsel %vm2669_vm0, %v7249_v50, 0  ;;  %v7243_v34 = vadd.f32 %v7242_v53, %v7122_v46  ;;  %v7133_v21 = vpop.f32.mrf.mxu0 }
 0x8c1   : > { %v7385_v33 = vand.u32 4294901760, %v16679_v6  ;;  %v16686_v47 = vsub.f32 %v7277_v9, %v16681_v32  ;;  %v16688_v30 = vand.u32 4294901760, %v7286_v38  ;;  %v7134_v12 = vadd.f32 %v7133_v21, %v6991_v36  ;;  %v12432_v45 = vpop.f32.mrf.mxu1  ;;  %12480 = vmatprep.mubr.f32.mxu1 %v16681_v32 }
 0x8c2   : > { %v7283_v48 = vsel %vm2669_vm0, %v7243_v34, 0  ;;  %v7261_v16 = vadd.f32 %v12432_v45, %v7140_v27  ;;  %12481 = vmatmul.mubr.f32.vlgmr.msra.gmra.mxu1 %v16675_v26  ;;  %v12407_v44 = vpop.f32.mrf.mxu0 }
 0x8c3   : > { %v16694_v42 = vsub.f32 %v7286_v38, %v16688_v30  ;;  %v16696_v11 = vand.u32 4294901760, %v7283_v48  ;;  %v7152_v52 = vadd.f32 %v12407_v44, %v7015_v28  ;;  %v7254_v57 = vpop.f32.mrf.mxu1  ;;  %12521 = vmatpush3.msra.mxu1 %v16576_v49  ;;  %v7375_v20 = vand.u32 4294901760, %v16686_v47 }
 0x8c4   : > { %v7292_v3 = vsel %vm2669_vm0, %v7261_v16, 0  ;;  %v7255_v14 = vadd.f32 %v7254_v57, %v7134_v12  ;;  %12522 = vmatprep.subr.mxu1 %v16581_v19  ;;  %v7145_v60 = vpop.f32.mrf.mxu0  ;;  %v7386_v13 = vsub.f32 %v16679_v6, %v7385_v33 }
 0x8c5   : > { %v7405_v22 = vand.u32 4294901760, %v16694_v42  ;;  %v16707_v18 = vsub.f32 %v7283_v48, %v16696_v11  ;;  %v16709_v15 = vand.u32 4294901760, %v7292_v3  ;;  %v12435_v29 = vpop.f32.mrf.mxu1  ;;  %12483 = vmatprep.mubr.f32.mxu1 %v16696_v11  ;;  %12523 = vmatpush3.msra.mxu1 %v16581_v19  ;;  %v7146_v2 = vadd.f32 %v7145_v60, %v7007_v62 }
 0x8c6   : > { %v7289_v17 = vsel %vm2669_vm0, %v7255_v14, 0  ;;  %v7273_v25 = vadd.f32 %v12435_v29, %v7152_v52  ;;  %12484 = vmatmul.mubr.f32.gmra.mxu1 %v16688_v30  ;;  %12524 = vmatprep.subr.mxu1 %v16591_v59  ;;  %v7376_v56 = vsub.f32 %v16686_v47, %v7375_v20  ;;  %v7387_v9 = vand.u32 4294901760, %v7386_v13 }
 0x8c7   : > { %v16717_v55 = vand.u32 4294901760, %v7289_v17  ;;  %v7266_v4 = vpop.f32.mrf.mxu1  ;;  %12525 = vmatpush3.msra.mxu1 %v16591_v59  ;;  %v7395_v23 = vand.u32 4294901760, %v16707_v18  ;;  %v16722_v5 = vsub.f32 %v7292_v3, %v16709_v15  ;;  %v7406_v53 = vsub.f32 %v16694_v42, %v7405_v22 }
 0x8c8   : > { %v7298_v46 = vsel %vm2669_vm0, %v7273_v25, 0  ;;  %v7267_v24 = vadd.f32 %v7266_v4, %v7146_v2  ;;  %12526 = vmatprep.subr.mxu1 %v16603_v37  ;;  %v7377_v41 = vand.u32 4294901760, %v7376_v56  ;;  %v18619_v4 = vld [vmem:[#allocation34_spill] sm:$0xff] }
 0x8c9   : > { %v16727_v50 = vsub.f32 %v7289_v17, %v16717_v55  ;;  %12486 = vmatprep.mubr.f32.mxu1 %v16717_v55  ;;  %12527 = vmatpush3.msra.mxu1 %v16603_v37  ;;  %v7396_v63 = vsub.f32 %v16707_v18, %v7395_v23  ;;  %v16732_v36 = vand.u32 4294901760, %v7298_v46  ;;  %v7425_v34 = vand.u32 4294901760, %v16722_v5 }
 0x8ca   : > { %v7295_v27 = vsel %vm2669_vm0, %v7267_v24, 0  ;;  %12452 = vmatprep.mubr.f32.mxu0 %v7377_v41  ;;  %12487 = vmatmul.mubr.f32.gmra.mxu1 %v16709_v15  ;;  %v7407_v48 = vand.u32 4294901760, %v7406_v53 }
 0x8cb   : > { %v16739_v35 = vand.u32 4294901760, %v7295_v27  ;;  %12453 = vmatmul.mubr.f32.vlgmr.msra.gmra.mxu0 %v7387_v9  ;;  %12528 = vmatprep.subr.mxu1 %v16616_v58  ;;  %v7397_v28 = vand.u32 4294901760, %v7396_v63  ;;  %v7415_v38 = vand.u32 4294901760, %v16727_v50  ;;  %v16753_v45 = vsub.f32 %v7298_v46, %v16732_v36  ;;  %v18621_v46 = vld [vmem:[#allocation45_spill] sm:$0xff] }
 0x8cc   : > { %12493 = vmatpush3.msra.mxu0 %v16579_v0  ;;  %12529 = vmatpush3.msra.mxu1 %v16616_v58  ;;  %v7426_v44 = vsub.f32 %v16722_v5, %v7425_v34 }
 0x8cd   : > { %v16747_v21 = vsub.f32 %v7295_v27, %v16739_v35  ;;  %12494 = vmatprep.subr.mxu0 %v16589_v8  ;;  %12530 = vmatprep.subr.mxu1 %v16624_v10  ;;  %v7416_v12 = vsub.f32 %v16727_v50, %v7415_v38  ;;  %v7445_v52 = vand.u32 4294901760, %v16753_v45 }
 0x8ce   : > { %12455 = vmatprep.mubr.f32.mxu0 %v7397_v28  ;;  %12489 = vmatprep.mubr.f32.mxu1 %v16739_v35  ;;  %v7427_v57 = vand.u32 4294901760, %v7426_v44 }
 0x8cf   : > { %12495 = vmatpush3.msra.mxu0 %v16589_v8  ;;  %12531 = vmatpush3.msra.mxu1 %v16624_v10  ;;  %v7435_v0 = vand.u32 4294901760, %v16747_v21  ;;  %v7417_v16 = vand.u32 4294901760, %v7416_v12  ;;  %v18624_v12 = vld [vmem:[#allocation24_spill] sm:$0xff] }
 0x8d0   : > { %12456 = vmatmul.mubr.f32.gmra.mxu0 %v7407_v48  ;;  %12490 = vmatmul.mubr.f32.gmra.mxu1 %v16732_v36  ;;  %v18625_v48 = vld [vmem:[#allocation62_spill] sm:$0xff] }
 0x8d1   : > { %12496 = vmatprep.subr.mxu0 %v16601_v61  ;;  %12532 = vmatprep.subr.mxu1 %v16635_v40  ;;  %v7436_v8 = vsub.f32 %v16747_v21, %v7435_v0 }
 0x8d2   : > { %12497 = vmatpush3.msra.mxu0 %v16601_v61  ;;  %12533 = vmatpush3.msra.mxu1 %v16635_v40  ;;  %v7446_v61 = vsub.f32 %v16753_v45, %v7445_v52 }
 0x8d3   : > { %12536 = vmatprep.mubr.f32.mxu1 %v7375_v20  ;;  %12498 = vmatprep.subr.mxu0 %v16613_v43  ;;  %v7437_v62 = vand.u32 4294901760, %v7436_v8  ;;  %v18626_v8 = vld [vmem:[#allocation19_spill] sm:$0xff] }
 0x8d4   : > { %12534 = vmatprep.subr.mxu1 %v16648_v39  ;;  %12458 = vmatprep.mubr.f32.mxu0 %v7417_v16 }
 0x8d5   : > { %12499 = vmatpush3.msra.mxu0 %v16613_v43  ;;  %12535 = vmatpush3.msra.mxu1 %v16648_v39  ;;  %v7447_v43 = vand.u32 4294901760, %v7446_v61 }
 0x8d6   : > { %12459 = vmatmul.mubr.f32.gmra.mxu0 %v7427_v57  ;;  %12500 = vmatprep.subr.mxu0 %v16627_v1 }
 0x8d7   : > { %12537 = vmatmul.mubr.f32.vlgmr.msra.gmra.mxu1 %v7385_v33  ;;  %12576 = vmatprep.subr.mxu1 %v16576_v49 }
 0x8d8   : > { %12501 = vmatpush3.msra.mxu0 %v16627_v1  ;;  %12539 = vmatprep.mubr.f32.mxu1 %v7395_v23  ;;  %v18620_v23 = vld [vmem:[#allocation31_spill] sm:$0xff] }
 0x8d9   : > { %12577 = vmatpush3.msra.mxu1 %v16576_v49  ;;  %12502 = vmatprep.subr.mxu0 %v16633_v54  ;;  %v18612_v49 = vld [vmem:[#allocation52_spill] sm:$0xff] }
 0x8da   : > { %12578 = vmatprep.subr.mxu1 %v16581_v19  ;;  %12461 = vmatprep.mubr.f32.mxu0 %v7437_v62 }
 0x8db   : > { %12503 = vmatpush3.msra.mxu0 %v16633_v54  ;;  %12579 = vmatpush3.msra.mxu1 %v16581_v19  ;;  %v18613_v19 = vld [vmem:[#allocation64_spill] sm:$0xff] }
 0x8dc   : > { %12462 = vmatmul.mubr.f32.gmra.mxu0 %v7447_v43  ;;  %12504 = vmatprep.subr.mxu0 %v16646_v31  ;;  %v13200_v43 = vld [vmem:[%s13789_s15 + $0x8] sm:$0xff] }
 0x8dd   : > { %12540 = vmatmul.mubr.f32.gmra.mxu1 %v7405_v22  ;;  %12580 = vmatprep.subr.mxu1 %v16591_v59 }
 0x8de   : > { %12505 = vmatpush3.msra.mxu0 %v16646_v31  ;;  %12508 = vmatprep.mubr.f32.mxu0 %v16686_v47 }
 0x8df   : > { %12542 = vmatprep.mubr.f32.mxu1 %v7415_v38  ;;  %12581 = vmatpush3.msra.mxu1 %v16591_v59  ;;  %v18615_v59 = vld [vmem:[#allocation20_spill] sm:$0xff] }
 0x8e0   : > { %12506 = vmatprep.subr.mxu0 %v16660_v7  ;;  %12582 = vmatprep.subr.mxu1 %v16603_v37 }
 0x8e1   : > { %12507 = vmatpush3.msra.mxu0 %v16660_v7  ;;  %12583 = vmatpush3.msra.mxu1 %v16603_v37  ;;  %v18616_v37 = vld [vmem:[#allocation21_spill] sm:$0xff] }
 0x8e2   : > { %12509 = vmatmul.mubr.f32.vlgmr.msra.gmra.mxu0 %v16679_v6  ;;  %12543 = vmatmul.mubr.f32.gmra.mxu1 %v7425_v34  ;;  %v16861_v34 = vld [vmem:[%s17959_s3] ss:$0 sm:$0xff] }
 0x8e3   : > { %12548 = vmatprep.subr.mxu0 %v16586_v51  ;;  %12584 = vmatprep.subr.mxu1 %v16616_v58 }
 0x8e4   : > { %12511 = vmatprep.mubr.f32.mxu0 %v16707_v18  ;;  %12545 = vmatprep.mubr.f32.mxu1 %v7435_v0 }
 0x8e5   : > { %12549 = vmatpush3.msra.mxu0 %v16586_v51  ;;  %12585 = vmatpush3.msra.mxu1 %v16616_v58  ;;  %v18614_v51 = vld [vmem:[#allocation18_spill] sm:$0xff]  ;;  %v18617_v58 = vld [vmem:[#allocation55_spill] sm:$0xff] }
 0x8e6   : > { %12550 = vmatprep.subr.mxu0 %v18612_v49  ;;  %12586 = vmatprep.subr.mxu1 %v16624_v10 }
 0x8e7   : > { %12551 = vmatpush3.msra.mxu0 %v18612_v49  ;;  %12587 = vmatpush3.msra.mxu1 %v16624_v10  ;;  %v18618_v10 = vld [vmem:[#allocation56_spill] sm:$0xff]  ;;  %v2662_v49 = vadd.f32 %v13200_v43, %v16861_v34 }
 0x8e8   : > { %12512 = vmatmul.mubr.f32.gmra.mxu0 %v16694_v42  ;;  %12546 = vmatmul.mubr.f32.gmra.mxu1 %v7445_v52 }
 0x8e9   : > { %12552 = vmatprep.subr.mxu0 %v18613_v19  ;;  %12588 = vmatprep.subr.mxu1 %v16635_v40 }
 0x8ea   : > { %12514 = vmatprep.mubr.f32.mxu0 %v16727_v50  ;;  %12553 = vmatpush3.msra.mxu0 %v18613_v19 }
 0x8eb   : > { %12589 = vmatpush3.msra.mxu1 %v16635_v40  ;;  %12592 = vmatprep.mubr.f32.mxu1 %v16681_v32 }
 0x8ec   : > { %12554 = vmatprep.subr.mxu0 %v18614_v51  ;;  %12590 = vmatprep.subr.mxu1 %v16648_v39 }
 0x8ed   : > { %12555 = vmatpush3.msra.mxu0 %v18614_v51  ;;  %12591 = vmatpush3.msra.mxu1 %v16648_v39 }
 0x8ee   : > { %12515 = vmatmul.mubr.f32.gmra.mxu0 %v16722_v5  ;;  %12556 = vmatprep.subr.mxu0 %v18615_v59  ;;  %v4799_v5 = vadd.f32 %v18620_v23, %v18619_v4  ;;  %v18631_v4 = vld [vmem:[#allocation15_spill] sm:$0xff] }
 0x8ef   : > { %12593 = vmatmul.mubr.f32.vlgmr.msra.gmra.mxu1 %v16675_v26  ;;  %12517 = vmatprep.mubr.f32.mxu0 %v16747_v21  ;;  %v18623_v21 = vld [vmem:[#allocation30_spill] sm:$0xff] }
 0x8f0   : > { %12557 = vmatpush3.msra.mxu0 %v18615_v59  ;;  %12595 = vmatprep.mubr.f32.mxu1 %v16696_v11  ;;  %v4929_v24 = vadd.f32 %v18621_v46, %v4799_v5  ;;  %v13201_v59 = vld [vmem:[%s13789_s15] sm:$0xff] }
 0x8f1   : > { %12558 = vmatprep.subr.mxu0 %v18616_v37  ;;  %v18632_v46 = vld [vmem:[#allocation47_spill] sm:$0xff] }
 0x8f2   : > { %12559 = vmatpush3.msra.mxu0 %v18616_v37  ;;  %v2661_v37 = vadd.f32 %v13201_v59, %v16861_v34 }
 0x8f3   : > { %12518 = vmatmul.mubr.f32.gmra.mxu0 %v16753_v45  ;;  %12560 = vmatprep.subr.mxu0 %v18617_v58  ;;  %v4811_v45 = vadd.f32 %v18624_v12, %v18623_v21  ;;  %v18634_v21 = vld [vmem:[#allocation49_spill] sm:$0xff] }
 0x8f4   : > { %12596 = vmatmul.mubr.f32.gmra.mxu1 %v16688_v30  ;;  %12561 = vmatpush3.msra.mxu0 %v18617_v58  ;;  %v13202_v58 = vld [vmem:[%s13789_s15 + $0x18] sm:$0xff]  ;;  %v5377_v12 = vadd.f32 %v18634_v21, %v2662_v49  ;;  %v18644_v21 = vld [vmem:[#allocation33_spill] sm:$0xff] }
 0x8f5   : > { %12564 = vmatprep.mubr.f32.mxu0 %v16681_v32  ;;  %12598 = vmatprep.mubr.f32.mxu1 %v16717_v55  ;;  %v4943_v57 = vadd.f32 %v18626_v8, %v4811_v45  ;;  %v18637_v49 = vld [vmem:[#allocation42_spill] sm:$0xff] }
 0x8f6   : > { %12562 = vmatprep.subr.mxu0 %v18618_v10 }
 0x8f7   : > { %12563 = vmatpush3.msra.mxu0 %v18618_v10  ;;  %v2664_v10 = vadd.f32 %v13202_v58, %v16861_v34  ;;  %v18639_v58 = vld [vmem:[#allocation60_spill] sm:$0xff] }
 0x8f8   : > { %12565 = vmatmul.mubr.f32.vlgmr.msra.gmra.mxu0 %v16675_v26  ;;  %12599 = vmatmul.mubr.f32.gmra.mxu1 %v16709_v15 }
 0x8f9   : > { %12567 = vmatprep.mubr.f32.mxu0 %v16696_v11  ;;  %12601 = vmatprep.mubr.f32.mxu1 %v16739_v35 }
 0x8fc   : > { %12568 = vmatmul.mubr.f32.gmra.mxu0 %v16688_v30  ;;  %12602 = vmatmul.mubr.f32.gmra.mxu1 %v16732_v36 }
 0x8fd   : > { %12570 = vmatprep.mubr.f32.mxu0 %v16717_v55 }
 0x900   : > { %12571 = vmatmul.mubr.f32.gmra.mxu0 %v16709_v15 }
 0x901   : > { %12573 = vmatprep.mubr.f32.mxu0 %v16739_v35 }
 0x904   : > { %12574 = vmatmul.mubr.f32.gmra.mxu0 %v16732_v36  ;;  %v18622_v36 = vld [vmem:[#allocation40_spill] sm:$0xff] }
 0x905   : > { %v5059_v27 = vadd.f32 %v18622_v36, %v4929_v24 }
 0x907   : > { %v5210_v0 = vadd.f32 %v18625_v48, %v5059_v27 }
 0x982   : > { %v12482_v1 = vpop.f32.mrf.mxu1 }
 0x984   : > { %v7560_v54 = vpop.f32.mrf.mxu1 }
 0x986   : > { %v12485_v40 = vpop.f32.mrf.mxu1 }
 0x988   : > { %v7572_v31 = vpop.f32.mrf.mxu1 }
 0x98a   : > { %v12488_v39 = vpop.f32.mrf.mxu1 }
 0x98b   : > { %v12454_v7 = vpop.f32.mrf.mxu0 }
 0x98c   : > { %v7584_v26 = vpop.f32.mrf.mxu1  ;;  %v7567_v63 = vadd.f32 %v12482_v1, %v12454_v7  ;;  %v18627_v1 = vld [vmem:[#allocation29_spill] sm:$0xff]  ;;  %v18629_v7 = vld [vmem:[#allocation48_spill] sm:$0xff] }
 0x98d   : > { %v7379_v6 = vpop.f32.mrf.mxu0 }
 0x98e   : > { %v7561_v35 = vadd.f32 %v7560_v54, %v7379_v6  ;;  %v18628_v54 = vld [vmem:[#allocation28_spill] sm:$0xff]  ;;  %v5331_v6 = vadd.f32 %v18629_v7, %v5210_v0 }
 0x98f   : > { %v18640_v7 = vld [vmem:[#allocation44_spill] sm:$0xff] }
 0x990   : > { %v12457_v32 = vpop.f32.mrf.mxu0  ;;  %v16840_v33 = vpop.f32.mrf.mxu1 }
 0x991   : > { %v7579_v16 = vadd.f32 %v12485_v40, %v12457_v32  ;;  %v4823_v40 = vadd.f32 %v18628_v54, %v18627_v1 }
 0x992   : > { %v7399_v47 = vpop.f32.mrf.mxu0  ;;  %v16842_v30 = vpop.f32.mrf.mxu1 }
 0x993   : > { %v7573_v62 = vadd.f32 %v7572_v31, %v7399_v47  ;;  %v13203_v31 = vld [vmem:[%s13789_s15 + $0x28] sm:$0xff]  ;;  %v4957_v24 = vadd.f32 %v18632_v46, %v4823_v40  ;;  %v13204_v40 = vld [vmem:[%s13789_s15 + $0x10] sm:$0xff] }
 0x994   : > { %v2666_v47 = vadd.f32 %v13203_v31, %v16861_v34 }
 0x996   : > { %v12460_v42 = vpop.f32.mrf.mxu0 }
 0x997   : > { %v12538_v11 = vpop.f32.mrf.mxu1 }
 0x998   : > { %v7419_v3 = vpop.f32.mrf.mxu0 }
 0x999   : > { %v7820_v14 = vpop.f32.mrf.mxu1  ;;  %v7585_v27 = vadd.f32 %v7584_v26, %v7419_v3  ;;  %v18636_v3 = vld [vmem:[#allocation51_spill] sm:$0xff] }
 0x99c   : > { %v12463_v60 = vpop.f32.mrf.mxu0 }
 0x99d   : > { %v12541_v20 = vpop.f32.mrf.mxu1 }
 0x99e   : > { %v16844_v13 = vpop.f32.mrf.mxu0 }
 0x99f   : > { %v7836_v22 = vpop.f32.mrf.mxu1 }
 0x9a2   : > { %v12510_v18 = vpop.f32.mrf.mxu0  ;;  %v16846_v15 = vpop.f32.mrf.mxu1 }
 0x9a3   : > { %v7698_v28 = vadd.f32 %v12510_v18, %v7567_v63  ;;  %v18633_v63 = vld [vmem:[#allocation36_spill] sm:$0xff] }
 0x9a4   : > { %v7690_v29 = vpop.f32.mrf.mxu0  ;;  %v16848_v17 = vpop.f32.mrf.mxu1  ;;  %v5075_v36 = vadd.f32 %v18633_v63, %v4943_v57 }
 0x9a5   : > { %v7691_v44 = vadd.f32 %v7690_v29, %v7561_v35  ;;  %v7829_v51 = vadd.f32 %v12538_v11, %v7698_v28  ;;  %v18630_v29 = vld [vmem:[#allocation37_spill] sm:$0xff]  ;;  %v7591_v11 = vadd.f32 %v12488_v39, %v12460_v42 }
 0x9a7   : > { %v7821_v5 = vadd.f32 %v7820_v14, %v7691_v44  ;;  %v5376_v14 = vadd.f32 %v5331_v6, %v2661_v37  ;;  %v18641_v6 = vld [vmem:[#allocation25_spill] sm:$0xff] }
 0x9a8   : > { %v12513_v2 = vpop.f32.mrf.mxu0  ;;  %v16850_v25 = vpop.f32.mrf.mxu1 }
 0x9a9   : > { %v7712_v19 = vadd.f32 %v12513_v2, %v7579_v16  ;;  %v4835_v2 = vadd.f32 %v18631_v4, %v18630_v29  ;;  %v18635_v16 = vld [vmem:[#allocation58_spill] sm:$0xff]  ;;  %v18642_v4 = vld [vmem:[#allocation39_spill] sm:$0xff] }
 0x9aa   : > { %v7704_v56 = vpop.f32.mrf.mxu0  ;;  %v16852_v55 = vpop.f32.mrf.mxu1  ;;  %v5222_v8 = vadd.f32 %v18635_v16, %v5075_v36 }
 0x9ab   : > { %v7705_v32 = vadd.f32 %v7704_v56, %v7573_v62  ;;  %v7845_v0 = vadd.f32 %v12541_v20, %v7712_v19  ;;  %v7603_v62 = vadd.f32 %v16840_v33, %v12463_v60  ;;  %v4971_v57 = vadd.f32 %v18636_v3, %v4835_v2 }
 0x9ac   : > { %v7597_v20 = vadd.f32 %v16842_v30, %v16844_v13  ;;  %v2663_v30 = vadd.f32 %v13204_v40, %v16861_v34  ;;  %v5381_v2 = vadd.f32 %v18642_v4, %v2666_v47 }
 0x9ad   : > { %v7837_v42 = vadd.f32 %v7836_v22, %v7705_v32  ;;  %v5107_v32 = vadd.f32 %v18641_v6, %v4971_v57 }
 0x9ae   : > { %v12516_v41 = vpop.f32.mrf.mxu0 }
 0x9af   : > { %v12594_v9 = vpop.f32.mrf.mxu1  ;;  %v7726_v56 = vadd.f32 %v12516_v41, %v7591_v11  ;;  %v5091_v41 = vadd.f32 %v18637_v49, %v4957_v24  ;;  %v13205_v11 = vld [vmem:[%s13789_s15 + $0x38] sm:$0xff] }
 0x9b0   : > { %v7718_v50 = vpop.f32.mrf.mxu0 }
 0x9b1   : > { %v8092_v53 = vpop.f32.mrf.mxu1  ;;  %v7719_v44 = vadd.f32 %v7718_v50, %v7585_v27  ;;  %v7861_v22 = vadd.f32 %v16846_v15, %v7726_v56  ;;  %v5234_v1 = vadd.f32 %v18639_v58, %v5091_v41  ;;  %v5379_v15 = vadd.f32 %v18640_v7, %v2664_v10  ;;  %v13206_v27 = vld [vmem:[%s13789_s15 + $0x20] sm:$0xff] }
 0x9b3   : > { %v12519_v38 = vpop.f32.mrf.mxu0 }
 0x9b4   : > { %v12597_v61 = vpop.f32.mrf.mxu1 }
 0x9b5   : > { %v7732_v52 = vpop.f32.mrf.mxu0 }
 0x9b6   : > { %v8104_v35 = vpop.f32.mrf.mxu1  ;;  %v7733_v13 = vadd.f32 %v7732_v52, %v7597_v20 }
 0x9b8   : > { %v12566_v18 = vpop.f32.mrf.mxu0  ;;  %v12600_v19 = vpop.f32.mrf.mxu1  ;;  %v7869_v47 = vadd.f32 %v16852_v55, %v7733_v13 }
 0x9b9   : > { %v7978_v23 = vadd.f32 %v12566_v18, %v7829_v51 }
 0x9ba   : > { %v7971_v28 = vpop.f32.mrf.mxu0  ;;  %v8116_v18 = vpop.f32.mrf.mxu1 }
 0x9bb   : > { %v8099_v45 = vadd.f32 %v12594_v9, %v7978_v23  ;;  %v7972_v48 = vadd.f32 %v7971_v28, %v7821_v5  ;;  %v7740_v9 = vadd.f32 %v12519_v38, %v7603_v62  ;;  %v2668_v23 = vadd.f32 %v13205_v11, %v16861_v34 }
 0x9bc   : > { %v12569_v39 = vpop.f32.mrf.mxu0  ;;  %v2665_v28 = vadd.f32 %v13206_v27, %v16861_v34  ;;  %v12603_v56 = vpop.f32.mrf.mxu1 }
 0x9bd   : > { %v8093_v43 = vadd.f32 %v8092_v53, %v7972_v48  ;;  %v7990_v51 = vadd.f32 %v12569_v39, %v7845_v0  ;;  %v16885_v26 = vadd.f32 %v8099_v45, %v5377_v12  ;;  %v18638_v53 = vld [vmem:[#allocation67_spill] sm:$0xff]  ;;  %v7877_v29 = vadd.f32 %v16850_v25, %v7740_v9  ;;  %v18645_v48 = vld [vmem:[#allocation53_spill] sm:$0xff]  ;;  %v8280_v9 = vld [vmem:[%s17962_s6 + $0x78] sm:$0xff] }
 0x9be   : > { %v7983_v59 = vpop.f32.mrf.mxu0  ;;  %v5343_v37 = vadd.f32 %v18638_v53, %v5222_v8  ;;  %v5246_v12 = vadd.f32 %v18644_v21, %v5107_v32  ;;  %v5383_v0 = vadd.f32 %v18645_v48, %v2668_v23  ;;  %v8128_v3 = vpop.f32.mrf.mxu1  ;;  %v8278_v32 = vld [vmem:[%s17962_s6 + $0x68] sm:$0xff] }
 0x9bf   : > { %v8111_v33 = vadd.f32 %v12597_v61, %v7990_v51  ;;  %v7984_v60 = vadd.f32 %v7983_v59, %v7837_v42  ;;  %8150 = vadd.xlane.f32.xlu1 %v16885_v26  ;;  %v16893_v50 = vadd.f32 %v8093_v43, %v5376_v14  ;;  %v7853_v61 = vadd.f32 %v16848_v17, %v7719_v44  ;;  %v18643_v17 = vld [vmem:[#allocation17_spill] sm:$0xff]  ;;  %v18646_v42 = vld [vmem:[#allocation54_spill] sm:$0xff] }
 0x9c0   : > { %v12572_v54 = vpop.f32.mrf.mxu0  ;;  %v5355_v63 = vadd.f32 %v18643_v17, %v5234_v1  ;;  %v5378_v10 = vadd.f32 %v5343_v37, %v2663_v30  ;;  %v5367_v14 = vadd.f32 %v18646_v42, %v5246_v12  ;;  %v13207_v43 = vld [vmem:[%s13789_s15 + $0x30] sm:$0xff] }
 0x9c1   : > { %v8002_v38 = vadd.f32 %v12572_v54, %v7861_v22  ;;  %8148 = vadd.xlane.f32.xlu0 %v16893_v50  ;;  %v8105_v52 = vadd.f32 %v8104_v35, %v7984_v60  ;;  %v16907_v24 = vadd.f32 %v8111_v33, %v5379_v15  ;;  %v2667_v51 = vadd.f32 %v13207_v43, %v16861_v34  ;;  %v8279_v34 = vld [vmem:[%s17962_s6 + $0x70] sm:$0xff] }
 0x9c2   : > { %v7995_v31 = vpop.f32.mrf.mxu0  ;;  %v5380_v55 = vadd.f32 %v5355_v63, %v2665_v28  ;;  %v16942_v59 = vand.u32 4294901760, %v8279_v34  ;;  %v8275_v28 = vld [vmem:[%s17962_s6 + $0x50] sm:$0xff] }
 0x9c3   : > { %v8123_v5 = vadd.f32 %v12600_v19, %v8002_v38  ;;  %v7996_v46 = vadd.f32 %v7995_v31, %v7853_v61  ;;  %v16919_v39 = vadd.f32 %v8105_v52, %v5378_v10  ;;  %v5382_v41 = vadd.f32 %v5367_v14, %v2667_v51  ;;  %v8273_v51 = vld [vmem:[%s17962_s6 + $0x40] sm:$0xff] }
 0x9c4   : > { %v12575_v36 = vpop.f32.mrf.mxu0  ;;  %v16940_v19 = vand.u32 4294901760, %v8280_v9  ;;  %v16948_v60 = vsub.f32 %v8279_v34, %v16942_v59  ;;  %v17026_v48 = vand.u32 4294901760, %v8275_v28 }
 0x9c5   : > { %v8014_v25 = vadd.f32 %v12575_v36, %v7877_v29  ;;  %8154 = vadd.xlane.f32.xlu0 %v16907_v24  ;;  %v16915_v35 = vadd.f32 %v8123_v5, %v5381_v2  ;;  %v8117_v16 = vadd.f32 %v8116_v18, %v7996_v46  ;;  %v16977_v29 = vand.u32 4294901760, %v8278_v32  ;;  %v8276_v5 = vld [vmem:[%s17962_s6 + $0x58] sm:$0xff] }
 0x9c6   : > { %v8007_v45 = vpop.f32.mrf.mxu0  ;;  %v16945_v33 = vsub.f32 %v8280_v9, %v16940_v19  ;;  %12604 = vmatprep.subr.mxu0 %v16940_v19  ;;  %v16956_v53 = vand.u32 4294901760, %v16948_v60  ;;  %v17007_v27 = vand.u32 4294901760, %v8276_v5 }
 0x9c7   : > { %v8135_v8 = vadd.f32 %v12603_v56, %v8014_v25  ;;  %v8008_v62 = vadd.f32 %v8007_v45, %v7869_v47  ;;  %8158 = vadd.xlane.f32.xlu1 %v16915_v35  ;;  %v16928_v49 = vadd.f32 %v8117_v16, %v5380_v55  ;;  %12605 = vmatpush3.msra.mxu0 %v16940_v19 }
 0x9c8   : > { %v16953_v22 = vand.u32 4294901760, %v16945_v33  ;;  %12606 = vmatprep.subr.mxu0 %v16942_v59  ;;  %v8460_v58 = vsub.f32 %v16948_v60, %v16956_v53  ;;  %v16986_v11 = vsub.f32 %v8278_v32, %v16977_v29  ;;  %v17024_v45 = vsub.f32 %v8276_v5, %v17007_v27  ;;  %v8271_v32 = vld [vmem:[%s17962_s6 + $0x30] sm:$0xff] }
 0x9c9   : > { %8152 = vadd.xlane.f32.xlu0 %v16919_v39  ;;  %v16923_v44 = vadd.f32 %v8135_v8, %v5383_v0  ;;  %v8129_v57 = vadd.f32 %v8128_v3, %v8008_v62  ;;  %12607 = vmatpush3.msra.mxu0 %v16942_v59  ;;  %v8274_v0 = vld [vmem:[%s17962_s6 + $0x48] sm:$0xff]  ;;  %v17044_v55 = vsub.f32 %v8275_v28, %v17026_v48 }
 0x9ca   : > { %v8453_v37 = vsub.f32 %v16945_v33, %v16953_v22  ;;  %v8461_v54 = vand.u32 4294901760, %v8460_v58  ;;  %12608 = vmatprep.subr.mxu0 %v16977_v29  ;;  %v17001_v63 = vand.u32 4294901760, %v16986_v11  ;;  %v17041_v14 = vand.u32 4294901760, %v17024_v45 }
 0x9cb   : > { %8162 = vadd.xlane.f32.xlu1 %v16923_v44  ;;  %v16931_v20 = vadd.f32 %v8129_v57, %v5382_v41  ;;  %12609 = vmatpush3.msra.mxu0 %v16977_v29  ;;  %v17046_v43 = vand.u32 4294901760, %v8274_v0  ;;  %v17058_v9 = vand.u32 4294901760, %v17044_v55 }
 0x9cc   : > { %v8454_v1 = vand.u32 4294901760, %v8453_v37  ;;  %v8467_v25 = vsub.f32 %v16986_v11, %v17001_v63  ;;  %v8481_v41 = vsub.f32 %v17024_v45, %v17041_v14 }
 0x9cd   : > { %8156 = vadd.xlane.f32.xlu0 %v16928_v49  ;;  %v17061_v34 = vsub.f32 %v8274_v0, %v17046_v43 }
 0x9ce   : > { %12648 = vmatprep.subr.mxu1 %v8454_v1 }
 0x9cf   : > { %12649 = vmatpush3.msra.mxu1 %v8454_v1  ;;  %v17068_v1 = vand.u32 4294901760, %v8273_v51 }
 0x9d0   : > { %12650 = vmatprep.subr.mxu1 %v8461_v54 }
 0x9d1   : > { %8160 = vadd.xlane.f32.xlu0 %v16931_v20  ;;  %12651 = vmatpush3.msra.mxu1 %v8461_v54  ;;  %v8272_v54 = vld [vmem:[%s17962_s6 + $0x38] sm:$0xff] }
 0xa48   : > { %v8151_v40 = vpop.xlane.xlu1 %8150 }
 0xa49   : > { %v8166_v30 = vmul.f32 0.0078125, %v8151_v40  ;;  %v8482_v40 = vand.u32 4294901760, %v8481_v41  ;;  %v8267_v41 = vld [vmem:[%s17962_s6 + $0x10] sm:$0xff] }
 0xa4a   : > { %v8149_v13 = vpop.xlane.xlu0 %8148 }
 0xa4b   : > { %v16965_v38 = vsub.f32 %v16885_v26, %v8166_v30  ;;  %v8165_v61 = vmul.f32 0.0078125, %v8149_v13  ;;  %v8488_v30 = vsub.f32 %v17044_v55, %v17058_v9  ;;  %v17077_v13 = vand.u32 4294901760, %v17061_v34 }
 0xa4d   : > { %v16968_v7 = vsub.f32 %v16893_v50, %v8165_v61  ;;  %v8182_v15 = vmul.f32 %v16965_v38, %v16965_v38  ;;  %v8277_v50 = vld [vmem:[%s17962_s6 + $0x60] sm:$0xff]  ;;  %18647 = vst [vmem:[#allocation65_spill] sm:$0xff] %v17077_v13  ;;  %v17079_v61 = vand.u32 4294901760, %v8272_v54 }
 0xa4e   : > { %v8155_v6 = vpop.xlane.xlu0 %8154  ;;  %v16988_v23 = vand.u32 4294901760, %v8277_v50 }
 0xa4f   : > { %v8168_v18 = vmul.f32 0.0078125, %v8155_v6  ;;  %8191 = vadd.xlane.f32.xlu1 %v8182_v15  ;;  %v8181_v31 = vmul.f32 %v16968_v7, %v16968_v7  ;;  %v17086_v6 = vsub.f32 %v8273_v51, %v17068_v1 }
 0xa50   : > { %v8159_v26 = vpop.xlane.xlu1 %8158  ;;  %12610 = vmatprep.subr.mxu0 %v16988_v23  ;;  %v17005_v10 = vsub.f32 %v8277_v50, %v16988_v23  ;;  %v17096_v50 = vand.u32 4294901760, %v8271_v32 }
 0xa51   : > { %v16983_v4 = vsub.f32 %v16907_v24, %v8168_v18  ;;  %v8170_v2 = vmul.f32 0.0078125, %v8159_v26  ;;  %8189 = vadd.xlane.f32.xlu0 %v8181_v31  ;;  %12611 = vmatpush3.msra.mxu0 %v16988_v23  ;;  %v8489_v18 = vand.u32 4294901760, %v8488_v30  ;;  %v8495_v31 = vsub.f32 %v17061_v34, %v17077_v13  ;;  %v8266_v30 = vld [vmem:[%s17962_s6 + $0x8] sm:$0xff] }
 0xa52   : > { %v8153_v52 = vpop.xlane.xlu0 %8152  ;;  %v17021_v56 = vand.u32 4294901760, %v17005_v10  ;;  %12612 = vmatprep.subr.mxu0 %v17007_v27  ;;  %v17094_v26 = vsub.f32 %v8272_v54, %v17079_v61  ;;  %v17157_v54 = vand.u32 4294901760, %v8267_v41 }
 0xa53   : > { %v16996_v46 = vsub.f32 %v16915_v35, %v8170_v2  ;;  %v8167_v24 = vmul.f32 0.0078125, %v8153_v52  ;;  %v8184_v17 = vmul.f32 %v16983_v4, %v16983_v4  ;;  %12613 = vmatpush3.msra.mxu0 %v17007_v27  ;;  %v17102_v2 = vand.u32 4294901760, %v17086_v6  ;;  %v8270_v52 = vld [vmem:[%s17962_s6 + $0x28] sm:$0xff] }
 0xa54   : > { %v8163_v36 = vpop.xlane.xlu1 %8162  ;;  %v8474_v42 = vsub.f32 %v17005_v10, %v17021_v56  ;;  %12614 = vmatprep.subr.mxu0 %v17026_v48  ;;  %v8496_v5 = vand.u32 4294901760, %v8495_v31  ;;  %v17170_v31 = vsub.f32 %v8267_v41, %v17157_v54 }
 0xa55   : > { %v17014_v21 = vsub.f32 %v16919_v39, %v8167_v24  ;;  %v8172_v12 = vmul.f32 0.0078125, %v8163_v36  ;;  %8195 = vadd.xlane.f32.xlu1 %v8184_v17  ;;  %v8186_v35 = vmul.f32 %v16996_v46, %v16996_v46  ;;  %v8468_v39 = vand.u32 4294901760, %v8467_v25  ;;  %12615 = vmatpush3.msra.mxu0 %v17026_v48  ;;  %18648 = vst [vmem:[#allocation16_spill] sm:$0xff] %v17102_v2 }
 0xa56   : > { %v8157_v47 = vpop.xlane.xlu0 %8156  ;;  %v8475_v57 = vand.u32 4294901760, %v8474_v42  ;;  %12616 = vmatprep.subr.mxu0 %v17046_v43  ;;  %v17109_v24 = vand.u32 4294901760, %v17094_v26  ;;  %v17112_v17 = vsub.f32 %v8271_v32, %v17096_v50  ;;  %v17114_v36 = vand.u32 4294901760, %v8270_v52 }
 0xa57   : > { %v17033_v16 = vsub.f32 %v16923_v44, %v8172_v12  ;;  %v8169_v8 = vmul.f32 0.0078125, %v8157_v47  ;;  %v8183_v62 = vmul.f32 %v17014_v21, %v17014_v21  ;;  %12652 = vmatprep.subr.mxu1 %v8468_v39  ;;  %12617 = vmatpush3.msra.mxu0 %v17046_v43  ;;  %v8502_v28 = vsub.f32 %v17086_v6, %v17102_v2  ;;  %v8269_v12 = vld [vmem:[%s17962_s6 + $0x20] sm:$0xff] }
 0xa58   : > { %12653 = vmatpush3.msra.mxu1 %v8468_v39  ;;  %12618 = vmatprep.subr.mxu0 %v17068_v1  ;;  %18649 = vst [vmem:[#allocation35_spill] sm:$0xff] %v17109_v24  ;;  %v8509_v25 = vsub.f32 %v17094_v26, %v17109_v24  ;;  %v17125_v47 = vand.u32 4294901760, %v17112_v17  ;;  %v17130_v0 = vand.u32 4294901760, %v8269_v12 }
 0xa59   : > { %v17050_v44 = vsub.f32 %v16928_v49, %v8169_v8  ;;  %8199 = vadd.xlane.f32.xlu1 %v8186_v35  ;;  %8193 = vadd.xlane.f32.xlu0 %v8183_v62  ;;  %v8188_v37 = vmul.f32 %v17033_v16, %v17033_v16  ;;  %v17128_v35 = vsub.f32 %v8270_v52, %v17114_v36  ;;  %v8503_v8 = vand.u32 4294901760, %v8502_v28  ;;  %v8268_v62 = vld [vmem:[%s17962_s6 + $0x18] sm:$0xff] }
 0xa5a   : > { %v8161_v3 = vpop.xlane.xlu0 %8160  ;;  %12654 = vmatprep.subr.mxu1 %v8475_v57  ;;  %12619 = vmatpush3.msra.mxu0 %v17068_v1  ;;  %18650 = vst [vmem:[#allocation61_spill] sm:$0xff] %v17125_v47  ;;  %v8510_v39 = vand.u32 4294901760, %v8509_v25  ;;  %v8516_v42 = vsub.f32 %v17112_v17, %v17125_v47 }
 0xa5b   : > { %v8171_v49 = vmul.f32 0.0078125, %v8161_v3  ;;  %v8185_v58 = vmul.f32 %v17050_v44, %v17050_v44  ;;  %12655 = vmatpush3.msra.mxu1 %v8475_v57  ;;  %12620 = vmatprep.subr.mxu0 %v17079_v61  ;;  %v17140_v51 = vand.u32 4294901760, %v17128_v35  ;;  %v17143_v3 = vsub.f32 %v8269_v12, %v17130_v0 }
 0xa5c   : > { %12656 = vmatprep.subr.mxu1 %v8482_v40  ;;  %12621 = vmatpush3.msra.mxu0 %v17079_v61  ;;  %v17146_v57 = vand.u32 4294901760, %v8268_v62  ;;  %v17183_v12 = vand.u32 4294901760, %v17170_v31 }
 0xa5d   : > { %v17083_v15 = vsub.f32 %v16931_v20, %v8171_v49  ;;  %8203 = vadd.xlane.f32.xlu1 %v8188_v37  ;;  %8197 = vadd.xlane.f32.xlu0 %v8185_v58  ;;  %18651 = vst [vmem:[#allocation59_spill] sm:$0xff] %v17140_v51  ;;  %v8517_v49 = vand.u32 4294901760, %v8516_v42  ;;  %v8523_v37 = vsub.f32 %v17128_v35, %v17140_v51  ;;  %v17155_v58 = vand.u32 4294901760, %v17143_v3 }
 0xa5e   : > { %12657 = vmatpush3.msra.mxu1 %v8482_v40  ;;  %12622 = vmatprep.subr.mxu0 %v17096_v50  ;;  %v17161_v40 = vsub.f32 %v8268_v62, %v17146_v57  ;;  %18654 = vst [vmem:[#allocation68_spill] sm:$0xff] %v17183_v12 }
 0xa5f   : > { %v8187_v20 = vmul.f32 %v17083_v15, %v17083_v15  ;;  %12658 = vmatprep.subr.mxu1 %v8489_v18  ;;  %12623 = vmatpush3.msra.mxu0 %v17096_v50  ;;  %18652 = vst [vmem:[#allocation22_spill] sm:$0xff] %v17155_v58  ;;  %v8524_v32 = vand.u32 4294901760, %v8523_v37 }
 0xa60   : > { %12659 = vmatpush3.msra.mxu1 %v8489_v18  ;;  %12624 = vmatprep.subr.mxu0 %v17114_v36  ;;  %v8530_v18 = vsub.f32 %v17143_v3, %v17155_v58  ;;  %v17176_v52 = vand.u32 4294901760, %v17161_v40 }
 0xa61   : > { %8201 = vadd.xlane.f32.xlu0 %v8187_v20  ;;  %12660 = vmatprep.subr.mxu1 %v8496_v5  ;;  %v17172_v20 = vand.u32 4294901760, %v8266_v30 }
 0xa62   : > { %12661 = vmatpush3.msra.mxu1 %v8496_v5  ;;  %12625 = vmatpush3.msra.mxu0 %v17114_v36  ;;  %18653 = vst [vmem:[#allocation63_spill] sm:$0xff] %v17176_v52  ;;  %v8265_v5 = vld [vmem:[%s17962_s6] sm:$0xff]  ;;  %v8531_v28 = vand.u32 4294901760, %v8530_v18  ;;  %v8537_v62 = vsub.f32 %v17161_v40, %v17176_v52 }
 0xa63   : > { %12662 = vmatprep.subr.mxu1 %v8503_v8  ;;  %12626 = vmatprep.subr.mxu0 %v17130_v0  ;;  %v17186_v25 = vsub.f32 %v8266_v30, %v17172_v20 }
 0xa64   : > { %12663 = vmatpush3.msra.mxu1 %v8503_v8  ;;  %12627 = vmatpush3.msra.mxu0 %v17130_v0  ;;  %v17188_v8 = vand.u32 4294901760, %v8265_v5 }
 0xa65   : > { %12664 = vmatprep.subr.mxu1 %v8510_v39  ;;  %12628 = vmatprep.subr.mxu0 %v17146_v57  ;;  %v17197_v42 = vand.u32 4294901760, %v17186_v25 }
 0xa66   : > { %12665 = vmatpush3.msra.mxu1 %v8510_v39  ;;  %12629 = vmatpush3.msra.mxu0 %v17146_v57  ;;  %v8544_v39 = vsub.f32 %v17170_v31, %v17183_v12  ;;  %v17200_v41 = vsub.f32 %v8265_v5, %v17188_v8 }
 0xa67   : > { %12666 = vmatprep.subr.mxu1 %v8517_v49  ;;  %12630 = vmatprep.subr.mxu0 %v17157_v54  ;;  %18655 = vst [vmem:[#allocation66_spill] sm:$0xff] %v17197_v42  ;;  %v8551_v30 = vsub.f32 %v17186_v25, %v17197_v42 }
 0xa68   : > { %12667 = vmatpush3.msra.mxu1 %v8517_v49  ;;  %12631 = vmatpush3.msra.mxu0 %v17157_v54  ;;  %v8538_v49 = vand.u32 4294901760, %v8537_v62  ;;  %v8545_v37 = vand.u32 4294901760, %v8544_v39 }
 0xa69   : > { %12668 = vmatprep.subr.mxu1 %v8524_v32  ;;  %12632 = vmatprep.subr.mxu0 %v17172_v20  ;;  %v8552_v18 = vand.u32 4294901760, %v8551_v30 }
 0xa6a   : > { %12669 = vmatpush3.msra.mxu1 %v8524_v32  ;;  %v17207_v32 = vand.u32 4294901760, %v17200_v41  ;;  %12633 = vmatpush3.msra.mxu0 %v17172_v20 }
 0xa6b   : > { %12670 = vmatprep.subr.mxu1 %v8531_v28  ;;  %12634 = vmatprep.subr.mxu0 %v17188_v8 }
 0xa6c   : > { %12671 = vmatpush3.msra.mxu1 %v8531_v28  ;;  %18656 = vst [vmem:[#allocation32_spill] sm:$0xff] %v17207_v32  ;;  %v8558_v5 = vsub.f32 %v17200_v41, %v17207_v32  ;;  %12635 = vmatpush3.msra.mxu0 %v17188_v8 }
 0xa6d   : > { %12672 = vmatprep.subr.mxu1 %v8538_v49  ;;  %12692 = vmatprep.subr.mxu0 %v16945_v33 }
 0xa6e   : > { %12673 = vmatpush3.msra.mxu1 %v8538_v49  ;;  %v8559_v28 = vand.u32 4294901760, %v8558_v5 }
 0xa6f   : > { %12674 = vmatprep.subr.mxu1 %v8545_v37 }
 0xa70   : > { %12675 = vmatpush3.msra.mxu1 %v8545_v37 }
 0xa71   : > { %12676 = vmatprep.subr.mxu1 %v8552_v18 }
 0xa72   : > { %12677 = vmatpush3.msra.mxu1 %v8552_v18 }
 0xa73   : > { %12678 = vmatprep.subr.mxu1 %v8559_v28 }
 0xa74   : > { %12679 = vmatpush3.msra.mxu1 %v8559_v28 }
 0xa75   : > { %12736 = vmatprep.subr.mxu1 %v16940_v19 }
 0xad8   : > { %v8192_v62 = vpop.xlane.xlu1 %8191 }
 0xad9   : > { %v8206_v39 = vmul.f32 0.0078125, %v8192_v62 }
 0xada   : > { %v8190_v49 = vpop.xlane.xlu0 %8189 }
 0xadb   : > { %v8214_v30 = vadd.f32 1e-05, %v8206_v39  ;;  %v8205_v42 = vmul.f32 0.0078125, %v8190_v49 }
 0xadd   : > { %13168 = vrsqrt.f32 %v8214_v30  ;;  %v8213_v32 = vadd.f32 1e-05, %v8205_v42 }
 0xade   : > { %v8196_v12 = vpop.xlane.xlu1 %8195 }
 0xadf   : > { %13170 = vrsqrt.f32 %v8213_v32  ;;  %v8208_v52 = vmul.f32 0.0078125, %v8196_v12 }
 0xae1   : > { %v8216_v58 = vadd.f32 1e-05, %v8208_v52  ;;  %v17219_v52 = vld [vmem:[%s17960_s4] ss:$0 sm:$0xff] }
 0xae2   : > { %v8200_v51 = vpop.xlane.xlu1 %8199  ;;  %v8194_v37 = vpop.xlane.xlu0 %8193 }
 0xae3   : > { %13172 = vrsqrt.f32 %v8216_v58  ;;  %v8210_v5 = vmul.f32 0.0078125, %v8200_v51  ;;  %v8207_v18 = vmul.f32 0.0078125, %v8194_v37 }
 0xae5   : > { %v8218_v47 = vadd.f32 1e-05, %v8210_v5  ;;  %v8215_v28 = vadd.f32 1e-05, %v8207_v18 }
 0xae6   : > { %v8204_v24 = vpop.xlane.xlu1 %8203  ;;  %v8198_v2 = vpop.xlane.xlu0 %8197 }
 0xae7   : > { %13174 = vrsqrt.f32 %v8218_v47  ;;  %v8212_v62 = vmul.f32 0.0078125, %v8204_v24  ;;  %v8209_v13 = vmul.f32 0.0078125, %v8198_v2  ;;  %v17225_v24 = vld [vmem:[%s17961_s5] ss:$0 sm:$0xff] }
 0xae8   : > { %13176 = vrsqrt.f32 %v8215_v28 }
 0xae9   : > { %v8220_v39 = vadd.f32 1e-05, %v8212_v62  ;;  %v8217_v49 = vadd.f32 1e-05, %v8209_v13 }
 0xaea   : > { %v13169_v42 = vpop.eup %13168  ;;  %v8202_v12 = vpop.xlane.xlu0 %8201 }
 0xaeb   : > { %v8230_v51 = vmul.f32 %v13169_v42, %v16965_v38  ;;  %13178 = vrsqrt.f32 %v8220_v39  ;;  %v8211_v58 = vmul.f32 0.0078125, %v8202_v12 }
 0xaec   : > { %v13171_v32 = vpop.eup %13170  ;;  %13180 = vrsqrt.f32 %v8217_v49 }
 0xaed   : > { %v8244_v13 = vmul.f32 %v17219_v52, %v8230_v51  ;;  %v8229_v2 = vmul.f32 %v13171_v32, %v16968_v7  ;;  %v8219_v47 = vadd.f32 1e-05, %v8211_v58 }
 0xaef   : > { %v17230_v30 = vadd.f32 %v17225_v24, %v8244_v13  ;;  %13182 = vrsqrt.f32 %v8219_v47  ;;  %v8243_v38 = vmul.f32 %v17219_v52, %v8229_v2 }
 0xaf0   : > { %v13173_v37 = vpop.eup %13172 }
 0xaf1   : > { %18657 = vst [vmem:[#allocation23_spill] sm:$0xff] %v17230_v30  ;;  %v8232_v5 = vmul.f32 %v13173_v37, %v16983_v4  ;;  %v17235_v18 = vadd.f32 %v17225_v24, %v8243_v38  ;;  %v17238_v28 = vand.u32 4294901760, %v17230_v30 }
 0xaf3   : > { %18658 = vst [vmem:[#allocation50_spill] sm:$0xff] %v17235_v18  ;;  %v17241_v62 = vand.u32 4294901760, %v17235_v18  ;;  %v17245_v7 = vsub.f32 %v17230_v30, %v17238_v28  ;;  %v8246_v39 = vmul.f32 %v17219_v52, %v8232_v5 }
 0xaf4   : > { %v13175_v49 = vpop.eup %13174 }
 0xaf5   : > { %v13177_v42 = vpop.eup %13176  ;;  %v8234_v12 = vmul.f32 %v13175_v49, %v16996_v46  ;;  %12680 = vmatprep.mubr.f32.mxu1 %v17241_v62  ;;  %v17252_v4 = vsub.f32 %v17235_v18, %v17241_v62  ;;  %v18226_v51 = vand.u32 4294901760, %v17245_v7  ;;  %v17256_v58 = vadd.f32 %v17225_v24, %v8246_v39 }
 0xaf6   : > { %v8231_v32 = vmul.f32 %v13177_v42, %v17014_v21  ;;  %12681 = vmatmul.mubr.f32.vlgmr.msra.gmra.mxu1 %v17238_v28 }
 0xaf7   : > { %18659 = vst [vmem:[#allocation43_spill] sm:$0xff] %v17256_v58  ;;  %12737 = vmatpush3.msra.mxu1 %v16940_v19  ;;  %v18228_v13 = vand.u32 4294901760, %v17252_v4  ;;  %v8248_v46 = vmul.f32 %v17219_v52, %v8234_v12  ;;  %v17266_v38 = vand.u32 4294901760, %v17256_v58  ;;  %v8382_v39 = vsub.f32 %v17245_v7, %v18226_v51 }
 0xaf8   : > { %v13179_v2 = vpop.eup %13178  ;;  %12738 = vmatprep.subr.mxu1 %v16942_v59  ;;  %v8245_v47 = vmul.f32 %v17219_v52, %v8231_v32 }
 0xaf9   : > { %v13181_v37 = vpop.eup %13180  ;;  %v8236_v5 = vmul.f32 %v13179_v2, %v17033_v16  ;;  %12739 = vmatpush3.msra.mxu1 %v16942_v59  ;;  %v8372_v21 = vsub.f32 %v17252_v4, %v18228_v13  ;;  %v17282_v12 = vadd.f32 %v17225_v24, %v8248_v46 }
 0xafa   : > { %v8233_v49 = vmul.f32 %v13181_v37, %v17050_v44  ;;  %12740 = vmatprep.subr.mxu1 %v16977_v29  ;;  %v17279_v42 = vadd.f32 %v17225_v24, %v8245_v47  ;;  %v17293_v47 = vsub.f32 %v17256_v58, %v17266_v38  ;;  %v8383_v37 = vand.u32 4294901760, %v8382_v39 }
 0xafb   : > { %18661 = vst [vmem:[#allocation38_spill] sm:$0xff] %v17282_v12  ;;  %12741 = vmatpush3.msra.mxu1 %v16977_v29  ;;  %v8373_v16 = vand.u32 4294901760, %v8372_v21  ;;  %v8250_v32 = vmul.f32 %v17219_v52, %v8236_v5  ;;  %v17303_v21 = vand.u32 4294901760, %v17282_v12 }
 0xafc   : > { %18660 = vst [vmem:[#allocation46_spill] sm:$0xff] %v17279_v42  ;;  %v13183_v2 = vpop.eup %13182  ;;  %12742 = vmatprep.subr.mxu1 %v16988_v23  ;;  %v17288_v51 = vand.u32 4294901760, %v17279_v42  ;;  %v8247_v44 = vmul.f32 %v17219_v52, %v8233_v49 }
 0xafd   : > { %v8235_v46 = vmul.f32 %v13183_v2, %v17083_v15  ;;  %12743 = vmatpush3.msra.mxu1 %v16988_v23  ;;  %12636 = vmatprep.mubr.f32.mxu0 %v8373_v16  ;;  %v17312_v39 = vadd.f32 %v17225_v24, %v8250_v32 }
 0xafe   : > { %12683 = vmatprep.mubr.f32.mxu1 %v17288_v51  ;;  %12744 = vmatprep.subr.mxu1 %v17007_v27  ;;  %v17300_v5 = vadd.f32 %v17225_v24, %v8247_v44  ;;  %v17307_v49 = vsub.f32 %v17279_v42, %v17288_v51  ;;  %v18229_v44 = vand.u32 4294901760, %v17293_v47 }
 0xaff   : > { %12637 = vmatmul.mubr.f32.vlgmr.msra.gmra.mxu0 %v8383_v37  ;;  %12684 = vmatmul.mubr.f32.gmra.mxu1 %v17266_v38  ;;  %v8249_v15 = vmul.f32 %v17219_v52, %v8235_v46  ;;  %18663 = vst [vmem:[#allocation26_spill] sm:$0xff] %v17312_v39  ;;  %v17337_v46 = vsub.f32 %v17282_v12, %v17303_v21 }
 0xb00   : > { %18662 = vst [vmem:[#allocation27_spill] sm:$0xff] %v17300_v5  ;;  %12693 = vmatpush3.msra.mxu0 %v16945_v33  ;;  %12745 = vmatpush3.msra.mxu1 %v17007_v27  ;;  %v17317_v16 = vand.u32 4294901760, %v17300_v5  ;;  %v18227_v2 = vand.u32 4294901760, %v17307_v49 }
 0xb01   : > { %12694 = vmatprep.subr.mxu0 %v16948_v60  ;;  %12746 = vmatprep.subr.mxu1 %v17026_v48  ;;  %v17324_v52 = vadd.f32 %v17225_v24, %v8249_v15  ;;  %v17345_v24 = vand.u32 4294901760, %v17312_v39  ;;  %v8402_v15 = vsub.f32 %v17293_v47, %v18229_v44  ;;  %v8421_v44 = vand.u32 4294901760, %v17337_v46 }
 0xb02   : > { %12695 = vmatpush3.msra.mxu0 %v16948_v60  ;;  %12747 = vmatpush3.msra.mxu1 %v17026_v48  ;;  %v8392_v33 = vsub.f32 %v17307_v49, %v18227_v2  ;;  %v17333_v32 = vsub.f32 %v17300_v5, %v17317_v16 }
 0xb03   : > { %18664 = vst [vmem:[#allocation57_spill] sm:$0xff] %v17324_v52  ;;  %12686 = vmatprep.mubr.f32.mxu1 %v17317_v16  ;;  %12696 = vmatprep.subr.mxu0 %v16986_v11  ;;  %v17342_v60 = vand.u32 4294901760, %v17324_v52  ;;  %v8403_v5 = vand.u32 4294901760, %v8402_v15 }
 0xb04   : > { %12748 = vmatprep.subr.mxu1 %v17046_v43  ;;  %12687 = vmatmul.mubr.f32.gmra.mxu1 %v17303_v21  ;;  %v8393_v37 = vand.u32 4294901760, %v8392_v33  ;;  %v18232_v2 = vand.u32 4294901760, %v17333_v32 }
 0xb05   : > { %12697 = vmatpush3.msra.mxu0 %v16986_v11  ;;  %12749 = vmatpush3.msra.mxu1 %v17046_v43  ;;  %v17357_v13 = vsub.f32 %v17324_v52, %v17342_v60  ;;  %v17370_v52 = vsub.f32 %v17312_v39, %v17345_v24 }
 0xb06   : > { %12698 = vmatprep.subr.mxu0 %v17005_v10  ;;  %12750 = vmatprep.subr.mxu1 %v17068_v1  ;;  %v8412_v33 = vsub.f32 %v17333_v32, %v18232_v2  ;;  %v8422_v2 = vsub.f32 %v17337_v46, %v8421_v44 }
 0xb07   : > { %12699 = vmatpush3.msra.mxu0 %v17005_v10  ;;  %12751 = vmatpush3.msra.mxu1 %v17068_v1  ;;  %v18233_v11 = vand.u32 4294901760, %v17357_v13  ;;  %v8441_v15 = vand.u32 4294901760, %v17370_v52 }
 0xb08   : > { %12639 = vmatprep.mubr.f32.mxu0 %v8393_v37  ;;  %12689 = vmatprep.mubr.f32.mxu1 %v17342_v60  ;;  %v8413_v10 = vand.u32 4294901760, %v8412_v33 }
 0xb09   : > { %12700 = vmatprep.subr.mxu0 %v17024_v45  ;;  %12752 = vmatprep.subr.mxu1 %v17079_v61  ;;  %v8432_v37 = vsub.f32 %v17357_v13, %v18233_v11  ;;  %v8442_v11 = vsub.f32 %v17370_v52, %v8441_v15 }
 0xb0a   : > { %12640 = vmatmul.mubr.f32.gmra.mxu0 %v8403_v5  ;;  %12690 = vmatmul.mubr.f32.gmra.mxu1 %v17345_v24  ;;  %v18665_v5 = vand.u32 4294901760, %v17252_v4 }
 0xb0b   : > { %12701 = vmatpush3.msra.mxu0 %v17024_v45  ;;  %12753 = vmatpush3.msra.mxu1 %v17079_v61  ;;  %v8423_v45 = vand.u32 4294901760, %v8422_v2  ;;  %v8433_v33 = vand.u32 4294901760, %v8432_v37 }
 0xb0c   : > { %12702 = vmatprep.subr.mxu0 %v17044_v55  ;;  %12754 = vmatprep.subr.mxu1 %v17096_v50 }
 0xb0d   : > { %12768 = vmatprep.mubr.f32.mxu1 %v18665_v5  ;;  %12703 = vmatpush3.msra.mxu0 %v17044_v55  ;;  %v8443_v55 = vand.u32 4294901760, %v8442_v11 }
 0xb0e   : > { %12755 = vmatpush3.msra.mxu1 %v17096_v50  ;;  %12642 = vmatprep.mubr.f32.mxu0 %v8413_v10 }
 0xb0f   : > { %12704 = vmatprep.subr.mxu0 %v17061_v34  ;;  %12756 = vmatprep.subr.mxu1 %v17114_v36 }
 0xb10   : > { %12643 = vmatmul.mubr.f32.gmra.mxu0 %v8423_v45  ;;  %12757 = vmatpush3.msra.mxu1 %v17114_v36 }
 0xb11   : > { %12705 = vmatpush3.msra.mxu0 %v17061_v34  ;;  %12758 = vmatprep.subr.mxu1 %v17130_v0  ;;  %v18666_v34 = vand.u32 4294901760, %v17245_v7 }
 0xb12   : > { %12706 = vmatprep.subr.mxu0 %v17086_v6  ;;  %12759 = vmatpush3.msra.mxu1 %v17130_v0 }
 0xb13   : > { %12707 = vmatpush3.msra.mxu0 %v17086_v6  ;;  %12645 = vmatprep.mubr.f32.mxu0 %v8433_v33  ;;  %v18667_v6 = vand.u32 4294901760, %v17307_v49 }
 0xb14   : > { %12708 = vmatprep.subr.mxu0 %v17094_v26  ;;  %12760 = vmatprep.subr.mxu1 %v17146_v57 }
 0xb15   : > { %12646 = vmatmul.mubr.f32.gmra.mxu0 %v8443_v55  ;;  %12761 = vmatpush3.msra.mxu1 %v17146_v57 }
 0xb16   : > { %12709 = vmatpush3.msra.mxu0 %v17094_v26  ;;  %12724 = vmatprep.mubr.f32.mxu0 %v17252_v4  ;;  %v18668_v26 = vand.u32 4294901760, %v17293_v47  ;;  %v9240_v4 = vld [vmem:[%s17964_s8 + $0x10] sm:$0xff] }
 0xb17   : > { %12710 = vmatprep.subr.mxu0 %v17112_v17  ;;  %12762 = vmatprep.subr.mxu1 %v17157_v54 }
 0xb18   : > { %12711 = vmatpush3.msra.mxu0 %v17112_v17  ;;  %12763 = vmatpush3.msra.mxu1 %v17157_v54  ;;  %v18669_v17 = vand.u32 4294901760, %v17333_v32 }
 0xb19   : > { %12712 = vmatprep.subr.mxu0 %v17128_v35  ;;  %12764 = vmatprep.subr.mxu1 %v17172_v20 }
 0xb1a   : > { %12713 = vmatpush3.msra.mxu0 %v17128_v35  ;;  %12765 = vmatpush3.msra.mxu1 %v17172_v20 }
 0xb1b   : > { %12714 = vmatprep.subr.mxu0 %v17143_v3  ;;  %12766 = vmatprep.subr.mxu1 %v17188_v8 }
 0xb1c   : > { %12715 = vmatpush3.msra.mxu0 %v17143_v3  ;;  %12767 = vmatpush3.msra.mxu1 %v17188_v8 }
 0xb1d   : > { %12716 = vmatprep.subr.mxu0 %v17161_v40  ;;  %12769 = vmatmul.mubr.f32.vlgmr.msra.gmra.mxu1 %v18666_v34 }
 0xb1e   : > { %12824 = vmatprep.subr.mxu1 %v16940_v19  ;;  %12717 = vmatpush3.msra.mxu0 %v17161_v40 }
 0xb1f   : > { %12771 = vmatprep.mubr.f32.mxu1 %v18667_v6  ;;  %12825 = vmatpush3.msra.mxu1 %v16940_v19  ;;  %v18670_v19 = vand.u32 4294901760, %v17357_v13 }
 0xb20   : > { %12718 = vmatprep.subr.mxu0 %v17170_v31  ;;  %12826 = vmatprep.subr.mxu1 %v16942_v59 }
 0xb21   : > { %12719 = vmatpush3.msra.mxu0 %v17170_v31  ;;  %12827 = vmatpush3.msra.mxu1 %v16942_v59  ;;  %v18671_v59 = vld [vmem:[#allocation65_spill] sm:$0xff] }
 0xb22   : > { %12720 = vmatprep.subr.mxu0 %v17186_v25  ;;  %12772 = vmatmul.mubr.f32.gmra.mxu1 %v18668_v26 }
 0xb23   : > { %12828 = vmatprep.subr.mxu1 %v16977_v29  ;;  %12721 = vmatpush3.msra.mxu0 %v17186_v25  ;;  %v9241_v25 = vld [vmem:[%s17964_s8 + $0x18] sm:$0xff] }
 0xb24   : > { %12774 = vmatprep.mubr.f32.mxu1 %v18669_v17  ;;  %12829 = vmatpush3.msra.mxu1 %v16977_v29  ;;  %v18674_v29 = vld [vmem:[#allocation61_spill] sm:$0xff] }
 0xb25   : > { %12722 = vmatprep.subr.mxu0 %v17200_v41  ;;  %12830 = vmatprep.subr.mxu1 %v16988_v23 }
 0xb26   : > { %12723 = vmatpush3.msra.mxu0 %v17200_v41  ;;  %12831 = vmatpush3.msra.mxu1 %v16988_v23  ;;  %v18675_v23 = vld [vmem:[#allocation59_spill] sm:$0xff] }
 0xb27   : > { %12725 = vmatmul.mubr.f32.vlgmr.msra.gmra.mxu0 %v17245_v7  ;;  %12775 = vmatmul.mubr.f32.gmra.mxu1 %v8421_v44  ;;  %v17583_v7 = vand.u32 4294901760, %v9241_v25 }
 0xb28   : > { %12780 = vmatprep.subr.mxu0 %v16953_v22  ;;  %12832 = vmatprep.subr.mxu1 %v17007_v27 }
 0xb29   : > { %12727 = vmatprep.mubr.f32.mxu0 %v17307_v49  ;;  %12777 = vmatprep.mubr.f32.mxu1 %v18670_v19  ;;  %v9239_v49 = vld [vmem:[%s17964_s8 + $0x8] sm:$0xff] }
 0xb2a   : > { %12781 = vmatpush3.msra.mxu0 %v16953_v22  ;;  %12833 = vmatpush3.msra.mxu1 %v17007_v27  ;;  %v18672_v22 = vld [vmem:[#allocation16_spill] sm:$0xff]  ;;  %v18677_v27 = vld [vmem:[#allocation63_spill] sm:$0xff] }
 0xb2b   : > { %12782 = vmatprep.subr.mxu0 %v16956_v53  ;;  %12834 = vmatprep.subr.mxu1 %v17026_v48 }
 0xb2c   : > { %12783 = vmatpush3.msra.mxu0 %v16956_v53  ;;  %12835 = vmatpush3.msra.mxu1 %v17026_v48  ;;  %v18673_v53 = vld [vmem:[#allocation35_spill] sm:$0xff]  ;;  %v18679_v48 = vld [vmem:[#allocation66_spill] sm:$0xff] }
 0xb2d   : > { %12728 = vmatmul.mubr.f32.gmra.mxu0 %v17293_v47  ;;  %12778 = vmatmul.mubr.f32.gmra.mxu1 %v8441_v15  ;;  %v17594_v47 = vand.u32 4294901760, %v9240_v4 }
 0xb2e   : > { %12784 = vmatprep.subr.mxu0 %v17001_v63  ;;  %12836 = vmatprep.subr.mxu1 %v17046_v43 }
 0xb2f   : > { %12730 = vmatprep.mubr.f32.mxu0 %v17333_v32  ;;  %12785 = vmatpush3.msra.mxu0 %v17001_v63  ;;  %v18676_v63 = vld [vmem:[#allocation22_spill] sm:$0xff]  ;;  %v17606_v44 = vsub.f32 %v9240_v4, %v17594_v47 }
 0xb30   : > { %12837 = vmatpush3.msra.mxu1 %v17046_v43  ;;  %12856 = vmatprep.mubr.f32.mxu1 %v17241_v62  ;;  %v9245_v43 = vld [vmem:[%s17964_s8 + $0x38] sm:$0xff] }
 0xb31   : > { %12786 = vmatprep.subr.mxu0 %v17021_v56  ;;  %12838 = vmatprep.subr.mxu1 %v17068_v1  ;;  %18686 = vst [vmem:[#allocation21_spill] sm:$0xff] %v17606_v44 }
 0xb32   : > { %12787 = vmatpush3.msra.mxu0 %v17021_v56  ;;  %12839 = vmatpush3.msra.mxu1 %v17068_v1  ;;  %v18678_v56 = vld [vmem:[#allocation68_spill] sm:$0xff]  ;;  %v9244_v1 = vld [vmem:[%s17964_s8 + $0x30] sm:$0xff] }
 0xb33   : > { %12731 = vmatmul.mubr.f32.gmra.mxu0 %v17337_v46  ;;  %12788 = vmatprep.subr.mxu0 %v17041_v14  ;;  %v9238_v46 = vld [vmem:[%s17964_s8] sm:$0xff] }
 0xb34   : > { %12840 = vmatprep.subr.mxu1 %v17079_v61  ;;  %12733 = vmatprep.mubr.f32.mxu0 %v17357_v13  ;;  %v17624_v10 = vand.u32 4294901760, %v9238_v46 }
 0xb35   : > { %12789 = vmatpush3.msra.mxu0 %v17041_v14  ;;  %12841 = vmatpush3.msra.mxu1 %v17079_v61  ;;  %v18680_v14 = vld [vmem:[#allocation32_spill] sm:$0xff] }
 0xb36   : > { %12790 = vmatprep.subr.mxu0 %v17058_v9  ;;  %12842 = vmatprep.subr.mxu1 %v17096_v50  ;;  %18690 = vst [vmem:[#allocation31_spill] sm:$0xff] %v17624_v10  ;;  %v17636_v45 = vsub.f32 %v9238_v46, %v17624_v10 }
 0xb37   : > { %12791 = vmatpush3.msra.mxu0 %v17058_v9  ;;  %12843 = vmatpush3.msra.mxu1 %v17096_v50  ;;  %v17531_v9 = vand.u32 4294901760, %v9245_v43  ;;  %v17539_v50 = vand.u32 4294901760, %v9244_v1 }
 0xb38   : > { %12734 = vmatmul.mubr.f32.gmra.mxu0 %v17370_v52  ;;  %12792 = vmatprep.subr.mxu0 %v18671_v59  ;;  %v17608_v52 = vand.u32 4294901760, %v9239_v49  ;;  %18692 = vst [vmem:[#allocation40_spill] sm:$0xff] %v17636_v45  ;;  %v17643_v6 = vand.u32 4294901760, %v17636_v45 }
 0xb39   : > { %12844 = vmatprep.subr.mxu1 %v17114_v36  ;;  %12793 = vmatpush3.msra.mxu0 %v18671_v59  ;;  %v17537_v61 = vsub.f32 %v9245_v43, %v17531_v9 }
 0xb3a   : > { %12812 = vmatprep.mubr.f32.mxu0 %v17241_v62  ;;  %12845 = vmatpush3.msra.mxu1 %v17114_v36  ;;  %v9243_v36 = vld [vmem:[%s17964_s8 + $0x28] sm:$0xff]  ;;  %v17622_v11 = vsub.f32 %v9239_v49, %v17608_v52  ;;  %18693 = vst [vmem:[#allocation30_spill] sm:$0xff] %v17643_v6  ;;  %v9499_v17 = vsub.f32 %v17636_v45, %v17643_v6 }
 0xb3b   : > { %12794 = vmatprep.subr.mxu0 %v18672_v22  ;;  %12846 = vmatprep.subr.mxu1 %v17130_v0  ;;  %v17547_v35 = vand.u32 4294901760, %v17537_v61  ;;  %v17552_v3 = vand.u32 4294901760, %v9243_v36 }
 0xb3c   : > { %12795 = vmatpush3.msra.mxu0 %v18672_v22  ;;  %12847 = vmatpush3.msra.mxu1 %v17130_v0  ;;  %v17550_v0 = vsub.f32 %v9244_v1, %v17539_v50  ;;  %18689 = vst [vmem:[#allocation34_spill] sm:$0xff] %v17622_v11  ;;  %v17633_v5 = vand.u32 4294901760, %v17622_v11  ;;  %v9500_v19 = vand.u32 4294901760, %v9499_v17 }
 0xb3d   : > { %12796 = vmatprep.subr.mxu0 %v18673_v53  ;;  %12848 = vmatprep.subr.mxu1 %v17146_v57  ;;  %18681 = vst [vmem:[#allocation41_spill] sm:$0xff] %v17547_v35  ;;  %v17565_v31 = vsub.f32 %v9243_v36, %v17552_v3 }
 0xb3e   : > { %12797 = vmatpush3.msra.mxu0 %v18673_v53  ;;  %12849 = vmatpush3.msra.mxu1 %v17146_v57  ;;  %v9242_v57 = vld [vmem:[%s17964_s8 + $0x20] sm:$0xff]  ;;  %v17562_v40 = vand.u32 4294901760, %v17550_v0  ;;  %18691 = vst [vmem:[#allocation45_spill] sm:$0xff] %v17633_v5  ;;  %v9492_v34 = vsub.f32 %v17622_v11, %v17633_v5 }
 0xb3f   : > { %12798 = vmatprep.subr.mxu0 %v18674_v29  ;;  %12850 = vmatprep.subr.mxu1 %v17157_v54 }
 0xb40   : > { %12799 = vmatpush3.msra.mxu0 %v18674_v29  ;;  %12851 = vmatpush3.msra.mxu1 %v17157_v54  ;;  %v9450_v54 = vsub.f32 %v17537_v61, %v17547_v35  ;;  %18682 = vst [vmem:[#allocation52_spill] sm:$0xff] %v17562_v40  ;;  %v9457_v41 = vsub.f32 %v17550_v0, %v17562_v40  ;;  %v9493_v26 = vand.u32 4294901760, %v9492_v34 }
 0xb41   : > { %12800 = vmatprep.subr.mxu0 %v18675_v23  ;;  %12852 = vmatprep.subr.mxu1 %v17172_v20 }
 0xb42   : > { %12801 = vmatpush3.msra.mxu0 %v18675_v23  ;;  %12853 = vmatpush3.msra.mxu1 %v17172_v20  ;;  %v17567_v20 = vand.u32 4294901760, %v9242_v57 }
 0xb43   : > { %12802 = vmatprep.subr.mxu0 %v18676_v63  ;;  %12854 = vmatprep.subr.mxu1 %v17188_v8 }
 0xb44   : > { %12803 = vmatpush3.msra.mxu0 %v18676_v63  ;;  %12855 = vmatpush3.msra.mxu1 %v17188_v8  ;;  %v9451_v8 = vand.u32 4294901760, %v9450_v54  ;;  %v17580_v62 = vsub.f32 %v9242_v57, %v17567_v20 }
 0xb45   : > { %12804 = vmatprep.subr.mxu0 %v18677_v27  ;;  %12857 = vmatmul.mubr.f32.vlgmr.msra.gmra.mxu1 %v17238_v28 }
 0xb46   : > { %12805 = vmatpush3.msra.mxu0 %v18677_v27  ;;  %12859 = vmatprep.mubr.f32.mxu1 %v17288_v51 }
 0xb47   : > { %12806 = vmatprep.subr.mxu0 %v18678_v56  ;;  %12896 = vmatprep.subr.mxu1 %v9451_v8 }
 0xb48   : > { %12807 = vmatpush3.msra.mxu0 %v18678_v56  ;;  %12897 = vmatpush3.msra.mxu1 %v9451_v8 }
 0xb49   : > { %12808 = vmatprep.subr.mxu0 %v18679_v48  ;;  %12860 = vmatmul.mubr.f32.gmra.mxu1 %v17266_v38 }
 0xb4a   : > { %12809 = vmatpush3.msra.mxu0 %v18679_v48  ;;  %12862 = vmatprep.mubr.f32.mxu1 %v17317_v16 }
 0xb4b   : > { %12810 = vmatprep.subr.mxu0 %v18680_v14 }
 0xb4c   : > { %12811 = vmatpush3.msra.mxu0 %v18680_v14 }
 0xb4d   : > { %12813 = vmatmul.mubr.f32.vlgmr.msra.gmra.mxu0 %v17238_v28  ;;  %12863 = vmatmul.mubr.f32.gmra.mxu1 %v17303_v21  ;;  %v17577_v28 = vand.u32 4294901760, %v17565_v31 }
 0xb4e   : > { %12815 = vmatprep.mubr.f32.mxu0 %v17288_v51  ;;  %12865 = vmatprep.mubr.f32.mxu1 %v17342_v60  ;;  %v9458_v51 = vand.u32 4294901760, %v9457_v41 }
 0xb4f   : > { %12868 = vmatprep.subr.mxu0 %v17531_v9  ;;  %18683 = vst [vmem:[#allocation64_spill] sm:$0xff] %v17577_v28  ;;  %v9464_v13 = vsub.f32 %v17565_v31, %v17577_v28 }
 0xb50   : > { %12869 = vmatpush3.msra.mxu0 %v17531_v9  ;;  %12898 = vmatprep.subr.mxu1 %v9458_v51 }
 0xb51   : > { %12816 = vmatmul.mubr.f32.gmra.mxu0 %v17266_v38  ;;  %12866 = vmatmul.mubr.f32.gmra.mxu1 %v17345_v24  ;;  %v17592_v38 = vand.u32 4294901760, %v17580_v62 }
 0xb52   : > { %12818 = vmatprep.mubr.f32.mxu0 %v17317_v16  ;;  %12870 = vmatprep.subr.mxu0 %v17539_v50  ;;  %v9465_v16 = vand.u32 4294901760, %v9464_v13 }
 0xb53   : > { %12871 = vmatpush3.msra.mxu0 %v17539_v50  ;;  %18684 = vst [vmem:[#allocation18_spill] sm:$0xff] %v17592_v38  ;;  %v9471_v2 = vsub.f32 %v17580_v62, %v17592_v38  ;;  %12899 = vmatpush3.msra.mxu1 %v9458_v51 }
 0xb54   : > { %12872 = vmatprep.subr.mxu0 %v17552_v3  ;;  %12900 = vmatprep.subr.mxu1 %v9465_v16 }
 0xb55   : > { %12819 = vmatmul.mubr.f32.gmra.mxu0 %v17303_v21  ;;  %v17597_v21 = vsub.f32 %v9241_v25, %v17583_v7  ;;  %12901 = vmatpush3.msra.mxu1 %v9465_v16 }
 0xb56   : > { %12821 = vmatprep.mubr.f32.mxu0 %v17342_v60  ;;  %12873 = vmatpush3.msra.mxu0 %v17552_v3  ;;  %v9472_v60 = vand.u32 4294901760, %v9471_v2 }
 0xb57   : > { %12874 = vmatprep.subr.mxu0 %v17567_v20  ;;  %18685 = vst [vmem:[#allocation20_spill] sm:$0xff] %v17597_v21  ;;  %v17612_v32 = vand.u32 4294901760, %v17597_v21 }
 0xb58   : > { %12875 = vmatpush3.msra.mxu0 %v17567_v20  ;;  %12902 = vmatprep.subr.mxu1 %v9472_v60 }
 0xb59   : > { %12822 = vmatmul.mubr.f32.gmra.mxu0 %v17345_v24  ;;  %12876 = vmatprep.subr.mxu0 %v17583_v7  ;;  %18687 = vst [vmem:[#allocation55_spill] sm:$0xff] %v17612_v32  ;;  %v17619_v24 = vand.u32 4294901760, %v17606_v44  ;;  %v9478_v37 = vsub.f32 %v17597_v21, %v17612_v32 }
 0xb5a   : > { %12877 = vmatpush3.msra.mxu0 %v17583_v7  ;;  %12903 = vmatpush3.msra.mxu1 %v9472_v60 }
 0xb5b   : > { %12878 = vmatprep.subr.mxu0 %v17594_v47  ;;  %18688 = vst [vmem:[#allocation56_spill] sm:$0xff] %v17619_v24  ;;  %v9485_v15 = vsub.f32 %v17606_v44, %v17619_v24  ;;  %v9479_v33 = vand.u32 4294901760, %v9478_v37  ;;  %v10361_v37 = vld [vmem:[%s17963_s7] ss:$0 sm:$0xff] }
 0xb5c   : > { %12879 = vmatpush3.msra.mxu0 %v17594_v47 }
 0xb5d   : > { %12880 = vmatprep.subr.mxu0 %v17608_v52  ;;  %v9486_v55 = vand.u32 4294901760, %v9485_v15  ;;  %12904 = vmatprep.subr.mxu1 %v9479_v33 }
 0xb5e   : > { %12881 = vmatpush3.msra.mxu0 %v17608_v52  ;;  %12905 = vmatpush3.msra.mxu1 %v9479_v33 }
 0xb5f   : > { %12882 = vmatprep.subr.mxu0 %v17624_v10  ;;  %12906 = vmatprep.subr.mxu1 %v9486_v55 }
 0xb60   : > { %12883 = vmatpush3.msra.mxu0 %v17624_v10  ;;  %12907 = vmatpush3.msra.mxu1 %v9486_v55 }
 0xb61   : > { %12924 = vmatprep.subr.mxu0 %v17537_v61  ;;  %12908 = vmatprep.subr.mxu1 %v9493_v26 }
 0xb62   : > { %12909 = vmatpush3.msra.mxu1 %v9493_v26 }
 0xb63   : > { %12910 = vmatprep.subr.mxu1 %v9500_v19 }
 0xb64   : > { %12911 = vmatpush3.msra.mxu1 %v9500_v19 }
 0xb65   : > { %12952 = vmatprep.subr.mxu1 %v17531_v9 }
 0xbb6   : > { %v12682_v59 = vpop.f32.mrf.mxu1 }
 0xbb8   : > { %v8596_v22 = vpop.f32.mrf.mxu1 }
 0xbbf   : > { %v12685_v53 = vpop.f32.mrf.mxu1  ;;  %v12638_v29 = vpop.f32.mrf.mxu0 }
 0xbc0   : > { %v8386_v55 = vadd.f32 %v12638_v29, %v10361_v37 }
 0xbc1   : > { %v8608_v23 = vpop.f32.mrf.mxu1  ;;  %v8375_v63 = vpop.f32.mrf.mxu0 }
 0xbc2   : > { %v8376_v17 = vadd.f32 %v10361_v37, %v8375_v63  ;;  %v8603_v12 = vadd.f32 %v12682_v59, %v8386_v55 }
 0xbc4   : > { %v12688_v27 = vpop.f32.mrf.mxu1  ;;  %v8597_v6 = vadd.f32 %v8596_v22, %v8376_v17 }
 0xbc6   : > { %v8620_v48 = vpop.f32.mrf.mxu1 }
 0xbca   : > { %v12641_v56 = vpop.f32.mrf.mxu0  ;;  %v12691_v43 = vpop.f32.mrf.mxu1 }
 0xbcb   : > { %v8406_v39 = vadd.f32 %v12641_v56, %v10361_v37 }
 0xbcc   : > { %v8395_v14 = vpop.f32.mrf.mxu0  ;;  %v8632_v36 = vpop.f32.mrf.mxu1 }
 0xbcd   : > { %v8396_v18 = vadd.f32 %v10361_v37, %v8395_v14  ;;  %v8615_v38 = vadd.f32 %v12685_v53, %v8406_v39 }
 0xbcf   : > { %v8609_v29 = vadd.f32 %v8608_v23, %v8396_v18 }
 0xbd0   : > { %v12644_v1 = vpop.f32.mrf.mxu0 }
 0xbd1   : > { %v8426_v5 = vadd.f32 %v12644_v1, %v10361_v37 }
 0xbd2   : > { %v8415_v57 = vpop.f32.mrf.mxu0 }
 0xbd3   : > { %v8416_v28 = vadd.f32 %v10361_v37, %v8415_v57  ;;  %v8627_v44 = vadd.f32 %v12688_v27, %v8426_v5 }
 0xbd5   : > { %v12647_v25 = vpop.f32.mrf.mxu0 }
 0xbd6   : > { %v8446_v11 = vadd.f32 %v12647_v25, %v10361_v37 }
 0xbd7   : > { %v8435_v41 = vpop.f32.mrf.mxu0 }
 0xbd8   : > { %v8436_v10 = vadd.f32 %v10361_v37, %v8435_v41  ;;  %v8639_v53 = vadd.f32 %v12691_v43, %v8446_v11 }
 0xbdd   : > { %v12770_v54 = vpop.f32.mrf.mxu1 }
 0xbdf   : > { %v8880_v8 = vpop.f32.mrf.mxu1 }
 0xbe2   : > { %v12773_v4 = vpop.f32.mrf.mxu1 }
 0xbe4   : > { %v8896_v13 = vpop.f32.mrf.mxu1 }
 0xbe7   : > { %v12726_v51 = vpop.f32.mrf.mxu0  ;;  %v12776_v16 = vpop.f32.mrf.mxu1 }
 0xbe8   : > { %v8750_v30 = vadd.f32 %v12726_v51, %v8603_v12  ;;  %v8621_v12 = vadd.f32 %v8620_v48, %v8416_v28 }
 0xbe9   : > { %v8742_v49 = vpop.f32.mrf.mxu0  ;;  %v8912_v46 = vpop.f32.mrf.mxu1 }
 0xbea   : > { %v8743_v32 = vadd.f32 %v8742_v49, %v8597_v6  ;;  %v8889_v45 = vadd.f32 %v12770_v54, %v8750_v30  ;;  %v8633_v54 = vadd.f32 %v8632_v36, %v8436_v10 }
 0xbec   : > { %v8881_v55 = vadd.f32 %v8880_v8, %v8743_v32 }
 0xbed   : > { %v12729_v2 = vpop.f32.mrf.mxu0  ;;  %v17653_v15 = vpop.f32.mrf.mxu1 }
 0xbee   : > { %v8764_v35 = vadd.f32 %v12729_v2, %v8615_v38 }
 0xbef   : > { %v8756_v60 = vpop.f32.mrf.mxu0  ;;  %v17655_v34 = vpop.f32.mrf.mxu1 }
 0xbf0   : > { %v8757_v56 = vadd.f32 %v8756_v60, %v8609_v29  ;;  %v8905_v6 = vadd.f32 %v12773_v4, %v8764_v35 }
 0xbf2   : > { %v8897_v5 = vadd.f32 %v8896_v13, %v8757_v56 }
 0xbf3   : > { %v12732_v33 = vpop.f32.mrf.mxu0 }
 0xbf4   : > { %v8778_v14 = vadd.f32 %v12732_v33, %v8627_v44 }
 0xbf5   : > { %v8770_v26 = vpop.f32.mrf.mxu0 }
 0xbf6   : > { %v8771_v39 = vadd.f32 %v8770_v26, %v8621_v12 }
 0xbf8   : > { %v12735_v42 = vpop.f32.mrf.mxu0  ;;  %v8913_v43 = vadd.f32 %v8912_v46, %v8771_v39 }
 0xbf9   : > { %v8792_v27 = vadd.f32 %v12735_v42, %v8639_v53 }
 0xbfa   : > { %v8784_v40 = vpop.f32.mrf.mxu0 }
 0xbfb   : > { %v8785_v48 = vadd.f32 %v8784_v40, %v8633_v54 }
 0xbfd   : > { %v8929_v17 = vadd.f32 %v17655_v34, %v8785_v48 }
 0xc05   : > { %v12858_v19 = vpop.f32.mrf.mxu1 }
 0xc07   : > { %v9184_v58 = vpop.f32.mrf.mxu1 }
 0xc09   : > { %v12861_v24 = vpop.f32.mrf.mxu1 }
 0xc0b   : > { %v9196_v63 = vpop.f32.mrf.mxu1 }
 0xc0d   : > { %v12814_v21 = vpop.f32.mrf.mxu0  ;;  %v12864_v57 = vpop.f32.mrf.mxu1 }
 0xc0e   : > { %v9062_v59 = vadd.f32 %v12814_v21, %v8889_v45  ;;  %v8921_v21 = vadd.f32 %v12776_v16, %v8778_v14 }
 0xc0f   : > { %v9055_v22 = vpop.f32.mrf.mxu0  ;;  %v9208_v35 = vpop.f32.mrf.mxu1 }
 0xc10   : > { %v9191_v1 = vadd.f32 %v12858_v19, %v9062_v59  ;;  %v9056_v51 = vadd.f32 %v9055_v22, %v8881_v55 }
 0xc11   : > { %v12817_v38 = vpop.f32.mrf.mxu0  ;;  %v12867_v33 = vpop.f32.mrf.mxu1 }
 0xc12   : > { %v9231_v18 = vmax.f32 %v9191_v1, 0.0  ;;  %v9185_v30 = vadd.f32 %v9184_v58, %v9056_v51  ;;  %v9074_v23 = vadd.f32 %v12817_v38, %v8905_v6 }
 0xc13   : > { %v9067_v25 = vpop.f32.mrf.mxu0  ;;  %v9220_v39 = vpop.f32.mrf.mxu1 }
 0xc14   : > { %v9257_v32 = vsel %vm2669_vm0, %v9231_v18, 0  ;;  %v9230_v44 = vmax.f32 %v9185_v30, 0.0  ;;  %v9203_v28 = vadd.f32 %v12861_v24, %v9074_v23  ;;  %v9068_v45 = vadd.f32 %v9067_v25, %v8897_v5 }
 0xc15   : > { %v17658_v8 = vand.u32 4294901760, %v9257_v32  ;;  %v12820_v11 = vpop.f32.mrf.mxu0  ;;  %v8937_v24 = vadd.f32 %v17653_v15, %v8792_v27 }
 0xc16   : > { %v9254_v41 = vsel %vm2669_vm0, %v9230_v44, 0  ;;  %v9233_v58 = vmax.f32 %v9203_v28, 0.0  ;;  %v9197_v4 = vadd.f32 %v9196_v63, %v9068_v45  ;;  %v9086_v13 = vadd.f32 %v12820_v11, %v8921_v21 }
 0xc17   : > { %v17662_v42 = vsub.f32 %v9257_v32, %v17658_v8  ;;  %v17664_v10 = vand.u32 4294901760, %v9254_v41  ;;  %v9079_v36 = vpop.f32.mrf.mxu0 }
 0xc18   : > { %v9263_v40 = vsel %vm2669_vm0, %v9233_v58, 0  ;;  %v9232_v49 = vmax.f32 %v9197_v4, 0.0  ;;  %v9215_v16 = vadd.f32 %v12864_v57, %v9086_v13  ;;  %v9080_v2 = vadd.f32 %v9079_v36, %v8913_v43 }
 0xc19   : > { %v9362_v46 = vand.u32 4294901760, %v17662_v42  ;;  %v17670_v60 = vsub.f32 %v9254_v41, %v17664_v10  ;;  %v17672_v37 = vand.u32 4294901760, %v9263_v40  ;;  %v12823_v26 = vpop.f32.mrf.mxu0  ;;  %12912 = vmatprep.mubr.f32.mxu1 %v17664_v10 }
 0xc1a   : > { %v9260_v15 = vsel %vm2669_vm0, %v9232_v49, 0  ;;  %v9235_v19 = vmax.f32 %v9215_v16, 0.0  ;;  %v9209_v29 = vadd.f32 %v9208_v35, %v9080_v2  ;;  %v9098_v63 = vadd.f32 %v12823_v26, %v8937_v24  ;;  %12913 = vmatmul.mubr.f32.vlgmr.msra.gmra.mxu1 %v17658_v8 }
 0xc1b   : > { %v9363_v56 = vsub.f32 %v17662_v42, %v9362_v46  ;;  %v17682_v59 = vsub.f32 %v9263_v40, %v17672_v37  ;;  %v17684_v55 = vand.u32 4294901760, %v9260_v15  ;;  %v9091_v14 = vpop.f32.mrf.mxu0  ;;  %12953 = vmatpush3.msra.mxu1 %v17531_v9  ;;  %v9352_v34 = vand.u32 4294901760, %v17670_v60 }
 0xc1c   : > { %v9269_v12 = vsel %vm2669_vm0, %v9235_v19, 0  ;;  %v9234_v22 = vmax.f32 %v9209_v29, 0.0  ;;  %v9227_v1 = vadd.f32 %v12867_v33, %v9098_v63  ;;  %v9092_v51 = vadd.f32 %v9091_v14, %v8929_v17  ;;  %12954 = vmatprep.subr.mxu1 %v17539_v50  ;;  %v18694_v33 = vld [vmem:[#allocation31_spill] sm:$0xff]  ;;  %v18696_v19 = vld [vmem:[#allocation21_spill] sm:$0xff]  ;;  %v18697_v29 = vld [vmem:[#allocation34_spill] sm:$0xff] }
 0xc1d   : > { %v17691_v6 = vsub.f32 %v9260_v15, %v17684_v55  ;;  %v17693_v53 = vand.u32 4294901760, %v9269_v12  ;;  %12915 = vmatprep.mubr.f32.mxu1 %v17684_v55  ;;  %12955 = vmatpush3.msra.mxu1 %v17539_v50  ;;  %v9353_v57 = vsub.f32 %v17670_v60, %v9352_v34  ;;  %v9382_v23 = vand.u32 4294901760, %v17682_v59 }
 0xc1e   : > { %v9266_v38 = vsel %vm2669_vm0, %v9234_v22, 0  ;;  %v9237_v18 = vmax.f32 %v9227_v1, 0.0  ;;  %v9221_v30 = vadd.f32 %v9220_v39, %v9092_v51  ;;  %12916 = vmatmul.mubr.f32.gmra.mxu1 %v17672_v37  ;;  %12956 = vmatprep.subr.mxu1 %v17552_v3  ;;  %v9364_v25 = vand.u32 4294901760, %v9363_v56 }
 0xc1f   : > { %v17704_v5 = vand.u32 4294901760, %v9266_v38  ;;  %12957 = vmatpush3.msra.mxu1 %v17552_v3  ;;  %v9354_v27 = vand.u32 4294901760, %v9353_v57  ;;  %v9372_v54 = vand.u32 4294901760, %v17691_v6  ;;  %v17709_v21 = vsub.f32 %v9269_v12, %v17693_v53 }
 0xc20   : > { %v9275_v32 = vsel %vm2669_vm0, %v9237_v18, 0  ;;  %v9236_v44 = vmax.f32 %v9221_v30, 0.0  ;;  %12958 = vmatprep.subr.mxu1 %v17567_v20  ;;  %v9383_v11 = vsub.f32 %v17682_v59, %v9382_v23 }
 0xc21   : > { %v17714_v28 = vsub.f32 %v9266_v38, %v17704_v5  ;;  %12884 = vmatprep.mubr.f32.mxu0 %v9354_v27  ;;  %12918 = vmatprep.mubr.f32.mxu1 %v17704_v5  ;;  %v9373_v45 = vsub.f32 %v17691_v6, %v9372_v54  ;;  %v17718_v48 = vand.u32 4294901760, %v9275_v32  ;;  %v9402_v4 = vand.u32 4294901760, %v17709_v21 }
 0xc22   : > { %v9272_v35 = vsel %vm2669_vm0, %v9236_v44, 0  ;;  %12959 = vmatpush3.msra.mxu1 %v17567_v20  ;;  %12885 = vmatmul.mubr.f32.vlgmr.msra.gmra.mxu0 %v9364_v25 }
 0xc23   : > { %v17725_v43 = vand.u32 4294901760, %v9272_v35  ;;  %12919 = vmatmul.mubr.f32.gmra.mxu1 %v17693_v53  ;;  %12960 = vmatprep.subr.mxu1 %v17583_v7  ;;  %v9374_v41 = vand.u32 4294901760, %v9373_v45  ;;  %v9392_v58 = vand.u32 4294901760, %v17714_v28  ;;  %v17740_v24 = vsub.f32 %v9275_v32, %v17718_v48 }
 0xc24   : > { %12925 = vmatpush3.msra.mxu0 %v17537_v61  ;;  %12961 = vmatpush3.msra.mxu1 %v17583_v7  ;;  %v9384_v61 = vand.u32 4294901760, %v9383_v11  ;;  %v9403_v16 = vsub.f32 %v17709_v21, %v9402_v4 }
 0xc25   : > { %v17734_v13 = vsub.f32 %v9272_v35, %v17725_v43  ;;  %12926 = vmatprep.subr.mxu0 %v17550_v0  ;;  %12962 = vmatprep.subr.mxu1 %v17594_v47  ;;  %v9393_v36 = vsub.f32 %v17714_v28, %v9392_v58  ;;  %v9422_v2 = vand.u32 4294901760, %v17740_v24 }
 0xc26   : > { %12887 = vmatprep.mubr.f32.mxu0 %v9374_v41  ;;  %12921 = vmatprep.mubr.f32.mxu1 %v17725_v43  ;;  %v9404_v26 = vand.u32 4294901760, %v9403_v16 }
 0xc27   : > { %12927 = vmatpush3.msra.mxu0 %v17550_v0  ;;  %12963 = vmatpush3.msra.mxu1 %v17594_v47  ;;  %v9412_v40 = vand.u32 4294901760, %v17734_v13  ;;  %v9394_v49 = vand.u32 4294901760, %v9393_v36  ;;  %v9423_v15 = vsub.f32 %v17740_v24, %v9422_v2 }
 0xc28   : > { %12888 = vmatmul.mubr.f32.gmra.mxu0 %v9384_v61  ;;  %12922 = vmatmul.mubr.f32.gmra.mxu1 %v17718_v48 }
 0xc29   : > { %12928 = vmatprep.subr.mxu0 %v17565_v31  ;;  %12964 = vmatprep.subr.mxu1 %v17608_v52  ;;  %v9413_v0 = vsub.f32 %v17734_v13, %v9412_v40 }
 0xc2a   : > { %12929 = vmatpush3.msra.mxu0 %v17565_v31  ;;  %12965 = vmatpush3.msra.mxu1 %v17608_v52  ;;  %v18695_v31 = vld [vmem:[#allocation20_spill] sm:$0xff] }
 0xc2b   : > { %12968 = vmatprep.mubr.f32.mxu1 %v9352_v34  ;;  %12930 = vmatprep.subr.mxu0 %v17580_v62  ;;  %v9414_v17 = vand.u32 4294901760, %v9413_v0 }
 0xc2c   : > { %12966 = vmatprep.subr.mxu1 %v18694_v33  ;;  %12890 = vmatprep.mubr.f32.mxu0 %v9394_v49 }
 0xc2d   : > { %12931 = vmatpush3.msra.mxu0 %v17580_v62  ;;  %12967 = vmatpush3.msra.mxu1 %v18694_v33  ;;  %v9424_v62 = vand.u32 4294901760, %v9423_v15 }
 0xc2e   : > { %12891 = vmatmul.mubr.f32.gmra.mxu0 %v9404_v26  ;;  %12932 = vmatprep.subr.mxu0 %v18695_v31 }
 0xc2f   : > { %12969 = vmatmul.mubr.f32.vlgmr.msra.gmra.mxu1 %v9362_v46  ;;  %13008 = vmatprep.subr.mxu1 %v17531_v9  ;;  %v18706_v46 = vld [vmem:[#allocation30_spill] sm:$0xff] }
 0xc30   : > { %12933 = vmatpush3.msra.mxu0 %v18695_v31  ;;  %12971 = vmatprep.mubr.f32.mxu1 %v9372_v54 }
 0xc31   : > { %13009 = vmatpush3.msra.mxu1 %v17531_v9  ;;  %12934 = vmatprep.subr.mxu0 %v18696_v19  ;;  %v18698_v9 = vld [vmem:[#allocation40_spill] sm:$0xff] }
 0xc32   : > { %13010 = vmatprep.subr.mxu1 %v17539_v50  ;;  %12893 = vmatprep.mubr.f32.mxu0 %v9414_v17 }
 0xc33   : > { %12935 = vmatpush3.msra.mxu0 %v18696_v19  ;;  %13011 = vmatpush3.msra.mxu1 %v17539_v50  ;;  %v18699_v50 = vld [vmem:[#allocation41_spill] sm:$0xff] }
 0xc34   : > { %12894 = vmatmul.mubr.f32.gmra.mxu0 %v9424_v62  ;;  %12936 = vmatprep.subr.mxu0 %v18697_v29 }
 0xc35   : > { %12972 = vmatmul.mubr.f32.gmra.mxu1 %v9382_v23  ;;  %13012 = vmatprep.subr.mxu1 %v17552_v3 }
 0xc36   : > { %12937 = vmatpush3.msra.mxu0 %v18697_v29  ;;  %12940 = vmatprep.mubr.f32.mxu0 %v17670_v60 }
 0xc37   : > { %12974 = vmatprep.mubr.f32.mxu1 %v9392_v58  ;;  %13013 = vmatpush3.msra.mxu1 %v17552_v3  ;;  %v18700_v3 = vld [vmem:[#allocation52_spill] sm:$0xff] }
 0xc38   : > { %12938 = vmatprep.subr.mxu0 %v18698_v9  ;;  %13014 = vmatprep.subr.mxu1 %v17567_v20 }
 0xc39   : > { %12939 = vmatpush3.msra.mxu0 %v18698_v9  ;;  %13015 = vmatpush3.msra.mxu1 %v17567_v20  ;;  %v18701_v20 = vld [vmem:[#allocation64_spill] sm:$0xff] }
 0xc3a   : > { %12941 = vmatmul.mubr.f32.vlgmr.msra.gmra.mxu0 %v17662_v42  ;;  %12975 = vmatmul.mubr.f32.gmra.mxu1 %v9402_v4  ;;  %v18705_v42 = vld [vmem:[#allocation45_spill] sm:$0xff] }
 0xc3b   : > { %12980 = vmatprep.subr.mxu0 %v18699_v50  ;;  %13016 = vmatprep.subr.mxu1 %v17583_v7 }
 0xc3c   : > { %12943 = vmatprep.mubr.f32.mxu0 %v17691_v6  ;;  %12977 = vmatprep.mubr.f32.mxu1 %v9412_v40 }
 0xc3d   : > { %12981 = vmatpush3.msra.mxu0 %v18699_v50  ;;  %13017 = vmatpush3.msra.mxu1 %v17583_v7  ;;  %v18702_v7 = vld [vmem:[#allocation18_spill] sm:$0xff] }
 0xc3e   : > { %12982 = vmatprep.subr.mxu0 %v18700_v3  ;;  %13018 = vmatprep.subr.mxu1 %v17594_v47 }
 0xc3f   : > { %12983 = vmatpush3.msra.mxu0 %v18700_v3  ;;  %13019 = vmatpush3.msra.mxu1 %v17594_v47  ;;  %v18703_v47 = vld [vmem:[#allocation55_spill] sm:$0xff] }
 0xc40   : > { %12944 = vmatmul.mubr.f32.gmra.mxu0 %v17682_v59  ;;  %12978 = vmatmul.mubr.f32.gmra.mxu1 %v9422_v2 }
 0xc41   : > { %12984 = vmatprep.subr.mxu0 %v18701_v20  ;;  %13020 = vmatprep.subr.mxu1 %v17608_v52 }
 0xc42   : > { %12946 = vmatprep.mubr.f32.mxu0 %v17714_v28  ;;  %12985 = vmatpush3.msra.mxu0 %v18701_v20 }
 0xc43   : > { %13021 = vmatpush3.msra.mxu1 %v17608_v52  ;;  %13024 = vmatprep.mubr.f32.mxu1 %v17664_v10  ;;  %v18704_v52 = vld [vmem:[#allocation56_spill] sm:$0xff] }
 0xc44   : > { %12986 = vmatprep.subr.mxu0 %v18702_v7  ;;  %13022 = vmatprep.subr.mxu1 %v18694_v33 }
 0xc45   : > { %12987 = vmatpush3.msra.mxu0 %v18702_v7  ;;  %13023 = vmatpush3.msra.mxu1 %v18694_v33 }
 0xc46   : > { %12947 = vmatmul.mubr.f32.gmra.mxu0 %v17709_v21  ;;  %12988 = vmatprep.subr.mxu0 %v18703_v47  ;;  %v10362_v21 = vld [vmem:[%s17965_s9] ss:$0 sm:$0xff] }
 0xc47   : > { %13025 = vmatmul.mubr.f32.vlgmr.msra.gmra.mxu1 %v17658_v8  ;;  %12949 = vmatprep.mubr.f32.mxu0 %v17734_v13 }
 0xc48   : > { %12989 = vmatpush3.msra.mxu0 %v18703_v47  ;;  %13027 = vmatprep.mubr.f32.mxu1 %v17684_v55 }
 0xc49   : > { %12990 = vmatprep.subr.mxu0 %v18704_v52 }
 0xc4a   : > { %12991 = vmatpush3.msra.mxu0 %v18704_v52 }
 0xc4b   : > { %12950 = vmatmul.mubr.f32.gmra.mxu0 %v17740_v24  ;;  %12992 = vmatprep.subr.mxu0 %v18705_v42 }
 0xc4c   : > { %13028 = vmatmul.mubr.f32.gmra.mxu1 %v17672_v37  ;;  %12993 = vmatpush3.msra.mxu0 %v18705_v42 }
 0xc4d   : > { %12996 = vmatprep.mubr.f32.mxu0 %v17664_v10  ;;  %13030 = vmatprep.mubr.f32.mxu1 %v17704_v5 }
 0xc4e   : > { %12994 = vmatprep.subr.mxu0 %v18706_v46 }
 0xc4f   : > { %12995 = vmatpush3.msra.mxu0 %v18706_v46 }
 0xc50   : > { %12997 = vmatmul.mubr.f32.vlgmr.msra.gmra.mxu0 %v17658_v8  ;;  %13031 = vmatmul.mubr.f32.gmra.mxu1 %v17693_v53 }
 0xc51   : > { %12999 = vmatprep.mubr.f32.mxu0 %v17684_v55  ;;  %13033 = vmatprep.mubr.f32.mxu1 %v17725_v43 }
 0xc54   : > { %13000 = vmatmul.mubr.f32.gmra.mxu0 %v17672_v37  ;;  %13034 = vmatmul.mubr.f32.gmra.mxu1 %v17718_v48 }
 0xc55   : > { %13002 = vmatprep.mubr.f32.mxu0 %v17704_v5 }
 0xc58   : > { %13003 = vmatmul.mubr.f32.gmra.mxu0 %v17693_v53 }
 0xc59   : > { %13005 = vmatprep.mubr.f32.mxu0 %v17725_v43 }
 0xc5c   : > { %13006 = vmatmul.mubr.f32.gmra.mxu0 %v17718_v48 }
 0xcda   : > { %v12914_v10 = vpop.f32.mrf.mxu1 }
 0xcdc   : > { %v9537_v8 = vpop.f32.mrf.mxu1 }
 0xcde   : > { %v12917_v60 = vpop.f32.mrf.mxu1 }
 0xce0   : > { %v9549_v63 = vpop.f32.mrf.mxu1 }
 0xce2   : > { %v12886_v56 = vpop.f32.mrf.mxu0 }
 0xce3   : > { %v12920_v59 = vpop.f32.mrf.mxu1  ;;  %v9367_v28 = vadd.f32 %v12886_v56, %v10362_v21 }
 0xce4   : > { %v9356_v55 = vpop.f32.mrf.mxu0 }
 0xce5   : > { %v9561_v14 = vpop.f32.mrf.mxu1  ;;  %v9357_v48 = vadd.f32 %v10362_v21, %v9356_v55  ;;  %v9544_v41 = vadd.f32 %v12914_v10, %v9367_v28  ;;  %v18709_v28 = vld [vmem:[#allocation43_spill] sm:$0xff] }
 0xce7   : > { %v9538_v36 = vadd.f32 %v9537_v8, %v9357_v48 }
 0xce8   : > { %v12889_v34 = vpop.f32.mrf.mxu0  ;;  %v12923_v37 = vpop.f32.mrf.mxu1 }
 0xce9   : > { %v9387_v43 = vadd.f32 %v12889_v34, %v10362_v21 }
 0xcea   : > { %v9376_v12 = vpop.f32.mrf.mxu0  ;;  %v9573_v22 = vpop.f32.mrf.mxu1 }
 0xceb   : > { %v9377_v4 = vadd.f32 %v10362_v21, %v9376_v12  ;;  %v9556_v16 = vadd.f32 %v12917_v60, %v9387_v43 }
 0xced   : > { %v9550_v26 = vadd.f32 %v9549_v63, %v9377_v4 }
 0xcee   : > { %v12892_v1 = vpop.f32.mrf.mxu0 }
 0xcef   : > { %v12970_v51 = vpop.f32.mrf.mxu1  ;;  %v9407_v61 = vadd.f32 %v12892_v1, %v10362_v21 }
 0xcf0   : > { %v9396_v6 = vpop.f32.mrf.mxu0 }
 0xcf1   : > { %v9797_v39 = vpop.f32.mrf.mxu1  ;;  %v9397_v2 = vadd.f32 %v10362_v21, %v9396_v6  ;;  %v9568_v15 = vadd.f32 %v12920_v59, %v9407_v61  ;;  %v18707_v59 = vld [vmem:[#allocation23_spill] sm:$0xff] }
 0xcf3   : > { %v9562_v7 = vadd.f32 %v9561_v14, %v9397_v2  ;;  %v18708_v14 = vld [vmem:[#allocation50_spill] sm:$0xff] }
 0xcf4   : > { %v12895_v53 = vpop.f32.mrf.mxu0 }
 0xcf5   : > { %v12973_v57 = vpop.f32.mrf.mxu1  ;;  %v9427_v17 = vadd.f32 %v12895_v53, %v10362_v21 }
 0xcf6   : > { %v9416_v38 = vpop.f32.mrf.mxu0 }
 0xcf7   : > { %v9813_v18 = vpop.f32.mrf.mxu1  ;;  %v9417_v3 = vadd.f32 %v10362_v21, %v9416_v38  ;;  %v9580_v8 = vadd.f32 %v12923_v37, %v9427_v17 }
 0xcf9   : > { %v9574_v1 = vadd.f32 %v9573_v22, %v9417_v3 }
 0xcfa   : > { %v12942_v30 = vpop.f32.mrf.mxu0  ;;  %v12976_v23 = vpop.f32.mrf.mxu1 }
 0xcfb   : > { %v9675_v13 = vadd.f32 %v12942_v30, %v9544_v41 }
 0xcfc   : > { %v9667_v5 = vpop.f32.mrf.mxu0  ;;  %v9829_v27 = vpop.f32.mrf.mxu1 }
 0xcfd   : > { %v9668_v49 = vadd.f32 %v9667_v5, %v9538_v36  ;;  %v9806_v31 = vadd.f32 %v12970_v51, %v9675_v13  ;;  %v18711_v13 = vld [vmem:[#allocation38_spill] sm:$0xff] }
 0xcff   : > { %v9798_v50 = vadd.f32 %v9797_v39, %v9668_v49  ;;  %v18712_v49 = vld [vmem:[#allocation27_spill] sm:$0xff] }
 0xd00   : > { %v12945_v54 = vpop.f32.mrf.mxu0  ;;  %v17829_v25 = vpop.f32.mrf.mxu1 }
 0xd01   : > { %v9689_v33 = vadd.f32 %v12945_v54, %v9556_v16 }
 0xd02   : > { %v9681_v32 = vpop.f32.mrf.mxu0  ;;  %v17834_v44 = vpop.f32.mrf.mxu1 }
 0xd03   : > { %v9682_v29 = vadd.f32 %v9681_v32, %v9550_v26  ;;  %v9822_v46 = vadd.f32 %v12973_v57, %v9689_v33  ;;  %v18714_v26 = vld [vmem:[#allocation57_spill] sm:$0xff] }
 0xd05   : > { %v9814_v34 = vadd.f32 %v9813_v18, %v9682_v29 }
 0xd06   : > { %v12948_v45 = vpop.f32.mrf.mxu0 }
 0xd07   : > { %v13026_v35 = vpop.f32.mrf.mxu1  ;;  %v9703_v20 = vadd.f32 %v12948_v45, %v9568_v15 }
 0xd08   : > { %v9695_v11 = vpop.f32.mrf.mxu0 }
 0xd09   : > { %v10069_v58 = vpop.f32.mrf.mxu1  ;;  %v9696_v10 = vadd.f32 %v9695_v11, %v9562_v7  ;;  %v9838_v6 = vadd.f32 %v12976_v23, %v9703_v20 }
 0xd0b   : > { %v12951_v24 = vpop.f32.mrf.mxu0  ;;  %v9830_v54 = vadd.f32 %v9829_v27, %v9696_v10 }
 0xd0c   : > { %v13029_v40 = vpop.f32.mrf.mxu1  ;;  %v9717_v39 = vadd.f32 %v12951_v24, %v9580_v8 }
 0xd0d   : > { %v9709_v0 = vpop.f32.mrf.mxu0 }
 0xd0e   : > { %v10081_v19 = vpop.f32.mrf.mxu1  ;;  %v9710_v37 = vadd.f32 %v9709_v0, %v9574_v1  ;;  %v9854_v23 = vadd.f32 %v17829_v25, %v9717_v39  ;;  %v18713_v25 = vld [vmem:[#allocation26_spill] sm:$0xff] }
 0xd10   : > { %v12998_v62 = vpop.f32.mrf.mxu0  ;;  %v13032_v60 = vpop.f32.mrf.mxu1  ;;  %v9846_v27 = vadd.f32 %v17834_v44, %v9710_v37 }
 0xd11   : > { %v9955_v9 = vadd.f32 %v12998_v62, %v9806_v31 }
 0xd12   : > { %v9948_v47 = vpop.f32.mrf.mxu0  ;;  %v10093_v5 = vpop.f32.mrf.mxu1 }
 0xd13   : > { %v10076_v52 = vadd.f32 %v13026_v35, %v9955_v9  ;;  %v9949_v42 = vadd.f32 %v9948_v47, %v9798_v50  ;;  %v18710_v35 = vld [vmem:[#allocation46_spill] sm:$0xff] }
 0xd14   : > { %v13001_v56 = vpop.f32.mrf.mxu0  ;;  %v13035_v43 = vpop.f32.mrf.mxu1 }
 0xd15   : > { %v10070_v63 = vadd.f32 %v10069_v58, %v9949_v42  ;;  %v9967_v55 = vadd.f32 %v13001_v56, %v9822_v46  ;;  %v10116_v12 = vadd.f32 %v10076_v52, %v18707_v59 }
 0xd16   : > { %v9960_v51 = vpop.f32.mrf.mxu0  ;;  %v10105_v0 = vpop.f32.mrf.mxu1 }
 0xd17   : > { %v10088_v53 = vadd.f32 %v13029_v40, %v9967_v55  ;;  %v9961_v38 = vadd.f32 %v9960_v51, %v9814_v34  ;;  %10127 = vadd.xlane.f32.xlu1 %v10116_v12  ;;  %v10115_v30 = vadd.f32 %v10070_v63, %v18708_v14 }
 0xd18   : > { %v13004_v57 = vpop.f32.mrf.mxu0 }
 0xd19   : > { %v10082_v21 = vadd.f32 %v10081_v19, %v9961_v38  ;;  %v9979_v32 = vadd.f32 %v13004_v57, %v9838_v6  ;;  %10125 = vadd.xlane.f32.xlu0 %v10115_v30  ;;  %v10118_v18 = vadd.f32 %v10088_v53, %v18709_v28 }
 0xd1a   : > { %v9972_v45 = vpop.f32.mrf.mxu0 }
 0xd1b   : > { %v10100_v48 = vadd.f32 %v13032_v60, %v9979_v32  ;;  %v9973_v22 = vadd.f32 %v9972_v45, %v9830_v54  ;;  %10131 = vadd.xlane.f32.xlu1 %v10118_v18  ;;  %v10117_v11 = vadd.f32 %v10082_v21, %v18710_v35 }
 0xd1c   : > { %v13007_v41 = vpop.f32.mrf.mxu0 }
 0xd1d   : > { %v10094_v58 = vadd.f32 %v10093_v5, %v9973_v22  ;;  %v9991_v4 = vadd.f32 %v13007_v41, %v9854_v23  ;;  %10129 = vadd.xlane.f32.xlu0 %v10117_v11  ;;  %v10120_v36 = vadd.f32 %v10100_v48, %v18711_v13 }
 0xd1e   : > { %v9984_v24 = vpop.f32.mrf.mxu0 }
 0xd1f   : > { %v10112_v61 = vadd.f32 %v13035_v43, %v9991_v4  ;;  %v9985_v40 = vadd.f32 %v9984_v24, %v9846_v27  ;;  %10135 = vadd.xlane.f32.xlu1 %v10120_v36  ;;  %v10119_v16 = vadd.f32 %v10094_v58, %v18712_v49 }
 0xd21   : > { %v10106_v2 = vadd.f32 %v10105_v0, %v9985_v40  ;;  %10133 = vadd.xlane.f32.xlu0 %v10119_v16  ;;  %v10122_v33 = vadd.f32 %v10112_v61, %v18713_v25  ;;  %v10364_v25 = vld [vmem:[%s17967_s11] ss:$0 sm:$0xff] }
 0xd23   : > { %10139 = vadd.xlane.f32.xlu1 %v10122_v33  ;;  %v10121_v31 = vadd.f32 %v10106_v2, %v18714_v26 }
 0xd25   : > { %10137 = vadd.xlane.f32.xlu0 %v10121_v31 }
 0xda0   : > { %v10128_v17 = vpop.xlane.xlu1 %10127 }
 0xda1   : > { %v10142_v15 = vmul.f32 0.0078125, %v10128_v17 }
 0xda2   : > { %v10126_v44 = vpop.xlane.xlu0 %10125 }
 0xda3   : > { %v17846_v19 = vsub.f32 %v10116_v12, %v10142_v15  ;;  %v10141_v62 = vmul.f32 0.0078125, %v10126_v44 }
 0xda4   : > { %v10132_v29 = vpop.xlane.xlu1 %10131 }
 0xda5   : > { %v17848_v9 = vsub.f32 %v10115_v30, %v10141_v62  ;;  %v10144_v50 = vmul.f32 0.0078125, %v10132_v29  ;;  %v10158_v3 = vmul.f32 %v17846_v19, %v17846_v19 }
 0xda6   : > { %v10130_v20 = vpop.xlane.xlu0 %10129 }
 0xda7   : > { %v17852_v7 = vsub.f32 %v10118_v18, %v10144_v50  ;;  %v10143_v47 = vmul.f32 0.0078125, %v10130_v20  ;;  %10167 = vadd.xlane.f32.xlu1 %v10158_v3  ;;  %v10157_v52 = vmul.f32 %v17848_v9, %v17848_v9 }
 0xda8   : > { %v10136_v42 = vpop.xlane.xlu1 %10135 }
 0xda9   : > { %v17856_v46 = vsub.f32 %v10117_v11, %v10143_v47  ;;  %v10146_v10 = vmul.f32 0.0078125, %v10136_v42  ;;  %10165 = vadd.xlane.f32.xlu0 %v10157_v52  ;;  %v10160_v8 = vmul.f32 %v17852_v7, %v17852_v7 }
 0xdaa   : > { %v10134_v60 = vpop.xlane.xlu0 %10133 }
 0xdab   : > { %v17860_v56 = vsub.f32 %v10120_v36, %v10146_v10  ;;  %v10145_v63 = vmul.f32 0.0078125, %v10134_v60  ;;  %10171 = vadd.xlane.f32.xlu1 %v10160_v8  ;;  %v10159_v55 = vmul.f32 %v17856_v46, %v17856_v46 }
 0xdac   : > { %v10140_v34 = vpop.xlane.xlu1 %10139 }
 0xdad   : > { %v17864_v59 = vsub.f32 %v10119_v16, %v10145_v63  ;;  %v10148_v12 = vmul.f32 0.0078125, %v10140_v34  ;;  %10169 = vadd.xlane.f32.xlu0 %v10159_v55  ;;  %v10162_v1 = vmul.f32 %v17860_v56, %v17860_v56  ;;  %v10363_v16 = vld [vmem:[%s17966_s10] ss:$0 sm:$0xff] }
 0xdae   : > { %v10138_v51 = vpop.xlane.xlu0 %10137 }
 0xdaf   : > { %v17868_v6 = vsub.f32 %v10122_v33, %v10148_v12  ;;  %v10147_v39 = vmul.f32 0.0078125, %v10138_v51  ;;  %10175 = vadd.xlane.f32.xlu1 %v10162_v1  ;;  %v10161_v53 = vmul.f32 %v17864_v59, %v17864_v59 }
 0xdb1   : > { %v17872_v38 = vsub.f32 %v10121_v31, %v10147_v39  ;;  %10173 = vadd.xlane.f32.xlu0 %v10161_v53  ;;  %v10164_v14 = vmul.f32 %v17868_v6, %v17868_v6 }
 0xdb3   : > { %10179 = vadd.xlane.f32.xlu1 %v10164_v14  ;;  %v10163_v30 = vmul.f32 %v17872_v38, %v17872_v38 }
 0xdb5   : > { %10177 = vadd.xlane.f32.xlu0 %v10163_v30 }
 0xe30   : > { %v10168_v5 = vpop.xlane.xlu1 %10167 }
 0xe31   : > { %v10182_v57 = vmul.f32 0.0078125, %v10168_v5 }
 0xe32   : > { %v10166_v54 = vpop.xlane.xlu0 %10165 }
 0xe33   : > { %v10190_v37 = vadd.f32 1e-05, %v10182_v57  ;;  %v10181_v21 = vmul.f32 0.0078125, %v10166_v54 }
 0xe34   : > { %v10172_v32 = vpop.xlane.xlu1 %10171 }
 0xe35   : > { %13184 = vrsqrt.f32 %v10190_v37  ;;  %v10189_v28 = vadd.f32 1e-05, %v10181_v21  ;;  %v10184_v18 = vmul.f32 0.0078125, %v10172_v32 }
 0xe36   : > { %v10170_v45 = vpop.xlane.xlu0 %10169 }
 0xe37   : > { %13186 = vrsqrt.f32 %v10189_v28  ;;  %v10192_v48 = vadd.f32 1e-05, %v10184_v18  ;;  %v10183_v22 = vmul.f32 0.0078125, %v10170_v45 }
 0xe38   : > { %v10176_v23 = vpop.xlane.xlu1 %10175 }
 0xe39   : > { %13188 = vrsqrt.f32 %v10192_v48  ;;  %v10191_v35 = vadd.f32 1e-05, %v10183_v22  ;;  %v10186_v11 = vmul.f32 0.0078125, %v10176_v23 }
 0xe3a   : > { %v10174_v43 = vpop.xlane.xlu0 %10173 }
 0xe3b   : > { %13190 = vrsqrt.f32 %v10191_v35  ;;  %v10194_v41 = vadd.f32 1e-05, %v10186_v11  ;;  %v10185_v58 = vmul.f32 0.0078125, %v10174_v43 }
 0xe3c   : > { %v10180_v4 = vpop.xlane.xlu1 %10179 }
 0xe3d   : > { %13192 = vrsqrt.f32 %v10194_v41  ;;  %v10193_v27 = vadd.f32 1e-05, %v10185_v58  ;;  %v10188_v13 = vmul.f32 0.0078125, %v10180_v4 }
 0xe3e   : > { %v10178_v36 = vpop.xlane.xlu0 %10177 }
 0xe3f   : > { %13194 = vrsqrt.f32 %v10193_v27  ;;  %v10196_v24 = vadd.f32 1e-05, %v10188_v13  ;;  %v10187_v61 = vmul.f32 0.0078125, %v10178_v36 }
 0xe41   : > { %13196 = vrsqrt.f32 %v10196_v24  ;;  %v10195_v40 = vadd.f32 1e-05, %v10187_v61 }
 0xe42   : > { %v13185_v49 = vpop.eup %13184 }
 0xe43   : > { %v10206_v0 = vmul.f32 %v13185_v49, %v17846_v19  ;;  %13198 = vrsqrt.f32 %v10195_v40 }
 0xe44   : > { %v13187_v2 = vpop.eup %13186 }
 0xe45   : > { %v10220_v33 = vmul.f32 %v10363_v16, %v10206_v0  ;;  %v10205_v26 = vmul.f32 %v13187_v2, %v17848_v9 }
 0xe46   : > { %v13189_v31 = vpop.eup %13188 }
 0xe47   : > { %v10234_v17 = vadd.f32 %v10364_v25, %v10220_v33  ;;  %v10219_v15 = vmul.f32 %v10363_v16, %v10205_v26  ;;  %v10208_v44 = vmul.f32 %v13189_v31, %v17852_v7 }
 0xe48   : > { %v13191_v62 = vpop.eup %13190 }
 0xe49   : > { %10242 = vst [vmem:[%s17890_s17 + $0x8] sm:$0xff] %v10234_v17  ;;  %v10233_v19 = vadd.f32 %v10364_v25, %v10219_v15  ;;  %v10222_v29 = vmul.f32 %v10363_v16, %v10208_v44  ;;  %v10207_v50 = vmul.f32 %v13191_v62, %v17856_v46 }
 0xe4a   : > { %v13193_v3 = vpop.eup %13192 }
 0xe4b   : > { %10241 = vst [vmem:[%s17890_s17] sm:$0xff] %v10233_v19  ;;  %v10236_v9 = vadd.f32 %v10364_v25, %v10222_v29  ;;  %v10221_v20 = vmul.f32 %v10363_v16, %v10207_v50  ;;  %v10210_v47 = vmul.f32 %v13193_v3, %v17860_v56 }
 0xe4c   : > { %v13195_v7 = vpop.eup %13194 }
 0xe4d   : > { %10244 = vst [vmem:[%s17890_s17 + $0x18] sm:$0xff] %v10236_v9  ;;  %v10235_v52 = vadd.f32 %v10364_v25, %v10221_v20  ;;  %v10224_v42 = vmul.f32 %v10363_v16, %v10210_v47  ;;  %v10209_v10 = vmul.f32 %v13195_v7, %v17864_v59 }
 0xe4e   : > { %v13197_v8 = vpop.eup %13196 }
 0xe4f   : > { %10243 = vst [vmem:[%s17890_s17 + $0x10] sm:$0xff] %v10235_v52  ;;  %v10238_v46 = vadd.f32 %v10364_v25, %v10224_v42  ;;  %v10223_v60 = vmul.f32 %v10363_v16, %v10209_v10  ;;  %v10212_v63 = vmul.f32 %v13197_v8, %v17868_v6 }
 0xe50   : > { %v13199_v55 = vpop.eup %13198 }
 0xe51   : > { %10246 = vst [vmem:[%s17890_s17 + $0x28] sm:$0xff] %v10238_v46  ;;  %v10237_v56 = vadd.f32 %v10364_v25, %v10223_v60  ;;  %v10226_v34 = vmul.f32 %v10363_v16, %v10212_v63  ;;  %v10211_v12 = vmul.f32 %v13199_v55, %v17872_v38 }
 0xe53   : > { %10245 = vst [vmem:[%s17890_s17 + $0x20] sm:$0xff] %v10237_v56  ;;  %v10240_v59 = vadd.f32 %v10364_v25, %v10226_v34  ;;  %v10225_v1 = vmul.f32 %v10363_v16, %v10211_v12 }
 0xe55   : > { %10248 = vst [vmem:[%s17890_s17 + $0x38] sm:$0xff] %v10240_v59  ;;  %v10239_v51 = vadd.f32 %v10364_v25, %v10225_v1 }
 0xe57   : > { %10247 = vst [vmem:[%s17890_s17 + $0x30] sm:$0xff] %v10239_v51 }
 0xe58   : > { %13273 = shalt.err (!%p13270_p3)
}
 0xe59   : > { %s13274_s26 = scalar_lea.hbm %s17908_s16, 1024  ;;  %s13278_s17 = scalar_lea.hbm %s17968_s12, 2048 }
 0xe5a   : > { %p13275_p2 = scmp.ne.s32.totalorder %s17908_s16, %s13274_s26  ;;  %p13279_p6 = scmp.lt.s32.totalorder %s17908_s16, %s17968_s12 }
 0xe5b   : > { %p13280_p9 = scmp.lt.s32.totalorder %s13278_s17, %s13274_s26 }
 0xe5c   : > { %p13276_p4 = pnand %p13275_p2, %p13444_p5 }
 0xe5d   : > { %p13281_p10 = por %p13280_p9, %p13279_p6 }
 0xe5e   : > { %p13277_p13 = pneg %p13276_p4 }
 0xe60   : > { %p13282_p12 = pnand %p13281_p10, %p13277_p13 }
 0xe62   : > { %13285 = shalt.err (!%p13282_p12)
}
 0xe63   : > { %s13339_s29 = smov 128   ;;  %s13340_s25 = smov 8  }
 0xe64   : > { %13044 = dma.vmem_to_hbm [thread:$0]  (%p13444_p5), %s17910_s20, 1024, %s17908_s16, %s17916_s19, %s13339_s29, %s13339_s29, %s13340_s25  }
 0xe65 PF: > { %s18715_s23 = sld [smem:[#allocation14_spill]]  ;;  %p13061_p7 = scmp.ge.s32.totalorder %s13328_s24, 2 }
 0xe66   : > { %s10278_s27 = sand.u32 1, %s13316_s21  }
 0xe67   : > { %s10279_s30 = scalar_lea.sflag [#allocation4], %s10278_s27 }
 0xe6b   : > { %p18716_p8 = scmp.ne.s32.totalorder %s18715_s23, 0 }
 0xe6d   : > { %p13054_p11 = pnand %p13061_p7, %p18716_p8 }
 0xe6f   : > { %p13055_p0 = pneg %p13054_p11 }
 0xe71   : > { %13311 = dma.done.wait (%p13055_p0), %s10279_s30, 1024  }
 0xe72   : > { %13313 = vsyncadd (%p13055_p0), %s10279_s30, 4294966272  ;;  %s18717_s24 = sld [smem:[#allocation12_spill]]  ;;  %s18720_s21 = smov %s13320_s22 }
 0xe73   : > { %s18718_s26 = sld [smem:[#allocation11_spill]] }
 0xe74   : > { %s18719_s23 = sld [smem:[#allocation13_spill]] }
 0xe78   : > { %p24_p1 = scmp.ge.s32.totalorder %s18717_s24, 4  }
 0xe79   : > { %s18721_s22 = smov %s18718_s26 }
 0xe7a   :  { %26 = sbr.rel (!%p24_p1) target bundleno = 5 (0x5), region = 112 }
 0xe7f   :  { %10284 = vsyncpa [#allocation3], 1 }
 0xe80   :  { %10286 = vsyncpa [#allocation3 + $0x1], 1 }
 0xe81   :  { %10287 = vsyncpa [#allocation6], 1 }
 0xe82   :  { %10288 = vsyncpa [#allocation4], 1 }
 0xe83   :  { %10290 = vsyncpa [#allocation4 + $0x1], 1 }

</bundles_post_ra>
